<compile_context>
chip_gen: v7x
topology: tpu7x:2x2x1
jax: 0.10.0
libtpu: 0.0.40
codegen_flags: <defaults>
</compile_context>

<pallas_src>
import functools

import jax
import jax.numpy as jnp
from jax import lax
from jax.experimental import pallas as pl
from jax.experimental.pallas import tpu as pltpu


def _round_up(n, m):
    return ((n + m - 1) // m) * m


def _layer_norm(x, g, b, eps=1e-5):
    mu = jnp.mean(x, axis=-1, keepdims=True)
    xc = x - mu
    var = jnp.mean(xc * xc, axis=-1, keepdims=True)
    return xc * lax.rsqrt(var + eps) * g + b


# -----------------------------------------------------------------------------
# Fused ViT kernel: grid = (num_layers,)
# -----------------------------------------------------------------------------
def vit_fused_kernel(
    # layer-independent inputs
    patches_ref, wp_ref, convb_ref, clspos_ref, pospatch_ref,
    # per-layer inputs (leading L axis squeezed by BlockSpec)
    wq_ref, bq_ref, wk_ref, bk_ref, wv_ref, bv_ref, wo_ref, bo_ref,
    g1_ref, beta1_ref, w1_ref, b1_ref, w2_ref, b2_ref, g2_ref, beta2_ref,
    # classification head
    projw_ref, projb_ref,
    # output
    out_ref,
    # scratch
    h_ref,
    *, batch, seq, seq_pad, num_head, head_dim,
):
    l = pl.program_id(0)
    n_layers = pl.num_programs(0)
    n_patch = seq - 1
    d_model = num_head * head_dim
    scale = 1.0 / (float(head_dim) ** 0.5)

    # --- grid step 0: patch embedding + cls token + positions ----------------
    @pl.when(l == 0)
    def _init():
        h_ref[...] = jnp.zeros_like(h_ref)
        emb = (
            jnp.dot(patches_ref[...].astype(jnp.bfloat16), wp_ref[...],
                    preferred_element_type=jnp.float32)
            + convb_ref[...]
        )
        for b in range(batch):
            base = b * seq_pad
            # kernel-internal token order: [patch_0 .. patch_{P-1}, cls, pad..]
            h_ref[pl.ds(base, n_patch), :] = (
                emb[b * n_patch:(b + 1) * n_patch, :] + pospatch_ref[...]
            )
            h_ref[pl.ds(base + n_patch, 1), :] = clspos_ref[...]
        # rows [base + seq .. base + seq_pad) stay zero (padding, masked below)

    # --- encoder layer l (post-norm, ReLU, eval-mode dropout) ----------------
    x = h_ref[...]                                   # (batch*seq_pad, D) f32
    xb = x.astype(jnp.bfloat16)

    key_idx = lax.broadcasted_iota(jnp.int32, (seq_pad, seq_pad), 1)
    key_bias = jnp.where(key_idx < seq, 0.0, -1e30)  # mask padded key rows

    # per-head Q/K/V projections over the whole slab (M = batch*seq_pad)
    q_h = [jnp.dot(xb, wq_ref[h], preferred_element_type=jnp.float32) + bq_ref[h]
           for h in range(num_head)]
    k_h = [jnp.dot(xb, wk_ref[h], preferred_element_type=jnp.float32) + bk_ref[h]
           for h in range(num_head)]
    v_h = [jnp.dot(xb, wv_ref[h], preferred_element_type=jnp.float32) + bv_ref[h]
           for h in range(num_head)]

    for b in range(batch):
        lo = b * seq_pad
        acc = jnp.zeros((seq_pad, d_model), jnp.float32)
        for h in range(num_head):
            qb = q_h[h][lo:lo + seq_pad, :]
            kb = k_h[h][lo:lo + seq_pad, :]
            vb = v_h[h][lo:lo + seq_pad, :]
            s = lax.dot_general(qb, kb, (((1,), (1,)), ((), ())),
                                preferred_element_type=jnp.float32)
            s = s * scale + key_bias
            s = s - jnp.max(s, axis=-1, keepdims=True)
            p = jnp.exp(s)
            p = p * pl.reciprocal(jnp.sum(p, axis=-1, keepdims=True), approx=True)
            o = jnp.dot(p, vb, preferred_element_type=jnp.float32)    # (S_pad, hd)
            # fold the output projection per head -> no lane-axis concat
            acc = acc + jnp.dot(o.astype(jnp.bfloat16), wo_ref[h],
                                preferred_element_type=jnp.float32)
        res = x[lo:lo + seq_pad, :] + acc + bo_ref[...]
        h_ref[pl.ds(lo, seq_pad), :] = _layer_norm(res, g1_ref[...], beta1_ref[...])

    x1 = h_ref[...]                                  # post-LN1, (B*S_pad, D)
    hmid = jnp.dot(x1.astype(jnp.bfloat16), w1_ref[...],
                   preferred_element_type=jnp.float32) + b1_ref[...]
    hmid = jnp.maximum(hmid, 0.0)
    ffn = jnp.dot(hmid.astype(jnp.bfloat16), w2_ref[...],
                  preferred_element_type=jnp.float32) + b2_ref[...]
    x_out = _layer_norm(x1 + ffn, g2_ref[...], beta2_ref[...])
    h_ref[...] = x_out

    # --- last grid step: classification head on the cls token ----------------
    @pl.when(l == n_layers - 1)
    def _head():
        for b in range(batch):
            row = x_out[b * seq_pad + n_patch: b * seq_pad + n_patch + 1, :]
            logits = (
                jnp.dot(row.astype(jnp.bfloat16), projw_ref[...],
                        preferred_element_type=jnp.float32)
                + projb_ref[...]
            )
            out_ref[pl.ds(b, 1), :] = logits.astype(out_ref.dtype)


# -----------------------------------------------------------------------------
# pallas_call wrapper
# -----------------------------------------------------------------------------
def _const_spec(arr):
    return pl.BlockSpec(tuple(arr.shape), lambda l: (0, 0))


def _layer_spec(arr):
    blk = (None,) + tuple(arr.shape[1:])
    if arr.ndim == 3:
        return pl.BlockSpec(blk, lambda l: (l, 0, 0))
    assert arr.ndim == 4
    return pl.BlockSpec(blk, lambda l: (l, 0, 0, 0))


_CONST = ("wp", "conv_b", "clspos", "pos_patch")
_PER_LAYER = ("wq", "bq", "wk", "bk", "wv", "bv", "wo", "bo",
              "g1", "beta1", "w1", "b1", "w2", "b2", "g2", "beta2")
_HEAD = ("proj_w", "proj_b")


def _extract_patches(x, patch_size):
    # x: (B, 1, H, W) NCHW -> (B*nH*nW, C*ph*pw), row-major over (nH, nW),
    # element order (C, ph, pw) to match Conv2d weight flattening.
    B, C, H, W = x.shape
    ph, pw = patch_size
    nh, nw = H // ph, W // pw
    p = x.reshape(B, C, nh, ph, nw, pw).transpose(0, 2, 4, 1, 3, 5)
    return p.reshape(B * nh * nw, C * ph * pw)


def vit_forward(x, kparams, cfg):
    """Pallas-backed fused forward pass. x: (B, 1, H, W) NCHW, float32."""
    B = x.shape[0]
    D, H = cfg["dim"], cfg["num_head"]
    L = cfg["num_layers"]
    ncls = cfg["num_classes"]
    S = cfg["seq_len"]
    S_pad = _round_up(S, 8)

    patches = _extract_patches(x, cfg["patch_size"])            # (B*(S-1), Kp)

    kernel = functools.partial(
        vit_fused_kernel, batch=B, seq=S, seq_pad=S_pad,
        num_head=H, head_dim=D // H)

    names = _CONST + _PER_LAYER + _HEAD
    args = [patches] + [kparams[n] for n in names]
    in_specs = [_const_spec(patches)] + [
        _layer_spec(kparams[n]) if n in _PER_LAYER else _const_spec(kparams[n])
        for n in names
    ]

    return pl.pallas_call(
        kernel,
        out_shape=jax.ShapeDtypeStruct((B, ncls), jnp.float32),
        grid_spec=pltpu.PrefetchScalarGridSpec(
            num_scalar_prefetch=0,
            grid=(L,),
            in_specs=in_specs,
            out_specs=pl.BlockSpec((B, ncls), lambda l: (0, 0)),
            scratch_shapes=[pltpu.VMEM((B * S_pad, D), jnp.float32)],
        ),
        compiler_params=pltpu.CompilerParams(
            dimension_semantics=("arbitrary",)),   # layers are sequential
    )(*args)


# -----------------------------------------------------------------------------
# Parameters (deterministic, synthetic) + one-time packing into kernel layout
# -----------------------------------------------------------------------------
def init_params(key, cfg):
    D, (ph, pw), C = cfg["dim"], cfg["patch_size"], 1
    dff, L, ncls, S = cfg["dff"], cfg["num_layers"], cfg["num_classes"], cfg["seq_len"]
    keys = jax.random.split(key, 6 + L)

    def nrm(k, shape, scale):
        return jax.random.normal(k, shape, jnp.float32) * scale

    params = {
        "conv_w": nrm(keys[0], (D, C, ph, pw), 0.2),          # PyTorch Conv2d layout
        "conv_b": nrm(keys[1], (D,), 0.1),
        "cls_token": nrm(keys[2], (1, 1, D), 1.0) * cfg["scaling"],
        "positions": nrm(keys[3], (S, D), 0.1),
        "proj_w": nrm(keys[4], (ncls, D), 0.1),               # PyTorch Linear layout
        "proj_b": nrm(keys[5], (ncls,), 0.1),
        "layers": [],
    }
    for l in range(L):
        lk = jax.random.split(keys[6 + l], 8)
        params["layers"].append({
            # math layout: the model computes x @ W (+ b)
            "wqkv": nrm(lk[0], (D, 3 * D), 0.1),
            "bqkv": nrm(lk[1], (1, 3 * D), 0.05),
            "wo": nrm(lk[2], (D, D), 0.1),
            "bo": nrm(lk[3], (1, D), 0.05),
            "g1": jnp.ones((1, D), jnp.float32),
            "beta1": jnp.zeros((1, D), jnp.float32),
            "w1": nrm(lk[4], (D, dff), 0.1),
            "b1": nrm(lk[5], (1, dff), 0.05),
            "w2": nrm(lk[6], (dff, D), 0.05),
            "b2": nrm(lk[7], (1, D), 0.05),
            "g2": jnp.ones((1, D), jnp.float32),
            "beta2": jnp.zeros((1, D), jnp.float32),
        })
    return params


def pack_kernel_params(params, cfg):
    """One-time layout transform: transpose / split heads / stack layers / bf16."""
    D, H = cfg["dim"], cfg["num_head"]
    hd = D // H
    bf16 = jnp.bfloat16

    def split_cols(w):    # (D, D) -> (H, D, hd); head h = columns h*hd:(h+1)*hd
        return w.reshape(D, H, hd).transpose(1, 0, 2)

    def split_bias(b):    # (1, D) -> (H, 1, hd)
        return b.reshape(1, H, hd).transpose(1, 0, 2)

    wq, wk, wv, bq, bk, bv, wo = [], [], [], [], [], [], []
    for lp in params["layers"]:
        wqkv, bqkv = lp["wqkv"], lp["bqkv"]
        wq.append(split_cols(wqkv[:, 0 * D:1 * D]))
        wk.append(split_cols(wqkv[:, 1 * D:2 * D]))
        wv.append(split_cols(wqkv[:, 2 * D:3 * D]))
        bq.append(split_bias(bqkv[:, 0 * D:1 * D]))
        bk.append(split_bias(bqkv[:, 1 * D:2 * D]))
        bv.append(split_bias(bqkv[:, 2 * D:3 * D]))
        wo.append(lp["wo"].reshape(H, hd, D))   # head h = rows h*hd:(h+1)*hd

    stack = lambda xs: jnp.stack(xs, axis=0)
    lstack = lambda key: jnp.stack([lp[key] for lp in params["layers"]], axis=0)

    return {
        "wp": params["conv_w"].reshape(D, -1).T.astype(bf16),          # (C*ph*pw, D)
        "conv_b": params["conv_b"].reshape(1, D),
        "clspos": params["cls_token"].reshape(1, D) + params["positions"][:1, :],
        "pos_patch": params["positions"][1:, :],                        # (S-1, D)
        "proj_w": params["proj_w"].T.astype(bf16),                      # (D, ncls)
        "proj_b": params["proj_b"].reshape(1, -1),
        "wq": stack(wq).astype(bf16), "bq": stack(bq),
        "wk": stack(wk).astype(bf16), "bk": stack(bk),
        "wv": stack(wv).astype(bf16), "bv": stack(bv),
        "wo": stack(wo).astype(bf16),
        "bo": lstack("bo"),
        "g1": lstack("g1"), "beta1": lstack("beta1"),
        "w1": lstack("w1").astype(bf16), "b1": lstack("b1"),
        "w2": lstack("w2").astype(bf16), "b2": lstack("b2"),
        "g2": lstack("g2"), "beta2": lstack("beta2"),
    }


# -----------------------------------------------------------------------------
# Pure-JAX f32 reference (numerical sanity check)
# -----------------------------------------------------------------------------
def _ln(x, g, b, eps=1e-5):
    mu = jnp.mean(x, axis=-1, keepdims=True)
    var = jnp.mean((x - mu) ** 2, axis=-1, keepdims=True)
    return (x - mu) * lax.rsqrt(var + eps) * g + b


def _ref_layer(x, p, num_head):
    B, S, D = x.shape
    hd = D // num_head
    scale = 1.0 / (float(hd) ** 0.5)
    qkv = x @ p["wqkv"] + p["bqkv"]
    q, k, v = jnp.split(qkv, 3, axis=-1)
    q = q.reshape(B, S, num_head, hd).transpose(0, 2, 1, 3)
    k = k.reshape(B, S, num_head, hd).transpose(0, 2, 1, 3)
    v = v.reshape(B, S, num_head, hd).transpose(0, 2, 1, 3)
    s = jnp.einsum("bhqd,bhkd->bhqk", q, k) * scale
    a = jax.nn.softmax(s, axis=-1)
    o = jnp.einsum("bhqk,bhkd->bhqd", a, v).transpose(0, 2, 1, 3).reshape(B, S, D)
    x = _ln(x + (o @ p["wo"] + p["bo"]), p["g1"], p["beta1"])
    hdd = jnp.maximum(x @ p["w1"] + p["b1"], 0.0)
    return _ln(x + (hdd @ p["w2"] + p["b2"]), p["g2"], p["beta2"])


def vit_reference(x, params, cfg):
    B = x.shape[0]
    D = cfg["dim"]
    patches = _extract_patches(x, cfg["patch_size"])
    n_patches = patches.shape[0] // B
    wp = params["conv_w"].reshape(D, -1).T
    emb = (patches @ wp + params["conv_b"]).reshape(B, n_patches, D)
    cls = jnp.broadcast_to(params["cls_token"], (B, 1, D))
    h = jnp.concatenate([cls, emb], axis=1) + params["positions"][None, :, :]
    for lp in params["layers"]:
        h = _ref_layer(h, lp, cfg["num_head"])
    return h[:, 0, :] @ params["proj_w"].T + params["proj_b"]


# -----------------------------------------------------------------------------
if __name__ == "__main__":
    # Small configuration consistent with the module's constructor.
    H_img, W_img = 8, 16
    cfg = dict(
        input_shape=(H_img, W_img),
        num_classes=4,
        num_head=4,
        num_layers=2,
        scaling=1,
        patch_size=(2, 2),
        dim=32,
        dff=2048,                      # nn.TransformerEncoderLayer default
    )
    cfg["seq_len"] = H_img * W_img // (cfg["patch_size"][0] * cfg["patch_size"][1]) + 1

    key = jax.random.PRNGKey(0)
    kparam_key, kx = jax.random.split(key)
    params = init_params(kparam_key, cfg)
    kparams = pack_kernel_params(params, cfg)      # one-time kernel-layout pack
    x = jax.random.normal(kx, (2, 1, H_img, W_img), jnp.float32)   # NCHW

    fwd = jax.jit(lambda xx, pp: vit_forward(xx, pp, cfg))
    out = fwd(x, kparams)
    jax.block_until_ready(out)

    assert out.shape == (2, cfg["num_classes"]), out.shape

    # f32 reference vs bf16-matmul kernel: tolerance widened accordingly.
    ref = vit_reference(x, params, cfg)
    err = float(jnp.max(jnp.abs(out - ref)))
    assert err < 1e-1, f"mismatch vs reference: max abs err = {err}"

    print("KERNEL_OK")
</pallas_src>

<mosaic_0001>
module attributes {stable_mosaic.version = 11 : i64} {
  func.func @vit_fused_kernel(%arg0: i32, %arg1: memref<64x4xf32, #tpu.memory_space<vmem>>, %arg2: memref<4x32xbf16, #tpu.memory_space<vmem>>, %arg3: memref<1x32xf32, #tpu.memory_space<vmem>>, %arg4: memref<1x32xf32, #tpu.memory_space<vmem>>, %arg5: memref<32x32xf32, #tpu.memory_space<vmem>>, %arg6: memref<1x4x32x8xbf16, #tpu.memory_space<vmem>>, %arg7: memref<1x4x1x8xf32, #tpu.memory_space<vmem>>, %arg8: memref<1x4x32x8xbf16, #tpu.memory_space<vmem>>, %arg9: memref<1x4x1x8xf32, #tpu.memory_space<vmem>>, %arg10: memref<1x4x32x8xbf16, #tpu.memory_space<vmem>>, %arg11: memref<1x4x1x8xf32, #tpu.memory_space<vmem>>, %arg12: memref<1x4x8x32xbf16, #tpu.memory_space<vmem>>, %arg13: memref<1x1x32xf32, #tpu.memory_space<vmem>>, %arg14: memref<1x1x32xf32, #tpu.memory_space<vmem>>, %arg15: memref<1x1x32xf32, #tpu.memory_space<vmem>>, %arg16: memref<1x32x2048xbf16, #tpu.memory_space<vmem>>, %arg17: memref<1x1x2048xf32, #tpu.memory_space<vmem>>, %arg18: memref<1x2048x32xbf16, #tpu.memory_space<vmem>>, %arg19: memref<1x1x32xf32, #tpu.memory_space<vmem>>, %arg20: memref<1x1x32xf32, #tpu.memory_space<vmem>>, %arg21: memref<1x1x32xf32, #tpu.memory_space<vmem>>, %arg22: memref<32x4xbf16, #tpu.memory_space<vmem>>, %arg23: memref<1x4xf32, #tpu.memory_space<vmem>>, %arg24: memref<2x4xf32, #tpu.memory_space<vmem>>, %arg25: memref<80x32xf32, #tpu.memory_space<vmem>>) attributes {dimension_semantics = [#tpu.dimension_semantics<arbitrary>], iteration_bounds = array<i64: 2>, scalar_prefetch = 0 : i64, scratch_operands = 1 : i64, tpu.core_type = #tpu.core_type<tc>, window_params = [{pipeline_mode = #tpu.pipeline_mode<synchronous>, transform_indices = @transform_0, window_bounds = array<i64: 64, 4>}, {pipeline_mode = #tpu.pipeline_mode<synchronous>, transform_indices = @transform_1, window_bounds = array<i64: 4, 32>}, {pipeline_mode = #tpu.pipeline_mode<synchronous>, transform_indices = @transform_2, window_bounds = array<i64: 1, 32>}, {pipeline_mode = #tpu.pipeline_mode<synchronous>, transform_indices = @transform_3, window_bounds = array<i64: 1, 32>}, {pipeline_mode = #tpu.pipeline_mode<synchronous>, transform_indices = @transform_4, window_bounds = array<i64: 32, 32>}, {transform_indices = @transform_5, window_bounds = array<i64: 1, 4, 32, 8>}, {transform_indices = @transform_6, window_bounds = array<i64: 1, 4, 1, 8>}, {transform_indices = @transform_7, window_bounds = array<i64: 1, 4, 32, 8>}, {transform_indices = @transform_8, window_bounds = array<i64: 1, 4, 1, 8>}, {transform_indices = @transform_9, window_bounds = array<i64: 1, 4, 32, 8>}, {transform_indices = @transform_10, window_bounds = array<i64: 1, 4, 1, 8>}, {transform_indices = @transform_11, window_bounds = array<i64: 1, 4, 8, 32>}, {transform_indices = @transform_12, window_bounds = array<i64: 1, 1, 32>}, {transform_indices = @transform_13, window_bounds = array<i64: 1, 1, 32>}, {transform_indices = @transform_14, window_bounds = array<i64: 1, 1, 32>}, {transform_indices = @transform_15, window_bounds = array<i64: 1, 32, 2048>}, {transform_indices = @transform_16, window_bounds = array<i64: 1, 1, 2048>}, {transform_indices = @transform_17, window_bounds = array<i64: 1, 2048, 32>}, {transform_indices = @transform_18, window_bounds = array<i64: 1, 1, 32>}, {transform_indices = @transform_19, window_bounds = array<i64: 1, 1, 32>}, {transform_indices = @transform_20, window_bounds = array<i64: 1, 1, 32>}, {pipeline_mode = #tpu.pipeline_mode<synchronous>, transform_indices = @transform_21, window_bounds = array<i64: 32, 4>}, {pipeline_mode = #tpu.pipeline_mode<synchronous>, transform_indices = @transform_22, window_bounds = array<i64: 1, 4>}, {pipeline_mode = #tpu.pipeline_mode<synchronous>, transform_indices = @transform_23, window_bounds = array<i64: 2, 4>}]} {
    %c0_i32 = arith.constant 0 : i32
    %0 = arith.cmpi eq, %arg0, %c0_i32 : i32
    %1 = arith.extui %0 : i1 to i32
    %c0_i32_0 = arith.constant 0 : i32
    %2 = arith.cmpi ne, %1, %c0_i32_0 : i32
    scf.if %2 {
      %cst_252 = arith.constant 0.000000e+00 : f32
      %391 = vector.broadcast %cst_252 : f32 to vector<80x32xf32>
      %c0_253 = arith.constant 0 : index
      %c0_254 = arith.constant 0 : index
      %392 = vector.load %arg25[%c0_253, %c0_254] : memref<80x32xf32, #tpu.memory_space<vmem>>, vector<80x32xf32>
      tpu.vector_store %arg25[%c0_253, %c0_254], %391 {strides = array<i32>} : memref<80x32xf32, #tpu.memory_space<vmem>>, vector<80x32xf32>,
      %c0_255 = arith.constant 0 : index
      %c0_256 = arith.constant 0 : index
      %393 = vector.load %arg1[%c0_255, %c0_256] : memref<64x4xf32, #tpu.memory_space<vmem>>, vector<64x4xf32>
      %394 = arith.truncf %393 : vector<64x4xf32> to vector<64x4xbf16>
      %c0_257 = arith.constant 0 : index
      %c0_258 = arith.constant 0 : index
      %395 = vector.load %arg2[%c0_257, %c0_258] : memref<4x32xbf16, #tpu.memory_space<vmem>>, vector<4x32xbf16>
      %cst_259 = arith.constant dense<0.000000e+00> : vector<64x32xf32>
      %396 = tpu.matmul %394, %395, %cst_259 {dimension_numbers = #tpu.dot_dimension_numbers<[1], [0], [0], [1], [0, 0, 1, 1], [], []>} : vector<64x4xbf16>, vector<4x32xbf16>, vector<64x32xf32> -> vector<64x32xf32>
      %c0_260 = arith.constant 0 : index
      %c0_261 = arith.constant 0 : index
      %397 = vector.load %arg3[%c0_260, %c0_261] : memref<1x32xf32, #tpu.memory_space<vmem>>, vector<1x32xf32>
      %398 = vector.broadcast %397 : vector<1x32xf32> to vector<64x32xf32>
      %399 = arith.addf %396, %398 : vector<64x32xf32>
      %400 = vector.extract_strided_slice %399 {offsets = [0, 0], sizes = [32, 32], strides = [1, 1]} : vector<64x32xf32> to vector<32x32xf32>
      %c0_262 = arith.constant 0 : index
      %c0_263 = arith.constant 0 : index
      %401 = vector.load %arg5[%c0_262, %c0_263] : memref<32x32xf32, #tpu.memory_space<vmem>>, vector<32x32xf32>
      %402 = arith.addf %400, %401 : vector<32x32xf32>
      %c0_264 = arith.constant 0 : index
      %c0_265 = arith.constant 0 : index
      %403 = vector.load %arg25[%c0_264, %c0_265] : memref<80x32xf32, #tpu.memory_space<vmem>>, vector<32x32xf32>
      tpu.vector_store %arg25[%c0_264, %c0_265], %402 {strides = array<i32>} : memref<80x32xf32, #tpu.memory_space<vmem>>, vector<32x32xf32>,
      %c0_266 = arith.constant 0 : index
      %c0_267 = arith.constant 0 : index
      %404 = vector.load %arg4[%c0_266, %c0_267] : memref<1x32xf32, #tpu.memory_space<vmem>>, vector<1x32xf32>
      %c32 = arith.constant 32 : index
      %c0_268 = arith.constant 0 : index
      %405 = vector.load %arg25[%c32, %c0_268] : memref<80x32xf32, #tpu.memory_space<vmem>>, vector<1x32xf32>
      tpu.vector_store %arg25[%c32, %c0_268], %404 {strides = array<i32>} : memref<80x32xf32, #tpu.memory_space<vmem>>, vector<1x32xf32>,
      %406 = vector.extract_strided_slice %399 {offsets = [32, 0], sizes = [32, 32], strides = [1, 1]} : vector<64x32xf32> to vector<32x32xf32>
      %c0_269 = arith.constant 0 : index
      %c0_270 = arith.constant 0 : index
      %407 = vector.load %arg5[%c0_269, %c0_270] : memref<32x32xf32, #tpu.memory_space<vmem>>, vector<32x32xf32>
      %408 = arith.addf %406, %407 : vector<32x32xf32>
      %c40_271 = arith.constant 40 : index
      %c0_272 = arith.constant 0 : index
      %409 = vector.load %arg25[%c40_271, %c0_272] : memref<80x32xf32, #tpu.memory_space<vmem>>, vector<32x32xf32>
      tpu.vector_store %arg25[%c40_271, %c0_272], %408 {strides = array<i32>} : memref<80x32xf32, #tpu.memory_space<vmem>>, vector<32x32xf32>,
      %c0_273 = arith.constant 0 : index
      %c0_274 = arith.constant 0 : index
      %410 = vector.load %arg4[%c0_273, %c0_274] : memref<1x32xf32, #tpu.memory_space<vmem>>, vector<1x32xf32>
      %c72 = arith.constant 72 : index
      %c0_275 = arith.constant 0 : index
      %411 = vector.load %arg25[%c72, %c0_275] : memref<80x32xf32, #tpu.memory_space<vmem>>, vector<1x32xf32>
      tpu.vector_store %arg25[%c72, %c0_275], %410 {strides = array<i32>} : memref<80x32xf32, #tpu.memory_space<vmem>>, vector<1x32xf32>,
    } else {
    }
    %c0 = arith.constant 0 : index
    %c0_1 = arith.constant 0 : index
    %3 = vector.load %arg25[%c0, %c0_1] : memref<80x32xf32, #tpu.memory_space<vmem>>, vector<80x32xf32>
    %4 = arith.truncf %3 : vector<80x32xf32> to vector<80x32xbf16>
    %5 = tpu.iota {dimensions = array<i32: 1>} : vector<40x40xi32>
    %c33_i32 = arith.constant 33 : i32
    %6 = vector.broadcast %c33_i32 : i32 to vector<40x40xi32>
    %7 = arith.cmpi slt, %5, %6 : vector<40x40xi32>
    %cst = arith.constant 0.000000e+00 : f32
    %cst_2 = arith.constant -1.000000e+30 : f32
    %8 = vector.broadcast %cst : f32 to vector<40x40xf32>
    %9 = vector.broadcast %cst_2 : f32 to vector<40x40xf32>
    %10 = arith.select %7, %8, %9 : vector<40x40xi1>, vector<40x40xf32>
    %c0_3 = arith.constant 0 : index
    %c0_4 = arith.constant 0 : index
    %c0_5 = arith.constant 0 : index
    %c0_6 = arith.constant 0 : index
    %11 = vector.load %arg6[%c0_3, %c0_4, %c0_5, %c0_6] : memref<1x4x32x8xbf16, #tpu.memory_space<vmem>>, vector<1x1x32x8xbf16>
    %12 = vector.shape_cast %11 : vector<1x1x32x8xbf16> to vector<32x8xbf16>
    %cst_7 = arith.constant dense<0.000000e+00> : vector<80x8xf32>
    %13 = tpu.matmul %4, %12, %cst_7 {dimension_numbers = #tpu.dot_dimension_numbers<[1], [0], [0], [1], [0, 0, 1, 1], [], []>} : vector<80x32xbf16>, vector<32x8xbf16>, vector<80x8xf32> -> vector<80x8xf32>
    %c0_8 = arith.constant 0 : index
    %c0_9 = arith.constant 0 : index
    %c0_10 = arith.constant 0 : index
    %c0_11 = arith.constant 0 : index
    %14 = vector.load %arg7[%c0_8, %c0_9, %c0_10, %c0_11] : memref<1x4x1x8xf32, #tpu.memory_space<vmem>>, vector<1x1x1x8xf32>
    %15 = vector.shape_cast %14 : vector<1x1x1x8xf32> to vector<1x8xf32>
    %16 = vector.broadcast %15 : vector<1x8xf32> to vector<80x8xf32>
    %17 = arith.addf %13, %16 : vector<80x8xf32>
    %c0_12 = arith.constant 0 : index
    %c1 = arith.constant 1 : index
    %c0_13 = arith.constant 0 : index
    %c0_14 = arith.constant 0 : index
    %18 = vector.load %arg6[%c0_12, %c1, %c0_13, %c0_14] : memref<1x4x32x8xbf16, #tpu.memory_space<vmem>>, vector<1x1x32x8xbf16>
    %19 = vector.shape_cast %18 : vector<1x1x32x8xbf16> to vector<32x8xbf16>
    %cst_15 = arith.constant dense<0.000000e+00> : vector<80x8xf32>
    %20 = tpu.matmul %4, %19, %cst_15 {dimension_numbers = #tpu.dot_dimension_numbers<[1], [0], [0], [1], [0, 0, 1, 1], [], []>} : vector<80x32xbf16>, vector<32x8xbf16>, vector<80x8xf32> -> vector<80x8xf32>
    %c0_16 = arith.constant 0 : index
    %c1_17 = arith.constant 1 : index
    %c0_18 = arith.constant 0 : index
    %c0_19 = arith.constant 0 : index
    %21 = vector.load %arg7[%c0_16, %c1_17, %c0_18, %c0_19] : memref<1x4x1x8xf32, #tpu.memory_space<vmem>>, vector<1x1x1x8xf32>
    %22 = vector.shape_cast %21 : vector<1x1x1x8xf32> to vector<1x8xf32>
    %23 = vector.broadcast %22 : vector<1x8xf32> to vector<80x8xf32>
    %24 = arith.addf %20, %23 : vector<80x8xf32>
    %c0_20 = arith.constant 0 : index
    %c2 = arith.constant 2 : index
    %c0_21 = arith.constant 0 : index
    %c0_22 = arith.constant 0 : index
    %25 = vector.load %arg6[%c0_20, %c2, %c0_21, %c0_22] : memref<1x4x32x8xbf16, #tpu.memory_space<vmem>>, vector<1x1x32x8xbf16>
    %26 = vector.shape_cast %25 : vector<1x1x32x8xbf16> to vector<32x8xbf16>
    %cst_23 = arith.constant dense<0.000000e+00> : vector<80x8xf32>
    %27 = tpu.matmul %4, %26, %cst_23 {dimension_numbers = #tpu.dot_dimension_numbers<[1], [0], [0], [1], [0, 0, 1, 1], [], []>} : vector<80x32xbf16>, vector<32x8xbf16>, vector<80x8xf32> -> vector<80x8xf32>
    %c0_24 = arith.constant 0 : index
    %c2_25 = arith.constant 2 : index
    %c0_26 = arith.constant 0 : index
    %c0_27 = arith.constant 0 : index
    %28 = vector.load %arg7[%c0_24, %c2_25, %c0_26, %c0_27] : memref<1x4x1x8xf32, #tpu.memory_space<vmem>>, vector<1x1x1x8xf32>
    %29 = vector.shape_cast %28 : vector<1x1x1x8xf32> to vector<1x8xf32>
    %30 = vector.broadcast %29 : vector<1x8xf32> to vector<80x8xf32>
    %31 = arith.addf %27, %30 : vector<80x8xf32>
    %c0_28 = arith.constant 0 : index
    %c3 = arith.constant 3 : index
    %c0_29 = arith.constant 0 : index
    %c0_30 = arith.constant 0 : index
    %32 = vector.load %arg6[%c0_28, %c3, %c0_29, %c0_30] : memref<1x4x32x8xbf16, #tpu.memory_space<vmem>>, vector<1x1x32x8xbf16>
    %33 = vector.shape_cast %32 : vector<1x1x32x8xbf16> to vector<32x8xbf16>
    %cst_31 = arith.constant dense<0.000000e+00> : vector<80x8xf32>
    %34 = tpu.matmul %4, %33, %cst_31 {dimension_numbers = #tpu.dot_dimension_numbers<[1], [0], [0], [1], [0, 0, 1, 1], [], []>} : vector<80x32xbf16>, vector<32x8xbf16>, vector<80x8xf32> -> vector<80x8xf32>
    %c0_32 = arith.constant 0 : index
    %c3_33 = arith.constant 3 : index
    %c0_34 = arith.constant 0 : index
    %c0_35 = arith.constant 0 : index
    %35 = vector.load %arg7[%c0_32, %c3_33, %c0_34, %c0_35] : memref<1x4x1x8xf32, #tpu.memory_space<vmem>>, vector<1x1x1x8xf32>
    %36 = vector.shape_cast %35 : vector<1x1x1x8xf32> to vector<1x8xf32>
    %37 = vector.broadcast %36 : vector<1x8xf32> to vector<80x8xf32>
    %38 = arith.addf %34, %37 : vector<80x8xf32>
    %c0_36 = arith.constant 0 : index
    %c0_37 = arith.constant 0 : index
    %c0_38 = arith.constant 0 : index
    %c0_39 = arith.constant 0 : index
    %39 = vector.load %arg8[%c0_36, %c0_37, %c0_38, %c0_39] : memref<1x4x32x8xbf16, #tpu.memory_space<vmem>>, vector<1x1x32x8xbf16>
    %40 = vector.shape_cast %39 : vector<1x1x32x8xbf16> to vector<32x8xbf16>
    %cst_40 = arith.constant dense<0.000000e+00> : vector<80x8xf32>
    %41 = tpu.matmul %4, %40, %cst_40 {dimension_numbers = #tpu.dot_dimension_numbers<[1], [0], [0], [1], [0, 0, 1, 1], [], []>} : vector<80x32xbf16>, vector<32x8xbf16>, vector<80x8xf32> -> vector<80x8xf32>
    %c0_41 = arith.constant 0 : index
    %c0_42 = arith.constant 0 : index
    %c0_43 = arith.constant 0 : index
    %c0_44 = arith.constant 0 : index
    %42 = vector.load %arg9[%c0_41, %c0_42, %c0_43, %c0_44] : memref<1x4x1x8xf32, #tpu.memory_space<vmem>>, vector<1x1x1x8xf32>
    %43 = vector.shape_cast %42 : vector<1x1x1x8xf32> to vector<1x8xf32>
    %44 = vector.broadcast %43 : vector<1x8xf32> to vector<80x8xf32>
    %45 = arith.addf %41, %44 : vector<80x8xf32>
    %c0_45 = arith.constant 0 : index
    %c1_46 = arith.constant 1 : index
    %c0_47 = arith.constant 0 : index
    %c0_48 = arith.constant 0 : index
    %46 = vector.load %arg8[%c0_45, %c1_46, %c0_47, %c0_48] : memref<1x4x32x8xbf16, #tpu.memory_space<vmem>>, vector<1x1x32x8xbf16>
    %47 = vector.shape_cast %46 : vector<1x1x32x8xbf16> to vector<32x8xbf16>
    %cst_49 = arith.constant dense<0.000000e+00> : vector<80x8xf32>
    %48 = tpu.matmul %4, %47, %cst_49 {dimension_numbers = #tpu.dot_dimension_numbers<[1], [0], [0], [1], [0, 0, 1, 1], [], []>} : vector<80x32xbf16>, vector<32x8xbf16>, vector<80x8xf32> -> vector<80x8xf32>
    %c0_50 = arith.constant 0 : index
    %c1_51 = arith.constant 1 : index
    %c0_52 = arith.constant 0 : index
    %c0_53 = arith.constant 0 : index
    %49 = vector.load %arg9[%c0_50, %c1_51, %c0_52, %c0_53] : memref<1x4x1x8xf32, #tpu.memory_space<vmem>>, vector<1x1x1x8xf32>
    %50 = vector.shape_cast %49 : vector<1x1x1x8xf32> to vector<1x8xf32>
    %51 = vector.broadcast %50 : vector<1x8xf32> to vector<80x8xf32>
    %52 = arith.addf %48, %51 : vector<80x8xf32>
    %c0_54 = arith.constant 0 : index
    %c2_55 = arith.constant 2 : index
    %c0_56 = arith.constant 0 : index
    %c0_57 = arith.constant 0 : index
    %53 = vector.load %arg8[%c0_54, %c2_55, %c0_56, %c0_57] : memref<1x4x32x8xbf16, #tpu.memory_space<vmem>>, vector<1x1x32x8xbf16>
    %54 = vector.shape_cast %53 : vector<1x1x32x8xbf16> to vector<32x8xbf16>
    %cst_58 = arith.constant dense<0.000000e+00> : vector<80x8xf32>
    %55 = tpu.matmul %4, %54, %cst_58 {dimension_numbers = #tpu.dot_dimension_numbers<[1], [0], [0], [1], [0, 0, 1, 1], [], []>} : vector<80x32xbf16>, vector<32x8xbf16>, vector<80x8xf32> -> vector<80x8xf32>
    %c0_59 = arith.constant 0 : index
    %c2_60 = arith.constant 2 : index
    %c0_61 = arith.constant 0 : index
    %c0_62 = arith.constant 0 : index
    %56 = vector.load %arg9[%c0_59, %c2_60, %c0_61, %c0_62] : memref<1x4x1x8xf32, #tpu.memory_space<vmem>>, vector<1x1x1x8xf32>
    %57 = vector.shape_cast %56 : vector<1x1x1x8xf32> to vector<1x8xf32>
    %58 = vector.broadcast %57 : vector<1x8xf32> to vector<80x8xf32>
    %59 = arith.addf %55, %58 : vector<80x8xf32>
    %c0_63 = arith.constant 0 : index
    %c3_64 = arith.constant 3 : index
    %c0_65 = arith.constant 0 : index
    %c0_66 = arith.constant 0 : index
    %60 = vector.load %arg8[%c0_63, %c3_64, %c0_65, %c0_66] : memref<1x4x32x8xbf16, #tpu.memory_space<vmem>>, vector<1x1x32x8xbf16>
    %61 = vector.shape_cast %60 : vector<1x1x32x8xbf16> to vector<32x8xbf16>
    %cst_67 = arith.constant dense<0.000000e+00> : vector<80x8xf32>
    %62 = tpu.matmul %4, %61, %cst_67 {dimension_numbers = #tpu.dot_dimension_numbers<[1], [0], [0], [1], [0, 0, 1, 1], [], []>} : vector<80x32xbf16>, vector<32x8xbf16>, vector<80x8xf32> -> vector<80x8xf32>
    %c0_68 = arith.constant 0 : index
    %c3_69 = arith.constant 3 : index
    %c0_70 = arith.constant 0 : index
    %c0_71 = arith.constant 0 : index
    %63 = vector.load %arg9[%c0_68, %c3_69, %c0_70, %c0_71] : memref<1x4x1x8xf32, #tpu.memory_space<vmem>>, vector<1x1x1x8xf32>
    %64 = vector.shape_cast %63 : vector<1x1x1x8xf32> to vector<1x8xf32>
    %65 = vector.broadcast %64 : vector<1x8xf32> to vector<80x8xf32>
    %66 = arith.addf %62, %65 : vector<80x8xf32>
    %c0_72 = arith.constant 0 : index
    %c0_73 = arith.constant 0 : index
    %c0_74 = arith.constant 0 : index
    %c0_75 = arith.constant 0 : index
    %67 = vector.load %arg10[%c0_72, %c0_73, %c0_74, %c0_75] : memref<1x4x32x8xbf16, #tpu.memory_space<vmem>>, vector<1x1x32x8xbf16>
    %68 = vector.shape_cast %67 : vector<1x1x32x8xbf16> to vector<32x8xbf16>
    %cst_76 = arith.constant dense<0.000000e+00> : vector<80x8xf32>
    %69 = tpu.matmul %4, %68, %cst_76 {dimension_numbers = #tpu.dot_dimension_numbers<[1], [0], [0], [1], [0, 0, 1, 1], [], []>} : vector<80x32xbf16>, vector<32x8xbf16>, vector<80x8xf32> -> vector<80x8xf32>
    %c0_77 = arith.constant 0 : index
    %c0_78 = arith.constant 0 : index
    %c0_79 = arith.constant 0 : index
    %c0_80 = arith.constant 0 : index
    %70 = vector.load %arg11[%c0_77, %c0_78, %c0_79, %c0_80] : memref<1x4x1x8xf32, #tpu.memory_space<vmem>>, vector<1x1x1x8xf32>
    %71 = vector.shape_cast %70 : vector<1x1x1x8xf32> to vector<1x8xf32>
    %72 = vector.broadcast %71 : vector<1x8xf32> to vector<80x8xf32>
    %73 = arith.addf %69, %72 : vector<80x8xf32>
    %c0_81 = arith.constant 0 : index
    %c1_82 = arith.constant 1 : index
    %c0_83 = arith.constant 0 : index
    %c0_84 = arith.constant 0 : index
    %74 = vector.load %arg10[%c0_81, %c1_82, %c0_83, %c0_84] : memref<1x4x32x8xbf16, #tpu.memory_space<vmem>>, vector<1x1x32x8xbf16>
    %75 = vector.shape_cast %74 : vector<1x1x32x8xbf16> to vector<32x8xbf16>
    %cst_85 = arith.constant dense<0.000000e+00> : vector<80x8xf32>
    %76 = tpu.matmul %4, %75, %cst_85 {dimension_numbers = #tpu.dot_dimension_numbers<[1], [0], [0], [1], [0, 0, 1, 1], [], []>} : vector<80x32xbf16>, vector<32x8xbf16>, vector<80x8xf32> -> vector<80x8xf32>
    %c0_86 = arith.constant 0 : index
    %c1_87 = arith.constant 1 : index
    %c0_88 = arith.constant 0 : index
    %c0_89 = arith.constant 0 : index
    %77 = vector.load %arg11[%c0_86, %c1_87, %c0_88, %c0_89] : memref<1x4x1x8xf32, #tpu.memory_space<vmem>>, vector<1x1x1x8xf32>
    %78 = vector.shape_cast %77 : vector<1x1x1x8xf32> to vector<1x8xf32>
    %79 = vector.broadcast %78 : vector<1x8xf32> to vector<80x8xf32>
    %80 = arith.addf %76, %79 : vector<80x8xf32>
    %c0_90 = arith.constant 0 : index
    %c2_91 = arith.constant 2 : index
    %c0_92 = arith.constant 0 : index
    %c0_93 = arith.constant 0 : index
    %81 = vector.load %arg10[%c0_90, %c2_91, %c0_92, %c0_93] : memref<1x4x32x8xbf16, #tpu.memory_space<vmem>>, vector<1x1x32x8xbf16>
    %82 = vector.shape_cast %81 : vector<1x1x32x8xbf16> to vector<32x8xbf16>
    %cst_94 = arith.constant dense<0.000000e+00> : vector<80x8xf32>
    %83 = tpu.matmul %4, %82, %cst_94 {dimension_numbers = #tpu.dot_dimension_numbers<[1], [0], [0], [1], [0, 0, 1, 1], [], []>} : vector<80x32xbf16>, vector<32x8xbf16>, vector<80x8xf32> -> vector<80x8xf32>
    %c0_95 = arith.constant 0 : index
    %c2_96 = arith.constant 2 : index
    %c0_97 = arith.constant 0 : index
    %c0_98 = arith.constant 0 : index
    %84 = vector.load %arg11[%c0_95, %c2_96, %c0_97, %c0_98] : memref<1x4x1x8xf32, #tpu.memory_space<vmem>>, vector<1x1x1x8xf32>
    %85 = vector.shape_cast %84 : vector<1x1x1x8xf32> to vector<1x8xf32>
    %86 = vector.broadcast %85 : vector<1x8xf32> to vector<80x8xf32>
    %87 = arith.addf %83, %86 : vector<80x8xf32>
    %c0_99 = arith.constant 0 : index
    %c3_100 = arith.constant 3 : index
    %c0_101 = arith.constant 0 : index
    %c0_102 = arith.constant 0 : index
    %88 = vector.load %arg10[%c0_99, %c3_100, %c0_101, %c0_102] : memref<1x4x32x8xbf16, #tpu.memory_space<vmem>>, vector<1x1x32x8xbf16>
    %89 = vector.shape_cast %88 : vector<1x1x32x8xbf16> to vector<32x8xbf16>
    %cst_103 = arith.constant dense<0.000000e+00> : vector<80x8xf32>
    %90 = tpu.matmul %4, %89, %cst_103 {dimension_numbers = #tpu.dot_dimension_numbers<[1], [0], [0], [1], [0, 0, 1, 1], [], []>} : vector<80x32xbf16>, vector<32x8xbf16>, vector<80x8xf32> -> vector<80x8xf32>
    %c0_104 = arith.constant 0 : index
    %c3_105 = arith.constant 3 : index
    %c0_106 = arith.constant 0 : index
    %c0_107 = arith.constant 0 : index
    %91 = vector.load %arg11[%c0_104, %c3_105, %c0_106, %c0_107] : memref<1x4x1x8xf32, #tpu.memory_space<vmem>>, vector<1x1x1x8xf32>
    %92 = vector.shape_cast %91 : vector<1x1x1x8xf32> to vector<1x8xf32>
    %93 = vector.broadcast %92 : vector<1x8xf32> to vector<80x8xf32>
    %94 = arith.addf %90, %93 : vector<80x8xf32>
    %cst_108 = arith.constant 0.000000e+00 : f32
    %95 = vector.broadcast %cst_108 : f32 to vector<40x32xf32>
    %96 = vector.extract_strided_slice %17 {offsets = [0, 0], sizes = [40, 8], strides = [1, 1]} : vector<80x8xf32> to vector<40x8xf32>
    %97 = vector.extract_strided_slice %45 {offsets = [0, 0], sizes = [40, 8], strides = [1, 1]} : vector<80x8xf32> to vector<40x8xf32>
    %98 = vector.extract_strided_slice %73 {offsets = [0, 0], sizes = [40, 8], strides = [1, 1]} : vector<80x8xf32> to vector<40x8xf32>
    %cst_109 = arith.constant dense<0.000000e+00> : vector<40x40xf32>
    %99 = tpu.matmul %96, %97, %cst_109 {dimension_numbers = #tpu.dot_dimension_numbers<[1], [1], [0], [0], [0, 0, 1, 0], [], []>} : vector<40x8xf32>, vector<40x8xf32>, vector<40x40xf32> -> vector<40x40xf32>
    %cst_110 = arith.constant 0.353553385 : f32
    %100 = vector.broadcast %cst_110 : f32 to vector<40x40xf32>
    %101 = arith.mulf %99, %100 : vector<40x40xf32>
    %102 = arith.addf %101, %10 : vector<40x40xf32>
    %cst_111 = arith.constant dense<0xFF800000> : vector<40xf32>
    %103 = vector.multi_reduction <maximumf>, %102, %cst_111 [1] : vector<40x40xf32> to vector<40xf32>
    %104 = vector.shape_cast %103 : vector<40xf32> to vector<40x1xf32>
    %105 = vector.broadcast %104 : vector<40x1xf32> to vector<40x40xf32>
    %106 = arith.subf %102, %105 : vector<40x40xf32>
    %107 = math.exp %106 : vector<40x40xf32>
    %cst_112 = arith.constant dense<0.000000e+00> : vector<40xf32>
    %108 = vector.multi_reduction <add>, %107, %cst_112 [1] : vector<40x40xf32> to vector<40xf32>
    %109 = vector.shape_cast %108 : vector<40xf32> to vector<40x1xf32>
    %110 = tpu.reciprocal %109 {approx = true} : vector<40x1xf32> -> vector<40x1xf32>
    %111 = vector.broadcast %110 : vector<40x1xf32> to vector<40x40xf32>
    %112 = arith.mulf %107, %111 : vector<40x40xf32>
    %cst_113 = arith.constant dense<0.000000e+00> : vector<40x8xf32>
    %113 = tpu.matmul %112, %98, %cst_113 {dimension_numbers = #tpu.dot_dimension_numbers<[1], [0], [0], [1], [0, 0, 1, 1], [], []>} : vector<40x40xf32>, vector<40x8xf32>, vector<40x8xf32> -> vector<40x8xf32>
    %114 = arith.truncf %113 : vector<40x8xf32> to vector<40x8xbf16>
    %c0_114 = arith.constant 0 : index
    %c0_115 = arith.constant 0 : index
    %c0_116 = arith.constant 0 : index
    %c0_117 = arith.constant 0 : index
    %115 = vector.load %arg12[%c0_114, %c0_115, %c0_116, %c0_117] : memref<1x4x8x32xbf16, #tpu.memory_space<vmem>>, vector<1x1x8x32xbf16>
    %116 = vector.shape_cast %115 : vector<1x1x8x32xbf16> to vector<8x32xbf16>
    %cst_118 = arith.constant dense<0.000000e+00> : vector<40x32xf32>
    %117 = tpu.matmul %114, %116, %cst_118 {dimension_numbers = #tpu.dot_dimension_numbers<[1], [0], [0], [1], [0, 0, 1, 1], [], []>} : vector<40x8xbf16>, vector<8x32xbf16>, vector<40x32xf32> -> vector<40x32xf32>
    %118 = arith.addf %95, %117 : vector<40x32xf32>
    %119 = vector.extract_strided_slice %24 {offsets = [0, 0], sizes = [40, 8], strides = [1, 1]} : vector<80x8xf32> to vector<40x8xf32>
    %120 = vector.extract_strided_slice %52 {offsets = [0, 0], sizes = [40, 8], strides = [1, 1]} : vector<80x8xf32> to vector<40x8xf32>
    %121 = vector.extract_strided_slice %80 {offsets = [0, 0], sizes = [40, 8], strides = [1, 1]} : vector<80x8xf32> to vector<40x8xf32>
    %cst_119 = arith.constant dense<0.000000e+00> : vector<40x40xf32>
    %122 = tpu.matmul %119, %120, %cst_119 {dimension_numbers = #tpu.dot_dimension_numbers<[1], [1], [0], [0], [0, 0, 1, 0], [], []>} : vector<40x8xf32>, vector<40x8xf32>, vector<40x40xf32> -> vector<40x40xf32>
    %cst_120 = arith.constant 0.353553385 : f32
    %123 = vector.broadcast %cst_120 : f32 to vector<40x40xf32>
    %124 = arith.mulf %122, %123 : vector<40x40xf32>
    %125 = arith.addf %124, %10 : vector<40x40xf32>
    %cst_121 = arith.constant dense<0xFF800000> : vector<40xf32>
    %126 = vector.multi_reduction <maximumf>, %125, %cst_121 [1] : vector<40x40xf32> to vector<40xf32>
    %127 = vector.shape_cast %126 : vector<40xf32> to vector<40x1xf32>
    %128 = vector.broadcast %127 : vector<40x1xf32> to vector<40x40xf32>
    %129 = arith.subf %125, %128 : vector<40x40xf32>
    %130 = math.exp %129 : vector<40x40xf32>
    %cst_122 = arith.constant dense<0.000000e+00> : vector<40xf32>
    %131 = vector.multi_reduction <add>, %130, %cst_122 [1] : vector<40x40xf32> to vector<40xf32>
    %132 = vector.shape_cast %131 : vector<40xf32> to vector<40x1xf32>
    %133 = tpu.reciprocal %132 {approx = true} : vector<40x1xf32> -> vector<40x1xf32>
    %134 = vector.broadcast %133 : vector<40x1xf32> to vector<40x40xf32>
    %135 = arith.mulf %130, %134 : vector<40x40xf32>
    %cst_123 = arith.constant dense<0.000000e+00> : vector<40x8xf32>
    %136 = tpu.matmul %135, %121, %cst_123 {dimension_numbers = #tpu.dot_dimension_numbers<[1], [0], [0], [1], [0, 0, 1, 1], [], []>} : vector<40x40xf32>, vector<40x8xf32>, vector<40x8xf32> -> vector<40x8xf32>
    %137 = arith.truncf %136 : vector<40x8xf32> to vector<40x8xbf16>
    %c0_124 = arith.constant 0 : index
    %c1_125 = arith.constant 1 : index
    %c0_126 = arith.constant 0 : index
    %c0_127 = arith.constant 0 : index
    %138 = vector.load %arg12[%c0_124, %c1_125, %c0_126, %c0_127] : memref<1x4x8x32xbf16, #tpu.memory_space<vmem>>, vector<1x1x8x32xbf16>
    %139 = vector.shape_cast %138 : vector<1x1x8x32xbf16> to vector<8x32xbf16>
    %cst_128 = arith.constant dense<0.000000e+00> : vector<40x32xf32>
    %140 = tpu.matmul %137, %139, %cst_128 {dimension_numbers = #tpu.dot_dimension_numbers<[1], [0], [0], [1], [0, 0, 1, 1], [], []>} : vector<40x8xbf16>, vector<8x32xbf16>, vector<40x32xf32> -> vector<40x32xf32>
    %141 = arith.addf %118, %140 : vector<40x32xf32>
    %142 = vector.extract_strided_slice %31 {offsets = [0, 0], sizes = [40, 8], strides = [1, 1]} : vector<80x8xf32> to vector<40x8xf32>
    %143 = vector.extract_strided_slice %59 {offsets = [0, 0], sizes = [40, 8], strides = [1, 1]} : vector<80x8xf32> to vector<40x8xf32>
    %144 = vector.extract_strided_slice %87 {offsets = [0, 0], sizes = [40, 8], strides = [1, 1]} : vector<80x8xf32> to vector<40x8xf32>
    %cst_129 = arith.constant dense<0.000000e+00> : vector<40x40xf32>
    %145 = tpu.matmul %142, %143, %cst_129 {dimension_numbers = #tpu.dot_dimension_numbers<[1], [1], [0], [0], [0, 0, 1, 0], [], []>} : vector<40x8xf32>, vector<40x8xf32>, vector<40x40xf32> -> vector<40x40xf32>
    %cst_130 = arith.constant 0.353553385 : f32
    %146 = vector.broadcast %cst_130 : f32 to vector<40x40xf32>
    %147 = arith.mulf %145, %146 : vector<40x40xf32>
    %148 = arith.addf %147, %10 : vector<40x40xf32>
    %cst_131 = arith.constant dense<0xFF800000> : vector<40xf32>
    %149 = vector.multi_reduction <maximumf>, %148, %cst_131 [1] : vector<40x40xf32> to vector<40xf32>
    %150 = vector.shape_cast %149 : vector<40xf32> to vector<40x1xf32>
    %151 = vector.broadcast %150 : vector<40x1xf32> to vector<40x40xf32>
    %152 = arith.subf %148, %151 : vector<40x40xf32>
    %153 = math.exp %152 : vector<40x40xf32>
    %cst_132 = arith.constant dense<0.000000e+00> : vector<40xf32>
    %154 = vector.multi_reduction <add>, %153, %cst_132 [1] : vector<40x40xf32> to vector<40xf32>
    %155 = vector.shape_cast %154 : vector<40xf32> to vector<40x1xf32>
    %156 = tpu.reciprocal %155 {approx = true} : vector<40x1xf32> -> vector<40x1xf32>
    %157 = vector.broadcast %156 : vector<40x1xf32> to vector<40x40xf32>
    %158 = arith.mulf %153, %157 : vector<40x40xf32>
    %cst_133 = arith.constant dense<0.000000e+00> : vector<40x8xf32>
    %159 = tpu.matmul %158, %144, %cst_133 {dimension_numbers = #tpu.dot_dimension_numbers<[1], [0], [0], [1], [0, 0, 1, 1], [], []>} : vector<40x40xf32>, vector<40x8xf32>, vector<40x8xf32> -> vector<40x8xf32>
    %160 = arith.truncf %159 : vector<40x8xf32> to vector<40x8xbf16>
    %c0_134 = arith.constant 0 : index
    %c2_135 = arith.constant 2 : index
    %c0_136 = arith.constant 0 : index
    %c0_137 = arith.constant 0 : index
    %161 = vector.load %arg12[%c0_134, %c2_135, %c0_136, %c0_137] : memref<1x4x8x32xbf16, #tpu.memory_space<vmem>>, vector<1x1x8x32xbf16>
    %162 = vector.shape_cast %161 : vector<1x1x8x32xbf16> to vector<8x32xbf16>
    %cst_138 = arith.constant dense<0.000000e+00> : vector<40x32xf32>
    %163 = tpu.matmul %160, %162, %cst_138 {dimension_numbers = #tpu.dot_dimension_numbers<[1], [0], [0], [1], [0, 0, 1, 1], [], []>} : vector<40x8xbf16>, vector<8x32xbf16>, vector<40x32xf32> -> vector<40x32xf32>
    %164 = arith.addf %141, %163 : vector<40x32xf32>
    %165 = vector.extract_strided_slice %38 {offsets = [0, 0], sizes = [40, 8], strides = [1, 1]} : vector<80x8xf32> to vector<40x8xf32>
    %166 = vector.extract_strided_slice %66 {offsets = [0, 0], sizes = [40, 8], strides = [1, 1]} : vector<80x8xf32> to vector<40x8xf32>
    %167 = vector.extract_strided_slice %94 {offsets = [0, 0], sizes = [40, 8], strides = [1, 1]} : vector<80x8xf32> to vector<40x8xf32>
    %cst_139 = arith.constant dense<0.000000e+00> : vector<40x40xf32>
    %168 = tpu.matmul %165, %166, %cst_139 {dimension_numbers = #tpu.dot_dimension_numbers<[1], [1], [0], [0], [0, 0, 1, 0], [], []>} : vector<40x8xf32>, vector<40x8xf32>, vector<40x40xf32> -> vector<40x40xf32>
    %cst_140 = arith.constant 0.353553385 : f32
    %169 = vector.broadcast %cst_140 : f32 to vector<40x40xf32>
    %170 = arith.mulf %168, %169 : vector<40x40xf32>
    %171 = arith.addf %170, %10 : vector<40x40xf32>
    %cst_141 = arith.constant dense<0xFF800000> : vector<40xf32>
    %172 = vector.multi_reduction <maximumf>, %171, %cst_141 [1] : vector<40x40xf32> to vector<40xf32>
    %173 = vector.shape_cast %172 : vector<40xf32> to vector<40x1xf32>
    %174 = vector.broadcast %173 : vector<40x1xf32> to vector<40x40xf32>
    %175 = arith.subf %171, %174 : vector<40x40xf32>
    %176 = math.exp %175 : vector<40x40xf32>
    %cst_142 = arith.constant dense<0.000000e+00> : vector<40xf32>
    %177 = vector.multi_reduction <add>, %176, %cst_142 [1] : vector<40x40xf32> to vector<40xf32>
    %178 = vector.shape_cast %177 : vector<40xf32> to vector<40x1xf32>
    %179 = tpu.reciprocal %178 {approx = true} : vector<40x1xf32> -> vector<40x1xf32>
    %180 = vector.broadcast %179 : vector<40x1xf32> to vector<40x40xf32>
    %181 = arith.mulf %176, %180 : vector<40x40xf32>
    %cst_143 = arith.constant dense<0.000000e+00> : vector<40x8xf32>
    %182 = tpu.matmul %181, %167, %cst_143 {dimension_numbers = #tpu.dot_dimension_numbers<[1], [0], [0], [1], [0, 0, 1, 1], [], []>} : vector<40x40xf32>, vector<40x8xf32>, vector<40x8xf32> -> vector<40x8xf32>
    %183 = arith.truncf %182 : vector<40x8xf32> to vector<40x8xbf16>
    %c0_144 = arith.constant 0 : index
    %c3_145 = arith.constant 3 : index
    %c0_146 = arith.constant 0 : index
    %c0_147 = arith.constant 0 : index
    %184 = vector.load %arg12[%c0_144, %c3_145, %c0_146, %c0_147] : memref<1x4x8x32xbf16, #tpu.memory_space<vmem>>, vector<1x1x8x32xbf16>
    %185 = vector.shape_cast %184 : vector<1x1x8x32xbf16> to vector<8x32xbf16>
    %cst_148 = arith.constant dense<0.000000e+00> : vector<40x32xf32>
    %186 = tpu.matmul %183, %185, %cst_148 {dimension_numbers = #tpu.dot_dimension_numbers<[1], [0], [0], [1], [0, 0, 1, 1], [], []>} : vector<40x8xbf16>, vector<8x32xbf16>, vector<40x32xf32> -> vector<40x32xf32>
    %187 = arith.addf %164, %186 : vector<40x32xf32>
    %188 = vector.extract_strided_slice %3 {offsets = [0, 0], sizes = [40, 32], strides = [1, 1]} : vector<80x32xf32> to vector<40x32xf32>
    %189 = arith.addf %188, %187 : vector<40x32xf32>
    %c0_149 = arith.constant 0 : index
    %c0_150 = arith.constant 0 : index
    %c0_151 = arith.constant 0 : index
    %190 = vector.load %arg13[%c0_149, %c0_150, %c0_151] : memref<1x1x32xf32, #tpu.memory_space<vmem>>, vector<1x1x32xf32>
    %191 = vector.shape_cast %190 : vector<1x1x32xf32> to vector<1x32xf32>
    %192 = vector.broadcast %191 : vector<1x32xf32> to vector<40x32xf32>
    %193 = arith.addf %189, %192 : vector<40x32xf32>
    %c0_152 = arith.constant 0 : index
    %c0_153 = arith.constant 0 : index
    %c0_154 = arith.constant 0 : index
    %194 = vector.load %arg14[%c0_152, %c0_153, %c0_154] : memref<1x1x32xf32, #tpu.memory_space<vmem>>, vector<1x1x32xf32>
    %195 = vector.shape_cast %194 : vector<1x1x32xf32> to vector<1x32xf32>
    %c0_155 = arith.constant 0 : index
    %c0_156 = arith.constant 0 : index
    %c0_157 = arith.constant 0 : index
    %196 = vector.load %arg15[%c0_155, %c0_156, %c0_157] : memref<1x1x32xf32, #tpu.memory_space<vmem>>, vector<1x1x32xf32>
    %197 = vector.shape_cast %196 : vector<1x1x32xf32> to vector<1x32xf32>
    %cst_158 = arith.constant dense<0.000000e+00> : vector<40xf32>
    %198 = vector.multi_reduction <add>, %193, %cst_158 [1] : vector<40x32xf32> to vector<40xf32>
    %199 = vector.shape_cast %198 : vector<40xf32> to vector<40x1xf32>
    %cst_159 = arith.constant 3.200000e+01 : f32
    %200 = vector.broadcast %cst_159 : f32 to vector<40x1xf32>
    %201 = arith.divf %199, %200 : vector<40x1xf32>
    %202 = vector.broadcast %201 : vector<40x1xf32> to vector<40x32xf32>
    %203 = arith.subf %193, %202 : vector<40x32xf32>
    %204 = arith.mulf %203, %203 : vector<40x32xf32>
    %cst_160 = arith.constant dense<0.000000e+00> : vector<40xf32>
    %205 = vector.multi_reduction <add>, %204, %cst_160 [1] : vector<40x32xf32> to vector<40xf32>
    %206 = vector.shape_cast %205 : vector<40xf32> to vector<40x1xf32>
    %cst_161 = arith.constant 3.200000e+01 : f32
    %207 = vector.broadcast %cst_161 : f32 to vector<40x1xf32>
    %208 = arith.divf %206, %207 : vector<40x1xf32>
    %cst_162 = arith.constant 9.99999974E-6 : f32
    %209 = vector.broadcast %cst_162 : f32 to vector<40x1xf32>
    %210 = arith.addf %208, %209 : vector<40x1xf32>
    %211 = math.rsqrt %210 : vector<40x1xf32>
    %212 = vector.broadcast %211 : vector<40x1xf32> to vector<40x32xf32>
    %213 = arith.mulf %203, %212 : vector<40x32xf32>
    %214 = vector.broadcast %195 : vector<1x32xf32> to vector<40x32xf32>
    %215 = arith.mulf %213, %214 : vector<40x32xf32>
    %216 = vector.broadcast %197 : vector<1x32xf32> to vector<40x32xf32>
    %217 = arith.addf %215, %216 : vector<40x32xf32>
    %c0_163 = arith.constant 0 : index
    %c0_164 = arith.constant 0 : index
    %218 = vector.load %arg25[%c0_163, %c0_164] : memref<80x32xf32, #tpu.memory_space<vmem>>, vector<40x32xf32>
    tpu.vector_store %arg25[%c0_163, %c0_164], %217 {strides = array<i32>} : memref<80x32xf32, #tpu.memory_space<vmem>>, vector<40x32xf32>,
    %cst_165 = arith.constant 0.000000e+00 : f32
    %219 = vector.broadcast %cst_165 : f32 to vector<40x32xf32>
    %220 = vector.extract_strided_slice %17 {offsets = [40, 0], sizes = [40, 8], strides = [1, 1]} : vector<80x8xf32> to vector<40x8xf32>
    %221 = vector.extract_strided_slice %45 {offsets = [40, 0], sizes = [40, 8], strides = [1, 1]} : vector<80x8xf32> to vector<40x8xf32>
    %222 = vector.extract_strided_slice %73 {offsets = [40, 0], sizes = [40, 8], strides = [1, 1]} : vector<80x8xf32> to vector<40x8xf32>
    %cst_166 = arith.constant dense<0.000000e+00> : vector<40x40xf32>
    %223 = tpu.matmul %220, %221, %cst_166 {dimension_numbers = #tpu.dot_dimension_numbers<[1], [1], [0], [0], [0, 0, 1, 0], [], []>} : vector<40x8xf32>, vector<40x8xf32>, vector<40x40xf32> -> vector<40x40xf32>
    %cst_167 = arith.constant 0.353553385 : f32
    %224 = vector.broadcast %cst_167 : f32 to vector<40x40xf32>
    %225 = arith.mulf %223, %224 : vector<40x40xf32>
    %226 = arith.addf %225, %10 : vector<40x40xf32>
    %cst_168 = arith.constant dense<0xFF800000> : vector<40xf32>
    %227 = vector.multi_reduction <maximumf>, %226, %cst_168 [1] : vector<40x40xf32> to vector<40xf32>
    %228 = vector.shape_cast %227 : vector<40xf32> to vector<40x1xf32>
    %229 = vector.broadcast %228 : vector<40x1xf32> to vector<40x40xf32>
    %230 = arith.subf %226, %229 : vector<40x40xf32>
    %231 = math.exp %230 : vector<40x40xf32>
    %cst_169 = arith.constant dense<0.000000e+00> : vector<40xf32>
    %232 = vector.multi_reduction <add>, %231, %cst_169 [1] : vector<40x40xf32> to vector<40xf32>
    %233 = vector.shape_cast %232 : vector<40xf32> to vector<40x1xf32>
    %234 = tpu.reciprocal %233 {approx = true} : vector<40x1xf32> -> vector<40x1xf32>
    %235 = vector.broadcast %234 : vector<40x1xf32> to vector<40x40xf32>
    %236 = arith.mulf %231, %235 : vector<40x40xf32>
    %cst_170 = arith.constant dense<0.000000e+00> : vector<40x8xf32>
    %237 = tpu.matmul %236, %222, %cst_170 {dimension_numbers = #tpu.dot_dimension_numbers<[1], [0], [0], [1], [0, 0, 1, 1], [], []>} : vector<40x40xf32>, vector<40x8xf32>, vector<40x8xf32> -> vector<40x8xf32>
    %238 = arith.truncf %237 : vector<40x8xf32> to vector<40x8xbf16>
    %c0_171 = arith.constant 0 : index
    %c0_172 = arith.constant 0 : index
    %c0_173 = arith.constant 0 : index
    %c0_174 = arith.constant 0 : index
    %239 = vector.load %arg12[%c0_171, %c0_172, %c0_173, %c0_174] : memref<1x4x8x32xbf16, #tpu.memory_space<vmem>>, vector<1x1x8x32xbf16>
    %240 = vector.shape_cast %239 : vector<1x1x8x32xbf16> to vector<8x32xbf16>
    %cst_175 = arith.constant dense<0.000000e+00> : vector<40x32xf32>
    %241 = tpu.matmul %238, %240, %cst_175 {dimension_numbers = #tpu.dot_dimension_numbers<[1], [0], [0], [1], [0, 0, 1, 1], [], []>} : vector<40x8xbf16>, vector<8x32xbf16>, vector<40x32xf32> -> vector<40x32xf32>
    %242 = arith.addf %219, %241 : vector<40x32xf32>
    %243 = vector.extract_strided_slice %24 {offsets = [40, 0], sizes = [40, 8], strides = [1, 1]} : vector<80x8xf32> to vector<40x8xf32>
    %244 = vector.extract_strided_slice %52 {offsets = [40, 0], sizes = [40, 8], strides = [1, 1]} : vector<80x8xf32> to vector<40x8xf32>
    %245 = vector.extract_strided_slice %80 {offsets = [40, 0], sizes = [40, 8], strides = [1, 1]} : vector<80x8xf32> to vector<40x8xf32>
    %cst_176 = arith.constant dense<0.000000e+00> : vector<40x40xf32>
    %246 = tpu.matmul %243, %244, %cst_176 {dimension_numbers = #tpu.dot_dimension_numbers<[1], [1], [0], [0], [0, 0, 1, 0], [], []>} : vector<40x8xf32>, vector<40x8xf32>, vector<40x40xf32> -> vector<40x40xf32>
    %cst_177 = arith.constant 0.353553385 : f32
    %247 = vector.broadcast %cst_177 : f32 to vector<40x40xf32>
    %248 = arith.mulf %246, %247 : vector<40x40xf32>
    %249 = arith.addf %248, %10 : vector<40x40xf32>
    %cst_178 = arith.constant dense<0xFF800000> : vector<40xf32>
    %250 = vector.multi_reduction <maximumf>, %249, %cst_178 [1] : vector<40x40xf32> to vector<40xf32>
    %251 = vector.shape_cast %250 : vector<40xf32> to vector<40x1xf32>
    %252 = vector.broadcast %251 : vector<40x1xf32> to vector<40x40xf32>
    %253 = arith.subf %249, %252 : vector<40x40xf32>
    %254 = math.exp %253 : vector<40x40xf32>
    %cst_179 = arith.constant dense<0.000000e+00> : vector<40xf32>
    %255 = vector.multi_reduction <add>, %254, %cst_179 [1] : vector<40x40xf32> to vector<40xf32>
    %256 = vector.shape_cast %255 : vector<40xf32> to vector<40x1xf32>
    %257 = tpu.reciprocal %256 {approx = true} : vector<40x1xf32> -> vector<40x1xf32>
    %258 = vector.broadcast %257 : vector<40x1xf32> to vector<40x40xf32>
    %259 = arith.mulf %254, %258 : vector<40x40xf32>
    %cst_180 = arith.constant dense<0.000000e+00> : vector<40x8xf32>
    %260 = tpu.matmul %259, %245, %cst_180 {dimension_numbers = #tpu.dot_dimension_numbers<[1], [0], [0], [1], [0, 0, 1, 1], [], []>} : vector<40x40xf32>, vector<40x8xf32>, vector<40x8xf32> -> vector<40x8xf32>
    %261 = arith.truncf %260 : vector<40x8xf32> to vector<40x8xbf16>
    %c0_181 = arith.constant 0 : index
    %c1_182 = arith.constant 1 : index
    %c0_183 = arith.constant 0 : index
    %c0_184 = arith.constant 0 : index
    %262 = vector.load %arg12[%c0_181, %c1_182, %c0_183, %c0_184] : memref<1x4x8x32xbf16, #tpu.memory_space<vmem>>, vector<1x1x8x32xbf16>
    %263 = vector.shape_cast %262 : vector<1x1x8x32xbf16> to vector<8x32xbf16>
    %cst_185 = arith.constant dense<0.000000e+00> : vector<40x32xf32>
    %264 = tpu.matmul %261, %263, %cst_185 {dimension_numbers = #tpu.dot_dimension_numbers<[1], [0], [0], [1], [0, 0, 1, 1], [], []>} : vector<40x8xbf16>, vector<8x32xbf16>, vector<40x32xf32> -> vector<40x32xf32>
    %265 = arith.addf %242, %264 : vector<40x32xf32>
    %266 = vector.extract_strided_slice %31 {offsets = [40, 0], sizes = [40, 8], strides = [1, 1]} : vector<80x8xf32> to vector<40x8xf32>
    %267 = vector.extract_strided_slice %59 {offsets = [40, 0], sizes = [40, 8], strides = [1, 1]} : vector<80x8xf32> to vector<40x8xf32>
    %268 = vector.extract_strided_slice %87 {offsets = [40, 0], sizes = [40, 8], strides = [1, 1]} : vector<80x8xf32> to vector<40x8xf32>
    %cst_186 = arith.constant dense<0.000000e+00> : vector<40x40xf32>
    %269 = tpu.matmul %266, %267, %cst_186 {dimension_numbers = #tpu.dot_dimension_numbers<[1], [1], [0], [0], [0, 0, 1, 0], [], []>} : vector<40x8xf32>, vector<40x8xf32>, vector<40x40xf32> -> vector<40x40xf32>
    %cst_187 = arith.constant 0.353553385 : f32
    %270 = vector.broadcast %cst_187 : f32 to vector<40x40xf32>
    %271 = arith.mulf %269, %270 : vector<40x40xf32>
    %272 = arith.addf %271, %10 : vector<40x40xf32>
    %cst_188 = arith.constant dense<0xFF800000> : vector<40xf32>
    %273 = vector.multi_reduction <maximumf>, %272, %cst_188 [1] : vector<40x40xf32> to vector<40xf32>
    %274 = vector.shape_cast %273 : vector<40xf32> to vector<40x1xf32>
    %275 = vector.broadcast %274 : vector<40x1xf32> to vector<40x40xf32>
    %276 = arith.subf %272, %275 : vector<40x40xf32>
    %277 = math.exp %276 : vector<40x40xf32>
    %cst_189 = arith.constant dense<0.000000e+00> : vector<40xf32>
    %278 = vector.multi_reduction <add>, %277, %cst_189 [1] : vector<40x40xf32> to vector<40xf32>
    %279 = vector.shape_cast %278 : vector<40xf32> to vector<40x1xf32>
    %280 = tpu.reciprocal %279 {approx = true} : vector<40x1xf32> -> vector<40x1xf32>
    %281 = vector.broadcast %280 : vector<40x1xf32> to vector<40x40xf32>
    %282 = arith.mulf %277, %281 : vector<40x40xf32>
    %cst_190 = arith.constant dense<0.000000e+00> : vector<40x8xf32>
    %283 = tpu.matmul %282, %268, %cst_190 {dimension_numbers = #tpu.dot_dimension_numbers<[1], [0], [0], [1], [0, 0, 1, 1], [], []>} : vector<40x40xf32>, vector<40x8xf32>, vector<40x8xf32> -> vector<40x8xf32>
    %284 = arith.truncf %283 : vector<40x8xf32> to vector<40x8xbf16>
    %c0_191 = arith.constant 0 : index
    %c2_192 = arith.constant 2 : index
    %c0_193 = arith.constant 0 : index
    %c0_194 = arith.constant 0 : index
    %285 = vector.load %arg12[%c0_191, %c2_192, %c0_193, %c0_194] : memref<1x4x8x32xbf16, #tpu.memory_space<vmem>>, vector<1x1x8x32xbf16>
    %286 = vector.shape_cast %285 : vector<1x1x8x32xbf16> to vector<8x32xbf16>
    %cst_195 = arith.constant dense<0.000000e+00> : vector<40x32xf32>
    %287 = tpu.matmul %284, %286, %cst_195 {dimension_numbers = #tpu.dot_dimension_numbers<[1], [0], [0], [1], [0, 0, 1, 1], [], []>} : vector<40x8xbf16>, vector<8x32xbf16>, vector<40x32xf32> -> vector<40x32xf32>
    %288 = arith.addf %265, %287 : vector<40x32xf32>
    %289 = vector.extract_strided_slice %38 {offsets = [40, 0], sizes = [40, 8], strides = [1, 1]} : vector<80x8xf32> to vector<40x8xf32>
    %290 = vector.extract_strided_slice %66 {offsets = [40, 0], sizes = [40, 8], strides = [1, 1]} : vector<80x8xf32> to vector<40x8xf32>
    %291 = vector.extract_strided_slice %94 {offsets = [40, 0], sizes = [40, 8], strides = [1, 1]} : vector<80x8xf32> to vector<40x8xf32>
    %cst_196 = arith.constant dense<0.000000e+00> : vector<40x40xf32>
    %292 = tpu.matmul %289, %290, %cst_196 {dimension_numbers = #tpu.dot_dimension_numbers<[1], [1], [0], [0], [0, 0, 1, 0], [], []>} : vector<40x8xf32>, vector<40x8xf32>, vector<40x40xf32> -> vector<40x40xf32>
    %cst_197 = arith.constant 0.353553385 : f32
    %293 = vector.broadcast %cst_197 : f32 to vector<40x40xf32>
    %294 = arith.mulf %292, %293 : vector<40x40xf32>
    %295 = arith.addf %294, %10 : vector<40x40xf32>
    %cst_198 = arith.constant dense<0xFF800000> : vector<40xf32>
    %296 = vector.multi_reduction <maximumf>, %295, %cst_198 [1] : vector<40x40xf32> to vector<40xf32>
    %297 = vector.shape_cast %296 : vector<40xf32> to vector<40x1xf32>
    %298 = vector.broadcast %297 : vector<40x1xf32> to vector<40x40xf32>
    %299 = arith.subf %295, %298 : vector<40x40xf32>
    %300 = math.exp %299 : vector<40x40xf32>
    %cst_199 = arith.constant dense<0.000000e+00> : vector<40xf32>
    %301 = vector.multi_reduction <add>, %300, %cst_199 [1] : vector<40x40xf32> to vector<40xf32>
    %302 = vector.shape_cast %301 : vector<40xf32> to vector<40x1xf32>
    %303 = tpu.reciprocal %302 {approx = true} : vector<40x1xf32> -> vector<40x1xf32>
    %304 = vector.broadcast %303 : vector<40x1xf32> to vector<40x40xf32>
    %305 = arith.mulf %300, %304 : vector<40x40xf32>
    %cst_200 = arith.constant dense<0.000000e+00> : vector<40x8xf32>
    %306 = tpu.matmul %305, %291, %cst_200 {dimension_numbers = #tpu.dot_dimension_numbers<[1], [0], [0], [1], [0, 0, 1, 1], [], []>} : vector<40x40xf32>, vector<40x8xf32>, vector<40x8xf32> -> vector<40x8xf32>
    %307 = arith.truncf %306 : vector<40x8xf32> to vector<40x8xbf16>
    %c0_201 = arith.constant 0 : index
    %c3_202 = arith.constant 3 : index
    %c0_203 = arith.constant 0 : index
    %c0_204 = arith.constant 0 : index
    %308 = vector.load %arg12[%c0_201, %c3_202, %c0_203, %c0_204] : memref<1x4x8x32xbf16, #tpu.memory_space<vmem>>, vector<1x1x8x32xbf16>
    %309 = vector.shape_cast %308 : vector<1x1x8x32xbf16> to vector<8x32xbf16>
    %cst_205 = arith.constant dense<0.000000e+00> : vector<40x32xf32>
    %310 = tpu.matmul %307, %309, %cst_205 {dimension_numbers = #tpu.dot_dimension_numbers<[1], [0], [0], [1], [0, 0, 1, 1], [], []>} : vector<40x8xbf16>, vector<8x32xbf16>, vector<40x32xf32> -> vector<40x32xf32>
    %311 = arith.addf %288, %310 : vector<40x32xf32>
    %312 = vector.extract_strided_slice %3 {offsets = [40, 0], sizes = [40, 32], strides = [1, 1]} : vector<80x32xf32> to vector<40x32xf32>
    %313 = arith.addf %312, %311 : vector<40x32xf32>
    %c0_206 = arith.constant 0 : index
    %c0_207 = arith.constant 0 : index
    %c0_208 = arith.constant 0 : index
    %314 = vector.load %arg13[%c0_206, %c0_207, %c0_208] : memref<1x1x32xf32, #tpu.memory_space<vmem>>, vector<1x1x32xf32>
    %315 = vector.shape_cast %314 : vector<1x1x32xf32> to vector<1x32xf32>
    %316 = vector.broadcast %315 : vector<1x32xf32> to vector<40x32xf32>
    %317 = arith.addf %313, %316 : vector<40x32xf32>
    %c0_209 = arith.constant 0 : index
    %c0_210 = arith.constant 0 : index
    %c0_211 = arith.constant 0 : index
    %318 = vector.load %arg14[%c0_209, %c0_210, %c0_211] : memref<1x1x32xf32, #tpu.memory_space<vmem>>, vector<1x1x32xf32>
    %319 = vector.shape_cast %318 : vector<1x1x32xf32> to vector<1x32xf32>
    %c0_212 = arith.constant 0 : index
    %c0_213 = arith.constant 0 : index
    %c0_214 = arith.constant 0 : index
    %320 = vector.load %arg15[%c0_212, %c0_213, %c0_214] : memref<1x1x32xf32, #tpu.memory_space<vmem>>, vector<1x1x32xf32>
    %321 = vector.shape_cast %320 : vector<1x1x32xf32> to vector<1x32xf32>
    %cst_215 = arith.constant dense<0.000000e+00> : vector<40xf32>
    %322 = vector.multi_reduction <add>, %317, %cst_215 [1] : vector<40x32xf32> to vector<40xf32>
    %323 = vector.shape_cast %322 : vector<40xf32> to vector<40x1xf32>
    %cst_216 = arith.constant 3.200000e+01 : f32
    %324 = vector.broadcast %cst_216 : f32 to vector<40x1xf32>
    %325 = arith.divf %323, %324 : vector<40x1xf32>
    %326 = vector.broadcast %325 : vector<40x1xf32> to vector<40x32xf32>
    %327 = arith.subf %317, %326 : vector<40x32xf32>
    %328 = arith.mulf %327, %327 : vector<40x32xf32>
    %cst_217 = arith.constant dense<0.000000e+00> : vector<40xf32>
    %329 = vector.multi_reduction <add>, %328, %cst_217 [1] : vector<40x32xf32> to vector<40xf32>
    %330 = vector.shape_cast %329 : vector<40xf32> to vector<40x1xf32>
    %cst_218 = arith.constant 3.200000e+01 : f32
    %331 = vector.broadcast %cst_218 : f32 to vector<40x1xf32>
    %332 = arith.divf %330, %331 : vector<40x1xf32>
    %cst_219 = arith.constant 9.99999974E-6 : f32
    %333 = vector.broadcast %cst_219 : f32 to vector<40x1xf32>
    %334 = arith.addf %332, %333 : vector<40x1xf32>
    %335 = math.rsqrt %334 : vector<40x1xf32>
    %336 = vector.broadcast %335 : vector<40x1xf32> to vector<40x32xf32>
    %337 = arith.mulf %327, %336 : vector<40x32xf32>
    %338 = vector.broadcast %319 : vector<1x32xf32> to vector<40x32xf32>
    %339 = arith.mulf %337, %338 : vector<40x32xf32>
    %340 = vector.broadcast %321 : vector<1x32xf32> to vector<40x32xf32>
    %341 = arith.addf %339, %340 : vector<40x32xf32>
    %c40 = arith.constant 40 : index
    %c0_220 = arith.constant 0 : index
    %342 = vector.load %arg25[%c40, %c0_220] : memref<80x32xf32, #tpu.memory_space<vmem>>, vector<40x32xf32>
    tpu.vector_store %arg25[%c40, %c0_220], %341 {strides = array<i32>} : memref<80x32xf32, #tpu.memory_space<vmem>>, vector<40x32xf32>,
    %c0_221 = arith.constant 0 : index
    %c0_222 = arith.constant 0 : index
    %343 = vector.load %arg25[%c0_221, %c0_222] : memref<80x32xf32, #tpu.memory_space<vmem>>, vector<80x32xf32>
    %344 = arith.truncf %343 : vector<80x32xf32> to vector<80x32xbf16>
    %c0_223 = arith.constant 0 : index
    %c0_224 = arith.constant 0 : index
    %c0_225 = arith.constant 0 : index
    %345 = vector.load %arg16[%c0_223, %c0_224, %c0_225] : memref<1x32x2048xbf16, #tpu.memory_space<vmem>>, vector<1x32x2048xbf16>
    %346 = vector.shape_cast %345 : vector<1x32x2048xbf16> to vector<32x2048xbf16>
    %cst_226 = arith.constant dense<0.000000e+00> : vector<80x2048xf32>
    %347 = tpu.matmul %344, %346, %cst_226 {dimension_numbers = #tpu.dot_dimension_numbers<[1], [0], [0], [1], [0, 0, 1, 1], [], []>} : vector<80x32xbf16>, vector<32x2048xbf16>, vector<80x2048xf32> -> vector<80x2048xf32>
    %c0_227 = arith.constant 0 : index
    %c0_228 = arith.constant 0 : index
    %c0_229 = arith.constant 0 : index
    %348 = vector.load %arg17[%c0_227, %c0_228, %c0_229] : memref<1x1x2048xf32, #tpu.memory_space<vmem>>, vector<1x1x2048xf32>
    %349 = vector.shape_cast %348 : vector<1x1x2048xf32> to vector<1x2048xf32>
    %350 = vector.broadcast %349 : vector<1x2048xf32> to vector<80x2048xf32>
    %351 = arith.addf %347, %350 : vector<80x2048xf32>
    %cst_230 = arith.constant 0.000000e+00 : f32
    %352 = vector.broadcast %cst_230 : f32 to vector<80x2048xf32>
    %353 = arith.maximumf %351, %352 : vector<80x2048xf32>
    %354 = arith.truncf %353 : vector<80x2048xf32> to vector<80x2048xbf16>
    %c0_231 = arith.constant 0 : index
    %c0_232 = arith.constant 0 : index
    %c0_233 = arith.constant 0 : index
    %355 = vector.load %arg18[%c0_231, %c0_232, %c0_233] : memref<1x2048x32xbf16, #tpu.memory_space<vmem>>, vector<1x2048x32xbf16>
    %356 = vector.shape_cast %355 : vector<1x2048x32xbf16> to vector<2048x32xbf16>
    %cst_234 = arith.constant dense<0.000000e+00> : vector<80x32xf32>
    %357 = tpu.matmul %354, %356, %cst_234 {dimension_numbers = #tpu.dot_dimension_numbers<[1], [0], [0], [1], [0, 0, 1, 1], [], []>} : vector<80x2048xbf16>, vector<2048x32xbf16>, vector<80x32xf32> -> vector<80x32xf32>
    %c0_235 = arith.constant 0 : index
    %c0_236 = arith.constant 0 : index
    %c0_237 = arith.constant 0 : index
    %358 = vector.load %arg19[%c0_235, %c0_236, %c0_237] : memref<1x1x32xf32, #tpu.memory_space<vmem>>, vector<1x1x32xf32>
    %359 = vector.shape_cast %358 : vector<1x1x32xf32> to vector<1x32xf32>
    %360 = vector.broadcast %359 : vector<1x32xf32> to vector<80x32xf32>
    %361 = arith.addf %357, %360 : vector<80x32xf32>
    %362 = arith.addf %343, %361 : vector<80x32xf32>
    %c0_238 = arith.constant 0 : index
    %c0_239 = arith.constant 0 : index
    %c0_240 = arith.constant 0 : index
    %363 = vector.load %arg20[%c0_238, %c0_239, %c0_240] : memref<1x1x32xf32, #tpu.memory_space<vmem>>, vector<1x1x32xf32>
    %364 = vector.shape_cast %363 : vector<1x1x32xf32> to vector<1x32xf32>
    %c0_241 = arith.constant 0 : index
    %c0_242 = arith.constant 0 : index
    %c0_243 = arith.constant 0 : index
    %365 = vector.load %arg21[%c0_241, %c0_242, %c0_243] : memref<1x1x32xf32, #tpu.memory_space<vmem>>, vector<1x1x32xf32>
    %366 = vector.shape_cast %365 : vector<1x1x32xf32> to vector<1x32xf32>
    %cst_244 = arith.constant dense<0.000000e+00> : vector<80xf32>
    %367 = vector.multi_reduction <add>, %362, %cst_244 [1] : vector<80x32xf32> to vector<80xf32>
    %368 = vector.shape_cast %367 : vector<80xf32> to vector<80x1xf32>
    %cst_245 = arith.constant 3.200000e+01 : f32
    %369 = vector.broadcast %cst_245 : f32 to vector<80x1xf32>
    %370 = arith.divf %368, %369 : vector<80x1xf32>
    %371 = vector.broadcast %370 : vector<80x1xf32> to vector<80x32xf32>
    %372 = arith.subf %362, %371 : vector<80x32xf32>
    %373 = arith.mulf %372, %372 : vector<80x32xf32>
    %cst_246 = arith.constant dense<0.000000e+00> : vector<80xf32>
    %374 = vector.multi_reduction <add>, %373, %cst_246 [1] : vector<80x32xf32> to vector<80xf32>
    %375 = vector.shape_cast %374 : vector<80xf32> to vector<80x1xf32>
    %cst_247 = arith.constant 3.200000e+01 : f32
    %376 = vector.broadcast %cst_247 : f32 to vector<80x1xf32>
    %377 = arith.divf %375, %376 : vector<80x1xf32>
    %cst_248 = arith.constant 9.99999974E-6 : f32
    %378 = vector.broadcast %cst_248 : f32 to vector<80x1xf32>
    %379 = arith.addf %377, %378 : vector<80x1xf32>
    %380 = math.rsqrt %379 : vector<80x1xf32>
    %381 = vector.broadcast %380 : vector<80x1xf32> to vector<80x32xf32>
    %382 = arith.mulf %372, %381 : vector<80x32xf32>
    %383 = vector.broadcast %364 : vector<1x32xf32> to vector<80x32xf32>
    %384 = arith.mulf %382, %383 : vector<80x32xf32>
    %385 = vector.broadcast %366 : vector<1x32xf32> to vector<80x32xf32>
    %386 = arith.addf %384, %385 : vector<80x32xf32>
    %c0_249 = arith.constant 0 : index
    %c0_250 = arith.constant 0 : index
    %387 = vector.load %arg25[%c0_249, %c0_250] : memref<80x32xf32, #tpu.memory_space<vmem>>, vector<80x32xf32>
    tpu.vector_store %arg25[%c0_249, %c0_250], %386 {strides = array<i32>} : memref<80x32xf32, #tpu.memory_space<vmem>>, vector<80x32xf32>,
    %c1_i32 = arith.constant 1 : i32
    %388 = arith.cmpi eq, %arg0, %c1_i32 : i32
    %389 = arith.extui %388 : i1 to i32
    %c0_i32_251 = arith.constant 0 : i32
    %390 = arith.cmpi ne, %389, %c0_i32_251 : i32
    scf.if %390 {
      %391 = vector.extract_strided_slice %386 {offsets = [32, 0], sizes = [1, 32], strides = [1, 1]} : vector<80x32xf32> to vector<1x32xf32>
      %392 = arith.truncf %391 : vector<1x32xf32> to vector<1x32xbf16>
      %c0_252 = arith.constant 0 : index
      %c0_253 = arith.constant 0 : index
      %393 = vector.load %arg22[%c0_252, %c0_253] : memref<32x4xbf16, #tpu.memory_space<vmem>>, vector<32x4xbf16>
      %cst_254 = arith.constant dense<0.000000e+00> : vector<1x4xf32>
      %394 = tpu.matmul %392, %393, %cst_254 {dimension_numbers = #tpu.dot_dimension_numbers<[1], [0], [0], [1], [0, 0, 1, 1], [], []>} : vector<1x32xbf16>, vector<32x4xbf16>, vector<1x4xf32> -> vector<1x4xf32>
      %c0_255 = arith.constant 0 : index
      %c0_256 = arith.constant 0 : index
      %395 = vector.load %arg23[%c0_255, %c0_256] : memref<1x4xf32, #tpu.memory_space<vmem>>, vector<1x4xf32>
      %396 = arith.addf %394, %395 : vector<1x4xf32>
      %c0_257 = arith.constant 0 : index
      %c0_258 = arith.constant 0 : index
      %397 = vector.load %arg24[%c0_257, %c0_258] : memref<2x4xf32, #tpu.memory_space<vmem>>, vector<1x4xf32>
      tpu.vector_store %arg24[%c0_257, %c0_258], %396 {strides = array<i32>} : memref<2x4xf32, #tpu.memory_space<vmem>>, vector<1x4xf32>,
      %398 = vector.extract_strided_slice %386 {offsets = [72, 0], sizes = [1, 32], strides = [1, 1]} : vector<80x32xf32> to vector<1x32xf32>
      %399 = arith.truncf %398 : vector<1x32xf32> to vector<1x32xbf16>
      %c0_259 = arith.constant 0 : index
      %c0_260 = arith.constant 0 : index
      %400 = vector.load %arg22[%c0_259, %c0_260] : memref<32x4xbf16, #tpu.memory_space<vmem>>, vector<32x4xbf16>
      %cst_261 = arith.constant dense<0.000000e+00> : vector<1x4xf32>
      %401 = tpu.matmul %399, %400, %cst_261 {dimension_numbers = #tpu.dot_dimension_numbers<[1], [0], [0], [1], [0, 0, 1, 1], [], []>} : vector<1x32xbf16>, vector<32x4xbf16>, vector<1x4xf32> -> vector<1x4xf32>
      %c0_262 = arith.constant 0 : index
      %c0_263 = arith.constant 0 : index
      %402 = vector.load %arg23[%c0_262, %c0_263] : memref<1x4xf32, #tpu.memory_space<vmem>>, vector<1x4xf32>
      %403 = arith.addf %401, %402 : vector<1x4xf32>
      %c1_264 = arith.constant 1 : index
      %c0_265 = arith.constant 0 : index
      %404 = vector.load %arg24[%c1_264, %c0_265] : memref<2x4xf32, #tpu.memory_space<vmem>>, vector<1x4xf32>
      tpu.vector_store %arg24[%c1_264, %c0_265], %403 {strides = array<i32>} : memref<2x4xf32, #tpu.memory_space<vmem>>, vector<1x4xf32>,
    } else {
    }
    return
  }
  func.func @transform_0(%arg0: i32) -> (i32, i32) {
    %c0_i32 = arith.constant 0 : i32
    %c0_i32_0 = arith.constant 0 : i32
    %c0_i32_1 = arith.constant 0 : i32
    return %c0_i32, %c0_i32_0 : i32, i32
  }
  func.func @transform_1(%arg0: i32) -> (i32, i32) {
    %c0_i32 = arith.constant 0 : i32
    %c0_i32_0 = arith.constant 0 : i32
    %c0_i32_1 = arith.constant 0 : i32
    return %c0_i32, %c0_i32_0 : i32, i32
  }
  func.func @transform_2(%arg0: i32) -> (i32, i32) {
    %c0_i32 = arith.constant 0 : i32
    %c0_i32_0 = arith.constant 0 : i32
    %c0_i32_1 = arith.constant 0 : i32
    return %c0_i32, %c0_i32_0 : i32, i32
  }
  func.func @transform_3(%arg0: i32) -> (i32, i32) {
    %c0_i32 = arith.constant 0 : i32
    %c0_i32_0 = arith.constant 0 : i32
    %c0_i32_1 = arith.constant 0 : i32
    return %c0_i32, %c0_i32_0 : i32, i32
  }
  func.func @transform_4(%arg0: i32) -> (i32, i32) {
    %c0_i32 = arith.constant 0 : i32
    %c0_i32_0 = arith.constant 0 : i32
    %c0_i32_1 = arith.constant 0 : i32
    return %c0_i32, %c0_i32_0 : i32, i32
  }
  func.func @transform_5(%arg0: i32) -> (i32, i32, i32, i32) {
    %c0_i32 = arith.constant 0 : i32
    %c0_i32_0 = arith.constant 0 : i32
    %c0_i32_1 = arith.constant 0 : i32
    %c0_i32_2 = arith.constant 0 : i32
    return %arg0, %c0_i32, %c0_i32_0, %c0_i32_1 : i32, i32, i32, i32
  }
  func.func @transform_6(%arg0: i32) -> (i32, i32, i32, i32) {
    %c0_i32 = arith.constant 0 : i32
    %c0_i32_0 = arith.constant 0 : i32
    %c0_i32_1 = arith.constant 0 : i32
    %c0_i32_2 = arith.constant 0 : i32
    return %arg0, %c0_i32, %c0_i32_0, %c0_i32_1 : i32, i32, i32, i32
  }
  func.func @transform_7(%arg0: i32) -> (i32, i32, i32, i32) {
    %c0_i32 = arith.constant 0 : i32
    %c0_i32_0 = arith.constant 0 : i32
    %c0_i32_1 = arith.constant 0 : i32
    %c0_i32_2 = arith.constant 0 : i32
    return %arg0, %c0_i32, %c0_i32_0, %c0_i32_1 : i32, i32, i32, i32
  }
  func.func @transform_8(%arg0: i32) -> (i32, i32, i32, i32) {
    %c0_i32 = arith.constant 0 : i32
    %c0_i32_0 = arith.constant 0 : i32
    %c0_i32_1 = arith.constant 0 : i32
    %c0_i32_2 = arith.constant 0 : i32
    return %arg0, %c0_i32, %c0_i32_0, %c0_i32_1 : i32, i32, i32, i32
  }
  func.func @transform_9(%arg0: i32) -> (i32, i32, i32, i32) {
    %c0_i32 = arith.constant 0 : i32
    %c0_i32_0 = arith.constant 0 : i32
    %c0_i32_1 = arith.constant 0 : i32
    %c0_i32_2 = arith.constant 0 : i32
    return %arg0, %c0_i32, %c0_i32_0, %c0_i32_1 : i32, i32, i32, i32
  }
  func.func @transform_10(%arg0: i32) -> (i32, i32, i32, i32) {
    %c0_i32 = arith.constant 0 : i32
    %c0_i32_0 = arith.constant 0 : i32
    %c0_i32_1 = arith.constant 0 : i32
    %c0_i32_2 = arith.constant 0 : i32
    return %arg0, %c0_i32, %c0_i32_0, %c0_i32_1 : i32, i32, i32, i32
  }
  func.func @transform_11(%arg0: i32) -> (i32, i32, i32, i32) {
    %c0_i32 = arith.constant 0 : i32
    %c0_i32_0 = arith.constant 0 : i32
    %c0_i32_1 = arith.constant 0 : i32
    %c0_i32_2 = arith.constant 0 : i32
    return %arg0, %c0_i32, %c0_i32_0, %c0_i32_1 : i32, i32, i32, i32
  }
  func.func @transform_12(%arg0: i32) -> (i32, i32, i32) {
    %c0_i32 = arith.constant 0 : i32
    %c0_i32_0 = arith.constant 0 : i32
    %c0_i32_1 = arith.constant 0 : i32
    return %arg0, %c0_i32, %c0_i32_0 : i32, i32, i32
  }
  func.func @transform_13(%arg0: i32) -> (i32, i32, i32) {
    %c0_i32 = arith.constant 0 : i32
    %c0_i32_0 = arith.constant 0 : i32
    %c0_i32_1 = arith.constant 0 : i32
    return %arg0, %c0_i32, %c0_i32_0 : i32, i32, i32
  }
  func.func @transform_14(%arg0: i32) -> (i32, i32, i32) {
    %c0_i32 = arith.constant 0 : i32
    %c0_i32_0 = arith.constant 0 : i32
    %c0_i32_1 = arith.constant 0 : i32
    return %arg0, %c0_i32, %c0_i32_0 : i32, i32, i32
  }
  func.func @transform_15(%arg0: i32) -> (i32, i32, i32) {
    %c0_i32 = arith.constant 0 : i32
    %c0_i32_0 = arith.constant 0 : i32
    %c0_i32_1 = arith.constant 0 : i32
    return %arg0, %c0_i32, %c0_i32_0 : i32, i32, i32
  }
  func.func @transform_16(%arg0: i32) -> (i32, i32, i32) {
    %c0_i32 = arith.constant 0 : i32
    %c0_i32_0 = arith.constant 0 : i32
    %c0_i32_1 = arith.constant 0 : i32
    return %arg0, %c0_i32, %c0_i32_0 : i32, i32, i32
  }
  func.func @transform_17(%arg0: i32) -> (i32, i32, i32) {
    %c0_i32 = arith.constant 0 : i32
    %c0_i32_0 = arith.constant 0 : i32
    %c0_i32_1 = arith.constant 0 : i32
    return %arg0, %c0_i32, %c0_i32_0 : i32, i32, i32
  }
  func.func @transform_18(%arg0: i32) -> (i32, i32, i32) {
    %c0_i32 = arith.constant 0 : i32
    %c0_i32_0 = arith.constant 0 : i32
    %c0_i32_1 = arith.constant 0 : i32
    return %arg0, %c0_i32, %c0_i32_0 : i32, i32, i32
  }
  func.func @transform_19(%arg0: i32) -> (i32, i32, i32) {
    %c0_i32 = arith.constant 0 : i32
    %c0_i32_0 = arith.constant 0 : i32
    %c0_i32_1 = arith.constant 0 : i32
    return %arg0, %c0_i32, %c0_i32_0 : i32, i32, i32
  }
  func.func @transform_20(%arg0: i32) -> (i32, i32, i32) {
    %c0_i32 = arith.constant 0 : i32
    %c0_i32_0 = arith.constant 0 : i32
    %c0_i32_1 = arith.constant 0 : i32
    return %arg0, %c0_i32, %c0_i32_0 : i32, i32, i32
  }
  func.func @transform_21(%arg0: i32) -> (i32, i32) {
    %c0_i32 = arith.constant 0 : i32
    %c0_i32_0 = arith.constant 0 : i32
    %c0_i32_1 = arith.constant 0 : i32
    return %c0_i32, %c0_i32_0 : i32, i32
  }
  func.func @transform_22(%arg0: i32) -> (i32, i32) {
    %c0_i32 = arith.constant 0 : i32
    %c0_i32_0 = arith.constant 0 : i32
    %c0_i32_1 = arith.constant 0 : i32
    return %c0_i32, %c0_i32_0 : i32, i32
  }
  func.func @transform_23(%arg0: i32) -> (i32, i32) {
    %c0_i32 = arith.constant 0 : i32
    %c0_i32_0 = arith.constant 0 : i32
    %c0_i32_1 = arith.constant 0 : i32
    return %c0_i32, %c0_i32_0 : i32, i32
  }
}

</mosaic_0001>

<bundles_post_ra>
// kernel: _lambda_.1
= control target key start
LH: loop header
LB: loop body
LE: loop exit
PB: predicated region body
PF: predicated region fallthrough
CT: control target
= control target key end

     0   :  { %s14307_s0 = inlined_call_operand.vmem [shape: f32[64,4], index: 0, kind: input, shape index: {}]   ;;  %s14308_s1 = inlined_call_operand.vmem [shape: bf16[4,32], index: 1, kind: input, shape index: {}]   ;;  %s14309_s2 = inlined_call_operand.vmem [shape: f32[1,32], index: 2, kind: input, shape index: {}]   ;;  %s14310_s3 = inlined_call_operand.vmem [shape: f32[1,32], index: 3, kind: input, shape index: {}]   ;;  %s14311_s4 = inlined_call_operand.vmem [shape: f32[32,32], index: 4, kind: input, shape index: {}]   ;;  %s14312_s5 = inlined_call_operand.vmem [shape: bf16[2,4,32,8], index: 5, kind: input, shape index: {}]   ;;  %s14313_s6 = inlined_call_operand.vmem [shape: f32[2,4,1,8], index: 6, kind: input, shape index: {}]   ;;  %s14314_s7 = inlined_call_operand.vmem [shape: bf16[2,4,32,8], index: 7, kind: input, shape index: {}]   ;;  %s14315_s8 = inlined_call_operand.vmem [shape: f32[2,4,1,8], index: 8, kind: input, shape index: {}]   ;;  %s14316_s9 = inlined_call_operand.vmem [shape: bf16[2,4,32,8], index: 9, kind: input, shape index: {}]   ;;  %s14317_s10 = inlined_call_operand.vmem [shape: f32[2,4,1,8], index: 10, kind: input, shape index: {}]   ;;  %s14318_s11 = inlined_call_operand.vmem [shape: bf16[2,4,8,32], index: 11, kind: input, shape index: {}]   ;;  %s14319_s12 = inlined_call_operand.vmem [shape: f32[2,1,32], index: 12, kind: input, shape index: {}]   ;;  %s14320_s13 = inlined_call_operand.vmem [shape: f32[2,1,32], index: 13, kind: input, shape index: {}]   ;;  %s14321_s14 = inlined_call_operand.vmem [shape: f32[2,1,32], index: 14, kind: input, shape index: {}]   ;;  %s14322_s15 = inlined_call_operand.vmem [shape: bf16[2,32,2048], index: 15, kind: input, shape index: {}]   ;;  %s14323_s16 = inlined_call_operand.vmem [shape: f32[2,1,2048], index: 16, kind: input, shape index: {}]   ;;  %s14324_s17 = inlined_call_operand.vmem [shape: bf16[2,2048,32], index: 17, kind: input, shape index: {}]   ;;  %s14325_s18 = inlined_call_operand.vmem [shape: f32[2,1,32], index: 18, kind: input, shape index: {}]   ;;  %s14326_s19 = inlined_call_operand.vmem [shape: f32[2,1,32], index: 19, kind: input, shape index: {}]   ;;  %s14327_s20 = inlined_call_operand.vmem [shape: f32[2,1,32], index: 20, kind: input, shape index: {}]   ;;  %s14328_s21 = inlined_call_operand.vmem [shape: bf16[32,4], index: 21, kind: input, shape index: {}]   ;;  %s14329_s22 = inlined_call_operand.vmem [shape: f32[1,4], index: 22, kind: input, shape index: {}]   ;;  %s14330_s23 = inlined_call_operand.hbm [shape: f32[2,4], index: 23, kind: output, shape index: {}]  }
   0x1   :  { %14376 = sst [smem:[#allocation69_spill]] %s14307_s0 }
   0x2   :  { %14377 = sst [smem:[#allocation70_spill]] %s14308_s1 }
   0x3   :  { %14378 = sst [smem:[#allocation71_spill]] %s14309_s2 }
   0x4   :  { %14379 = sst [smem:[#allocation72_spill]] %s14310_s3 }
   0x5   :  { %14380 = sst [smem:[#allocation73_spill]] %s14311_s4 }
   0x6   :  { %14381 = sst [smem:[#allocation74_spill]] %s14312_s5 }
   0x7   :  { %14382 = sst [smem:[#allocation75_spill]] %s14313_s6 }
   0x8   :  { %14383 = sst [smem:[#allocation76_spill]] %s14314_s7 }
   0x9   :  { %14384 = sst [smem:[#allocation77_spill]] %s14315_s8 }
   0xa   :  { %14385 = sst [smem:[#allocation78_spill]] %s14316_s9 }
   0xb   :  { %14386 = sst [smem:[#allocation79_spill]] %s14317_s10 }
   0xc   :  { %14387 = sst [smem:[#allocation80_spill]] %s14318_s11 }
   0xd   :  { %14388 = sst [smem:[#allocation81_spill]] %s14322_s15 }
   0xe   :  { %14389 = sst [smem:[#allocation82_spill]] %s14328_s21 }
   0xf   :  { %14390 = sst [smem:[#allocation83_spill]] %s14329_s22 }
  0x10   :  { %14391 = sst [smem:[#allocation84_spill]] %s14330_s23 }
  0x11   :  { %28 = vsyncpa [#allocation4], 0  ;;  %s11508_s4 = smov 0  }
  0x12 LB: > { %14392 = sst [smem:[#allocation6_spill]] %s11377_s4  ;;  %s11514_s30 = sadd.s32 4294967295, %s11377_s4   ;;  %s11377_s4 = sphi %s11508_s4, %s34_s4  }
  0x13   : > { %14393 = sst [smem:[#allocation7_spill]] %s11514_s30  ;;  %p8795_p0 = scmp.ge.s32.totalorder %s11377_s4, 1 }
  0x14   : > { %p767_p1 = scmp.lt.s32.totalorder %s11377_s4, 3 }
  0x16   : > { %p768_p2 = pnand %p8795_p0, %p767_p1 }
  0x18   : > { %771 = sbr.rel (%p768_p2) target bundleno = 6279 (0x1887), region = 112 }
  0x1f   : > { %p885_p3 = scmp.lt.s32.totalorder %s11514_s30, 1  ;;  %s14394_s2 = sld [smem:[#allocation74_spill]] }
  0x20   : > { %s14395_s28 = sld [smem:[#allocation75_spill]]  ;;  %s14397_s4 = sld [smem:[#allocation76_spill]] }
  0x21   : > { %s11520_s24 = scalar_select %p885_p3, %s11514_s30, 1 }
  0x22   : > { %s14399_s8 = sld [smem:[#allocation77_spill]]  ;;  %s14401_s9 = sld [smem:[#allocation78_spill]] }
  0x23   : > { %s9329_s25 = sshll.u32 %s11520_s24, 6  ;;  %s8798_s5 = sshll.u32 %s11520_s24, 2 }
  0x24   : > { %s14402_s10 = sld [smem:[#allocation79_spill]]  ;;  %s9332_s3 = sshll.u32 %s11520_s24, 4 }
  0x25   : > { %s11527_s6 = scalar_lea.vmem %s14394_s2, %s9329_s25  ;;  %s14403_s11 = sld [smem:[#allocation80_spill]] }
  0x26   : > { %s11532_s29 = scalar_lea.vmem %s14395_s28, %s8798_s5  ;;  %s11537_s23 = scalar_lea.vmem %s14397_s4, %s9329_s25 }
  0x27   : > { %14396 = sst [smem:[#allocation8_spill]] %s11532_s29  ;;  %s14404_s15 = sld [smem:[#allocation81_spill]] }
  0x28   : > { %14398 = sst [smem:[#allocation9_spill]] %s11537_s23  ;;  %s11542_s30 = scalar_lea.vmem %s14399_s8, %s8798_s5 }
  0x29   : > { %14400 = sst [smem:[#allocation10_spill]] %s11542_s30  ;;  %s11547_s2 = scalar_lea.vmem %s14401_s9, %s9329_s25 }
  0x2a   : > { %s11552_s28 = scalar_lea.vmem %s14402_s10, %s8798_s5  ;;  %s9333_s5 = sshll.u32 %s11520_s24, 8 }
  0x2b   : > { %s11562_s22 = scalar_lea.vmem %s14403_s11, %s9332_s3  ;;  %s11581_s23 = scalar_lea.vmem %s14323_s16, %s9332_s3 }
  0x2c   : > { %s9334_s21 = sshll.u32 %s11520_s24, 10  ;;  %s945_s9 = scalar_lea.vmem %s14326_s19, %s11520_s24 }
  0x2d   : > { %s11576_s10 = scalar_lea.vmem %s14404_s15, %s9333_s5  ;;  %s11591_s1 = scalar_lea.vmem %s14324_s17, %s9334_s21 }
  0x2e   : > { %s948_s0 = scalar_lea.vmem %s14327_s20, %s11520_s24  ;;  %s14405_s3 = sld [smem:[#allocation7_spill]] }
  0x34   : > { %p8812_p4 = scmp.ne.s32.totalorder %s14405_s3, 0 }
  0x35   : > { %s14406_s11 = sld [smem:[#allocation70_spill]] (!%p8812_p4)  ;;  %vm998_vm0 = vcmask (!%p8812_p4), 1041408   ;;  %s14407_s21 = sld [smem:[#allocation69_spill]] (!%p8812_p4)  ;;  %vm985_vm1 = vcmask (!%p8812_p4), 31744   ;;  %vm954_vm2 = vcmask (!%p8812_p4), 261120   ;;  %v11379_v12 = vmov (!%p8812_p4), 0.0  }
  0x36   : > { %953 = sbr.rel (%p8812_p4) target bundleno = 285 (0x11d), region = 116  ;;  %957 = vst.msk [vmem:[#allocation2 + $0x10] sm:$0xff] (!%p8812_p4), %vm954_vm2, %v11379_v12  ;;  %959 = vst.msk [vmem:[#allocation2 + $0x20] sm:$0xff] (!%p8812_p4), %vm954_vm2, %v11379_v12  ;;  %s14408_s15 = sld [smem:[#allocation72_spill]] (!%p8812_p4)  ;;  %vm1080_vm3 = vcmask (!%p8812_p4), 253952  }
  0x37   : > { %964 = vst.msk [vmem:[#allocation2 + $0x48] sm:$0xff] (!%p8812_p4), %vm954_vm2, %v11379_v12  ;;  %955 = vst.msk [vmem:[#allocation2] sm:$0xff] (!%p8812_p4), %vm954_vm2, %v11379_v12  ;;  %s14409_s4 = sld [smem:[#allocation71_spill]] (!%p8812_p4)  ;;  %s14410_s25 = sld [smem:[#allocation73_spill]] (!%p8812_p4) }
  0x38   : > { %956 = vst.msk [vmem:[#allocation2 + $0x8] sm:$0xff] (!%p8812_p4), %vm954_vm2, %v11379_v12  ;;  %958 = vst.msk [vmem:[#allocation2 + $0x18] sm:$0xff] (!%p8812_p4), %vm954_vm2, %v11379_v12 }
  0x39   : > { %960 = vst.msk [vmem:[#allocation2 + $0x28] sm:$0xff] (!%p8812_p4), %vm954_vm2, %v11379_v12  ;;  %961 = vst.msk [vmem:[#allocation2 + $0x30] sm:$0xff] (!%p8812_p4), %vm954_vm2, %v11379_v12 }
  0x3a   : > { %962 = vst.msk [vmem:[#allocation2 + $0x38] sm:$0xff] (!%p8812_p4), %vm954_vm2, %v11379_v12  ;;  %963 = vst.msk [vmem:[#allocation2 + $0x40] sm:$0xff] (!%p8812_p4), %vm954_vm2, %v11379_v12 }
  0x3b   : > { %v977_v0 = vld [vmem:[%s14406_s11] sm:$0x3] (!%p8812_p4)  ;;  %v966_v2 = vld [vmem:[%s14407_s21 + $0x8] sm:$0xff] (!%p8812_p4)  ;;  %v967_v7 = vld [vmem:[%s14407_s21 + $0x10] sm:$0xff] (!%p8812_p4) }
  0x3c   : > { %v965_v1 = vld [vmem:[%s14407_s21] sm:$0xff] (!%p8812_p4)  ;;  %10936 = vmatprep.subr.msk.bf16.mxu0 (!%p8812_p4), %vm998_vm0, %v977_v0  ;;  %10937 = vmatprep.subr.msk.bf16.mxu1 (!%p8812_p4), %vm998_vm0, %v977_v0  ;;  %v1000_v3 = vsel (!%p8812_p4), %vm998_vm0, %v977_v0, 0  ;;  %v970_v6 = vld [vmem:[%s14407_s21 + $0x28] sm:$0xff] (!%p8812_p4)  ;;  %v968_v9 = vld [vmem:[%s14407_s21 + $0x18] sm:$0xff] (!%p8812_p4) }
  0x3d   : > { %v973_v4 = vpack.c.bf16 %v966_v2, %v965_v1  ;;  %v969_v5 = vld [vmem:[%s14407_s21 + $0x20] sm:$0xff]  ;;  %9991 = vmatpush3.bf16.msra.mxu0 %v1000_v3  ;;  %10929 = vmatpush3.bf16.msra.mxu1 %v1000_v3  ;;  %v971_v10 = vld [vmem:[%s14407_s21 + $0x30] sm:$0xff]  ;;  %v972_v11 = vld [vmem:[%s14407_s21 + $0x38] sm:$0xff]  ;;  %v974_v13 = vpack.c.bf16 %v968_v9, %v967_v7 }
  0x3e   : > { %v975_v8 = vpack.c.bf16 %v970_v6, %v969_v5  ;;  %v976_v14 = vpack.c.bf16 %v972_v11, %v971_v10  ;;  %v1079_v15 = vld [vmem:[%s14408_s15] sm:$0x1]  ;;  %v1069_v19 = vld [vmem:[%s14410_s25 + $0x10] sm:$0xff]  ;;  %v1070_v29 = vld [vmem:[%s14410_s25 + $0x18] sm:$0xff] }
  0x3f   : > { %9992 = vmatprep.mubr.msk.bf16.mxu0 %vm985_vm1, %v973_v4  ;;  %v1094_v16 = vld [vmem:[%s14408_s15] sm:$0x1]  ;;  %1081 = vst.msk [vmem:[#allocation2 + $0x20] sm:$0x1] %vm1080_vm3, %v1079_v15  ;;  %v1068_v36 = vld [vmem:[%s14410_s25 + $0x8] sm:$0xff] }
  0x40   : > { %9996 = vmatprep.mubr.msk.bf16.mxu1 %vm985_vm1, %v975_v8  ;;  %9993 = vmatmul.mubr.msk.bf16.vlgmr.msra.gmra.mrb[0].mxu0 %vm985_vm1, %v974_v13  ;;  %1095 = vst.msk [vmem:[#allocation2 + $0x48] sm:$0x1] %vm1080_vm3, %v1094_v16  ;;  %v8813_v17 = vld [vmem:[%s14409_s4] ss:$0 sm:$0xff] }
  0x41   : > { %9997 = vmatmul.mubr.msk.bf16.vlgmr.msra.gmra.mrb[0].mxu1 %vm985_vm1, %v976_v14  ;;  %v1067_v24 = vld [vmem:[%s14410_s25] sm:$0xff] }
 0x113   : > { %v9994_v18 = vpop.f32.mrb[0].mxu0 }
 0x114   : > { %v9998_v20 = vpop.f32.mrb[0].mxu1  ;;  %v1045_v21 = vadd.f32 %v9994_v18, %v8813_v17  ;;  %v1036_v23 = vpop.f32.mrb[1].mxu0 }
 0x115   : > { %v1061_v22 = vadd.f32 %v9998_v20, %v8813_v17  ;;  %v1052_v25 = vpop.f32.mrb[1].mxu1  ;;  %v1037_v26 = vadd.f32 %v8813_v17, %v1036_v23  ;;  %v9995_v28 = vpop.f32.mrb[2].mxu0 }
 0x116   : > { %v1053_v27 = vadd.f32 %v8813_v17, %v1052_v25  ;;  %v9999_v30 = vpop.f32.mrb[2].mxu1  ;;  %v1073_v31 = vadd.f32 %v1069_v19, %v1045_v21  ;;  %v1048_v33 = vadd.f32 %v9995_v28, %v8813_v17  ;;  %v1039_v35 = vpop.f32.mrb[3].mxu0 }
 0x117   : > { %v1088_v32 = vadd.f32 %v1069_v19, %v1061_v22  ;;  %v1064_v34 = vadd.f32 %v9999_v30, %v8813_v17  ;;  %v1055_v37 = vpop.f32.mrb[3].mxu1  ;;  %v1071_v38 = vadd.f32 %v1067_v24, %v1037_v26  ;;  %v1040_v40 = vadd.f32 %v8813_v17, %v1039_v35 }
 0x118   : > { %v1086_v39 = vadd.f32 %v1067_v24, %v1053_v27  ;;  %v1056_v41 = vadd.f32 %v8813_v17, %v1055_v37  ;;  %1077 = vst.msk [vmem:[#allocation2 + $0x10] sm:$0xff] %vm954_vm2, %v1073_v31  ;;  %v1074_v42 = vadd.f32 %v1070_v29, %v1048_v33 }
 0x119   : > { %1092 = vst.msk [vmem:[#allocation2 + $0x38] sm:$0xff] %vm954_vm2, %v1088_v32  ;;  %v1089_v43 = vadd.f32 %v1070_v29, %v1064_v34  ;;  %1075 = vst.msk [vmem:[#allocation2] sm:$0xff] %vm954_vm2, %v1071_v38  ;;  %v1072_v44 = vadd.f32 %v1068_v36, %v1040_v40 }
 0x11a   : > { %1090 = vst.msk [vmem:[#allocation2 + $0x28] sm:$0xff] %vm954_vm2, %v1086_v39  ;;  %v1087_v45 = vadd.f32 %v1068_v36, %v1056_v41  ;;  %1078 = vst.msk [vmem:[#allocation2 + $0x18] sm:$0xff] %vm954_vm2, %v1074_v42 }
 0x11b   : > { %1093 = vst.msk [vmem:[#allocation2 + $0x40] sm:$0xff] %vm954_vm2, %v1089_v43  ;;  %1076 = vst.msk [vmem:[#allocation2 + $0x8] sm:$0xff] %vm954_vm2, %v1072_v44 }
 0x11c   : > { %1091 = vst.msk [vmem:[#allocation2 + $0x30] sm:$0xff] %vm954_vm2, %v1087_v45 }
 0x11d PF: > { %v10961_v46 = vld [vmem:[%s11527_s6] sm:$0xff]   ;;  %v14345_v47 = vmov 0.0   ;;  %v10962_v48 = vld [vmem:[%s11527_s6 + $0x8] sm:$0xff]   ;;  %vm11381_vm4 = vmmov 0   ;;  %v10963_v51 = vld [vmem:[%s11527_s6 + $0x10] sm:$0xff]   ;;  %vm1138_vm5 = vcmask 261120   ;;  %s14557_s11 = scalar_lea.vmem %s14319_s12, %s11520_s24  ;;  %s14558_s30 = scalar_lea.vmem %s14320_s13, %s11520_s24 }
 0x11e   : > { %10000 = vmatprep.subr.bf16.mxu0 %v14345_v47  ;;  %10024 = vmatprep.subr.bf16.mxu1 %v14345_v47  ;;  %v10964_v53 = vld [vmem:[%s11527_s6 + $0x18] sm:$0xff]   ;;  %v10965_v54 = vld [vmem:[%s11527_s6 + $0x20] sm:$0xff]   ;;  %v10967_v57 = vld [vmem:[%s11527_s6 + $0x30] sm:$0xff]   ;;  %v14343_v16 = vmov 0.0|0.0   ;;  %s14412_s8 = sld [smem:[#allocation8_spill]]  ;;  %vm2301_vm6 = vcmask 64512   ;;  %s14559_s5 = scalar_lea.vmem %s14321_s14, %s11520_s24 }
 0x11f   : > { %10001 = vmatpush3.bf16.msra.mxu0 %v10961_v46  ;;  %10004 = vmatprep.mubr.msk.bf16.mxu0 %vm11381_vm4, %v14345_v47  ;;  %v1098_v55 = vld [vmem:[#allocation2 + $0x10] sm:$0xff]  ;;  %v10966_v58 = vld [vmem:[%s11527_s6 + $0x28] sm:$0xff]   ;;  %v10968_v60 = vld [vmem:[%s11527_s6 + $0x38] sm:$0xff]   ;;  %s14411_s6 = sld [smem:[#allocation9_spill]]  ;;  %vm2432_vm9 = vcmask 326656   ;;  %vm2901_vm10 = vcmask 1043456  }
 0x120   : > { %v1096_v49 = vld [vmem:[#allocation2] sm:$0xff]  ;;  %10002 = vmatprep.subr.bf16.mxu0 %v14345_v47  ;;  %10028 = vmatprep.mubr.msk.bf16.mxu1 %vm11381_vm4, %v14345_v47  ;;  %v1105_v4 = vld [vmem:[#allocation2 + $0x48] sm:$0xff]  ;;  %v10981_v42 = vld [vmem:[%s11547_s2 + $0x10] sm:$0xff]  }
 0x121   : > { %10025 = vmatpush3.bf16.msra.mxu1 %v10963_v51  ;;  %v1099_v56 = vld [vmem:[#allocation2 + $0x18] sm:$0xff]  ;;  %v1100_v61 = vld [vmem:[#allocation2 + $0x20] sm:$0xff]  ;;  %v1101_v62 = vld [vmem:[#allocation2 + $0x28] sm:$0xff] }
 0x122   : > { %v1097_v50 = vld [vmem:[#allocation2 + $0x8] sm:$0xff]  ;;  %10026 = vmatprep.subr.bf16.mxu1 %v14345_v47  ;;  %v11696_v59 = vpack.c.bf16 %v1099_v56, %v1098_v55  ;;  %v11710_v63 = vpack.c.bf16 %v1101_v62, %v1100_v61  ;;  %v1103_v1 = vld [vmem:[#allocation2 + $0x38] sm:$0xff]  ;;  %v1104_v3 = vld [vmem:[#allocation2 + $0x40] sm:$0xff] }
 0x123   : > { %v11682_v52 = vpack.c.bf16 %v1097_v50, %v1096_v49  ;;  %10003 = vmatpush3.bf16.msra.mxu0 %v10962_v48  ;;  %v1102_v0 = vld [vmem:[#allocation2 + $0x30] sm:$0xff]  ;;  %v11730_v5 = vpack.c.bf16 %v1105_v4, %v1104_v3  ;;  %v10975_v12 = vld [vmem:[%s11547_s2] sm:$0xff]   ;;  %v10976_v13 = vld [vmem:[%s11547_s2 + $0x8] sm:$0xff]  }
 0x124   : > { %10048 = vmatprep.subr.bf16.mxu0 %v14345_v47  ;;  %v11720_v2 = vpack.c.bf16 %v1103_v1, %v1102_v0  ;;  %v10977_v14 = vld [vmem:[%s11547_s2 + $0x20] sm:$0xff]   ;;  %v10978_v15 = vld [vmem:[%s11547_s2 + $0x28] sm:$0xff]   ;;  %v10982_v50 = vld [vmem:[%s11547_s2 + $0x18] sm:$0xff]  }
 0x125   : > { %10027 = vmatpush3.bf16.msra.mxu1 %v10964_v53  ;;  %v10969_v6 = vld [vmem:[%s14411_s6] sm:$0xff]   ;;  %v10970_v7 = vld [vmem:[%s14411_s6 + $0x8] sm:$0xff]   ;;  %v10971_v8 = vld [vmem:[%s14411_s6 + $0x10] sm:$0xff]  }
 0x126   : > { %10005 = vmatmul.mubr.msk.bf16.vlgmr.msra.gmra.mrb[0].mxu0 %vm1138_vm5, %v11682_v52  ;;  %10072 = vmatprep.subr.bf16.mxu1 %v14345_v47  ;;  %v10972_v9 = vld [vmem:[%s14411_s6 + $0x18] sm:$0xff]   ;;  %v10973_v10 = vld [vmem:[%s14411_s6 + $0x20] sm:$0xff]   ;;  %v10974_v11 = vld [vmem:[%s14411_s6 + $0x28] sm:$0xff]  }
 0x127   : > { %10008 = vmatprep.mubr.msk.bf16.mxu0 %vm11381_vm4, %v14345_v47  ;;  %10049 = vmatpush3.bf16.msra.mxu0 %v10965_v54  ;;  %v10979_v32 = vld [vmem:[%s14411_s6 + $0x30] sm:$0xff]   ;;  %v10980_v35 = vld [vmem:[%s14411_s6 + $0x38] sm:$0xff]   ;;  %v11922_v37 = vld [vmem:[%s14412_s8] ss:$0 sm:$0xff] }
 0x128   : > { %10050 = vmatprep.subr.bf16.mxu0 %v14345_v47  ;;  %10029 = vmatmul.mubr.msk.bf16.vlgmr.msra.gmra.mrb[0].mxu1 %vm1138_vm5, %v11682_v52  ;;  %v11934_v44 = vld [vmem:[%s14412_s8 + $0x1] ss:$0 sm:$0xff]  ;;  %vm12056_vm7 = vmpackc.low %vm2301_vm6, %vm2301_vm6 }
 0x129   : > { %10032 = vmatprep.mubr.msk.bf16.mxu1 %vm11381_vm4, %v14345_v47  ;;  %10073 = vmatpush3.bf16.msra.mxu1 %v10967_v57 }
 0x12a   : > { %10074 = vmatprep.subr.bf16.mxu1 %v14345_v47 }
 0x12b   : > { %10051 = vmatpush3.bf16.msra.mxu0 %v10966_v58 }
 0x12c   : > { %10096 = vmatprep.subr.bf16.mxu0 %v14345_v47 }
 0x12d   : > { %10075 = vmatpush3.bf16.msra.mxu1 %v10968_v60 }
 0x12e   : > { %10009 = vmatmul.mubr.msk.bf16.gmra.mrb[4].mxu0 %vm1138_vm5, %v11696_v59  ;;  %10120 = vmatprep.subr.bf16.mxu1 %v14345_v47 }
 0x12f   : > { %10012 = vmatprep.mubr.msk.bf16.mxu0 %vm11381_vm4, %v14345_v47 }
 0x130   : > { %10033 = vmatmul.mubr.msk.bf16.gmra.mrb[4].mxu1 %vm1138_vm5, %v11696_v59 }
 0x131   : > { %10036 = vmatprep.mubr.msk.bf16.mxu1 %vm11381_vm4, %v14345_v47 }
 0x136   : > { %10013 = vmatmul.mubr.msk.bf16.gmra.mrb[8].mxu0 %vm1138_vm5, %v11710_v63 }
 0x137   : > { %10016 = vmatprep.mubr.msk.bf16.mxu0 %vm11381_vm4, %v14345_v47 }
 0x138   : > { %10037 = vmatmul.mubr.msk.bf16.gmra.mrb[8].mxu1 %vm1138_vm5, %v11710_v63 }
 0x139   : > { %10040 = vmatprep.mubr.msk.bf16.mxu1 %vm11381_vm4, %v14345_v47 }
 0x13e   : > { %10017 = vmatmul.mubr.msk.bf16.gmra.mrb[12].mxu0 %vm1138_vm5, %v11720_v2 }
 0x13f   : > { %10020 = vmatprep.mubr.msk.bf16.mxu0 %vm11381_vm4, %v14345_v47 }
 0x140   : > { %10041 = vmatmul.mubr.msk.bf16.gmra.mrb[12].mxu1 %vm1138_vm5, %v11720_v2 }
 0x141   : > { %10044 = vmatprep.mubr.msk.bf16.mxu1 %vm11381_vm4, %v14345_v47 }
 0x146   : > { %10021 = vmatmul.mubr.msk.bf16.gmra.mrb[16].mxu0 %vm1138_vm5, %v11730_v5 }
 0x147   : > { %10052 = vmatprep.mubr.msk.bf16.mxu0 %vm11381_vm4, %v14345_v47 }
 0x148   : > { %10045 = vmatmul.mubr.msk.bf16.gmra.mrb[16].mxu1 %vm1138_vm5, %v11730_v5 }
 0x149   : > { %10076 = vmatprep.mubr.msk.bf16.mxu1 %vm11381_vm4, %v14345_v47 }
 0x14e   : > { %10053 = vmatmul.mubr.msk.bf16.vlgmr.msra.gmra.mrb[20].mxu0 %vm1138_vm5, %v11682_v52 }
 0x14f   : > { %10056 = vmatprep.mubr.msk.bf16.mxu0 %vm11381_vm4, %v14345_v47  ;;  %10097 = vmatpush3.bf16.msra.mxu0 %v10969_v6 }
 0x150   : > { %10098 = vmatprep.subr.bf16.mxu0 %v14345_v47  ;;  %10077 = vmatmul.mubr.msk.bf16.vlgmr.msra.gmra.mrb[20].mxu1 %vm1138_vm5, %v11682_v52 }
 0x151   : > { %10080 = vmatprep.mubr.msk.bf16.mxu1 %vm11381_vm4, %v14345_v47  ;;  %10121 = vmatpush3.bf16.msra.mxu1 %v10971_v8 }
 0x152   : > { %10122 = vmatprep.subr.bf16.mxu1 %v14345_v47 }
 0x153   : > { %10099 = vmatpush3.bf16.msra.mxu0 %v10970_v7 }
 0x154   : > { %10144 = vmatprep.subr.bf16.mxu0 %v14345_v47 }
 0x155   : > { %10123 = vmatpush3.bf16.msra.mxu1 %v10972_v9 }
 0x156   : > { %10057 = vmatmul.mubr.msk.bf16.gmra.mrb[24].mxu0 %vm1138_vm5, %v11696_v59  ;;  %10168 = vmatprep.subr.bf16.mxu1 %v14345_v47 }
 0x157   : > { %10060 = vmatprep.mubr.msk.bf16.mxu0 %vm11381_vm4, %v14345_v47 }
 0x158   : > { %10081 = vmatmul.mubr.msk.bf16.gmra.mrb[24].mxu1 %vm1138_vm5, %v11696_v59 }
 0x159   : > { %10084 = vmatprep.mubr.msk.bf16.mxu1 %vm11381_vm4, %v14345_v47 }
 0x15e   : > { %10061 = vmatmul.mubr.msk.bf16.gmra.mrb[28].mxu0 %vm1138_vm5, %v11710_v63 }
 0x15f   : > { %10064 = vmatprep.mubr.msk.bf16.mxu0 %vm11381_vm4, %v14345_v47 }
 0x160   : > { %10085 = vmatmul.mubr.msk.bf16.gmra.mrb[28].mxu1 %vm1138_vm5, %v11710_v63 }
 0x161   : > { %10088 = vmatprep.mubr.msk.bf16.mxu1 %vm11381_vm4, %v14345_v47 }
 0x166   : > { %10065 = vmatmul.mubr.msk.bf16.gmra.mrb[32].mxu0 %vm1138_vm5, %v11720_v2 }
 0x167   : > { %10068 = vmatprep.mubr.msk.bf16.mxu0 %vm11381_vm4, %v14345_v47 }
 0x168   : > { %10089 = vmatmul.mubr.msk.bf16.gmra.mrb[32].mxu1 %vm1138_vm5, %v11720_v2 }
 0x169   : > { %10092 = vmatprep.mubr.msk.bf16.mxu1 %vm11381_vm4, %v14345_v47 }
 0x16e   : > { %10069 = vmatmul.mubr.msk.bf16.gmra.mrb[36].mxu0 %vm1138_vm5, %v11730_v5 }
 0x16f   : > { %10100 = vmatprep.mubr.msk.bf16.mxu0 %vm11381_vm4, %v14345_v47 }
 0x170   : > { %10093 = vmatmul.mubr.msk.bf16.gmra.mrb[36].mxu1 %vm1138_vm5, %v11730_v5 }
 0x171   : > { %10124 = vmatprep.mubr.msk.bf16.mxu1 %vm11381_vm4, %v14345_v47 }
 0x176   : > { %10101 = vmatmul.mubr.msk.bf16.vlgmr.msra.gmra.mrb[40].mxu0 %vm1138_vm5, %v11682_v52 }
 0x177   : > { %10104 = vmatprep.mubr.msk.bf16.mxu0 %vm11381_vm4, %v14345_v47  ;;  %10145 = vmatpush3.bf16.msra.mxu0 %v10973_v10 }
 0x178   : > { %10146 = vmatprep.subr.bf16.mxu0 %v14345_v47  ;;  %10125 = vmatmul.mubr.msk.bf16.vlgmr.msra.gmra.mrb[40].mxu1 %vm1138_vm5, %v11682_v52 }
 0x179   : > { %10128 = vmatprep.mubr.msk.bf16.mxu1 %vm11381_vm4, %v14345_v47  ;;  %10169 = vmatpush3.bf16.msra.mxu1 %v10979_v32 }
 0x17a   : > { %10170 = vmatprep.subr.bf16.mxu1 %v14345_v47 }
 0x17b   : > { %10147 = vmatpush3.bf16.msra.mxu0 %v10974_v11 }
 0x17c   : > { %10192 = vmatprep.subr.bf16.mxu0 %v14345_v47 }
 0x17d   : > { %10171 = vmatpush3.bf16.msra.mxu1 %v10980_v35 }
 0x17e   : > { %10105 = vmatmul.mubr.msk.bf16.gmra.mrb[44].mxu0 %vm1138_vm5, %v11696_v59  ;;  %10216 = vmatprep.subr.bf16.mxu1 %v14345_v47 }
 0x17f   : > { %10108 = vmatprep.mubr.msk.bf16.mxu0 %vm11381_vm4, %v14345_v47 }
 0x180   : > { %10129 = vmatmul.mubr.msk.bf16.gmra.mrb[44].mxu1 %vm1138_vm5, %v11696_v59 }
 0x181   : > { %10132 = vmatprep.mubr.msk.bf16.mxu1 %vm11381_vm4, %v14345_v47 }
 0x186   : > { %10109 = vmatmul.mubr.msk.bf16.gmra.mrb[48].mxu0 %vm1138_vm5, %v11710_v63 }
 0x187   : > { %10112 = vmatprep.mubr.msk.bf16.mxu0 %vm11381_vm4, %v14345_v47 }
 0x188   : > { %10133 = vmatmul.mubr.msk.bf16.gmra.mrb[48].mxu1 %vm1138_vm5, %v11710_v63 }
 0x189   : > { %10136 = vmatprep.mubr.msk.bf16.mxu1 %vm11381_vm4, %v14345_v47 }
 0x18e   : > { %10113 = vmatmul.mubr.msk.bf16.gmra.mrb[52].mxu0 %vm1138_vm5, %v11720_v2 }
 0x18f   : > { %10116 = vmatprep.mubr.msk.bf16.mxu0 %vm11381_vm4, %v14345_v47 }
 0x190   : > { %10137 = vmatmul.mubr.msk.bf16.gmra.mrb[52].mxu1 %vm1138_vm5, %v11720_v2 }
 0x191   : > { %10140 = vmatprep.mubr.msk.bf16.mxu1 %vm11381_vm4, %v14345_v47 }
 0x196   : > { %10117 = vmatmul.mubr.msk.bf16.gmra.mrb[56].mxu0 %vm1138_vm5, %v11730_v5 }
 0x197   : > { %10148 = vmatprep.mubr.msk.bf16.mxu0 %vm11381_vm4, %v14345_v47 }
 0x198   : > { %10141 = vmatmul.mubr.msk.bf16.gmra.mrb[56].mxu1 %vm1138_vm5, %v11730_v5 }
 0x199   : > { %10172 = vmatprep.mubr.msk.bf16.mxu1 %vm11381_vm4, %v14345_v47 }
 0x19e   : > { %10149 = vmatmul.mubr.msk.bf16.vlgmr.msra.gmra.mrb[60].mxu0 %vm1138_vm5, %v11682_v52 }
 0x19f   : > { %10152 = vmatprep.mubr.msk.bf16.mxu0 %vm11381_vm4, %v14345_v47  ;;  %10193 = vmatpush3.bf16.msra.mxu0 %v10975_v12 }
 0x1a0   : > { %10194 = vmatprep.subr.bf16.mxu0 %v14345_v47  ;;  %10173 = vmatmul.mubr.msk.bf16.vlgmr.msra.gmra.mrb[60].mxu1 %vm1138_vm5, %v11682_v52 }
 0x1a1   : > { %10176 = vmatprep.mubr.msk.bf16.mxu1 %vm11381_vm4, %v14345_v47  ;;  %10217 = vmatpush3.bf16.msra.mxu1 %v10981_v42 }
 0x1a2   : > { %10218 = vmatprep.subr.bf16.mxu1 %v14345_v47 }
 0x1a3   : > { %10195 = vmatpush3.bf16.msra.mxu0 %v10976_v13 }
 0x1a4   : > { %10240 = vmatprep.subr.bf16.mxu0 %v14345_v47 }
 0x1a5   : > { %10219 = vmatpush3.bf16.msra.mxu1 %v10982_v50 }
 0x1a6   : > { %10153 = vmatmul.mubr.msk.bf16.gmra.mrb[64].mxu0 %vm1138_vm5, %v11696_v59  ;;  %10264 = vmatprep.subr.bf16.mxu1 %v14345_v47 }
 0x1a7   : > { %10156 = vmatprep.mubr.msk.bf16.mxu0 %vm11381_vm4, %v14345_v47 }
 0x1a8   : > { %10177 = vmatmul.mubr.msk.bf16.gmra.mrb[64].mxu1 %vm1138_vm5, %v11696_v59 }
 0x1a9   : > { %10180 = vmatprep.mubr.msk.bf16.mxu1 %vm11381_vm4, %v14345_v47 }
 0x1ae   : > { %10157 = vmatmul.mubr.msk.bf16.gmra.mrb[68].mxu0 %vm1138_vm5, %v11710_v63 }
 0x1af   : > { %10160 = vmatprep.mubr.msk.bf16.mxu0 %vm11381_vm4, %v14345_v47 }
 0x1b0   : > { %10181 = vmatmul.mubr.msk.bf16.gmra.mrb[68].mxu1 %vm1138_vm5, %v11710_v63 }
 0x1b1   : > { %10184 = vmatprep.mubr.msk.bf16.mxu1 %vm11381_vm4, %v14345_v47 }
 0x1b6   : > { %10161 = vmatmul.mubr.msk.bf16.gmra.mrb[72].mxu0 %vm1138_vm5, %v11720_v2 }
 0x1b7   : > { %10164 = vmatprep.mubr.msk.bf16.mxu0 %vm11381_vm4, %v14345_v47 }
 0x1b8   : > { %10185 = vmatmul.mubr.msk.bf16.gmra.mrb[72].mxu1 %vm1138_vm5, %v11720_v2 }
 0x1b9   : > { %10188 = vmatprep.mubr.msk.bf16.mxu1 %vm11381_vm4, %v14345_v47 }
 0x1be   : > { %10165 = vmatmul.mubr.msk.bf16.gmra.mrb[76].mxu0 %vm1138_vm5, %v11730_v5 }
 0x1bf   : > { %10196 = vmatprep.mubr.msk.bf16.mxu0 %vm11381_vm4, %v14345_v47 }
 0x1c0   : > { %10189 = vmatmul.mubr.msk.bf16.gmra.mrb[76].mxu1 %vm1138_vm5, %v11730_v5 }
 0x1c1   : > { %10220 = vmatprep.mubr.msk.bf16.mxu1 %vm11381_vm4, %v14345_v47 }
 0x1c6   : > { %10197 = vmatmul.mubr.msk.bf16.vlgmr.msra.gmra.mrb[80].mxu0 %vm1138_vm5, %v11682_v52 }
 0x1c7   : > { %10200 = vmatprep.mubr.msk.bf16.mxu0 %vm11381_vm4, %v14345_v47  ;;  %10241 = vmatpush3.bf16.msra.mxu0 %v10977_v14 }
 0x1c8   : > { %10242 = vmatprep.subr.bf16.mxu0 %v14345_v47  ;;  %10221 = vmatmul.mubr.msk.bf16.vlgmr.msra.gmra.mrb[80].mxu1 %vm1138_vm5, %v11682_v52 }
 0x1c9   : > { %10224 = vmatprep.mubr.msk.bf16.mxu1 %vm11381_vm4, %v14345_v47 }
 0x1cb   : > { %10243 = vmatpush3.bf16.msra.mxu0 %v10978_v15 }
 0x1cc   : > { %10816 = vmatprep.subr.bf16.mxu0 %v14343_v16 }
 0x1ce   : > { %10201 = vmatmul.mubr.msk.bf16.gmra.mrb[84].mxu0 %vm1138_vm5, %v11696_v59 }
 0x1cf   : > { %10204 = vmatprep.mubr.msk.bf16.mxu0 %vm11381_vm4, %v14345_v47 }
 0x1d0   : > { %10225 = vmatmul.mubr.msk.bf16.gmra.mrb[84].mxu1 %vm1138_vm5, %v11696_v59 }
 0x1d1   : > { %10228 = vmatprep.mubr.msk.bf16.mxu1 %vm11381_vm4, %v14345_v47 }
 0x1d6   : > { %10205 = vmatmul.mubr.msk.bf16.gmra.mrb[88].mxu0 %vm1138_vm5, %v11710_v63 }
 0x1d7   : > { %10208 = vmatprep.mubr.msk.bf16.mxu0 %vm11381_vm4, %v14345_v47 }
 0x1d8   : > { %10229 = vmatmul.mubr.msk.bf16.gmra.mrb[88].mxu1 %vm1138_vm5, %v11710_v63 }
 0x1d9   : > { %10232 = vmatprep.mubr.msk.bf16.mxu1 %vm11381_vm4, %v14345_v47 }
 0x1de   : > { %10209 = vmatmul.mubr.msk.bf16.gmra.mrb[92].mxu0 %vm1138_vm5, %v11720_v2 }
 0x1df   : > { %10212 = vmatprep.mubr.msk.bf16.mxu0 %vm11381_vm4, %v14345_v47 }
 0x1e0   : > { %10233 = vmatmul.mubr.msk.bf16.gmra.mrb[92].mxu1 %vm1138_vm5, %v11720_v2 }
 0x1e1   : > { %10236 = vmatprep.mubr.msk.bf16.mxu1 %vm11381_vm4, %v14345_v47 }
 0x1e6   : > { %10213 = vmatmul.mubr.msk.bf16.gmra.mrb[96].mxu0 %vm1138_vm5, %v11730_v5 }
 0x1e7   : > { %10244 = vmatprep.mubr.msk.bf16.mxu0 %vm11381_vm4, %v14345_v47 }
 0x1e8   : > { %10237 = vmatmul.mubr.msk.bf16.gmra.mrb[96].mxu1 %vm1138_vm5, %v11730_v5 }
 0x1ee   : > { %10245 = vmatmul.mubr.msk.bf16.vlgmr.msra.gmra.mrb[100].mxu0 %vm1138_vm5, %v11682_v52 }
 0x1ef   : > { %10248 = vmatprep.mubr.msk.bf16.mxu0 %vm11381_vm4, %v14345_v47 }
 0x1f6   : > { %10249 = vmatmul.mubr.msk.bf16.gmra.mrb[104].mxu0 %vm1138_vm5, %v11696_v59 }
 0x1f7   : > { %10252 = vmatprep.mubr.msk.bf16.mxu0 %vm11381_vm4, %v14345_v47 }
 0x1f9   : > { %v11892_v17 = vpop.f32.mrb[0].mxu0 }
 0x1fa   : > { %v10006_v18 = vpop.f32.mrb[1].mxu0 }
 0x1fb   : > { %v11894_v19 = vpop.f32.mrb[2].mxu0  ;;  %v11896_v21 = vpop.f32.mrb[0].mxu1 }
 0x1fc   : > { %v10007_v20 = vpop.f32.mrb[3].mxu0  ;;  %v10030_v22 = vpop.f32.mrb[1].mxu1 }
 0x1fd   : > { %v11900_v23 = vpop.f32.mrb[2].mxu1 }
 0x1fe   : > { %10253 = vmatmul.mubr.msk.bf16.gmra.mrb[108].mxu0 %vm1138_vm5, %v11710_v63  ;;  %v10031_v24 = vpop.f32.mrb[3].mxu1 }
 0x1ff   : > { %10256 = vmatprep.mubr.msk.bf16.mxu0 %vm11381_vm4, %v14345_v47 }
 0x201   : > { %v11904_v25 = vpop.f32.mrb[4].mxu0 }
 0x202   : > { %v10010_v26 = vpop.f32.mrb[5].mxu0 }
 0x203   : > { %v11906_v27 = vpop.f32.mrb[6].mxu0  ;;  %v11908_v29 = vpop.f32.mrb[4].mxu1 }
 0x204   : > { %v10011_v28 = vpop.f32.mrb[7].mxu0  ;;  %v10034_v30 = vpop.f32.mrb[5].mxu1 }
 0x205   : > { %v11912_v31 = vpop.f32.mrb[6].mxu1 }
 0x206   : > { %10257 = vmatmul.mubr.msk.bf16.gmra.mrb[112].mxu0 %vm1138_vm5, %v11720_v2  ;;  %v10035_v33 = vpop.f32.mrb[7].mxu1 }
 0x207   : > { %10260 = vmatprep.mubr.msk.bf16.mxu0 %vm11381_vm4, %v14345_v47 }
 0x209   : > { %v11917_v34 = vpop.f32.mrb[8].mxu0 }
 0x20a   : > { %v10014_v36 = vpop.f32.mrb[9].mxu0 }
 0x20b   : > { %v1207_v38 = vpop.f32.mrb[10].mxu0  ;;  %v11927_v41 = vpop.f32.mrb[8].mxu1 }
 0x20c   : > { %v11925_v39 = vadd.f32 %v11922_v37, %v1207_v38  ;;  %v10015_v40 = vpop.f32.mrb[11].mxu0  ;;  %v10038_v43 = vpop.f32.mrb[9].mxu1 }
 0x20d   : > { %v1305_v45 = vpop.f32.mrb[10].mxu1 }
 0x20e   : > { %14413 = vst [vmem:[#allocation11_spill] sm:$0xff] %v11925_v39  ;;  %10261 = vmatmul.mubr.msk.bf16.gmra.mrb[116].mxu0 %vm1138_vm5, %v11730_v5  ;;  %v11939_v46 = vadd.f32 %v11934_v44, %v1305_v45  ;;  %v10039_v48 = vpop.f32.mrb[11].mxu1 }
 0x20f   : > { %10298 = vmatprep.mubr.msk.f32.mxu0 %vm11381_vm4, %v14345_v47 }
 0x210   : > { %14414 = vst [vmem:[#allocation12_spill] sm:$0xff] %v11939_v46 }
 0x211   : > { %v1212_v49 = vpop.f32.mrb[12].mxu0 }
 0x212   : > { %v11947_v51 = vadd.f32 %v11922_v37, %v1212_v49  ;;  %v10018_v53 = vpop.f32.mrb[13].mxu0  ;;  %v8844_v49 = vld [vmem:[%s14412_s8 + $0x2] ss:$0 sm:$0xff] }
 0x213   : > { %v1215_v54 = vpop.f32.mrb[14].mxu0  ;;  %v1310_v57 = vpop.f32.mrb[12].mxu1 }
 0x214   : > { %14415 = vst [vmem:[#allocation13_spill] sm:$0xff] %v11947_v51  ;;  %v11951_v55 = vadd.f32 %v11922_v37, %v1215_v54  ;;  %v10019_v56 = vpop.f32.mrb[15].mxu0  ;;  %v11954_v58 = vadd.f32 %v11934_v44, %v1310_v57  ;;  %v10042_v60 = vpop.f32.mrb[13].mxu1  ;;  %v10983_v57 = vld [vmem:[%s11547_s2 + $0x30] sm:$0xff]  }
 0x215   : > { %v1313_v61 = vpop.f32.mrb[14].mxu1  ;;  %10265 = vmatpush3.bf16.msra.mxu1 %v10983_v57 }
 0x216   : > { %14416 = vst [vmem:[#allocation14_spill] sm:$0xff] %v11951_v55  ;;  %14417 = vst [vmem:[#allocation15_spill] sm:$0xff] %v11954_v58  ;;  %v11958_v62 = vadd.f32 %v11934_v44, %v1313_v61  ;;  %v10043_v0 = vpop.f32.mrb[15].mxu1  ;;  %v8857_v61 = vld [vmem:[%s14412_s8 + $0x3] ss:$0 sm:$0xff]  ;;  %10266 = vmatprep.subr.bf16.mxu1 %v14345_v47 }
 0x218   : > { %14418 = vst [vmem:[#allocation16_spill] sm:$0xff] %v11958_v62 }
 0x219   : > { %v1220_v1 = vpop.f32.mrb[16].mxu0 }
 0x21a   : > { %v11965_v3 = vadd.f32 %v11922_v37, %v1220_v1  ;;  %v10022_v4 = vpop.f32.mrb[17].mxu0 }
 0x21b   : > { %v1223_v6 = vpop.f32.mrb[18].mxu0  ;;  %v1318_v9 = vpop.f32.mrb[16].mxu1 }
 0x21c   : > { %14419 = vst [vmem:[#allocation17_spill] sm:$0xff] %v11965_v3  ;;  %v11968_v7 = vadd.f32 %v11922_v37, %v1223_v6  ;;  %v10023_v8 = vpop.f32.mrb[19].mxu0  ;;  %v11971_v10 = vadd.f32 %v11934_v44, %v1318_v9  ;;  %v10046_v11 = vpop.f32.mrb[17].mxu1 }
 0x21d   : > { %v1321_v12 = vpop.f32.mrb[18].mxu1  ;;  %v10984_v8 = vld [vmem:[%s11547_s2 + $0x38] sm:$0xff]   ;;  %s14432_s2 = sld [smem:[#allocation10_spill]] }
 0x21e   : > { %14420 = vst [vmem:[#allocation18_spill] sm:$0xff] %v11968_v7  ;;  %14421 = vst [vmem:[#allocation19_spill] sm:$0xff] %v11971_v10  ;;  %v11974_v13 = vadd.f32 %v11934_v44, %v1321_v12  ;;  %v10047_v14 = vpop.f32.mrb[19].mxu1  ;;  %10267 = vmatpush3.bf16.msra.mxu1 %v10984_v8 }
 0x21f   : > { %10824 = vmatprep.subr.bf16.mxu1 %v14343_v16 }
 0x220   : > { %14422 = vst [vmem:[#allocation20_spill] sm:$0xff] %v11974_v13 }
 0x221   : > { %v11978_v15 = vpop.f32.mrb[20].mxu0 }
 0x222   : > { %v10054_v18 = vpop.f32.mrb[21].mxu0 }
 0x223   : > { %v11982_v20 = vpop.f32.mrb[22].mxu0  ;;  %v11984_v24 = vpop.f32.mrb[20].mxu1 }
 0x224   : > { %v10055_v22 = vpop.f32.mrb[23].mxu0  ;;  %v10078_v26 = vpop.f32.mrb[21].mxu1 }
 0x225   : > { %v11986_v28 = vpop.f32.mrb[22].mxu1 }
 0x226   : > { %v10079_v30 = vpop.f32.mrb[23].mxu1 }
 0x229   : > { %v11990_v32 = vpop.f32.mrb[24].mxu0 }
 0x22a   : > { %v10058_v33 = vpop.f32.mrb[25].mxu0 }
 0x22b   : > { %v11994_v35 = vpop.f32.mrb[26].mxu0  ;;  %v11996_v38 = vpop.f32.mrb[24].mxu1 }
 0x22c   : > { %v10059_v36 = vpop.f32.mrb[27].mxu0  ;;  %14423 = vst [vmem:[#allocation21_spill] sm:$0xff] %v11996_v38  ;;  %v10082_v40 = vpop.f32.mrb[25].mxu1 }
 0x22d   : > { %v11998_v42 = vpop.f32.mrb[26].mxu1 }
 0x22e   : > { %14424 = vst [vmem:[#allocation22_spill] sm:$0xff] %v11998_v42  ;;  %v10083_v43 = vpop.f32.mrb[27].mxu1 }
 0x231   : > { %v12002_v45 = vpop.f32.mrb[28].mxu0 }
 0x232   : > { %v10062_v48 = vpop.f32.mrb[29].mxu0 }
 0x233   : > { %v1403_v50 = vpop.f32.mrb[30].mxu0  ;;  %v12009_v56 = vpop.f32.mrb[28].mxu1 }
 0x234   : > { %v12007_v53 = vadd.f32 %v8844_v49, %v1403_v50  ;;  %v10063_v54 = vpop.f32.mrb[31].mxu0  ;;  %14426 = vst [vmem:[#allocation24_spill] sm:$0xff] %v12009_v56  ;;  %v10086_v60 = vpop.f32.mrb[29].mxu1 }
 0x235   : > { %v1501_v0 = vpop.f32.mrb[30].mxu1 }
 0x236   : > { %14425 = vst [vmem:[#allocation23_spill] sm:$0xff] %v12007_v53  ;;  %v12013_v1 = vadd.f32 %v8857_v61, %v1501_v0  ;;  %v10087_v4 = vpop.f32.mrb[31].mxu1 }
 0x238   : > { %14427 = vst [vmem:[#allocation25_spill] sm:$0xff] %v12013_v1 }
 0x239   : > { %v1408_v6 = vpop.f32.mrb[32].mxu0 }
 0x23a   : > { %v12020_v9 = vadd.f32 %v8844_v49, %v1408_v6  ;;  %v10066_v11 = vpop.f32.mrb[33].mxu0 }
 0x23b   : > { %v1411_v12 = vpop.f32.mrb[34].mxu0  ;;  %v1506_v22 = vpop.f32.mrb[32].mxu1 }
 0x23c   : > { %14428 = vst [vmem:[#allocation26_spill] sm:$0xff] %v12020_v9  ;;  %v12023_v14 = vadd.f32 %v8844_v49, %v1411_v12  ;;  %v10067_v18 = vpop.f32.mrb[35].mxu0  ;;  %v12025_v26 = vadd.f32 %v8857_v61, %v1506_v22  ;;  %v10090_v30 = vpop.f32.mrb[33].mxu1 }
 0x23d   : > { %v1509_v33 = vpop.f32.mrb[34].mxu1  ;;  %v12045_v18 = vld [vmem:[%s14432_s2] ss:$0 sm:$0xff] }
 0x23e   : > { %14429 = vst [vmem:[#allocation27_spill] sm:$0xff] %v12023_v14  ;;  %14430 = vst [vmem:[#allocation28_spill] sm:$0xff] %v12025_v26  ;;  %v12028_v36 = vadd.f32 %v8857_v61, %v1509_v33  ;;  %v10091_v40 = vpop.f32.mrb[35].mxu1  ;;  %v12050_v33 = vld [vmem:[%s14432_s2 + $0x1] ss:$0 sm:$0xff] }
 0x240   : > { %14431 = vst [vmem:[#allocation29_spill] sm:$0xff] %v12028_v36 }
 0x241   : > { %v1416_v43 = vpop.f32.mrb[36].mxu0 }
 0x242   : > { %v12034_v48 = vadd.f32 %v8844_v49, %v1416_v43  ;;  %v10070_v50 = vpop.f32.mrb[37].mxu0 }
 0x243   : > { %v1419_v54 = vpop.f32.mrb[38].mxu0  ;;  %v1514_v0 = vpop.f32.mrb[36].mxu1  ;;  %v14550_v50 = vld [vmem:[#allocation25_spill] sm:$0xff] }
 0x244   : > { %14433 = vst [vmem:[#allocation30_spill] sm:$0xff] %v12034_v48  ;;  %v12036_v57 = vadd.f32 %v8844_v49, %v1419_v54  ;;  %v10071_v60 = vpop.f32.mrb[39].mxu0  ;;  %v12038_v4 = vadd.f32 %v8857_v61, %v1514_v0  ;;  %v10094_v6 = vpop.f32.mrb[37].mxu1 }
 0x245   : > { %v1517_v8 = vpop.f32.mrb[38].mxu1 }
 0x246   : > { %14434 = vst [vmem:[#allocation31_spill] sm:$0xff] %v12036_v57  ;;  %14435 = vst [vmem:[#allocation32_spill] sm:$0xff] %v12038_v4  ;;  %v12040_v11 = vadd.f32 %v8857_v61, %v1517_v8  ;;  %v10095_v12 = vpop.f32.mrb[39].mxu1 }
 0x248   : > { %14436 = vst [vmem:[#allocation33_spill] sm:$0xff] %v12040_v11 }
 0x249   : > { %v1578_v22 = vpop.f32.mrb[40].mxu0 }
 0x24a   : > { %v10102_v49 = vpop.f32.mrb[41].mxu0  ;;  %v1579_v40 = vadd.f32 %v12045_v18, %v1578_v22 }
 0x24b   : > { %v1581_v30 = vpop.f32.mrb[42].mxu0  ;;  %v1676_v54 = vpop.f32.mrb[40].mxu1 }
 0x24c   : > { %v1582_v61 = vadd.f32 %v12045_v18, %v1581_v30  ;;  %v10103_v43 = vpop.f32.mrb[43].mxu0  ;;  %v1677_v0 = vadd.f32 %v12050_v33, %v1676_v54  ;;  %v10126_v6 = vpop.f32.mrb[41].mxu1 }
 0x24d   : > { %v1679_v8 = vpop.f32.mrb[42].mxu1 }
 0x24e   : > { %v10817_v60 = vpack.c.bf16 %v1582_v61, %v1579_v40  ;;  %v1680_v12 = vadd.f32 %v12050_v33, %v1679_v8  ;;  %v10127_v22 = vpop.f32.mrb[43].mxu1 }
 0x250   : > { %10819 = vmatpush3.bf16.xpose.msk.msra.mxu0 %vm12056_vm7, %v10817_v60  ;;  %v10831_v40 = vpack.c.bf16 %v1680_v12, %v1677_v0  ;;  %v14439_v12 = vmov 0.0  }
 0x251   : > { %v1586_v49 = vpop.f32.mrb[44].mxu0  ;;  %10820 = vmatprep.subr.bf16.mxu0 %v14343_v16  ;;  %10268 = vmatprep.mubr.msk.bf16.mxu1 %vm11381_vm4, %v14439_v12 }
 0x252   : > { %v10106_v30 = vpop.f32.mrb[45].mxu0  ;;  %v1587_v43 = vadd.f32 %v12045_v18, %v1586_v49  ;;  %10269 = vmatmul.mubr.msk.bf16.vlgmr.msra.gmra.mrb[100].mxu1 %vm1138_vm5, %v11682_v52 }
 0x253   : > { %v1589_v61 = vpop.f32.mrb[46].mxu0  ;;  %v1684_v6 = vpop.f32.mrb[44].mxu1  ;;  %10272 = vmatprep.mubr.msk.bf16.mxu1 %vm11381_vm4, %v14439_v12 }
 0x254   : > { %v1590_v54 = vadd.f32 %v12045_v18, %v1589_v61  ;;  %v10107_v60 = vpop.f32.mrb[47].mxu0  ;;  %v1685_v22 = vadd.f32 %v12050_v33, %v1684_v6  ;;  %v10130_v11 = vpop.f32.mrb[45].mxu1 }
 0x255   : > { %v1687_v4 = vpop.f32.mrb[46].mxu1 }
 0x256   : > { %v10821_v8 = vpack.c.bf16 %v1590_v54, %v1587_v43  ;;  %v1688_v16 = vadd.f32 %v12050_v33, %v1687_v4  ;;  %v10131_v47 = vpop.f32.mrb[47].mxu1 }
 0x258   : > { %10823 = vmatpush3.bf16.xpose.msk.msra.mxu0 %vm12056_vm7, %v10821_v8  ;;  %v10835_v30 = vpack.c.bf16 %v1688_v16, %v1685_v22  ;;  %v1189_v8 = vadd.f32 %v11922_v37, %v11892_v17  ;;  %v14441_v16 = vmov 0.0|0.0  }
 0x259   : > { %v1594_v0 = vpop.f32.mrb[48].mxu0  ;;  %10296 = vmatprep.subr.mxu0 %v14439_v12 }
 0x25a   : > { %v10110_v49 = vpop.f32.mrb[49].mxu0  ;;  %v1595_v11 = vadd.f32 %v12045_v18, %v1594_v0  ;;  %10273 = vmatmul.mubr.msk.bf16.gmra.mrb[104].mxu1 %vm1138_vm5, %v11696_v59 }
 0x25b   : > { %v1597_v61 = vpop.f32.mrb[50].mxu0  ;;  %v1692_v4 = vpop.f32.mrb[48].mxu1  ;;  %10276 = vmatprep.mubr.msk.bf16.mxu1 %vm11381_vm4, %v14439_v12 }
 0x25c   : > { %v12082_v43 = vadd.f32 %v12045_v18, %v1597_v61  ;;  %v10111_v54 = vpop.f32.mrb[51].mxu0  ;;  %v10134_v47 = vpop.f32.mrb[49].mxu1 }
 0x25d   : > { %v1695_v60 = vpop.f32.mrb[50].mxu1  ;;  %v1192_v47 = vadd.f32 %v11922_v37, %v11894_v19  ;;  %v1197_v19 = vadd.f32 %v11922_v37, %v11904_v25 }
 0x25e   : > { %14440 = vst [vmem:[#allocation34_spill] sm:$0xff] %v12082_v43  ;;  %v10135_v6 = vpop.f32.mrb[51].mxu1  ;;  %v12103_v17 = vadd.f32 %v12050_v33, %v1695_v60 }
 0x260   : > { %10297 = vmatpush3.xpose.msk.msra.mxu0 %vm2301_vm6, %v1595_v11  ;;  %14443 = vst [vmem:[#allocation36_spill] sm:$0xff] %v12103_v17 }
 0x261   : > { %10830 = vmatprep.subr.bf16.mxu0 %v14441_v16  ;;  %v1602_v22 = vpop.f32.mrb[52].mxu0 }
 0x262   : > { %v12093_v0 = vadd.f32 %v12045_v18, %v1602_v22  ;;  %v10114_v49 = vpop.f32.mrb[53].mxu0  ;;  %10277 = vmatmul.mubr.msk.bf16.gmra.mrb[108].mxu1 %vm1138_vm5, %v11710_v63 }
 0x263   : > { %10299 = vmatmul.mubr.msk.f32.vlgmr.msra.gmra.mrb[120].mxu0 %vm2301_vm6, %v1189_v8  ;;  %v1605_v61 = vpop.f32.mrb[54].mxu0  ;;  %v1700_v6 = vpop.f32.mrb[52].mxu1  ;;  %10280 = vmatprep.mubr.msk.bf16.mxu1 %vm11381_vm4, %v14439_v12 }
 0x264   : > { %14442 = vst [vmem:[#allocation35_spill] sm:$0xff] %v12093_v0  ;;  %10833 = vmatpush3.bf16.xpose.msk.msra.mxu0 %vm12056_vm7, %v10831_v40  ;;  %10301 = vmatprep.mubr.msk.f32.mxu0 %vm11381_vm4, %v14439_v12  ;;  %v12106_v11 = vadd.f32 %v12045_v18, %v1605_v61  ;;  %v10115_v54 = vpop.f32.mrb[55].mxu0  ;;  %v12112_v40 = vadd.f32 %v12050_v33, %v1700_v6  ;;  %v10138_v8 = vpop.f32.mrb[53].mxu1 }
 0x265   : > { %10834 = vmatprep.subr.bf16.mxu0 %v14441_v16  ;;  %v1200_v6 = vadd.f32 %v11922_v37, %v11906_v27  ;;  %v12143_v8 = vld [vmem:[%s14432_s2 + $0x2] ss:$0 sm:$0xff] }
 0x266   : > { %14444 = vst [vmem:[#allocation37_spill] sm:$0xff] %v12106_v11  ;;  %14445 = vst [vmem:[#allocation38_spill] sm:$0xff] %v12112_v40 }
 0x267   : > { %10302 = vmatmul.mubr.msk.f32.gmra.mrb[122].mxu0 %vm2301_vm6, %v1192_v47 }
 0x268   : > { %10304 = vmatprep.mubr.msk.f32.mxu0 %vm11381_vm4, %v14439_v12 }
 0x269   : > { %v1610_v22 = vpop.f32.mrb[56].mxu0 }
 0x26a   : > { %v12126_v49 = vadd.f32 %v12045_v18, %v1610_v22  ;;  %v10118_v61 = vpop.f32.mrb[57].mxu0  ;;  %10281 = vmatmul.mubr.msk.bf16.gmra.mrb[112].mxu1 %vm1138_vm5, %v11720_v2 }
 0x26b   : > { %10305 = vmatmul.mubr.msk.f32.gmra.mrb[124].mxu0 %vm2301_vm6, %v1197_v19  ;;  %v1613_v54 = vpop.f32.mrb[58].mxu0  ;;  %10284 = vmatprep.mubr.msk.bf16.mxu1 %vm11381_vm4, %v14439_v12 }
 0x26c   : > { %14446 = vst [vmem:[#allocation39_spill] sm:$0xff] %v12126_v49  ;;  %10837 = vmatpush3.bf16.xpose.msk.msra.mxu0 %vm12056_vm7, %v10835_v30  ;;  %10307 = vmatprep.mubr.msk.f32.mxu0 %vm11381_vm4, %v14439_v12  ;;  %v12136_v25 = vadd.f32 %v12045_v18, %v1613_v54  ;;  %v10119_v47 = vpop.f32.mrb[59].mxu0  ;;  %v1693_v30 = vadd.f32 %v12050_v33, %v1692_v4 }
 0x26d   : > { %10346 = vmatprep.subr.mxu0 %v14439_v12  ;;  %v1205_v18 = vadd.f32 %v11922_v37, %v11917_v34  ;;  %v1287_v37 = vadd.f32 %v11934_v44, %v11896_v21  ;;  %v1290_v54 = vadd.f32 %v11934_v44, %v11900_v23  ;;  %v1295_v23 = vadd.f32 %v11934_v44, %v11908_v29 }
 0x26e   : > { %14447 = vst [vmem:[#allocation40_spill] sm:$0xff] %v12136_v25 }
 0x26f   : > { %10308 = vmatmul.mubr.msk.f32.gmra.mrb[126].mxu0 %vm2301_vm6, %v1200_v6 }
 0x270   : > { %10310 = vmatprep.mubr.msk.f32.mxu0 %vm11381_vm4, %v14439_v12 }
 0x271   : > { %v1774_v19 = vpop.f32.mrb[60].mxu0 }
 0x272   : > { %v12155_v27 = vadd.f32 %v12143_v8, %v1774_v19  ;;  %v10150_v22 = vpop.f32.mrb[61].mxu0  ;;  %10285 = vmatmul.mubr.msk.bf16.gmra.mrb[116].mxu1 %vm1138_vm5, %v11730_v5  ;;  %v1303_v5 = vadd.f32 %v11934_v44, %v11927_v41 }
 0x273   : > { %10311 = vmatmul.mubr.msk.f32.gmra.mrb[128].mxu0 %vm2301_vm6, %v1205_v18  ;;  %v1777_v4 = vpop.f32.mrb[62].mxu0  ;;  %v1298_v22 = vadd.f32 %v11934_v44, %v11912_v31  ;;  %10323 = vmatprep.mubr.msk.f32.mxu1 %vm11381_vm4, %v14439_v12 }
 0x274   : > { %10347 = vmatpush3.xpose.msk.msra.mxu0 %vm2301_vm6, %v1693_v30  ;;  %10348 = vmatprep.mubr.msk.f32.mxu0 %vm11381_vm4, %v14439_v12  ;;  %v12162_v63 = vadd.f32 %v12143_v8, %v1777_v4  ;;  %v10151_v34 = vpop.f32.mrb[63].mxu0 }
 0x275   : > { %10388 = vmatprep.subr.bf16.mxu0 %v14439_v12 }
 0x277   : > { %10349 = vmatmul.mubr.msk.f32.vlgmr.msra.gmra.mrb[130].mxu0 %vm2301_vm6, %v1287_v37 }
 0x278   : > { %10351 = vmatprep.mubr.msk.f32.mxu0 %vm11381_vm4, %v14439_v12 }
 0x279   : > { %v1782_v47 = vpop.f32.mrb[64].mxu0 }
 0x27a   : > { %v12179_v21 = vadd.f32 %v12143_v8, %v1782_v47  ;;  %v10154_v6 = vpop.f32.mrb[65].mxu0 }
 0x27b   : > { %10352 = vmatmul.mubr.msk.f32.gmra.mrb[132].mxu0 %vm2301_vm6, %v1290_v54  ;;  %v1785_v30 = vpop.f32.mrb[66].mxu0 }
 0x27c   : > { %10354 = vmatprep.mubr.msk.f32.mxu0 %vm11381_vm4, %v14439_v12  ;;  %v12185_v18 = vadd.f32 %v12143_v8, %v1785_v30  ;;  %v10155_v2 = vpop.f32.mrb[67].mxu0 }
 0x27f   : > { %10355 = vmatmul.mubr.msk.f32.gmra.mrb[134].mxu0 %vm2301_vm6, %v1295_v23 }
 0x280   : > { %10357 = vmatprep.mubr.msk.f32.mxu0 %vm11381_vm4, %v14439_v12 }
 0x281   : > { %v12198_v4 = vpop.f32.mrb[68].mxu0 }
 0x282   : > { %v10158_v29 = vpop.f32.mrb[69].mxu0 }
 0x283   : > { %10358 = vmatmul.mubr.msk.f32.gmra.mrb[136].mxu0 %vm2301_vm6, %v1298_v22  ;;  %v1793_v34 = vpop.f32.mrb[70].mxu0 }
 0x284   : > { %10360 = vmatprep.mubr.msk.f32.mxu0 %vm11381_vm4, %v14439_v12  ;;  %v12206_v37 = vadd.f32 %v12143_v8, %v1793_v34  ;;  %v10159_v54 = vpop.f32.mrb[71].mxu0 }
 0x286   : > { %14448 = vst [vmem:[#allocation41_spill] sm:$0xff] %v12206_v37  ;;  %v11383_v37 = vmov -1e+30  }
 0x287   : > { %10361 = vmatmul.mubr.msk.f32.gmra.mrb[138].mxu0 %vm2301_vm6, %v1303_v5 }
 0x288   : > { %10390 = vmatprep.mubr.msk.bf16.mxu0 %vm11381_vm4, %v14439_v12 }
 0x289   : > { %v1798_v31 = vpop.f32.mrb[72].mxu0 }
 0x28a   : > { %v12214_v47 = vadd.f32 %v12143_v8, %v1798_v31  ;;  %v10162_v6 = vpop.f32.mrb[73].mxu0 }
 0x28b   : > { %v1801_v30 = vpop.f32.mrb[74].mxu0  ;;  %v8912_v6 = vld [vmem:[%s11552_s28] ss:$0 sm:$0xff] }
 0x28c   : > { %14449 = vst [vmem:[#allocation42_spill] sm:$0xff] %v12214_v47  ;;  %v12219_v23 = vadd.f32 %v12143_v8, %v1801_v30  ;;  %v10163_v22 = vpop.f32.mrb[75].mxu0 }
 0x28e   : > { %14450 = vst [vmem:[#allocation43_spill] sm:$0xff] %v12219_v23 }
 0x291   : > { %v1806_v41 = vpop.f32.mrb[76].mxu0 }
 0x292   : > { %v12222_v44 = vadd.f32 %v12143_v8, %v1806_v41  ;;  %v10166_v29 = vpop.f32.mrb[77].mxu0 }
 0x293   : > { %v1809_v34 = vpop.f32.mrb[78].mxu0 }
 0x294   : > { %14451 = vst [vmem:[#allocation44_spill] sm:$0xff] %v12222_v44  ;;  %v12227_v5 = vadd.f32 %v12143_v8, %v1809_v34  ;;  %v10167_v31 = vpop.f32.mrb[79].mxu0  ;;  %v14353_v44 = vlaneseq }
 0x296   : > { %14452 = vst [vmem:[#allocation45_spill] sm:$0xff] %v12227_v5 }
 0x299   : > { %v1968_v60 = vpop.f32.mrb[80].mxu0 }
 0x29a   : > { %v1969_v2 = vadd.f32 %v8912_v6, %v1968_v60  ;;  %v10198_v59 = vpop.f32.mrb[81].mxu0 }
 0x29b   : > { %v1971_v30 = vpop.f32.mrb[82].mxu0 }
 0x29c   : > { %v1972_v52 = vadd.f32 %v8912_v6, %v1971_v30  ;;  %v10199_v22 = vpop.f32.mrb[83].mxu0 }
 0x29e   : > { %v10825_v19 = vpack.c.bf16 %v1972_v52, %v1969_v2 }
 0x2a0   : > { %10826 = vmatpush3.bf16.msra.mxu1 %v10825_v19 }
 0x2a1   : > { %v1976_v41 = vpop.f32.mrb[84].mxu0  ;;  %10827 = vmatprep.subr.bf16.mxu1 %v14441_v16 }
 0x2a2   : > { %v1977_v29 = vadd.f32 %v8912_v6, %v1976_v41  ;;  %v10202_v61 = vpop.f32.mrb[85].mxu0 }
 0x2a3   : > { %v1979_v36 = vpop.f32.mrb[86].mxu0 }
 0x2a4   : > { %v1980_v54 = vadd.f32 %v8912_v6, %v1979_v36  ;;  %v10203_v26 = vpop.f32.mrb[87].mxu0 }
 0x2a6   : > { %v10828_v34 = vpack.c.bf16 %v1980_v54, %v1977_v29 }
 0x2a8   : > { %10829 = vmatpush3.bf16.msra.mxu1 %v10828_v34 }
 0x2a9   : > { %v1984_v31 = vpop.f32.mrb[88].mxu0  ;;  %10321 = vmatprep.subr.mxu1 %v14439_v12 }
 0x2aa   : > { %v1985_v60 = vadd.f32 %v8912_v6, %v1984_v31  ;;  %v10206_v59 = vpop.f32.mrb[89].mxu0 }
 0x2ab   : > { %v1987_v1 = vpop.f32.mrb[90].mxu0 }
 0x2ac   : > { %v12232_v30 = vadd.f32 %v8912_v6, %v1987_v1  ;;  %v10207_v52 = vpop.f32.mrb[91].mxu0  ;;  %10322 = vmatpush3.msra.mxu1 %v1985_v60 }
 0x2ad   : > { %10838 = vmatprep.subr.bf16.mxu1 %v14441_v16  ;;  %v12248_v52 = vld [vmem:[%s11552_s28 + $0x2] ss:$0 sm:$0xff] }
 0x2ae   : > { %14453 = vst [vmem:[#allocation46_spill] sm:$0xff] %v12232_v30 }
 0x2b1   : > { %v1992_v19 = vpop.f32.mrb[92].mxu0 }
 0x2b2   : > { %v12235_v61 = vadd.f32 %v8912_v6, %v1992_v19  ;;  %v10210_v36 = vpop.f32.mrb[93].mxu0 }
 0x2b3   : > { %v1995_v26 = vpop.f32.mrb[94].mxu0 }
 0x2b4   : > { %14454 = vst [vmem:[#allocation47_spill] sm:$0xff] %v12235_v61  ;;  %v12239_v54 = vadd.f32 %v8912_v6, %v1995_v26  ;;  %v10211_v22 = vpop.f32.mrb[95].mxu0 }
 0x2b6   : > { %14455 = vst [vmem:[#allocation48_spill] sm:$0xff] %v12239_v54 }
 0x2b9   : > { %v2000_v41 = vpop.f32.mrb[96].mxu0 }
 0x2ba   : > { %v12241_v29 = vadd.f32 %v8912_v6, %v2000_v41  ;;  %v10214_v1 = vpop.f32.mrb[97].mxu0 }
 0x2bb   : > { %v2003_v34 = vpop.f32.mrb[98].mxu0 }
 0x2bc   : > { %14456 = vst [vmem:[#allocation49_spill] sm:$0xff] %v12241_v29  ;;  %v12245_v60 = vadd.f32 %v8912_v6, %v2003_v34  ;;  %v10215_v59 = vpop.f32.mrb[99].mxu0 }
 0x2be   : > { %14457 = vst [vmem:[#allocation50_spill] sm:$0xff] %v12245_v60 }
 0x2c1   : > { %v2164_v19 = vpop.f32.mrb[100].mxu0 }
 0x2c2   : > { %v12251_v36 = vadd.f32 %v12248_v52, %v2164_v19  ;;  %v10246_v26 = vpop.f32.mrb[101].mxu0 }
 0x2c3   : > { %v2167_v2 = vpop.f32.mrb[102].mxu0 }
 0x2c4   : > { %v12254_v22 = vadd.f32 %v12248_v52, %v2167_v2  ;;  %v10247_v41 = vpop.f32.mrb[103].mxu0 }
 0x2c9   : > { %v2172_v57 = vpop.f32.mrb[104].mxu0 }
 0x2ca   : > { %v12259_v6 = vadd.f32 %v12248_v52, %v2172_v57  ;;  %v10250_v34 = vpop.f32.mrb[105].mxu0 }
 0x2cb   : > { %v2175_v59 = vpop.f32.mrb[106].mxu0 }
 0x2cc   : > { %v12262_v31 = vadd.f32 %v12248_v52, %v2175_v59  ;;  %v10251_v19 = vpop.f32.mrb[107].mxu0  ;;  %v1112_v59 = vand.u32 127, %v14353_v44 }
 0x2ce   : > { %vm1113_vm8 = vcmp.lt.s32.totalorder %v1112_v59, 33 }
 0x2d1   : > { %v12266_v48 = vpop.f32.mrb[108].mxu0 }
 0x2d2   : > { %v10254_v2 = vpop.f32.mrb[109].mxu0 }
 0x2d3   : > { %v2183_v41 = vpop.f32.mrb[110].mxu0 }
 0x2d4   : > { %v12269_v14 = vadd.f32 %v12248_v52, %v2183_v41  ;;  %v10255_v1 = vpop.f32.mrb[111].mxu0 }
 0x2d6   : > { %14458 = vst [vmem:[#allocation51_spill] sm:$0xff] %v12269_v14 }
 0x2d9   : > { %v2188_v9 = vpop.f32.mrb[112].mxu0 }
 0x2da   : > { %v12272_v57 = vadd.f32 %v12248_v52, %v2188_v9  ;;  %v10258_v34 = vpop.f32.mrb[113].mxu0 }
 0x2db   : > { %v2191_v53 = vpop.f32.mrb[114].mxu0 }
 0x2dc   : > { %14459 = vst [vmem:[#allocation52_spill] sm:$0xff] %v12272_v57  ;;  %v12277_v19 = vadd.f32 %v12248_v52, %v2191_v53  ;;  %v10259_v26 = vpop.f32.mrb[115].mxu0 }
 0x2dd   : > { %v12288_v26 = vsel %vm1113_vm8, 0.0, %v11383_v37 }
 0x2de   : > { %14460 = vst [vmem:[#allocation53_spill] sm:$0xff] %v12277_v19 }
 0x2e1   : > { %v2196_v5 = vpop.f32.mrb[116].mxu0 }
 0x2e2   : > { %v12280_v2 = vadd.f32 %v12248_v52, %v2196_v5  ;;  %v10262_v41 = vpop.f32.mrb[117].mxu0 }
 0x2e3   : > { %v2199_v23 = vpop.f32.mrb[118].mxu0 }
 0x2e4   : > { %14461 = vst [vmem:[#allocation54_spill] sm:$0xff] %v12280_v2  ;;  %v12285_v9 = vadd.f32 %v12248_v52, %v2199_v23  ;;  %v10263_v34 = vpop.f32.mrb[119].mxu0 }
 0x2e6   : > { %14462 = vst [vmem:[#allocation55_spill] sm:$0xff] %v12285_v9 }
 0x336   : > { %v2398_v53 = vpop.f32.mrb[120].mxu0 }
 0x337   : > { %v2422_v47 = vmul.f32 0.35355338, %v2398_v53  ;;  %v10300_v5 = vpop.f32.mrb[121].mxu0 }
 0x339   : > { %v12291_v41 = vadd.f32 %v2422_v47, %v12288_v26 }
 0x33a   : > { %v2403_v14 = vpop.f32.mrb[122].mxu0 }
 0x33b   : > { %v2423_v1 = vmul.f32 0.35355338, %v2403_v14  ;;  %v10303_v19 = vpop.f32.mrb[123].mxu0  ;;  %v2433_v23 = vsel %vm2432_vm9, %v12291_v41, -inf }
 0x33c   : > { %2434 = vmax.xlane.f32.xlu0 %v2433_v23 }
 0x33d   : > { %v12296_v34 = vadd.f32 %v2423_v1, %v12288_v26 }
 0x33e   : > { %v2408_v59 = vpop.f32.mrb[124].mxu0 }
 0x33f   : > { %v2424_v44 = vmul.f32 0.35355338, %v2408_v59  ;;  %v10306_v37 = vpop.f32.mrb[125].mxu0  ;;  %v2436_v53 = vsel %vm2432_vm9, %v12296_v34, -inf }
 0x340   : > { %2437 = vmax.xlane.f32.xlu0 %v2436_v53 }
 0x341   : > { %v12301_v47 = vadd.f32 %v2424_v44, %v12288_v26 }
 0x342   : > { %v2413_v5 = vpop.f32.mrb[126].mxu0 }
 0x343   : > { %v2425_v14 = vmul.f32 0.35355338, %v2413_v5  ;;  %v10309_v19 = vpop.f32.mrb[127].mxu0  ;;  %v2439_v9 = vsel %vm2432_vm9, %v12301_v47, -inf }
 0x344   : > { %2440 = vmax.xlane.f32.xlu1 %v2439_v9 }
 0x345   : > { %v12306_v1 = vadd.f32 %v2425_v14, %v12288_v26 }
 0x346   : > { %v2418_v23 = vpop.f32.mrb[128].mxu0 }
 0x347   : > { %v2426_v59 = vmul.f32 0.35355338, %v2418_v23  ;;  %v10312_v37 = vpop.f32.mrb[129].mxu0  ;;  %v2442_v2 = vsel %vm2432_vm9, %v12306_v1, -inf }
 0x348   : > { %2443 = vmax.xlane.f32.xlu1 %v2442_v2 }
 0x349   : > { %v12311_v44 = vadd.f32 %v2426_v59, %v12288_v26 }
 0x34a   : > { %v2693_v53 = vpop.f32.mrb[130].mxu0 }
 0x34b   : > { %v2717_v5 = vmul.f32 0.35355338, %v2693_v53  ;;  %v10350_v19 = vpop.f32.mrb[131].mxu0  ;;  %v2445_v57 = vsel %vm2432_vm9, %v12311_v44, -inf }
 0x34c   : > { %2446 = vmax.xlane.f32.xlu0 %v2445_v57 }
 0x34d   : > { %v12316_v9 = vadd.f32 %v2717_v5, %v12288_v26 }
 0x34e   : > { %v2698_v14 = vpop.f32.mrb[132].mxu0 }
 0x34f   : > { %v2718_v23 = vmul.f32 0.35355338, %v2698_v14  ;;  %v10353_v37 = vpop.f32.mrb[133].mxu0  ;;  %v2727_v60 = vsel %vm2432_vm9, %v12316_v9, -inf }
 0x350   : > { %2728 = vmax.xlane.f32.xlu1 %v2727_v60 }
 0x351   : > { %v12321_v2 = vadd.f32 %v2718_v23, %v12288_v26 }
 0x352   : > { %v2703_v59 = vpop.f32.mrb[134].mxu0 }
 0x353   : > { %v2719_v53 = vmul.f32 0.35355338, %v2703_v59  ;;  %v10356_v19 = vpop.f32.mrb[135].mxu0  ;;  %v2730_v54 = vsel %vm2432_vm9, %v12321_v2, -inf }
 0x354   : > { %2731 = vmax.xlane.f32.xlu0 %v2730_v54 }
 0x355   : > { %v12326_v57 = vadd.f32 %v2719_v53, %v12288_v26 }
 0x356   : > { %v2708_v5 = vpop.f32.mrb[136].mxu0 }
 0x357   : > { %v2720_v14 = vmul.f32 0.35355338, %v2708_v5  ;;  %v10359_v37 = vpop.f32.mrb[137].mxu0  ;;  %v2733_v29 = vsel %vm2432_vm9, %v12326_v57, -inf }
 0x358   : > { %2734 = vmax.xlane.f32.xlu1 %v2733_v29  ;;  %v1703_v37 = vpop.f32.mrb[54].mxu1 }
 0x359   : > { %v12331_v60 = vadd.f32 %v2720_v14, %v12288_v26  ;;  %v12341_v29 = vadd.f32 %v12050_v33, %v1703_v37  ;;  %v10139_v14 = vpop.f32.mrb[55].mxu1 }
 0x35a   : > { %v2713_v23 = vpop.f32.mrb[138].mxu0  ;;  %v1708_v30 = vpop.f32.mrb[56].mxu1 }
 0x35b   : > { %v2721_v59 = vmul.f32 0.35355338, %v2713_v23  ;;  %v10362_v19 = vpop.f32.mrb[139].mxu0  ;;  %v2736_v54 = vsel %vm2432_vm9, %v12331_v60, -inf  ;;  %14463 = vst [vmem:[#allocation56_spill] sm:$0xff] %v12341_v29  ;;  %v12344_v23 = vadd.f32 %v12050_v33, %v1708_v30 }
 0x35c   : > { %2737 = vmax.xlane.f32.xlu0 %v2736_v54  ;;  %v10142_v19 = vpop.f32.mrb[57].mxu1  ;;  %v12349_v54 = vld [vmem:[%s14432_s2 + $0x3] ss:$0 sm:$0xff] }
 0x35d   : > { %v12336_v53 = vadd.f32 %v2721_v59, %v12288_v26  ;;  %14464 = vst [vmem:[#allocation57_spill] sm:$0xff] %v12344_v23  ;;  %v12346_v61 = vpop.f32.mrb[58].mxu1 }
 0x35e   : > { %14465 = vst [vmem:[#allocation58_spill] sm:$0xff] %v12346_v61  ;;  %v10143_v13 = vpop.f32.mrb[59].mxu1 }
 0x35f   : > { %v2739_v5 = vsel %vm2432_vm9, %v12336_v53, -inf  ;;  %v1872_v10 = vpop.f32.mrb[60].mxu1 }
 0x360   : > { %2740 = vmax.xlane.f32.xlu1 %v2739_v5  ;;  %v12354_v5 = vadd.f32 %v12349_v54, %v1872_v10  ;;  %v10174_v37 = vpop.f32.mrb[61].mxu1 }
 0x361   : > { %v1875_v62 = vpop.f32.mrb[62].mxu1 }
 0x362   : > { %v12357_v14 = vadd.f32 %v12349_v54, %v1875_v62  ;;  %v10175_v33 = vpop.f32.mrb[63].mxu1 }
 0x363   : > { %v1880_v30 = vpop.f32.mrb[64].mxu1 }
 0x364   : > { %v12362_v58 = vadd.f32 %v12349_v54, %v1880_v30  ;;  %v10178_v46 = vpop.f32.mrb[65].mxu1 }
 0x365   : > { %v1883_v59 = vpop.f32.mrb[66].mxu1 }
 0x366   : > { %v12365_v13 = vadd.f32 %v12349_v54, %v1883_v59  ;;  %v10179_v10 = vpop.f32.mrb[67].mxu1 }
 0x367   : > { %v12367_v7 = vpop.f32.mrb[68].mxu1 }
 0x368   : > { %v10182_v37 = vpop.f32.mrb[69].mxu1 }
 0x3c9   : > { %v2435_v33 = vpop.xlane.xlu0 %2434 }
 0x3ca   : > { %v2448_v61 = vsub.f32 %v12291_v41, %v2435_v33  ;;  %v1891_v41 = vpop.f32.mrb[70].mxu1 }
 0x3cb   : > { %v12386_v33 = vadd.f32 %v12349_v54, %v1891_v41 }
 0x3cc   : > { %v2453_v3 = vmul.f32 1.442695, %v2448_v61 }
 0x3cd   : > { %v2438_v19 = vpop.xlane.xlu0 %2437  ;;  %14466 = vst [vmem:[#allocation59_spill] sm:$0xff] %v12386_v33 }
 0x3ce   : > { %11113 = vpow2.f32 %v2453_v3  ;;  %v2449_v30 = vsub.f32 %v12296_v34, %v2438_v19 }
 0x3d0   : > { %v2455_v46 = vmul.f32 1.442695, %v2449_v30 }
 0x3d1   : > { %v2441_v29 = vpop.xlane.xlu1 %2440 }
 0x3d2   : > { %11115 = vpow2.f32 %v2455_v46  ;;  %v2450_v59 = vsub.f32 %v12301_v47, %v2441_v29  ;;  %v10183_v29 = vpop.f32.mrb[71].mxu1 }
 0x3d4   : > { %v2457_v10 = vmul.f32 1.442695, %v2450_v59 }
 0x3d5   : > { %v2444_v23 = vpop.xlane.xlu1 %2443 }
 0x3d6   : > { %11117 = vpow2.f32 %v2457_v10  ;;  %v2451_v55 = vsub.f32 %v12306_v1, %v2444_v23  ;;  %v1896_v23 = vpop.f32.mrb[72].mxu1 }
 0x3d8   : > { %v12375_v62 = vpop.eup %11113  ;;  %v2459_v37 = vmul.f32 1.442695, %v2451_v55 }
 0x3d9   : > { %v2447_v51 = vpop.xlane.xlu0 %2446  ;;  %v2463_v61 = vsel %vm2432_vm9, %v12375_v62, 0.0 }
 0x3da   : > { %11119 = vpow2.f32 %v2459_v37  ;;  %v2452_v3 = vsub.f32 %v12311_v44, %v2447_v51  ;;  %2464 = vadd.xlane.f32.xlu0 %v2463_v61  ;;  %v12389_v51 = vadd.f32 %v12349_v54, %v1896_v23  ;;  %v10186_v44 = vpop.f32.mrb[73].mxu1 }
 0x3db   : > { %v1899_v61 = vpop.f32.mrb[74].mxu1 }
 0x3dc   : > { %v12380_v34 = vpop.eup %11115  ;;  %v2461_v47 = vmul.f32 1.442695, %v2452_v3  ;;  %14467 = vst [vmem:[#allocation60_spill] sm:$0xff] %v12389_v51 }
 0x3dd   : > { %v2729_v19 = vpop.xlane.xlu1 %2728  ;;  %v2466_v1 = vsel %vm2432_vm9, %v12380_v34, 0.0 }
 0x3de   : > { %11121 = vpow2.f32 %v2461_v47  ;;  %v2742_v55 = vsub.f32 %v12316_v9, %v2729_v19  ;;  %2467 = vadd.xlane.f32.xlu1 %v2466_v1  ;;  %v10187_v47 = vpop.f32.mrb[75].mxu1 }
 0x3df   : > { %v1904_v1 = vpop.f32.mrb[76].mxu1 }
 0x3e0   : > { %v12391_v30 = vpop.eup %11117  ;;  %v2747_v46 = vmul.f32 1.442695, %v2742_v55  ;;  %v12404_v55 = vadd.f32 %v12349_v54, %v1899_v61  ;;  %v10190_v44 = vpop.f32.mrb[77].mxu1 }
 0x3e1   : > { %v2732_v10 = vpop.xlane.xlu0 %2731  ;;  %v2469_v37 = vsel %vm2432_vm9, %v12391_v30, 0.0 }
 0x3e2   : > { %11123 = vpow2.f32 %v2747_v46  ;;  %v2743_v9 = vsub.f32 %v12321_v2, %v2732_v10  ;;  %2470 = vadd.xlane.f32.xlu0 %v2469_v37  ;;  %14468 = vst [vmem:[#allocation61_spill] sm:$0xff] %v12404_v55  ;;  %v12407_v2 = vadd.f32 %v12349_v54, %v1904_v1 }
 0x3e4   : > { %v12398_v3 = vpop.eup %11119  ;;  %v2749_v41 = vmul.f32 1.442695, %v2743_v9  ;;  %14469 = vst [vmem:[#allocation62_spill] sm:$0xff] %v12407_v2 }
 0x3e5   : > { %v2735_v29 = vpop.xlane.xlu1 %2734  ;;  %v2472_v19 = vsel %vm2432_vm9, %v12398_v3, 0.0 }
 0x3e6   : > { %11125 = vpow2.f32 %v2749_v41  ;;  %v2744_v23 = vsub.f32 %v12326_v57, %v2735_v29  ;;  %2473 = vadd.xlane.f32.xlu1 %v2472_v19  ;;  %v12418_v29 = vpop.f32.mrb[78].mxu1 }
 0x3e7   : > { %14470 = vst [vmem:[#allocation63_spill] sm:$0xff] %v12418_v29 }
 0x3e8   : > { %v12409_v46 = vpop.eup %11121  ;;  %v2751_v10 = vmul.f32 1.442695, %v2744_v23  ;;  %v10191_v23 = vpop.f32.mrb[79].mxu1 }
 0x3e9   : > { %v2738_v9 = vpop.xlane.xlu0 %2737  ;;  %v2475_v41 = vsel %vm2432_vm9, %v12409_v46, 0.0 }
 0x3ea   : > { %11127 = vpow2.f32 %v2751_v10  ;;  %v2745_v57 = vsub.f32 %v12331_v60, %v2738_v9  ;;  %2476 = vadd.xlane.f32.xlu0 %v2475_v41  ;;  %v2066_v9 = vpop.f32.mrb[80].mxu1 }
 0x3eb   : > { %v10222_v41 = vpop.f32.mrb[81].mxu1 }
 0x3ec   : > { %v12416_v61 = vpop.eup %11123  ;;  %v2753_v47 = vmul.f32 1.442695, %v2745_v57  ;;  %v2069_v59 = vpop.f32.mrb[82].mxu1 }
 0x3ed   : > { %v2741_v19 = vpop.xlane.xlu1 %2740  ;;  %v2757_v1 = vsel %vm2432_vm9, %v12416_v61, 0.0 }
 0x3ee   : > { %11129 = vpow2.f32 %v2753_v47  ;;  %v2746_v44 = vsub.f32 %v12336_v53, %v2741_v19  ;;  %2758 = vadd.xlane.f32.xlu1 %v2757_v1  ;;  %v12432_v47 = vld [vmem:[%s11552_s28 + $0x1] ss:$0 sm:$0xff]  ;;  %v10223_v53 = vpop.f32.mrb[83].mxu1 }
 0x3ef   : > { %v12435_v19 = vadd.f32 %v12432_v47, %v2066_v9  ;;  %v12438_v1 = vadd.f32 %v12432_v47, %v2069_v59  ;;  %v2074_v41 = vpop.f32.mrb[84].mxu1 }
 0x3f0   : > { %v12423_v37 = vpop.eup %11125  ;;  %v2755_v10 = vmul.f32 1.442695, %v2746_v44  ;;  %v10226_v29 = vpop.f32.mrb[85].mxu1  ;;  %v12451_v59 = vadd.f32 %v12432_v47, %v2074_v41 }
 0x3f1   : > { %v2760_v60 = vsel %vm2432_vm9, %v12423_v37, 0.0 }
 0x3f2   : > { %11131 = vpow2.f32 %v2755_v10  ;;  %2761 = vadd.xlane.f32.xlu0 %v2760_v60 }
 0x3f4   : > { %v12427_v57 = vpop.eup %11127 }
 0x3f5   : > { %v2763_v23 = vsel %vm2432_vm9, %v12427_v57, 0.0 }
 0x3f6   : > { %2764 = vadd.xlane.f32.xlu1 %v2763_v23  ;;  %v2077_v23 = vpop.f32.mrb[86].mxu1 }
 0x3f7   : > { %v10227_v53 = vpop.f32.mrb[87].mxu1  ;;  %v12454_v2 = vadd.f32 %v12432_v47, %v2077_v23 }
 0x3f8   : > { %v12440_v44 = vpop.eup %11129 }
 0x3f9   : > { %v2766_v60 = vsel %vm2432_vm9, %v12440_v44, 0.0 }
 0x3fa   : > { %2767 = vadd.xlane.f32.xlu0 %v2766_v60  ;;  %v12458_v60 = vpop.f32.mrb[88].mxu1 }
 0x3fb   : > { %v10230_v29 = vpop.f32.mrb[89].mxu1 }
 0x3fc   : > { %v12446_v55 = vpop.eup %11131  ;;  %v2085_v33 = vpop.f32.mrb[90].mxu1  ;;  %v12467_v29 = vld [vmem:[%s11552_s28 + $0x3] ss:$0 sm:$0xff] }
 0x3fd   : > { %v2769_v9 = vsel %vm2432_vm9, %v12446_v55, 0.0  ;;  %v10231_v51 = vpop.f32.mrb[91].mxu1  ;;  %v2086_v40 = vadd.f32 %v12432_v47, %v2085_v33 }
 0x3fe   : > { %2770 = vadd.xlane.f32.xlu1 %v2769_v9  ;;  %v2090_v17 = vpop.f32.mrb[92].mxu1 }
 0x3ff   : > { %v2091_v9 = vadd.f32 %v12432_v47, %v2090_v17  ;;  %v10234_v53 = vpop.f32.mrb[93].mxu1 }
 0x400   : > { %v2093_v39 = vpop.f32.mrb[94].mxu1 }
 0x401   : > { %v12462_v41 = vpack.c.bf16 %v2091_v9, %v2086_v40  ;;  %v2094_v23 = vadd.f32 %v12432_v47, %v2093_v39  ;;  %v10235_v25 = vpop.f32.mrb[95].mxu1 }
 0x402   : > { %v2098_v11 = vpop.f32.mrb[96].mxu1 }
 0x403   : > { %14471 = vst [vmem:[#allocation64_spill] sm:$0xff] %v12462_v41  ;;  %v2099_v10 = vadd.f32 %v12432_v47, %v2098_v11  ;;  %v10238_v49 = vpop.f32.mrb[97].mxu1 }
 0x404   : > { %v2101_v43 = vpop.f32.mrb[98].mxu1 }
 0x405   : > { %v12469_v51 = vpack.c.bf16 %v2099_v10, %v2094_v23  ;;  %v12472_v33 = vadd.f32 %v12432_v47, %v2101_v43  ;;  %v10239_v17 = vpop.f32.mrb[99].mxu1 }
 0x406   : > { %v2262_v53 = vpop.f32.mrb[100].mxu1 }
 0x407   : > { %14472 = vst [vmem:[#allocation65_spill] sm:$0xff] %v12469_v51  ;;  %14473 = vst [vmem:[#allocation66_spill] sm:$0xff] %v12472_v33  ;;  %v12475_v40 = vadd.f32 %v12467_v29, %v2262_v53  ;;  %v10270_v9 = vpop.f32.mrb[101].mxu1 }
 0x408   : > { %v2265_v39 = vpop.f32.mrb[102].mxu1 }
 0x409   : > { %v12478_v25 = vadd.f32 %v12467_v29, %v2265_v39  ;;  %v10271_v11 = vpop.f32.mrb[103].mxu1 }
 0x40a   : > { %v2270_v49 = vpop.f32.mrb[104].mxu1 }
 0x40b   : > { %v12483_v10 = vadd.f32 %v12467_v29, %v2270_v49  ;;  %v10274_v43 = vpop.f32.mrb[105].mxu1 }
 0x40c   : > { %v2273_v23 = vpop.f32.mrb[106].mxu1 }
 0x40d   : > { %v12486_v17 = vadd.f32 %v12467_v29, %v2273_v23  ;;  %v10275_v53 = vpop.f32.mrb[107].mxu1 }
 0x40e   : > { %v12488_v33 = vpop.f32.mrb[108].mxu1 }
 0x40f   : > { %14474 = vst [vmem:[#allocation67_spill] sm:$0xff] %v12488_v33  ;;  %v10278_v39 = vpop.f32.mrb[109].mxu1 }
 0x410   : > { %v2281_v11 = vpop.f32.mrb[110].mxu1 }
 0x411   : > { %v12493_v51 = vadd.f32 %v12467_v29, %v2281_v11  ;;  %v10279_v41 = vpop.f32.mrb[111].mxu1 }
 0x412   : > { %v2286_v0 = vpop.f32.mrb[112].mxu1 }
 0x413   : > { %14475 = vst [vmem:[#allocation68_spill] sm:$0xff] %v12493_v51  ;;  %v12496_v49 = vadd.f32 %v12467_v29, %v2286_v0  ;;  %v10282_v43 = vpop.f32.mrb[113].mxu1 }
 0x414   : > { %v2289_v56 = vpop.f32.mrb[114].mxu1 }
 0x415   : > { %v12501_v53 = vadd.f32 %v12467_v29, %v2289_v56  ;;  %v10283_v42 = vpop.f32.mrb[115].mxu1 }
 0x416   : > { %v2294_v9 = vpop.f32.mrb[116].mxu1 }
 0x417   : > { %v12504_v39 = vadd.f32 %v12467_v29, %v2294_v9  ;;  %v10286_v11 = vpop.f32.mrb[117].mxu1 }
 0x418   : > { %v2297_v33 = vpop.f32.mrb[118].mxu1 }
 0x419   : > { %v10926_v41 = vpack.c.bf16 %v12504_v39, %v12501_v53  ;;  %v12509_v0 = vadd.f32 %v12467_v29, %v2297_v33  ;;  %v10287_v43 = vpop.f32.mrb[119].mxu1  ;;  %v14476_v33 = vpack.c.bf16 %v12438_v1, %v12435_v19  ;;  %v2083_v19 = vadd.f32 %v12432_v47, %v12458_v60 }
 0x467   : > { %v2465_v38 = vpop.xlane.xlu0 %2464 }
 0x468   : > { %11133 = vrcp.f32 %v2465_v38 }
 0x46b   : > { %v2468_v23 = vpop.xlane.xlu1 %2467 }
 0x46c   : > { %11135 = vrcp.f32 %v2468_v23 }
 0x46f   : > { %v2471_v56 = vpop.xlane.xlu0 %2470 }
 0x470   : > { %11137 = vrcp.f32 %v2471_v56 }
 0x472   : > { %v11134_v42 = vpop.eup %11133 }
 0x473   : > { %v2483_v51 = vmul.f32 %v11134_v42, %v12375_v62  ;;  %v2474_v9 = vpop.xlane.xlu1 %2473 }
 0x474   : > { %11139 = vrcp.f32 %v2474_v9 }
 0x475   : > { %10324 = vmatmul.mubr.msk.f32.vlgmr.msra.gmra.mrb[120].mxu1 %vm2432_vm9, %v2483_v51  ;;  %v14477_v51 = vpack.c.bf16 %v12454_v2, %v12451_v59 }
 0x476   : > { %v11136_v11 = vpop.eup %11135  ;;  %10326 = vmatprep.mubr.msk.f32.mxu1 %vm11381_vm4, %v14439_v12  ;;  %10840 = vmatpush3.bf16.msra.mxu1 %v14476_v33 }
 0x477   : > { %v2477_v38 = vpop.xlane.xlu0 %2476  ;;  %v2484_v23 = vmul.f32 %v11136_v11, %v12380_v34  ;;  %10841 = vmatprep.subr.bf16.mxu1 %v14441_v16 }
 0x478   : > { %11141 = vrcp.f32 %v2477_v38 }
 0x479   : > { %10327 = vmatmul.mubr.msk.f32.gmra.mrb[122].mxu1 %vm2432_vm9, %v2484_v23 }
 0x47a   : > { %v11138_v62 = vpop.eup %11137  ;;  %10329 = vmatprep.mubr.msk.f32.mxu1 %vm11381_vm4, %v14439_v12  ;;  %10843 = vmatpush3.bf16.msra.mxu1 %v14477_v51 }
 0x47b   : > { %v2759_v1 = vpop.xlane.xlu1 %2758  ;;  %v2485_v43 = vmul.f32 %v11138_v62, %v12391_v30  ;;  %10371 = vmatprep.subr.mxu1 %v14439_v12 }
 0x47c   : > { %11143 = vrcp.f32 %v2759_v1 }
 0x47d   : > { %10330 = vmatmul.mubr.msk.f32.gmra.mrb[124].mxu1 %vm2432_vm9, %v2485_v43 }
 0x47e   : > { %v11140_v34 = vpop.eup %11139  ;;  %10332 = vmatprep.mubr.msk.f32.mxu1 %vm11381_vm4, %v14439_v12  ;;  %10372 = vmatpush3.msra.mxu1 %v2083_v19 }
 0x47f   : > { %v2762_v56 = vpop.xlane.xlu0 %2761  ;;  %v2486_v2 = vmul.f32 %v11140_v34, %v12398_v3  ;;  %10402 = vmatprep.subr.bf16.mxu1 %v14439_v12 }
 0x480   : > { %11145 = vrcp.f32 %v2762_v56 }
 0x481   : > { %10333 = vmatmul.mubr.msk.f32.gmra.mrb[126].mxu1 %vm2432_vm9, %v2486_v2  ;;  %v14478_v2 = vpack.c.bf16 %v12254_v22, %v12251_v36  ;;  %v2181_v36 = vadd.f32 %v12248_v52, %v12266_v48 }
 0x482   : > { %v11142_v47 = vpop.eup %11141  ;;  %10335 = vmatprep.mubr.msk.f32.mxu1 %vm11381_vm4, %v14439_v12 }
 0x483   : > { %v2765_v30 = vpop.xlane.xlu1 %2764  ;;  %v2487_v59 = vmul.f32 %v11142_v47, %v12409_v46 }
 0x484   : > { %11147 = vrcp.f32 %v2765_v30 }
 0x485   : > { %10336 = vmatmul.mubr.msk.f32.gmra.mrb[128].mxu1 %vm2432_vm9, %v2487_v59  ;;  %v14479_v59 = vpack.c.bf16 %v12262_v31, %v12259_v6 }
 0x486   : > { %v11144_v60 = vpop.eup %11143  ;;  %10373 = vmatprep.mubr.msk.f32.mxu1 %vm11381_vm4, %v14439_v12 }
 0x487   : > { %v2777_v3 = vmul.f32 %v11144_v60, %v12416_v61  ;;  %v2768_v42 = vpop.xlane.xlu0 %2767 }
 0x488   : > { %11149 = vrcp.f32 %v2768_v42 }
 0x489   : > { %10374 = vmatmul.mubr.msk.f32.vlgmr.msra.gmra.mrb[130].mxu1 %vm2432_vm9, %v2777_v3 }
 0x48a   : > { %v11146_v9 = vpop.eup %11145  ;;  %10376 = vmatprep.mubr.msk.f32.mxu1 %vm11381_vm4, %v14439_v12 }
 0x48b   : > { %v2771_v11 = vpop.xlane.xlu1 %2770  ;;  %v2778_v46 = vmul.f32 %v11146_v9, %v12423_v37 }
 0x48c   : > { %11151 = vrcp.f32 %v2771_v11 }
 0x48d   : > { %10377 = vmatmul.mubr.msk.f32.gmra.mrb[132].mxu1 %vm2432_vm9, %v2778_v46 }
 0x48e   : > { %v11148_v33 = vpop.eup %11147  ;;  %10379 = vmatprep.mubr.msk.f32.mxu1 %vm11381_vm4, %v14439_v12 }
 0x48f   : > { %v2779_v61 = vmul.f32 %v11148_v33, %v12427_v57  ;;  %v2596_v57 = vld [vmem:[%s11562_s22] sm:$0xf]  ;;  %v14480_v33 = vpack.c.bf16 %v12162_v63, %v12155_v27 }
 0x490   : > { %v2971_v51 = vsel %vm2901_vm10, %v2596_v57, 0  ;;  %v14481_v57 = vpack.c.bf16 %v12185_v18, %v12179_v21  ;;  %v11313_v21 = vld [vmem:[%s14412_s8 + $0x2] ss:$0 sm:$0xff] }
 0x491   : > { %10380 = vmatmul.mubr.msk.f32.gmra.mrb[134].mxu1 %vm2432_vm9, %v2779_v61  ;;  %v1385_v18 = vadd.f32 %v11313_v21, %v11978_v15  ;;  %v1396_v15 = vadd.f32 %v11313_v21, %v11994_v35 }
 0x492   : > { %v11150_v38 = vpop.eup %11149  ;;  %10382 = vmatprep.mubr.msk.f32.mxu1 %vm11381_vm4, %v14439_v12  ;;  %10403 = vmatpush3.bf16.msra.mxu1 %v2971_v51 }
 0x493   : > { %v2780_v23 = vmul.f32 %v11150_v38, %v12440_v44  ;;  %10852 = vmatprep.subr.bf16.mxu1 %v14441_v16  ;;  %v8989_v44 = vld [vmem:[%s11562_s22 + $0x4] sm:$0xf] }
 0x494   : > { %v2903_v19 = vsel %vm2901_vm10, %v8989_v44, 0  ;;  %v1791_v44 = vadd.f32 %v12143_v8, %v12198_v4  ;;  %v1393_v8 = vadd.f32 %v11313_v21, %v11990_v32 }
 0x495   : > { %10383 = vmatmul.mubr.msk.f32.gmra.mrb[136].mxu1 %vm2432_vm9, %v2780_v23  ;;  %10389 = vmatpush3.bf16.msra.mxu0 %v2903_v19  ;;  %v1388_v19 = vadd.f32 %v11313_v21, %v11982_v20  ;;  %v1401_v20 = vadd.f32 %v11313_v21, %v12002_v45 }
 0x496   : > { %v11152_v37 = vpop.eup %11151  ;;  %10385 = vmatprep.mubr.msk.f32.mxu1 %vm11381_vm4, %v14439_v12  ;;  %10844 = vmatprep.subr.bf16.mxu0 %v14441_v16 }
 0x497   : > { %v2781_v62 = vmul.f32 %v11152_v37, %v12446_v55 }
 0x499   : > { %10386 = vmatmul.mubr.msk.f32.gmra.mrb[138].mxu1 %vm2432_vm9, %v2781_v62 }
 0x49a   : > { %10404 = vmatprep.mubr.msk.bf16.mxu1 %vm11381_vm4, %v14439_v12 }
 0x548   : > { %v2569_v1 = vpop.f32.mrb[120].mxu1 }
 0x549   : > { %v10325_v55 = vpop.f32.mrb[121].mxu1 }
 0x54c   : > { %v2574_v43 = vpop.f32.mrb[122].mxu1 }
 0x54d   : > { %v2593_v34 = vpack.c.bf16 %v2574_v43, %v2569_v1  ;;  %v10328_v56 = vpop.f32.mrb[123].mxu1 }
 0x54f   : > { %10405 = vmatmul.mubr.msk.bf16.vlgmr.msra.gmra.mrb[140].mxu1 %vm2301_vm6, %v2593_v34 }
 0x550   : > { %10854 = vmatpush3.bf16.msra.mxu1 %v14478_v2  ;;  %v2579_v47 = vpop.f32.mrb[124].mxu1  ;;  %10408 = vmatprep.mubr.msk.bf16.mxu1 %vm11381_vm4, %v14439_v12 }
 0x551   : > { %v10331_v30 = vpop.f32.mrb[125].mxu1  ;;  %10855 = vmatprep.subr.bf16.mxu1 %v14441_v16 }
 0x554   : > { %10857 = vmatpush3.bf16.msra.mxu1 %v14479_v59  ;;  %v2584_v60 = vpop.f32.mrb[126].mxu1 }
 0x555   : > { %v2594_v3 = vpack.c.bf16 %v2584_v60, %v2579_v47  ;;  %v10334_v42 = vpop.f32.mrb[127].mxu1  ;;  %10449 = vmatprep.subr.mxu1 %v14439_v12 }
 0x557   : > { %10409 = vmatmul.mubr.msk.bf16.gmra.mrb[144].mxu1 %vm2301_vm6, %v2594_v3 }
 0x558   : > { %10450 = vmatpush3.msra.mxu1 %v2181_v36  ;;  %v2589_v22 = vpop.f32.mrb[128].mxu1  ;;  %10412 = vmatprep.mubr.msk.bf16.mxu1 %vm11381_vm4, %v14439_v12 }
 0x559   : > { %v10337_v9 = vpop.f32.mrb[129].mxu1  ;;  %10858 = vmatprep.subr.bf16.mxu1 %v14441_v16  ;;  %v2595_v6 = vpack.c.bf16 %v2589_v22, %v2589_v22 }
 0x55c   : > { %v2863_v31 = vpop.f32.mrb[130].mxu1 }
 0x55d   : > { %v10375_v11 = vpop.f32.mrb[131].mxu1 }
 0x55f   : > { %10413 = vmatmul.mubr.msk.bf16.gmra.mrb[148].mxu1 %vm2301_vm6, %v2595_v6 }
 0x560   : > { %v2868_v46 = vpop.f32.mrb[132].mxu1  ;;  %10451 = vmatprep.mubr.msk.f32.mxu1 %vm11381_vm4, %v14439_v12 }
 0x561   : > { %v2887_v48 = vpack.c.bf16 %v2868_v46, %v2863_v31  ;;  %v10378_v52 = vpop.f32.mrb[133].mxu1 }
 0x563   : > { %10391 = vmatmul.mubr.msk.bf16.vlgmr.msra.gmra.mrb[140].mxu0 %vm2301_vm6, %v2887_v48 }
 0x564   : > { %10847 = vmatpush3.bf16.xpose.msk.msra.mxu0 %vm12056_vm7, %v14480_v33  ;;  %v2873_v61 = vpop.f32.mrb[134].mxu1  ;;  %10394 = vmatprep.mubr.msk.bf16.mxu0 %vm11381_vm4, %v14439_v12 }
 0x565   : > { %v10381_v38 = vpop.f32.mrb[135].mxu1  ;;  %10848 = vmatprep.subr.bf16.mxu0 %v14441_v16 }
 0x568   : > { %v2878_v23 = vpop.f32.mrb[136].mxu1 }
 0x569   : > { %v2888_v37 = vpack.c.bf16 %v2878_v23, %v2873_v61  ;;  %v10384_v62 = vpop.f32.mrb[137].mxu1 }
 0x56b   : > { %10395 = vmatmul.mubr.msk.bf16.gmra.mrb[144].mxu0 %vm2301_vm6, %v2888_v37 }
 0x56c   : > { %10851 = vmatpush3.bf16.xpose.msk.msra.mxu0 %vm12056_vm7, %v14481_v57  ;;  %v2883_v27 = vpop.f32.mrb[138].mxu1  ;;  %10398 = vmatprep.mubr.msk.bf16.mxu0 %vm11381_vm4, %v14439_v12 }
 0x56d   : > { %v10387_v63 = vpop.f32.mrb[139].mxu1  ;;  %10424 = vmatprep.subr.mxu0 %v14439_v12  ;;  %v2889_v51 = vpack.c.bf16 %v2883_v27, %v2883_v27 }
 0x573   : > { %10399 = vmatmul.mubr.msk.bf16.gmra.mrb[148].mxu0 %vm2301_vm6, %v2889_v51 }
 0x574   : > { %10425 = vmatpush3.xpose.msk.msra.mxu0 %vm2301_vm6, %v1791_v44  ;;  %10426 = vmatprep.mubr.msk.f32.mxu0 %vm11381_vm4, %v14439_v12 }
 0x575   : > { %10466 = vmatprep.subr.bf16.mxu0 %v14439_v12 }
 0x57b   : > { %10427 = vmatmul.mubr.msk.f32.vlgmr.msra.gmra.mrb[152].mxu0 %vm2301_vm6, %v1385_v18 }
 0x57c   : > { %10429 = vmatprep.mubr.msk.f32.mxu0 %vm11381_vm4, %v14439_v12 }
 0x57f   : > { %10430 = vmatmul.mubr.msk.f32.gmra.mrb[154].mxu0 %vm2301_vm6, %v1388_v19 }
 0x580   : > { %10432 = vmatprep.mubr.msk.f32.mxu0 %vm11381_vm4, %v14439_v12 }
 0x583   : > { %10433 = vmatmul.mubr.msk.f32.gmra.mrb[156].mxu0 %vm2301_vm6, %v1393_v8 }
 0x584   : > { %10435 = vmatprep.mubr.msk.f32.mxu0 %vm11381_vm4, %v14439_v12 }
 0x587   : > { %10436 = vmatmul.mubr.msk.f32.gmra.mrb[158].mxu0 %vm2301_vm6, %v1396_v15 }
 0x588   : > { %10438 = vmatprep.mubr.msk.f32.mxu0 %vm11381_vm4, %v14439_v12 }
 0x58b   : > { %10439 = vmatmul.mubr.msk.f32.gmra.mrb[160].mxu0 %vm2301_vm6, %v1401_v20 }
 0x58c   : > { %10468 = vmatprep.mubr.msk.bf16.mxu0 %vm11381_vm4, %v14439_v12 }
 0x622   : > { %v3007_v32 = vpop.f32.mrb[140].mxu1 }
 0x623   : > { %v10406_v4 = vpop.f32.mrb[141].mxu1 }
 0x624   : > { %v3010_v1 = vpop.f32.mrb[142].mxu1 }
 0x625   : > { %v10407_v55 = vpop.f32.mrb[143].mxu1 }
 0x62a   : > { %v3015_v43 = vpop.f32.mrb[144].mxu1 }
 0x62b   : > { %v10410_v34 = vpop.f32.mrb[145].mxu1 }
 0x62c   : > { %v3018_v56 = vpop.f32.mrb[146].mxu1 }
 0x62d   : > { %v10411_v35 = vpop.f32.mrb[147].mxu1 }
 0x632   : > { %v3023_v2 = vpop.f32.mrb[148].mxu1 }
 0x633   : > { %v10414_v47 = vpop.f32.mrb[149].mxu1 }
 0x634   : > { %v3026_v30 = vpop.f32.mrb[150].mxu1 }
 0x635   : > { %v10415_v59 = vpop.f32.mrb[151].mxu1 }
 0x636   : > { %v2939_v60 = vpop.f32.mrb[140].mxu0 }
 0x637   : > { %v10392_v3 = vpop.f32.mrb[141].mxu0  ;;  %v12634_v45 = vadd.f32 %v3007_v32, %v2939_v60 }
 0x638   : > { %v2942_v42 = vpop.f32.mrb[142].mxu0 }
 0x639   : > { %v10393_v36 = vpop.f32.mrb[143].mxu0  ;;  %v12636_v22 = vadd.f32 %v3010_v1, %v2942_v42 }
 0x63e   : > { %v2947_v9 = vpop.f32.mrb[144].mxu0 }
 0x63f   : > { %v10396_v31 = vpop.f32.mrb[145].mxu0  ;;  %v12638_v6 = vadd.f32 %v3015_v43, %v2947_v9 }
 0x640   : > { %v2950_v11 = vpop.f32.mrb[146].mxu0 }
 0x641   : > { %v10397_v46 = vpop.f32.mrb[147].mxu0  ;;  %v12640_v48 = vadd.f32 %v3018_v56, %v2950_v11 }
 0x646   : > { %v2955_v52 = vpop.f32.mrb[148].mxu0 }
 0x647   : > { %v10400_v33 = vpop.f32.mrb[149].mxu0  ;;  %v12642_v61 = vadd.f32 %v3023_v2, %v2955_v52 }
 0x648   : > { %v2958_v38 = vpop.f32.mrb[150].mxu0 }
 0x649   : > { %v10401_v23 = vpop.f32.mrb[151].mxu0 }
 0x64e   : > { %v3125_v37 = vpop.f32.mrb[152].mxu0 }
 0x64f   : > { %v3149_v62 = vmul.f32 0.35355338, %v3125_v37  ;;  %v10428_v57 = vpop.f32.mrb[153].mxu0 }
 0x651   : > { %v3154_v27 = vadd.f32 %v3149_v62, %v12288_v26 }
 0x652   : > { %v3130_v63 = vpop.f32.mrb[154].mxu0 }
 0x653   : > { %v3150_v51 = vmul.f32 0.35355338, %v3130_v63  ;;  %v10431_v44 = vpop.f32.mrb[155].mxu0  ;;  %v3159_v21 = vsel %vm2432_vm9, %v3154_v27, -inf }
 0x654   : > { %3160 = vmax.xlane.f32.xlu0 %v3159_v21 }
 0x655   : > { %v3155_v18 = vadd.f32 %v3150_v51, %v12288_v26 }
 0x656   : > { %v3135_v19 = vpop.f32.mrb[156].mxu0 }
 0x657   : > { %v3151_v8 = vmul.f32 0.35355338, %v3135_v19  ;;  %v10434_v15 = vpop.f32.mrb[157].mxu0  ;;  %v3162_v20 = vsel %vm2432_vm9, %v3155_v18, -inf }
 0x658   : > { %3163 = vmax.xlane.f32.xlu1 %v3162_v20 }
 0x659   : > { %v3156_v32 = vadd.f32 %v3151_v8, %v12288_v26 }
 0x65a   : > { %v3140_v4 = vpop.f32.mrb[158].mxu0 }
 0x65b   : > { %v3152_v1 = vmul.f32 0.35355338, %v3140_v4  ;;  %v10437_v55 = vpop.f32.mrb[159].mxu0  ;;  %v3165_v43 = vsel %vm2432_vm9, %v3156_v32, -inf }
 0x65c   : > { %3166 = vmax.xlane.f32.xlu0 %v3165_v43 }
 0x65d   : > { %v3157_v34 = vadd.f32 %v3152_v1, %v12288_v26 }
 0x65e   : > { %v3145_v56 = vpop.f32.mrb[160].mxu0 }
 0x65f   : > { %v3153_v35 = vmul.f32 0.35355338, %v3145_v56  ;;  %v10440_v2 = vpop.f32.mrb[161].mxu0  ;;  %v3168_v47 = vsel %vm2432_vm9, %v3157_v34, -inf }
 0x660   : > { %3169 = vmax.xlane.f32.xlu1 %v3168_v47 }
 0x661   : > { %v3158_v30 = vadd.f32 %v3153_v35, %v12288_v26  ;;  %v14482_v35 = vpack.c.bf16 %v12357_v14, %v12354_v5  ;;  %v14483_v14 = vpack.c.bf16 %v12365_v13, %v12362_v58  ;;  %v11314_v58 = vld [vmem:[%s14412_s8 + $0x3] ss:$0 sm:$0xff] }
 0x662   : > { %v1483_v13 = vadd.f32 %v11314_v58, %v11984_v24  ;;  %v14485_v24 = vpack.c.bf16 %v12486_v17, %v12483_v10  ;;  %v14489_v17 = vld [vmem:[#allocation24_spill] sm:$0xff] }
 0x663   : > { %v3171_v59 = vsel %vm2432_vm9, %v3158_v30, -inf }
 0x664   : > { %3172 = vmax.xlane.f32.xlu0 %v3171_v59 }
 0x6e1   : > { %v3161_v60 = vpop.xlane.xlu0 %3160 }
 0x6e2   : > { %v3174_v3 = vsub.f32 %v3154_v27, %v3161_v60 }
 0x6e4   : > { %v3179_v42 = vmul.f32 1.442695, %v3174_v3 }
 0x6e5   : > { %v3164_v36 = vpop.xlane.xlu1 %3163 }
 0x6e6   : > { %11153 = vpow2.f32 %v3179_v42  ;;  %v3175_v9 = vsub.f32 %v3155_v18, %v3164_v36  ;;  %v1889_v36 = vadd.f32 %v12349_v54, %v12367_v7  ;;  %v1486_v7 = vadd.f32 %v11314_v58, %v11986_v28  ;;  %v14486_v54 = vld [vmem:[#allocation21_spill] sm:$0xff]  ;;  %v14488_v28 = vld [vmem:[#allocation22_spill] sm:$0xff] }
 0x6e7   : > { %v1494_v10 = vadd.f32 %v11314_v58, %v14488_v28 }
 0x6e8   : > { %v3181_v31 = vmul.f32 1.442695, %v3175_v9  ;;  %v14484_v9 = vpack.c.bf16 %v12478_v25, %v12475_v40  ;;  %v1491_v40 = vadd.f32 %v11314_v58, %v14486_v54  ;;  %v14487_v25 = vld [vmem:[#allocation67_spill] sm:$0xff] }
 0x6e9   : > { %v3167_v11 = vpop.xlane.xlu0 %3166 }
 0x6ea   : > { %11155 = vpow2.f32 %v3181_v31  ;;  %v3176_v46 = vsub.f32 %v3156_v32, %v3167_v11  ;;  %v2279_v31 = vadd.f32 %v12467_v29, %v14487_v25  ;;  %v1499_v11 = vadd.f32 %v11314_v58, %v14489_v17  ;;  %v9011_v29 = vld [vmem:[%s11562_s22 + $0x8] sm:$0xf] }
 0x6ec   : > { %v3183_v52 = vmul.f32 1.442695, %v3176_v46  ;;  %v3334_v46 = vsel %vm2901_vm10, %v9011_v29, 0 }
 0x6ed   : > { %v3170_v33 = vpop.xlane.xlu1 %3169  ;;  %10467 = vmatpush3.bf16.msra.mxu0 %v3334_v46 }
 0x6ee   : > { %11157 = vpow2.f32 %v3183_v52  ;;  %v3177_v38 = vsub.f32 %v3157_v34, %v3170_v33  ;;  %10530 = vmatprep.subr.bf16.mxu0 %v14439_v12 }
 0x6f0   : > { %v11154_v23 = vpop.eup %11153  ;;  %v3185_v37 = vmul.f32 1.442695, %v3177_v38 }
 0x6f1   : > { %v3173_v62 = vpop.xlane.xlu0 %3172  ;;  %v3189_v57 = vsel %vm2432_vm9, %v11154_v23, 0.0 }
 0x6f2   : > { %11159 = vpow2.f32 %v3185_v37  ;;  %v3178_v63 = vsub.f32 %v3158_v30, %v3173_v62  ;;  %3190 = vadd.xlane.f32.xlu1 %v3189_v57 }
 0x6f4   : > { %v11156_v27 = vpop.eup %11155  ;;  %v3187_v51 = vmul.f32 1.442695, %v3178_v63 }
 0x6f5   : > { %v3192_v44 = vsel %vm2432_vm9, %v11156_v27, 0.0 }
 0x6f6   : > { %11161 = vpow2.f32 %v3187_v51  ;;  %3193 = vadd.xlane.f32.xlu0 %v3192_v44 }
 0x6f8   : > { %v11158_v21 = vpop.eup %11157 }
 0x6f9   : > { %v3195_v18 = vsel %vm2432_vm9, %v11158_v21, 0.0 }
 0x6fa   : > { %3196 = vadd.xlane.f32.xlu1 %v3195_v18 }
 0x6fc   : > { %v11160_v19 = vpop.eup %11159 }
 0x6fd   : > { %v3198_v8 = vsel %vm2432_vm9, %v11160_v19, 0.0 }
 0x6fe   : > { %3199 = vadd.xlane.f32.xlu0 %v3198_v8 }
 0x700   : > { %v11162_v15 = vpop.eup %11161 }
 0x701   : > { %v3201_v20 = vsel %vm2432_vm9, %v11162_v15, 0.0 }
 0x702   : > { %3202 = vadd.xlane.f32.xlu1 %v3201_v20 }
 0x77f   : > { %v3191_v32 = vpop.xlane.xlu1 %3190 }
 0x780   : > { %11163 = vrcp.f32 %v3191_v32 }
 0x783   : > { %v3194_v4 = vpop.xlane.xlu0 %3193 }
 0x784   : > { %11165 = vrcp.f32 %v3194_v4 }
 0x787   : > { %v3197_v1 = vpop.xlane.xlu1 %3196 }
 0x788   : > { %11167 = vrcp.f32 %v3197_v1 }
 0x78a   : > { %v11164_v55 = vpop.eup %11163 }
 0x78b   : > { %v3209_v43 = vmul.f32 %v11164_v55, %v11154_v23  ;;  %v3200_v34 = vpop.xlane.xlu0 %3199 }
 0x78c   : > { %11169 = vrcp.f32 %v3200_v34 }
 0x78d   : > { %10452 = vmatmul.mubr.msk.f32.vlgmr.msra.gmra.mrb[152].mxu1 %vm2432_vm9, %v3209_v43 }
 0x78e   : > { %v11166_v56 = vpop.eup %11165  ;;  %10861 = vmatpush3.bf16.xpose.msk.msra.mxu1 %vm12056_vm7, %v14482_v35  ;;  %10454 = vmatprep.mubr.msk.f32.mxu1 %vm11381_vm4, %v14439_v12 }
 0x78f   : > { %v3203_v2 = vpop.xlane.xlu1 %3202  ;;  %v3210_v47 = vmul.f32 %v11166_v56, %v11156_v27  ;;  %10862 = vmatprep.subr.bf16.mxu1 %v14441_v16 }
 0x790   : > { %11171 = vrcp.f32 %v3203_v2 }
 0x791   : > { %10455 = vmatmul.mubr.msk.f32.gmra.mrb[154].mxu1 %vm2432_vm9, %v3210_v47 }
 0x792   : > { %v11168_v30 = vpop.eup %11167  ;;  %10457 = vmatprep.mubr.msk.f32.mxu1 %vm11381_vm4, %v14439_v12 }
 0x793   : > { %v3211_v59 = vmul.f32 %v11168_v30, %v11158_v21 }
 0x795   : > { %10458 = vmatmul.mubr.msk.f32.gmra.mrb[156].mxu1 %vm2432_vm9, %v3211_v59 }
 0x796   : > { %v11170_v5 = vpop.eup %11169  ;;  %10865 = vmatpush3.bf16.xpose.msk.msra.mxu1 %vm12056_vm7, %v14483_v14  ;;  %10460 = vmatprep.mubr.msk.f32.mxu1 %vm11381_vm4, %v14439_v12 }
 0x797   : > { %v3212_v60 = vmul.f32 %v11170_v5, %v11160_v19  ;;  %10488 = vmatprep.subr.mxu1 %v14439_v12 }
 0x799   : > { %10461 = vmatmul.mubr.msk.f32.gmra.mrb[158].mxu1 %vm2432_vm9, %v3212_v60 }
 0x79a   : > { %v11172_v3 = vpop.eup %11171  ;;  %10463 = vmatprep.mubr.msk.f32.mxu1 %vm11381_vm4, %v14439_v12 }
 0x79b   : > { %v3213_v42 = vmul.f32 %v11172_v3, %v11162_v15 }
 0x79d   : > { %10464 = vmatmul.mubr.msk.f32.gmra.mrb[160].mxu1 %vm2432_vm9, %v3213_v42 }
 0x79e   : > { %10489 = vmatpush3.xpose.msk.msra.mxu1 %vm2301_vm6, %v1889_v36  ;;  %10490 = vmatprep.mubr.msk.f32.mxu1 %vm11381_vm4, %v14439_v12 }
 0x79f   : > { %10866 = vmatprep.subr.bf16.mxu1 %v14441_v16 }
 0x7a1   : > { %10491 = vmatmul.mubr.msk.f32.vlgmr.msra.gmra.mrb[162].mxu1 %vm2301_vm6, %v1483_v13 }
 0x7a2   : > { %10868 = vmatpush3.bf16.msra.mxu1 %v14484_v9  ;;  %10493 = vmatprep.mubr.msk.f32.mxu1 %vm11381_vm4, %v14439_v12 }
 0x7a3   : > { %10869 = vmatprep.subr.bf16.mxu1 %v14441_v16 }
 0x7a5   : > { %10494 = vmatmul.mubr.msk.f32.gmra.mrb[164].mxu1 %vm2301_vm6, %v1486_v7 }
 0x7a6   : > { %10871 = vmatpush3.bf16.msra.mxu1 %v14485_v24  ;;  %10496 = vmatprep.mubr.msk.f32.mxu1 %vm11381_vm4, %v14439_v12 }
 0x7a7   : > { %10513 = vmatprep.subr.mxu1 %v14439_v12 }
 0x7a9   : > { %10497 = vmatmul.mubr.msk.f32.gmra.mrb[166].mxu1 %vm2301_vm6, %v1491_v40 }
 0x7aa   : > { %10514 = vmatpush3.msra.mxu1 %v2279_v31  ;;  %10499 = vmatprep.mubr.msk.f32.mxu1 %vm11381_vm4, %v14439_v12 }
 0x7ab   : > { %10872 = vmatprep.subr.bf16.mxu1 %v14441_v16 }
 0x7ad   : > { %10500 = vmatmul.mubr.msk.f32.gmra.mrb[168].mxu1 %vm2301_vm6, %v1494_v10 }
 0x7ae   : > { %10502 = vmatprep.mubr.msk.f32.mxu1 %vm11381_vm4, %v14439_v12 }
 0x7b1   : > { %10503 = vmatmul.mubr.msk.f32.gmra.mrb[170].mxu1 %vm2301_vm6, %v1499_v11 }
 0x7b2   : > { %10515 = vmatprep.mubr.msk.f32.mxu1 %vm11381_vm4, %v14439_v12 }
 0x860   : > { %v3295_v52 = vpop.f32.mrb[152].mxu1 }
 0x861   : > { %v10453_v33 = vpop.f32.mrb[153].mxu1 }
 0x864   : > { %v3300_v38 = vpop.f32.mrb[154].mxu1 }
 0x865   : > { %v3319_v23 = vpack.c.bf16 %v3300_v38, %v3295_v52  ;;  %v10456_v37 = vpop.f32.mrb[155].mxu1 }
 0x867   : > { %10469 = vmatmul.mubr.msk.bf16.vlgmr.msra.gmra.mrb[164].mxu0 %vm2301_vm6, %v3319_v23 }
 0x868   : > { %v3305_v62 = vpop.f32.mrb[156].mxu1  ;;  %10472 = vmatprep.mubr.msk.bf16.mxu0 %vm11381_vm4, %v14439_v12 }
 0x869   : > { %v10459_v57 = vpop.f32.mrb[157].mxu1 }
 0x86c   : > { %v3310_v63 = vpop.f32.mrb[158].mxu1 }
 0x86d   : > { %v3320_v27 = vpack.c.bf16 %v3310_v63, %v3305_v62  ;;  %v10462_v51 = vpop.f32.mrb[159].mxu1 }
 0x86f   : > { %10473 = vmatmul.mubr.msk.bf16.gmra.mrb[168].mxu0 %vm2301_vm6, %v3320_v27 }
 0x870   : > { %v3315_v44 = vpop.f32.mrb[160].mxu1  ;;  %10476 = vmatprep.mubr.msk.bf16.mxu0 %vm11381_vm4, %v14439_v12 }
 0x871   : > { %v10465_v21 = vpop.f32.mrb[161].mxu1  ;;  %v3321_v19 = vpack.c.bf16 %v3315_v44, %v3315_v44 }
 0x874   : > { %v3493_v18 = vpop.f32.mrb[162].mxu1 }
 0x875   : > { %v3517_v8 = vmul.f32 0.35355338, %v3493_v18  ;;  %v10492_v15 = vpop.f32.mrb[163].mxu1 }
 0x877   : > { %10477 = vmatmul.mubr.msk.bf16.gmra.mrb[172].mxu0 %vm2301_vm6, %v3321_v19  ;;  %v3522_v20 = vadd.f32 %v3517_v8, %v12288_v26 }
 0x878   : > { %v3498_v32 = vpop.f32.mrb[164].mxu1  ;;  %10532 = vmatprep.mubr.msk.bf16.mxu0 %vm11381_vm4, %v14439_v12 }
 0x879   : > { %v3518_v4 = vmul.f32 0.35355338, %v3498_v32  ;;  %v10495_v1 = vpop.f32.mrb[165].mxu1  ;;  %v3527_v55 = vsel %vm2432_vm9, %v3522_v20, -inf }
 0x87a   : > { %3528 = vmax.xlane.f32.xlu0 %v3527_v55 }
 0x87b   : > { %v3523_v43 = vadd.f32 %v3518_v4, %v12288_v26 }
 0x87c   : > { %v3503_v34 = vpop.f32.mrb[166].mxu1 }
 0x87d   : > { %v3519_v56 = vmul.f32 0.35355338, %v3503_v34  ;;  %v10498_v35 = vpop.f32.mrb[167].mxu1  ;;  %v3530_v2 = vsel %vm2432_vm9, %v3523_v43, -inf }
 0x87e   : > { %3531 = vmax.xlane.f32.xlu1 %v3530_v2 }
 0x87f   : > { %v3524_v47 = vadd.f32 %v3519_v56, %v12288_v26 }
 0x880   : > { %v3508_v30 = vpop.f32.mrb[168].mxu1 }
 0x881   : > { %v3520_v59 = vmul.f32 0.35355338, %v3508_v30  ;;  %v10501_v5 = vpop.f32.mrb[169].mxu1  ;;  %v3533_v14 = vsel %vm2432_vm9, %v3524_v47, -inf }
 0x882   : > { %3534 = vmax.xlane.f32.xlu0 %v3533_v14 }
 0x883   : > { %v3525_v60 = vadd.f32 %v3520_v59, %v12288_v26 }
 0x884   : > { %v3513_v3 = vpop.f32.mrb[170].mxu1 }
 0x885   : > { %v3521_v42 = vmul.f32 0.35355338, %v3513_v3  ;;  %v10504_v36 = vpop.f32.mrb[171].mxu1  ;;  %v3536_v58 = vsel %vm2432_vm9, %v3525_v60, -inf }
 0x886   : > { %3537 = vmax.xlane.f32.xlu1 %v3536_v58  ;;  %v14491_v36 = vld [vmem:[#allocation34_spill] sm:$0xff] }
 0x887   : > { %v3526_v13 = vadd.f32 %v3521_v42, %v12288_v26  ;;  %v14490_v42 = vld [vmem:[#allocation35_spill] sm:$0xff] }
 0x889   : > { %v3539_v9 = vsel %vm2432_vm9, %v3526_v13, -inf }
 0x88a   : > { %3540 = vmax.xlane.f32.xlu0 %v3539_v9 }
 0x907   : > { %v3529_v7 = vpop.xlane.xlu0 %3528 }
 0x908   : > { %v3542_v24 = vsub.f32 %v3522_v20, %v3529_v7 }
 0x90a   : > { %v3547_v54 = vmul.f32 1.442695, %v3542_v24 }
 0x90b   : > { %v3532_v40 = vpop.xlane.xlu1 %3531 }
 0x90c   : > { %11173 = vpow2.f32 %v3547_v54  ;;  %v3543_v25 = vsub.f32 %v3523_v43, %v3532_v40  ;;  %v14493_v54 = vld [vmem:[#allocation39_spill] sm:$0xff]  ;;  %v14494_v40 = vld [vmem:[#allocation37_spill] sm:$0xff] }
 0x90e   : > { %v3549_v31 = vmul.f32 1.442695, %v3543_v25  ;;  %v14495_v25 = vpack.c.bf16 %v14493_v54, %v14494_v40 }
 0x90f   : > { %v3535_v28 = vpop.xlane.xlu0 %3534 }
 0x910   : > { %11175 = vpow2.f32 %v3549_v31  ;;  %v3544_v10 = vsub.f32 %v3524_v47, %v3535_v28 }
 0x912   : > { %v3551_v17 = vmul.f32 1.442695, %v3544_v10 }
 0x913   : > { %v3538_v11 = vpop.xlane.xlu1 %3537 }
 0x914   : > { %11177 = vpow2.f32 %v3551_v17  ;;  %v3545_v29 = vsub.f32 %v3525_v60, %v3538_v11  ;;  %v14496_v17 = vld [vmem:[#allocation40_spill] sm:$0xff]  ;;  %v14497_v11 = vld [vmem:[#allocation11_spill] sm:$0xff] }
 0x916   : > { %v11174_v46 = vpop.eup %11173  ;;  %v3553_v52 = vmul.f32 1.442695, %v3545_v29  ;;  %v14498_v29 = vld [vmem:[#allocation38_spill] sm:$0xff] }
 0x917   : > { %v3541_v33 = vpop.xlane.xlu0 %3540  ;;  %v3557_v38 = vsel %vm2432_vm9, %v11174_v46, 0.0 }
 0x918   : > { %11179 = vpow2.f32 %v3553_v52  ;;  %v3546_v23 = vsub.f32 %v3526_v13, %v3541_v33  ;;  %3558 = vadd.xlane.f32.xlu1 %v3557_v38  ;;  %v14501_v33 = vld [vmem:[#allocation13_spill] sm:$0xff]  ;;  %v14502_v38 = vld [vmem:[#allocation14_spill] sm:$0xff] }
 0x91a   : > { %v11176_v37 = vpop.eup %11175  ;;  %v3555_v62 = vmul.f32 1.442695, %v3546_v23  ;;  %v14503_v23 = vld [vmem:[#allocation57_spill] sm:$0xff] }
 0x91b   : > { %v3560_v57 = vsel %vm2432_vm9, %v11176_v37, 0.0 }
 0x91c   : > { %11181 = vpow2.f32 %v3555_v62  ;;  %3561 = vadd.xlane.f32.xlu0 %v3560_v57  ;;  %v14506_v57 = vld [vmem:[#allocation17_spill] sm:$0xff] }
 0x91e   : > { %v11178_v63 = vpop.eup %11177 }
 0x91f   : > { %v3563_v27 = vsel %vm2432_vm9, %v11178_v63, 0.0 }
 0x920   : > { %3564 = vadd.xlane.f32.xlu1 %v3563_v27  ;;  %v14507_v27 = vld [vmem:[#allocation58_spill] sm:$0xff] }
 0x922   : > { %v11180_v51 = vpop.eup %11179 }
 0x923   : > { %v3566_v44 = vsel %vm2432_vm9, %v11180_v51, 0.0 }
 0x924   : > { %3567 = vadd.xlane.f32.xlu0 %v3566_v44  ;;  %v14508_v44 = vld [vmem:[#allocation18_spill] sm:$0xff] }
 0x926   : > { %v11182_v21 = vpop.eup %11181 }
 0x927   : > { %v3569_v18 = vsel %vm2432_vm9, %v11182_v21, 0.0 }
 0x928   : > { %3570 = vadd.xlane.f32.xlu1 %v3569_v18  ;;  %v14510_v18 = vld [vmem:[#allocation64_spill] sm:$0xff] }
 0x93a   : > { %v3370_v19 = vpop.f32.mrb[164].mxu0 }
 0x93b   : > { %v12750_v8 = vadd.f32 %v3370_v19, %v12634_v45  ;;  %v10470_v15 = vpop.f32.mrb[165].mxu0  ;;  %v14511_v19 = vld [vmem:[#allocation15_spill] sm:$0xff] }
 0x93c   : > { %v3373_v20 = vpop.f32.mrb[166].mxu0  ;;  %v14512_v15 = vld [vmem:[#allocation65_spill] sm:$0xff] }
 0x93d   : > { %v12753_v32 = vadd.f32 %v3373_v20, %v12636_v22  ;;  %v10471_v4 = vpop.f32.mrb[167].mxu0  ;;  %v14513_v20 = vld [vmem:[#allocation16_spill] sm:$0xff] }
 0x93e   : > { %v14514_v4 = vld [vmem:[#allocation66_spill] sm:$0xff] }
 0x942   : > { %v3378_v1 = vpop.f32.mrb[168].mxu0 }
 0x943   : > { %v12756_v55 = vadd.f32 %v3378_v1, %v12638_v6  ;;  %v10474_v43 = vpop.f32.mrb[169].mxu0  ;;  %v14515_v1 = vld [vmem:[#allocation19_spill] sm:$0xff] }
 0x944   : > { %v3381_v34 = vpop.f32.mrb[170].mxu0  ;;  %v14516_v43 = vld [vmem:[#allocation20_spill] sm:$0xff] }
 0x945   : > { %v12759_v56 = vadd.f32 %v3381_v34, %v12640_v48  ;;  %v10475_v35 = vpop.f32.mrb[171].mxu0  ;;  %v9030_v34 = vld [vmem:[%s11562_s22 + $0xc] sm:$0xf] }
 0x946   : > { %v3702_v35 = vsel %vm2901_vm10, %v9030_v34, 0 }
 0x947   : > { %10531 = vmatpush3.bf16.msra.mxu0 %v3702_v35 }
 0x948   : > { %10880 = vmatprep.subr.bf16.mxu0 %v14441_v16 }
 0x94a   : > { %v3386_v2 = vpop.f32.mrb[172].mxu0 }
 0x94b   : > { %v12762_v45 = vadd.f32 %v3386_v2, %v12642_v61  ;;  %v10478_v47 = vpop.f32.mrb[173].mxu0  ;;  %v14492_v61 = vpack.c.bf16 %v14490_v42, %v14491_v36  ;;  %v14521_v42 = vld [vmem:[#allocation48_spill] sm:$0xff] }
 0x94c   : > { %v3389_v30 = vpop.f32.mrb[174].mxu0 }
 0x94d   : > { %v10479_v59 = vpop.f32.mrb[175].mxu0 }
 0x9a5   : > { %v3559_v22 = vpop.xlane.xlu1 %3558 }
 0x9a6   : > { %11183 = vrcp.f32 %v3559_v22 }
 0x9a9   : > { %v3562_v5 = vpop.xlane.xlu0 %3561 }
 0x9aa   : > { %11185 = vrcp.f32 %v3562_v5  ;;  %v14517_v5 = vld [vmem:[#allocation47_spill] sm:$0xff] }
 0x9ad   : > { %v3565_v14 = vpop.xlane.xlu1 %3564 }
 0x9ae   : > { %11187 = vrcp.f32 %v3565_v14  ;;  %v14518_v14 = vld [vmem:[#allocation46_spill] sm:$0xff] }
 0x9b0   : > { %v11184_v6 = vpop.eup %11183 }
 0x9b1   : > { %v3577_v60 = vmul.f32 %v11184_v6, %v11174_v46  ;;  %v3568_v3 = vpop.xlane.xlu0 %3567  ;;  %v14499_v46 = vld [vmem:[#allocation36_spill] sm:$0xff]  ;;  %v14519_v6 = vpack.c.bf16 %v14517_v5, %v14518_v14 }
 0x9b2   : > { %11189 = vrcp.f32 %v3568_v3  ;;  %v14500_v52 = vpack.c.bf16 %v14498_v29, %v14499_v46 }
 0x9b3   : > { %10516 = vmatmul.mubr.msk.f32.vlgmr.msra.gmra.mrb[172].mxu1 %vm2432_vm9, %v3577_v60 }
 0x9b4   : > { %v11186_v48 = vpop.eup %11185  ;;  %10875 = vmatpush3.bf16.xpose.msk.msra.mxu1 %vm12056_vm7, %v14492_v61  ;;  %10518 = vmatprep.mubr.msk.f32.mxu1 %vm11381_vm4, %v14439_v12 }
 0x9b5   : > { %v3571_v58 = vpop.xlane.xlu1 %3570  ;;  %v3578_v13 = vmul.f32 %v11186_v48, %v11176_v37  ;;  %10876 = vmatprep.subr.bf16.mxu1 %v14441_v16  ;;  %v14504_v37 = vld [vmem:[#allocation56_spill] sm:$0xff]  ;;  %v14520_v48 = vld [vmem:[#allocation49_spill] sm:$0xff] }
 0x9b6   : > { %11191 = vrcp.f32 %v3571_v58  ;;  %v14505_v62 = vpack.c.bf16 %v14503_v23, %v14504_v37  ;;  %v14522_v36 = vpack.c.bf16 %v14520_v48, %v14521_v42 }
 0x9b7   : > { %10519 = vmatmul.mubr.msk.f32.gmra.mrb[174].mxu1 %vm2432_vm9, %v3578_v13 }
 0x9b8   : > { %v11188_v9 = vpop.eup %11187  ;;  %10521 = vmatprep.mubr.msk.f32.mxu1 %vm11381_vm4, %v14439_v12 }
 0x9b9   : > { %v3579_v7 = vmul.f32 %v11188_v9, %v11178_v63  ;;  %v11315_v63 = vld [vmem:[%s14432_s2 + $0x1] ss:$0 sm:$0xff]  ;;  %v14523_v9 = vld [vmem:[#allocation50_spill] sm:$0xff] }
 0x9bb   : > { %10522 = vmatmul.mubr.msk.f32.gmra.mrb[176].mxu1 %vm2432_vm9, %v3579_v7 }
 0x9bc   : > { %v11190_v24 = vpop.eup %11189  ;;  %10879 = vmatpush3.bf16.xpose.msk.msra.mxu1 %vm12056_vm7, %v14495_v25  ;;  %10524 = vmatprep.mubr.msk.f32.mxu1 %vm11381_vm4, %v14439_v12 }
 0x9bd   : > { %v3580_v31 = vmul.f32 %v11190_v24, %v11180_v51  ;;  %10552 = vmatprep.subr.mxu1 %v14439_v12  ;;  %v1712_v51 = vadd.f32 %v11315_v63, %v14507_v27 }
 0x9bf   : > { %10525 = vmatmul.mubr.msk.f32.gmra.mrb[178].mxu1 %vm2432_vm9, %v3580_v31 }
 0x9c0   : > { %v11192_v28 = vpop.eup %11191  ;;  %10527 = vmatprep.mubr.msk.f32.mxu1 %vm11381_vm4, %v14439_v12 }
 0x9c1   : > { %v3581_v10 = vmul.f32 %v11192_v28, %v11182_v21  ;;  %v14509_v21 = vld [vmem:[#allocation12_spill] sm:$0xff] }
 0x9c3   : > { %10528 = vmatmul.mubr.msk.f32.gmra.mrb[180].mxu1 %vm2432_vm9, %v3581_v10 }
 0x9c4   : > { %10553 = vmatpush3.xpose.msk.msra.mxu1 %vm2301_vm6, %v14496_v17  ;;  %10554 = vmatprep.mubr.msk.f32.mxu1 %vm11381_vm4, %v14439_v12 }
 0x9c5   : > { %10886 = vmatprep.subr.bf16.mxu1 %v14441_v16 }
 0x9c7   : > { %10555 = vmatmul.mubr.msk.f32.vlgmr.msra.gmra.mrb[182].mxu1 %vm2301_vm6, %v14497_v11 }
 0x9c8   : > { %10889 = vmatpush3.bf16.xpose.msk.msra.mxu1 %vm12056_vm7, %v14500_v52  ;;  %10557 = vmatprep.mubr.msk.f32.mxu1 %vm11381_vm4, %v14439_v12 }
 0x9c9   : > { %10890 = vmatprep.subr.bf16.mxu1 %v14441_v16 }
 0x9cb   : > { %10558 = vmatmul.mubr.msk.f32.gmra.mrb[184].mxu1 %vm2301_vm6, %v14501_v33 }
 0x9cc   : > { %10560 = vmatprep.mubr.msk.f32.mxu1 %vm11381_vm4, %v14439_v12 }
 0x9cf   : > { %10561 = vmatmul.mubr.msk.f32.gmra.mrb[186].mxu1 %vm2301_vm6, %v14502_v38 }
 0x9d0   : > { %10893 = vmatpush3.bf16.xpose.msk.msra.mxu1 %vm12056_vm7, %v14505_v62  ;;  %10563 = vmatprep.mubr.msk.f32.mxu1 %vm11381_vm4, %v14439_v12 }
 0x9d1   : > { %10602 = vmatprep.subr.mxu1 %v14439_v12 }
 0x9d3   : > { %10564 = vmatmul.mubr.msk.f32.gmra.mrb[188].mxu1 %vm2301_vm6, %v14506_v57 }
 0x9d4   : > { %10566 = vmatprep.mubr.msk.f32.mxu1 %vm11381_vm4, %v14439_v12 }
 0x9d7   : > { %10567 = vmatmul.mubr.msk.f32.gmra.mrb[190].mxu1 %vm2301_vm6, %v14508_v44 }
 0x9d8   : > { %10603 = vmatpush3.xpose.msk.msra.mxu1 %vm2301_vm6, %v1712_v51  ;;  %10604 = vmatprep.mubr.msk.f32.mxu1 %vm11381_vm4, %v14439_v12 }
 0x9d9   : > { %10930 = vmatprep.subr.bf16.mxu1 %v14441_v16 }
 0x9db   : > { %10605 = vmatmul.mubr.msk.f32.vlgmr.msra.gmra.mrb[192].mxu1 %vm2301_vm6, %v14509_v21 }
 0x9dc   : > { %10933 = vmatpush3.bf16.msra.mxu1 %v14510_v18  ;;  %10607 = vmatprep.mubr.msk.f32.mxu1 %vm11381_vm4, %v14439_v12 }
 0x9dd   : > { %10931 = vmatprep.subr.bf16.mxu1 %v14441_v16 }
 0x9df   : > { %10608 = vmatmul.mubr.msk.f32.gmra.mrb[194].mxu1 %vm2301_vm6, %v14511_v19 }
 0x9e0   : > { %10934 = vmatpush3.bf16.msra.mxu1 %v14512_v15  ;;  %10610 = vmatprep.mubr.msk.f32.mxu1 %vm11381_vm4, %v14439_v12 }
 0x9e1   : > { %10932 = vmatprep.subr.mxu1 %v14439_v12 }
 0x9e3   : > { %10611 = vmatmul.mubr.msk.f32.gmra.mrb[196].mxu1 %vm2301_vm6, %v14513_v20 }
 0x9e4   : > { %10935 = vmatpush3.msra.mxu1 %v14514_v4  ;;  %10613 = vmatprep.mubr.msk.f32.mxu1 %vm11381_vm4, %v14439_v12 }
 0x9e5   : > { %10644 = vmatprep.subr.bf16.mxu1 %v14439_v12 }
 0x9e7   : > { %10614 = vmatmul.mubr.msk.f32.gmra.mrb[198].mxu1 %vm2301_vm6, %v14515_v1 }
 0x9e8   : > { %10616 = vmatprep.mubr.msk.f32.mxu1 %vm11381_vm4, %v14439_v12 }
 0x9eb   : > { %10617 = vmatmul.mubr.msk.f32.gmra.mrb[200].mxu1 %vm2301_vm6, %v14516_v43 }
 0x9ec   : > { %10641 = vmatprep.mubr.msk.f32.mxu1 %vm11381_vm4, %v14439_v12 }
 0xa86   : > { %v3663_v2 = vpop.f32.mrb[172].mxu1 }
 0xa87   : > { %v10517_v47 = vpop.f32.mrb[173].mxu1 }
 0xa8a   : > { %v3668_v30 = vpop.f32.mrb[174].mxu1 }
 0xa8b   : > { %v3687_v59 = vpack.c.bf16 %v3668_v30, %v3663_v2  ;;  %v10520_v22 = vpop.f32.mrb[175].mxu1 }
 0xa8d   : > { %10533 = vmatmul.mubr.msk.bf16.vlgmr.msra.gmra.mrb[176].mxu0 %vm2301_vm6, %v3687_v59 }
 0xa8e   : > { %10882 = vmatpush3.bf16.msra.mxu0 %v14519_v6  ;;  %v3673_v60 = vpop.f32.mrb[176].mxu1  ;;  %10536 = vmatprep.mubr.msk.bf16.mxu0 %vm11381_vm4, %v14439_v12 }
 0xa8f   : > { %v10523_v3 = vpop.f32.mrb[177].mxu1  ;;  %10883 = vmatprep.subr.bf16.mxu0 %v14441_v16 }
 0xa92   : > { %10885 = vmatpush3.bf16.msra.mxu0 %v14522_v36  ;;  %v3678_v61 = vpop.f32.mrb[178].mxu1 }
 0xa93   : > { %v3688_v58 = vpack.c.bf16 %v3678_v61, %v3673_v60  ;;  %v10526_v13 = vpop.f32.mrb[179].mxu1  ;;  %10577 = vmatprep.subr.mxu0 %v14439_v12 }
 0xa95   : > { %10537 = vmatmul.mubr.msk.bf16.gmra.mrb[180].mxu0 %vm2301_vm6, %v3688_v58 }
 0xa96   : > { %10578 = vmatpush3.msra.mxu0 %v14523_v9  ;;  %v3683_v7 = vpop.f32.mrb[180].mxu1  ;;  %10540 = vmatprep.mubr.msk.bf16.mxu0 %vm11381_vm4, %v14439_v12 }
 0xa97   : > { %v10529_v24 = vpop.f32.mrb[181].mxu1  ;;  %10894 = vmatprep.subr.bf16.mxu0 %v14441_v16  ;;  %v3689_v40 = vpack.c.bf16 %v3683_v7, %v3683_v7 }
 0xa9a   : > { %v3973_v54 = vpop.f32.mrb[182].mxu1 }
 0xa9b   : > { %v3997_v25 = vmul.f32 0.35355338, %v3973_v54  ;;  %v10556_v31 = vpop.f32.mrb[183].mxu1 }
 0xa9d   : > { %10541 = vmatmul.mubr.msk.bf16.gmra.mrb[184].mxu0 %vm2301_vm6, %v3689_v40  ;;  %v4002_v28 = vadd.f32 %v3997_v25, %v12288_v26 }
 0xa9e   : > { %v3978_v10 = vpop.f32.mrb[184].mxu1  ;;  %10579 = vmatprep.mubr.msk.f32.mxu0 %vm11381_vm4, %v14439_v12 }
 0xa9f   : > { %v3998_v17 = vmul.f32 0.35355338, %v3978_v10  ;;  %v10559_v11 = vpop.f32.mrb[185].mxu1  ;;  %v4007_v29 = vsel %vm2432_vm9, %v4002_v28, -inf }
 0xaa0   : > { %4008 = vmax.xlane.f32.xlu0 %v4007_v29 }
 0xaa1   : > { %v4003_v46 = vadd.f32 %v3998_v17, %v12288_v26 }
 0xaa2   : > { %v3983_v52 = vpop.f32.mrb[186].mxu1 }
 0xaa3   : > { %v3999_v33 = vmul.f32 0.35355338, %v3983_v52  ;;  %v10562_v38 = vpop.f32.mrb[187].mxu1  ;;  %v4010_v23 = vsel %vm2432_vm9, %v4003_v46, -inf }
 0xaa4   : > { %4011 = vmax.xlane.f32.xlu1 %v4010_v23 }
 0xaa5   : > { %v4004_v37 = vadd.f32 %v3999_v33, %v12288_v26 }
 0xaa6   : > { %v3988_v62 = vpop.f32.mrb[188].mxu1 }
 0xaa7   : > { %v4000_v57 = vmul.f32 0.35355338, %v3988_v62  ;;  %v10565_v63 = vpop.f32.mrb[189].mxu1  ;;  %v4013_v27 = vsel %vm2432_vm9, %v4004_v37, -inf }
 0xaa8   : > { %4014 = vmax.xlane.f32.xlu0 %v4013_v27 }
 0xaa9   : > { %v4005_v51 = vadd.f32 %v4000_v57, %v12288_v26 }
 0xaaa   : > { %v3993_v44 = vpop.f32.mrb[190].mxu1 }
 0xaab   : > { %v4001_v21 = vmul.f32 0.35355338, %v3993_v44  ;;  %v10568_v19 = vpop.f32.mrb[191].mxu1  ;;  %v4016_v20 = vsel %vm2432_vm9, %v4005_v51, -inf }
 0xaac   : > { %4017 = vmax.xlane.f32.xlu1 %v4016_v20 }
 0xaad   : > { %v4006_v1 = vadd.f32 %v4001_v21, %v12288_v26 }
 0xaae   : > { %v4267_v43 = vpop.f32.mrb[192].mxu1 }
 0xaaf   : > { %v4291_v34 = vmul.f32 0.35355338, %v4267_v43  ;;  %v10606_v35 = vpop.f32.mrb[193].mxu1  ;;  %v4019_v2 = vsel %vm2432_vm9, %v4006_v1, -inf }
 0xab0   : > { %4020 = vmax.xlane.f32.xlu0 %v4019_v2 }
 0xab1   : > { %v4296_v47 = vadd.f32 %v4291_v34, %v12288_v26 }
 0xab2   : > { %v4272_v30 = vpop.f32.mrb[194].mxu1 }
 0xab3   : > { %v4292_v59 = vmul.f32 0.35355338, %v4272_v30  ;;  %v10609_v22 = vpop.f32.mrb[195].mxu1  ;;  %v4301_v5 = vsel %vm2432_vm9, %v4296_v47, -inf }
 0xab4   : > { %4302 = vmax.xlane.f32.xlu1 %v4301_v5 }
 0xab5   : > { %v4297_v14 = vadd.f32 %v4292_v59, %v12288_v26 }
 0xab6   : > { %v4277_v6 = vpop.f32.mrb[196].mxu1 }
 0xab7   : > { %v4293_v60 = vmul.f32 0.35355338, %v4277_v6  ;;  %v10612_v3 = vpop.f32.mrb[197].mxu1  ;;  %v4304_v48 = vsel %vm2432_vm9, %v4297_v14, -inf }
 0xab8   : > { %4305 = vmax.xlane.f32.xlu0 %v4304_v48 }
 0xab9   : > { %v4298_v42 = vadd.f32 %v4293_v60, %v12288_v26 }
 0xaba   : > { %v4282_v36 = vpop.f32.mrb[198].mxu1 }
 0xabb   : > { %v4294_v61 = vmul.f32 0.35355338, %v4282_v36  ;;  %v10615_v58 = vpop.f32.mrb[199].mxu1  ;;  %v4307_v13 = vsel %vm2432_vm9, %v4298_v42, -inf }
 0xabc   : > { %4308 = vmax.xlane.f32.xlu1 %v4307_v13 }
 0xabd   : > { %v4299_v9 = vadd.f32 %v4294_v61, %v12288_v26 }
 0xabe   : > { %v4287_v7 = vpop.f32.mrb[200].mxu1 }
 0xabf   : > { %v4295_v24 = vmul.f32 0.35355338, %v4287_v7  ;;  %v10618_v54 = vpop.f32.mrb[201].mxu1  ;;  %v4310_v40 = vsel %vm2432_vm9, %v4299_v9, -inf }
 0xac0   : > { %4311 = vmax.xlane.f32.xlu0 %v4310_v40 }
 0xac1   : > { %v4300_v25 = vadd.f32 %v4295_v24, %v12288_v26 }
 0xac3   : > { %v4313_v31 = vsel %vm2432_vm9, %v4300_v25, -inf }
 0xac4   : > { %4314 = vmax.xlane.f32.xlu1 %v4313_v31 }
 0xb2d   : > { %v4009_v10 = vpop.xlane.xlu0 %4008 }
 0xb2e   : > { %v4022_v17 = vsub.f32 %v4002_v28, %v4009_v10 }
 0xb30   : > { %v4027_v11 = vmul.f32 1.442695, %v4022_v17 }
 0xb31   : > { %v4012_v29 = vpop.xlane.xlu1 %4011 }
 0xb32   : > { %11193 = vpow2.f32 %v4027_v11  ;;  %v4023_v52 = vsub.f32 %v4003_v46, %v4012_v29 }
 0xb34   : > { %v4029_v33 = vmul.f32 1.442695, %v4023_v52 }
 0xb35   : > { %v4015_v38 = vpop.xlane.xlu0 %4014 }
 0xb36   : > { %11195 = vpow2.f32 %v4029_v33  ;;  %v4024_v23 = vsub.f32 %v4004_v37, %v4015_v38 }
 0xb38   : > { %v4031_v62 = vmul.f32 1.442695, %v4024_v23 }
 0xb39   : > { %v4018_v57 = vpop.xlane.xlu1 %4017 }
 0xb3a   : > { %11197 = vpow2.f32 %v4031_v62  ;;  %v4025_v63 = vsub.f32 %v4005_v51, %v4018_v57 }
 0xb3c   : > { %v12898_v27 = vpop.eup %11193  ;;  %v4033_v44 = vmul.f32 1.442695, %v4025_v63 }
 0xb3d   : > { %v4021_v21 = vpop.xlane.xlu0 %4020  ;;  %v4037_v19 = vsel %vm2432_vm9, %v12898_v27, 0.0 }
 0xb3e   : > { %11199 = vpow2.f32 %v4033_v44  ;;  %v4026_v28 = vsub.f32 %v4006_v1, %v4021_v21  ;;  %4038 = vadd.xlane.f32.xlu0 %v4037_v19 }
 0xb40   : > { %v12902_v20 = vpop.eup %11195  ;;  %v4035_v46 = vmul.f32 1.442695, %v4026_v28 }
 0xb41   : > { %v4303_v43 = vpop.xlane.xlu1 %4302  ;;  %v4040_v37 = vsel %vm2432_vm9, %v12902_v20, 0.0 }
 0xb42   : > { %11201 = vpow2.f32 %v4035_v46  ;;  %v4316_v34 = vsub.f32 %v4296_v47, %v4303_v43  ;;  %4041 = vadd.xlane.f32.xlu1 %v4040_v37 }
 0xb44   : > { %v12906_v51 = vpop.eup %11197  ;;  %v4321_v35 = vmul.f32 1.442695, %v4316_v34 }
 0xb45   : > { %v4306_v2 = vpop.xlane.xlu0 %4305  ;;  %v4043_v30 = vsel %vm2432_vm9, %v12906_v51, 0.0 }
 0xb46   : > { %11203 = vpow2.f32 %v4321_v35  ;;  %v4317_v1 = vsub.f32 %v4297_v14, %v4306_v2  ;;  %4044 = vadd.xlane.f32.xlu0 %v4043_v30 }
 0xb48   : > { %v12910_v59 = vpop.eup %11199  ;;  %v4323_v22 = vmul.f32 1.442695, %v4317_v1 }
 0xb49   : > { %v4309_v5 = vpop.xlane.xlu1 %4308  ;;  %v4046_v6 = vsel %vm2432_vm9, %v12910_v59, 0.0 }
 0xb4a   : > { %11205 = vpow2.f32 %v4323_v22  ;;  %v4318_v47 = vsub.f32 %v4298_v42, %v4309_v5  ;;  %4047 = vadd.xlane.f32.xlu1 %v4046_v6 }
 0xb4c   : > { %v12914_v60 = vpop.eup %11201  ;;  %v4325_v3 = vmul.f32 1.442695, %v4318_v47 }
 0xb4d   : > { %v4312_v48 = vpop.xlane.xlu0 %4311  ;;  %v4049_v36 = vsel %vm2432_vm9, %v12914_v60, 0.0 }
 0xb4e   : > { %11207 = vpow2.f32 %v4325_v3  ;;  %v4319_v14 = vsub.f32 %v4299_v9, %v4312_v48  ;;  %4050 = vadd.xlane.f32.xlu0 %v4049_v36 }
 0xb50   : > { %v12918_v61 = vpop.eup %11203  ;;  %v4327_v58 = vmul.f32 1.442695, %v4319_v14 }
 0xb51   : > { %v4315_v13 = vpop.xlane.xlu1 %4314  ;;  %v4331_v7 = vsel %vm2432_vm9, %v12918_v61, 0.0 }
 0xb52   : > { %11209 = vpow2.f32 %v4327_v58  ;;  %v4320_v42 = vsub.f32 %v4300_v25, %v4315_v13  ;;  %4332 = vadd.xlane.f32.xlu1 %v4331_v7 }
 0xb54   : > { %v12922_v24 = vpop.eup %11205  ;;  %v4329_v54 = vmul.f32 1.442695, %v4320_v42 }
 0xb55   : > { %v4334_v40 = vsel %vm2432_vm9, %v12922_v24, 0.0 }
 0xb56   : > { %11211 = vpow2.f32 %v4329_v54  ;;  %4335 = vadd.xlane.f32.xlu0 %v4334_v40  ;;  %v4170_v54 = vld [vmem:[%s11562_s22] sm:$0xf] }
 0xb57   : > { %v4543_v40 = vsel %vm2901_vm10, %v4170_v54, 0 }
 0xb58   : > { %v12926_v9 = vpop.eup %11207 }
 0xb59   : > { %v4337_v31 = vsel %vm2432_vm9, %v12926_v9, 0.0 }
 0xb5a   : > { %4338 = vadd.xlane.f32.xlu1 %v4337_v31 }
 0xb5c   : > { %v12930_v10 = vpop.eup %11209 }
 0xb5d   : > { %v4340_v25 = vsel %vm2432_vm9, %v12930_v10, 0.0 }
 0xb5e   : > { %4341 = vadd.xlane.f32.xlu0 %v4340_v25 }
 0xb60   : > { %v12934_v17 = vpop.eup %11211  ;;  %v3738_v11 = vpop.f32.mrb[176].mxu0 }
 0xb61   : > { %v12937_v29 = vadd.f32 %v3738_v11, %v12750_v8  ;;  %v10534_v52 = vpop.f32.mrb[177].mxu0  ;;  %v4343_v33 = vsel %vm2432_vm9, %v12934_v17, 0.0 }
 0xb62   : > { %4344 = vadd.xlane.f32.xlu1 %v4343_v33  ;;  %v3741_v38 = vpop.f32.mrb[178].mxu0  ;;  %v14524_v33 = vld [vmem:[#allocation52_spill] sm:$0xff] }
 0xb63   : > { %v12942_v23 = vadd.f32 %v3741_v38, %v12753_v32  ;;  %v10535_v62 = vpop.f32.mrb[179].mxu0  ;;  %v14525_v38 = vld [vmem:[#allocation51_spill] sm:$0xff] }
 0xb64   : > { %v14526_v62 = vpack.c.bf16 %v14524_v33, %v14525_v38 }
 0xb68   : > { %v3746_v57 = vpop.f32.mrb[180].mxu0 }
 0xb69   : > { %v12945_v63 = vadd.f32 %v3746_v57, %v12756_v55  ;;  %v10538_v44 = vpop.f32.mrb[181].mxu0 }
 0xb6a   : > { %v3749_v21 = vpop.f32.mrb[182].mxu0 }
 0xb6b   : > { %v12948_v19 = vadd.f32 %v3749_v21, %v12759_v56  ;;  %v10539_v8 = vpop.f32.mrb[183].mxu0  ;;  %v14527_v21 = vld [vmem:[#allocation54_spill] sm:$0xff] }
 0xb6c   : > { %v14528_v8 = vld [vmem:[#allocation53_spill] sm:$0xff] }
 0xb70   : > { %v3754_v28 = vpop.f32.mrb[184].mxu0 }
 0xb71   : > { %v12951_v46 = vadd.f32 %v3754_v28, %v12762_v45  ;;  %v10542_v43 = vpop.f32.mrb[185].mxu0  ;;  %v14529_v28 = vpack.c.bf16 %v14527_v21, %v14528_v8 }
 0xb72   : > { %v3757_v37 = vpop.f32.mrb[186].mxu0 }
 0xb73   : > { %v10543_v34 = vpop.f32.mrb[187].mxu0 }
 0xbcb   : > { %v4039_v32 = vpop.xlane.xlu0 %4038 }
 0xbcc   : > { %11213 = vrcp.f32 %v4039_v32  ;;  %v14530_v32 = vld [vmem:[#allocation55_spill] sm:$0xff] }
 0xbcf   : > { %v4042_v35 = vpop.xlane.xlu1 %4041 }
 0xbd0   : > { %11215 = vrcp.f32 %v4042_v35 }
 0xbd3   : > { %v4045_v2 = vpop.xlane.xlu0 %4044 }
 0xbd4   : > { %11217 = vrcp.f32 %v4045_v2 }
 0xbd6   : > { %v11214_v55 = vpop.eup %11213 }
 0xbd7   : > { %v4057_v30 = vmul.f32 %v11214_v55, %v12898_v27  ;;  %v4048_v1 = vpop.xlane.xlu1 %4047 }
 0xbd8   : > { %11219 = vrcp.f32 %v4048_v1 }
 0xbd9   : > { %10580 = vmatmul.mubr.msk.f32.vlgmr.msra.gmra.mrb[162].mxu0 %vm2432_vm9, %v4057_v30 }
 0xbda   : > { %v11216_v56 = vpop.eup %11215  ;;  %10896 = vmatpush3.bf16.msra.mxu0 %v14510_v18  ;;  %10582 = vmatprep.mubr.msk.f32.mxu0 %vm11381_vm4, %v14439_v12 }
 0xbdb   : > { %v4051_v45 = vpop.xlane.xlu0 %4050  ;;  %10897 = vmatprep.subr.bf16.mxu0 %v14441_v16  ;;  %v4058_v22 = vmul.f32 %v11216_v56, %v12902_v20 }
 0xbdc   : > { %11221 = vrcp.f32 %v4051_v45 }
 0xbdd   : > { %10583 = vmatmul.mubr.msk.f32.gmra.mrb[188].mxu0 %vm2432_vm9, %v4058_v22 }
 0xbde   : > { %v11218_v5 = vpop.eup %11217  ;;  %10899 = vmatpush3.bf16.msra.mxu0 %v14512_v15  ;;  %10585 = vmatprep.mubr.msk.f32.mxu0 %vm11381_vm4, %v14439_v12 }
 0xbdf   : > { %v4333_v27 = vpop.xlane.xlu1 %4332  ;;  %10627 = vmatprep.subr.mxu0 %v14439_v12  ;;  %v4059_v18 = vmul.f32 %v11218_v5, %v12906_v51  ;;  %v14531_v5 = vld [vmem:[#allocation42_spill] sm:$0xff] }
 0xbe0   : > { %11223 = vrcp.f32 %v4333_v27  ;;  %v14532_v27 = vld [vmem:[#allocation41_spill] sm:$0xff] }
 0xbe1   : > { %10586 = vmatmul.mubr.msk.f32.gmra.mrb[190].mxu0 %vm2432_vm9, %v4059_v18  ;;  %v14533_v18 = vpack.c.bf16 %v14531_v5, %v14532_v27 }
 0xbe2   : > { %v11220_v6 = vpop.eup %11219  ;;  %10628 = vmatpush3.msra.mxu0 %v14514_v4  ;;  %10588 = vmatprep.mubr.msk.f32.mxu0 %vm11381_vm4, %v14439_v12 }
 0xbe3   : > { %v4336_v20 = vpop.xlane.xlu0 %4335  ;;  %v4060_v15 = vmul.f32 %v11220_v6, %v12910_v59  ;;  %10658 = vmatprep.subr.bf16.mxu0 %v14439_v12 }
 0xbe4   : > { %11225 = vrcp.f32 %v4336_v20 }
 0xbe5   : > { %10589 = vmatmul.mubr.msk.f32.gmra.mrb[192].mxu0 %vm2432_vm9, %v4060_v15 }
 0xbe6   : > { %v11222_v47 = vpop.eup %11221  ;;  %10591 = vmatprep.mubr.msk.f32.mxu0 %vm11381_vm4, %v14439_v12 }
 0xbe7   : > { %v4339_v51 = vpop.xlane.xlu1 %4338  ;;  %v4061_v3 = vmul.f32 %v11222_v47, %v12914_v60 }
 0xbe8   : > { %11227 = vrcp.f32 %v4339_v51 }
 0xbe9   : > { %10592 = vmatmul.mubr.msk.f32.gmra.mrb[194].mxu0 %vm2432_vm9, %v4061_v3  ;;  %v14534_v3 = vld [vmem:[#allocation44_spill] sm:$0xff] }
 0xbea   : > { %v11224_v4 = vpop.eup %11223  ;;  %10629 = vmatprep.mubr.msk.f32.mxu0 %vm11381_vm4, %v14439_v12 }
 0xbeb   : > { %v4351_v59 = vmul.f32 %v11224_v4, %v12918_v61  ;;  %v4342_v48 = vpop.xlane.xlu0 %4341  ;;  %v14535_v4 = vld [vmem:[#allocation43_spill] sm:$0xff] }
 0xbec   : > { %11229 = vrcp.f32 %v4342_v48 }
 0xbed   : > { %10630 = vmatmul.mubr.msk.f32.vlgmr.msra.gmra.mrb[196].mxu0 %vm2432_vm9, %v4351_v59  ;;  %v14536_v59 = vpack.c.bf16 %v14534_v3, %v14535_v4 }
 0xbee   : > { %v11226_v36 = vpop.eup %11225  ;;  %10632 = vmatprep.mubr.msk.f32.mxu0 %vm11381_vm4, %v14439_v12  ;;  %10659 = vmatpush3.bf16.msra.mxu0 %v4543_v40 }
 0xbef   : > { %v4345_v14 = vpop.xlane.xlu1 %4344  ;;  %v4352_v60 = vmul.f32 %v11226_v36, %v12922_v24  ;;  %10908 = vmatprep.subr.bf16.mxu0 %v14441_v16 }
 0xbf0   : > { %11231 = vrcp.f32 %v4345_v14 }
 0xbf1   : > { %10633 = vmatmul.mubr.msk.f32.gmra.mrb[198].mxu0 %vm2432_vm9, %v4352_v60  ;;  %v14537_v60 = vld [vmem:[#allocation45_spill] sm:$0xff] }
 0xbf2   : > { %v11228_v58 = vpop.eup %11227  ;;  %10635 = vmatprep.mubr.msk.f32.mxu0 %vm11381_vm4, %v14439_v12 }
 0xbf3   : > { %v4353_v61 = vmul.f32 %v11228_v58, %v12926_v9  ;;  %v9067_v9 = vld [vmem:[%s11562_s22 + $0x4] sm:$0xf]  ;;  %v14538_v58 = vld [vmem:[#allocation23_spill] sm:$0xff] }
 0xbf4   : > { %v4475_v31 = vsel %vm2901_vm10, %v9067_v9, 0 }
 0xbf5   : > { %10636 = vmatmul.mubr.msk.f32.gmra.mrb[200].mxu0 %vm2432_vm9, %v4353_v61  ;;  %v14539_v61 = vld [vmem:[#allocation26_spill] sm:$0xff] }
 0xbf6   : > { %v11230_v13 = vpop.eup %11229  ;;  %10638 = vmatprep.mubr.msk.f32.mxu0 %vm11381_vm4, %v14439_v12 }
 0xbf7   : > { %v4354_v7 = vmul.f32 %v11230_v13, %v12930_v10  ;;  %v14540_v13 = vld [vmem:[#allocation27_spill] sm:$0xff] }
 0xbf9   : > { %10639 = vmatmul.mubr.msk.f32.gmra.mrb[202].mxu0 %vm2432_vm9, %v4354_v7  ;;  %v14541_v7 = vld [vmem:[#allocation30_spill] sm:$0xff] }
 0xbfa   : > { %v11232_v42 = vpop.eup %11231  ;;  %10660 = vmatprep.mubr.msk.bf16.mxu0 %vm11381_vm4, %v14439_v12 }
 0xbfb   : > { %v4355_v24 = vmul.f32 %v11232_v42, %v12934_v17  ;;  %v14542_v42 = vld [vmem:[#allocation31_spill] sm:$0xff] }
 0xbfd   : > { %10642 = vmatmul.mubr.msk.f32.vlgmr.msra.gmra.mrb[202].mxu1 %vm2432_vm9, %v4355_v24 }
 0xbfe   : > { %10646 = vmatprep.mubr.msk.bf16.mxu1 %vm11381_vm4, %v14439_v12  ;;  %10645 = vmatpush3.bf16.msra.mxu1 %v4475_v31 }
 0xbff   : > { %10900 = vmatprep.subr.bf16.mxu1 %v14441_v16 }
 0xcac   : > { %v4143_v10 = vpop.f32.mrb[162].mxu0 }
 0xcad   : > { %v10581_v25 = vpop.f32.mrb[163].mxu0 }
 0xcb0   : > { %v4148_v17 = vpop.f32.mrb[188].mxu0 }
 0xcb1   : > { %v4167_v11 = vpack.c.bf16 %v4148_v17, %v4143_v10  ;;  %v10584_v52 = vpop.f32.mrb[189].mxu0 }
 0xcb3   : > { %10661 = vmatmul.mubr.msk.bf16.vlgmr.msra.gmra.mrb[204].mxu0 %vm2301_vm6, %v4167_v11 }
 0xcb4   : > { %10910 = vmatpush3.bf16.msra.mxu0 %v14526_v62  ;;  %v4153_v57 = vpop.f32.mrb[190].mxu0  ;;  %10664 = vmatprep.mubr.msk.bf16.mxu0 %vm11381_vm4, %v14439_v12 }
 0xcb5   : > { %v10587_v44 = vpop.f32.mrb[191].mxu0  ;;  %10911 = vmatprep.subr.bf16.mxu0 %v14441_v16 }
 0xcb8   : > { %10913 = vmatpush3.bf16.msra.mxu0 %v14529_v28  ;;  %v4158_v43 = vpop.f32.mrb[192].mxu0 }
 0xcb9   : > { %v4168_v37 = vpack.c.bf16 %v4158_v43, %v4153_v57  ;;  %v10590_v34 = vpop.f32.mrb[193].mxu0  ;;  %10705 = vmatprep.subr.mxu0 %v14439_v12 }
 0xcbb   : > { %10665 = vmatmul.mubr.msk.bf16.gmra.mrb[208].mxu0 %vm2301_vm6, %v4168_v37 }
 0xcbc   : > { %10706 = vmatpush3.msra.mxu0 %v14530_v32  ;;  %v4163_v35 = vpop.f32.mrb[194].mxu0  ;;  %10668 = vmatprep.mubr.msk.bf16.mxu0 %vm11381_vm4, %v14439_v12 }
 0xcbd   : > { %v10593_v2 = vpop.f32.mrb[195].mxu0  ;;  %10914 = vmatprep.subr.bf16.mxu0 %v14441_v16  ;;  %v4169_v30 = vpack.c.bf16 %v4163_v35, %v4163_v35 }
 0xcc0   : > { %v4437_v55 = vpop.f32.mrb[196].mxu0 }
 0xcc1   : > { %v10631_v1 = vpop.f32.mrb[197].mxu0 }
 0xcc3   : > { %10669 = vmatmul.mubr.msk.bf16.gmra.mrb[212].mxu0 %vm2301_vm6, %v4169_v30 }
 0xcc4   : > { %v4442_v56 = vpop.f32.mrb[198].mxu0  ;;  %10707 = vmatprep.mubr.msk.f32.mxu0 %vm11381_vm4, %v14439_v12 }
 0xcc5   : > { %v4461_v45 = vpack.c.bf16 %v4442_v56, %v4437_v55  ;;  %v10634_v22 = vpop.f32.mrb[199].mxu0 }
 0xcc7   : > { %10647 = vmatmul.mubr.msk.bf16.vlgmr.msra.gmra.mrb[204].mxu1 %vm2301_vm6, %v4461_v45 }
 0xcc8   : > { %10903 = vmatpush3.bf16.xpose.msk.msra.mxu1 %vm12056_vm7, %v14533_v18  ;;  %v4447_v6 = vpop.f32.mrb[200].mxu0  ;;  %10650 = vmatprep.mubr.msk.bf16.mxu1 %vm11381_vm4, %v14439_v12 }
 0xcc9   : > { %v10637_v20 = vpop.f32.mrb[201].mxu0  ;;  %10904 = vmatprep.subr.bf16.mxu1 %v14441_v16 }
 0xccc   : > { %v4452_v15 = vpop.f32.mrb[202].mxu0 }
 0xccd   : > { %v4462_v47 = vpack.c.bf16 %v4452_v15, %v4447_v6  ;;  %v10640_v51 = vpop.f32.mrb[203].mxu0 }
 0xccf   : > { %10651 = vmatmul.mubr.msk.bf16.gmra.mrb[208].mxu1 %vm2301_vm6, %v4462_v47 }
 0xcd0   : > { %10907 = vmatpush3.bf16.xpose.msk.msra.mxu1 %vm12056_vm7, %v14536_v59  ;;  %v4457_v48 = vpop.f32.mrb[202].mxu1  ;;  %10654 = vmatprep.mubr.msk.bf16.mxu1 %vm11381_vm4, %v14439_v12 }
 0xcd1   : > { %v10643_v36 = vpop.f32.mrb[203].mxu1  ;;  %10680 = vmatprep.subr.mxu1 %v14439_v12  ;;  %v4463_v14 = vpack.c.bf16 %v4457_v48, %v4457_v48 }
 0xcd7   : > { %10655 = vmatmul.mubr.msk.bf16.gmra.mrb[212].mxu1 %vm2301_vm6, %v4463_v14 }
 0xcd8   : > { %10681 = vmatpush3.xpose.msk.msra.mxu1 %vm2301_vm6, %v14537_v60  ;;  %10682 = vmatprep.mubr.msk.f32.mxu1 %vm11381_vm4, %v14439_v12 }
 0xcd9   : > { %10722 = vmatprep.subr.bf16.mxu1 %v14439_v12 }
 0xcdf   : > { %10683 = vmatmul.mubr.msk.f32.vlgmr.msra.gmra.mrb[216].mxu1 %vm2301_vm6, %v14538_v58 }
 0xce0   : > { %10685 = vmatprep.mubr.msk.f32.mxu1 %vm11381_vm4, %v14439_v12 }
 0xce3   : > { %10686 = vmatmul.mubr.msk.f32.gmra.mrb[218].mxu1 %vm2301_vm6, %v14539_v61 }
 0xce4   : > { %10688 = vmatprep.mubr.msk.f32.mxu1 %vm11381_vm4, %v14439_v12 }
 0xce7   : > { %10689 = vmatmul.mubr.msk.f32.gmra.mrb[220].mxu1 %vm2301_vm6, %v14540_v13 }
 0xce8   : > { %10691 = vmatprep.mubr.msk.f32.mxu1 %vm11381_vm4, %v14439_v12 }
 0xceb   : > { %10692 = vmatmul.mubr.msk.f32.gmra.mrb[222].mxu1 %vm2301_vm6, %v14541_v7 }
 0xcec   : > { %10694 = vmatprep.mubr.msk.f32.mxu1 %vm11381_vm4, %v14439_v12 }
 0xcef   : > { %10695 = vmatmul.mubr.msk.f32.gmra.mrb[224].mxu1 %vm2301_vm6, %v14542_v42 }
 0xcf0   : > { %10724 = vmatprep.mubr.msk.bf16.mxu1 %vm11381_vm4, %v14439_v12 }
 0xd86   : > { %v4579_v24 = vpop.f32.mrb[204].mxu0 }
 0xd87   : > { %v10662_v54 = vpop.f32.mrb[205].mxu0 }
 0xd88   : > { %v4582_v40 = vpop.f32.mrb[206].mxu0 }
 0xd89   : > { %v10663_v9 = vpop.f32.mrb[207].mxu0 }
 0xd8e   : > { %v4587_v31 = vpop.f32.mrb[208].mxu0 }
 0xd8f   : > { %v10666_v10 = vpop.f32.mrb[209].mxu0 }
 0xd90   : > { %v4590_v25 = vpop.f32.mrb[210].mxu0 }
 0xd91   : > { %v10667_v17 = vpop.f32.mrb[211].mxu0 }
 0xd96   : > { %v4595_v11 = vpop.f32.mrb[212].mxu0 }
 0xd97   : > { %v10670_v52 = vpop.f32.mrb[213].mxu0 }
 0xd98   : > { %v4598_v33 = vpop.f32.mrb[214].mxu0 }
 0xd99   : > { %v10671_v38 = vpop.f32.mrb[215].mxu0 }
 0xd9a   : > { %v4511_v62 = vpop.f32.mrb[204].mxu1 }
 0xd9b   : > { %v13068_v57 = vadd.f32 %v4579_v24, %v4511_v62  ;;  %v10648_v44 = vpop.f32.mrb[205].mxu1 }
 0xd9c   : > { %v4514_v21 = vpop.f32.mrb[206].mxu1 }
 0xd9d   : > { %v13070_v8 = vadd.f32 %v4582_v40, %v4514_v21  ;;  %v10649_v28 = vpop.f32.mrb[207].mxu1 }
 0xda2   : > { %v4519_v43 = vpop.f32.mrb[208].mxu1 }
 0xda3   : > { %v13072_v37 = vadd.f32 %v4587_v31, %v4519_v43  ;;  %v10652_v34 = vpop.f32.mrb[209].mxu1 }
 0xda4   : > { %v4522_v32 = vpop.f32.mrb[210].mxu1 }
 0xda5   : > { %v13074_v35 = vadd.f32 %v4590_v25, %v4522_v32  ;;  %v10653_v2 = vpop.f32.mrb[211].mxu1 }
 0xdaa   : > { %v4527_v55 = vpop.f32.mrb[212].mxu1 }
 0xdab   : > { %v13076_v30 = vadd.f32 %v4595_v11, %v4527_v55  ;;  %v10656_v1 = vpop.f32.mrb[213].mxu1 }
 0xdac   : > { %v4530_v56 = vpop.f32.mrb[214].mxu1 }
 0xdad   : > { %v10657_v45 = vpop.f32.mrb[215].mxu1 }
 0xdb2   : > { %v4697_v22 = vpop.f32.mrb[216].mxu1 }
 0xdb3   : > { %v4721_v5 = vmul.f32 0.35355338, %v4697_v22  ;;  %v10684_v27 = vpop.f32.mrb[217].mxu1 }
 0xdb5   : > { %v4726_v18 = vadd.f32 %v4721_v5, %v12288_v26 }
 0xdb6   : > { %v4702_v6 = vpop.f32.mrb[218].mxu1 }
 0xdb7   : > { %v4722_v20 = vmul.f32 0.35355338, %v4702_v6  ;;  %v10687_v15 = vpop.f32.mrb[219].mxu1  ;;  %v4731_v47 = vsel %vm2432_vm9, %v4726_v18, -inf }
 0xdb8   : > { %4732 = vmax.xlane.f32.xlu0 %v4731_v47 }
 0xdb9   : > { %v4727_v51 = vadd.f32 %v4722_v20, %v12288_v26 }
 0xdba   : > { %v4707_v3 = vpop.f32.mrb[220].mxu1 }
 0xdbb   : > { %v4723_v4 = vmul.f32 0.35355338, %v4707_v3  ;;  %v10690_v59 = vpop.f32.mrb[221].mxu1  ;;  %v4734_v48 = vsel %vm2432_vm9, %v4727_v51, -inf }
 0xdbc   : > { %4735 = vmax.xlane.f32.xlu1 %v4734_v48  ;;  %v14543_v48 = vld [vmem:[#allocation60_spill] sm:$0xff] }
 0xdbd   : > { %v4728_v36 = vadd.f32 %v4723_v4, %v12288_v26 }
 0xdbe   : > { %v4712_v14 = vpop.f32.mrb[222].mxu1 }
 0xdbf   : > { %v4724_v60 = vmul.f32 0.35355338, %v4712_v14  ;;  %v10693_v58 = vpop.f32.mrb[223].mxu1  ;;  %v4737_v61 = vsel %vm2432_vm9, %v4728_v36, -inf }
 0xdc0   : > { %4738 = vmax.xlane.f32.xlu0 %v4737_v61 }
 0xdc1   : > { %v4729_v13 = vadd.f32 %v4724_v60, %v12288_v26 }
 0xdc2   : > { %v4717_v7 = vpop.f32.mrb[224].mxu1 }
 0xdc3   : > { %v4725_v42 = vmul.f32 0.35355338, %v4717_v7  ;;  %v10696_v24 = vpop.f32.mrb[225].mxu1  ;;  %v4740_v54 = vsel %vm2432_vm9, %v4729_v13, -inf }
 0xdc4   : > { %4741 = vmax.xlane.f32.xlu1 %v4740_v54  ;;  %v14547_v24 = vld [vmem:[#allocation61_spill] sm:$0xff] }
 0xdc5   : > { %v4730_v40 = vadd.f32 %v4725_v42, %v12288_v26  ;;  %v14546_v42 = vld [vmem:[#allocation62_spill] sm:$0xff] }
 0xdc6   : > { %v14548_v54 = vpack.c.bf16 %v14546_v42, %v14547_v24 }
 0xdc7   : > { %v4743_v9 = vsel %vm2432_vm9, %v4730_v40, -inf }
 0xdc8   : > { %4744 = vmax.xlane.f32.xlu0 %v4743_v9 }
 0xe45   : > { %v4733_v31 = vpop.xlane.xlu0 %4732 }
 0xe46   : > { %v4746_v10 = vsub.f32 %v4726_v18, %v4733_v31 }
 0xe48   : > { %v4751_v25 = vmul.f32 1.442695, %v4746_v10  ;;  %v11316_v10 = vld [vmem:[%s14432_s2 + $0x3] ss:$0 sm:$0xff] }
 0xe49   : > { %v4736_v17 = vpop.xlane.xlu1 %4735 }
 0xe4a   : > { %11233 = vpow2.f32 %v4751_v25  ;;  %v4747_v11 = vsub.f32 %v4727_v51, %v4736_v17  ;;  %v14549_v25 = vld [vmem:[#allocation63_spill] sm:$0xff] }
 0xe4b   : > { %v1908_v17 = vadd.f32 %v11316_v10, %v14549_v25 }
 0xe4c   : > { %v4753_v52 = vmul.f32 1.442695, %v4747_v11  ;;  %v14551_v11 = vld [vmem:[#allocation28_spill] sm:$0xff] }
 0xe4d   : > { %v4739_v33 = vpop.xlane.xlu0 %4738 }
 0xe4e   : > { %11235 = vpow2.f32 %v4753_v52  ;;  %v4748_v38 = vsub.f32 %v4728_v36, %v4739_v33  ;;  %v14544_v36 = vld [vmem:[#allocation59_spill] sm:$0xff]  ;;  %v14552_v52 = vld [vmem:[#allocation29_spill] sm:$0xff]  ;;  %v14553_v33 = vld [vmem:[#allocation32_spill] sm:$0xff] }
 0xe4f   : > { %v14545_v14 = vpack.c.bf16 %v14543_v48, %v14544_v36 }
 0xe50   : > { %v4755_v62 = vmul.f32 1.442695, %v4748_v38  ;;  %v14554_v38 = vld [vmem:[#allocation33_spill] sm:$0xff] }
 0xe51   : > { %v4742_v44 = vpop.xlane.xlu1 %4741 }
 0xe52   : > { %11237 = vpow2.f32 %v4755_v62  ;;  %v4749_v21 = vsub.f32 %v4729_v13, %v4742_v44  ;;  %v9089_v62 = vld [vmem:[%s11562_s22 + $0x8] sm:$0xf] }
 0xe53   : > { %v4905_v44 = vsel %vm2901_vm10, %v9089_v62, 0 }
 0xe54   : > { %v11234_v28 = vpop.eup %11233  ;;  %v4757_v43 = vmul.f32 1.442695, %v4749_v21  ;;  %10723 = vmatpush3.bf16.msra.mxu1 %v4905_v44 }
 0xe55   : > { %v4745_v34 = vpop.xlane.xlu0 %4744  ;;  %v4761_v32 = vsel %vm2432_vm9, %v11234_v28, 0.0  ;;  %10922 = vmatprep.subr.bf16.mxu1 %v14441_v16 }
 0xe56   : > { %11239 = vpow2.f32 %v4757_v43  ;;  %v4750_v2 = vsub.f32 %v4730_v40, %v4745_v34  ;;  %4762 = vadd.xlane.f32.xlu1 %v4761_v32 }
 0xe58   : > { %v11236_v55 = vpop.eup %11235  ;;  %v4759_v1 = vmul.f32 1.442695, %v4750_v2  ;;  %v14555_v2 = vld [vmem:[#allocation68_spill] sm:$0xff] }
 0xe59   : > { %v4764_v56 = vsel %vm2432_vm9, %v11236_v55, 0.0 }
 0xe5a   : > { %11241 = vpow2.f32 %v4759_v1  ;;  %4765 = vadd.xlane.f32.xlu0 %v4764_v56 }
 0xe5c   : > { %v11238_v45 = vpop.eup %11237 }
 0xe5d   : > { %v4767_v22 = vsel %vm2432_vm9, %v11238_v45, 0.0 }
 0xe5e   : > { %4768 = vadd.xlane.f32.xlu1 %v4767_v22 }
 0xe60   : > { %v11240_v5 = vpop.eup %11239 }
 0xe61   : > { %v4770_v27 = vsel %vm2432_vm9, %v11240_v5, 0.0 }
 0xe62   : > { %4771 = vadd.xlane.f32.xlu0 %v4770_v27 }
 0xe64   : > { %v11242_v18 = vpop.eup %11241 }
 0xe65   : > { %v4773_v6 = vsel %vm2432_vm9, %v11242_v18, 0.0 }
 0xe66   : > { %4774 = vadd.xlane.f32.xlu1 %v4773_v6 }
 0xee3   : > { %v4763_v20 = vpop.xlane.xlu1 %4762 }
 0xee4   : > { %11243 = vrcp.f32 %v4763_v20 }
 0xee7   : > { %v4766_v15 = vpop.xlane.xlu0 %4765 }
 0xee8   : > { %11245 = vrcp.f32 %v4766_v15 }
 0xeeb   : > { %v4769_v47 = vpop.xlane.xlu1 %4768 }
 0xeec   : > { %11247 = vrcp.f32 %v4769_v47 }
 0xeee   : > { %v11244_v51 = vpop.eup %11243 }
 0xeef   : > { %v4781_v3 = vmul.f32 %v11244_v51, %v11234_v28  ;;  %v4772_v4 = vpop.xlane.xlu0 %4771 }
 0xef0   : > { %11249 = vrcp.f32 %v4772_v4 }
 0xef1   : > { %10708 = vmatmul.mubr.msk.f32.vlgmr.msra.gmra.mrb[216].mxu0 %vm2432_vm9, %v4781_v3 }
 0xef2   : > { %v11246_v59 = vpop.eup %11245  ;;  %10917 = vmatpush3.bf16.xpose.msk.msra.mxu0 %vm12056_vm7, %v14545_v14  ;;  %10710 = vmatprep.mubr.msk.f32.mxu0 %vm11381_vm4, %v14439_v12 }
 0xef3   : > { %v4775_v60 = vpop.xlane.xlu1 %4774  ;;  %v4782_v58 = vmul.f32 %v11246_v59, %v11236_v55  ;;  %10918 = vmatprep.subr.bf16.mxu0 %v14441_v16  ;;  %v14556_v55 = vpack.c.bf16 %v12496_v49, %v14555_v2 }
 0xef4   : > { %11251 = vrcp.f32 %v4775_v60 }
 0xef5   : > { %10711 = vmatmul.mubr.msk.f32.gmra.mrb[218].mxu0 %vm2432_vm9, %v4782_v58 }
 0xef6   : > { %v11248_v61 = vpop.eup %11247  ;;  %10713 = vmatprep.mubr.msk.f32.mxu0 %vm11381_vm4, %v14439_v12 }
 0xef7   : > { %v4783_v13 = vmul.f32 %v11248_v61, %v11238_v45 }
 0xef9   : > { %10714 = vmatmul.mubr.msk.f32.gmra.mrb[220].mxu0 %vm2432_vm9, %v4783_v13 }
 0xefa   : > { %v11250_v7 = vpop.eup %11249  ;;  %10921 = vmatpush3.bf16.xpose.msk.msra.mxu0 %vm12056_vm7, %v14548_v54  ;;  %10716 = vmatprep.mubr.msk.f32.mxu0 %vm11381_vm4, %v14439_v12 }
 0xefb   : > { %v4784_v40 = vmul.f32 %v11250_v7, %v11240_v5  ;;  %10744 = vmatprep.subr.mxu0 %v14439_v12 }
 0xefd   : > { %10717 = vmatmul.mubr.msk.f32.gmra.mrb[222].mxu0 %vm2432_vm9, %v4784_v40 }
 0xefe   : > { %v11252_v9 = vpop.eup %11251  ;;  %10719 = vmatprep.mubr.msk.f32.mxu0 %vm11381_vm4, %v14439_v12 }
 0xeff   : > { %v4785_v31 = vmul.f32 %v11252_v9, %v11242_v18 }
 0xf01   : > { %10720 = vmatmul.mubr.msk.f32.gmra.mrb[224].mxu0 %vm2432_vm9, %v4785_v31 }
 0xf02   : > { %10745 = vmatpush3.xpose.msk.msra.mxu0 %vm2301_vm6, %v1908_v17  ;;  %10746 = vmatprep.mubr.msk.f32.mxu0 %vm11381_vm4, %v14439_v12 }
 0xf03   : > { %10786 = vmatprep.subr.bf16.mxu0 %v14439_v12 }
 0xf05   : > { %10747 = vmatmul.mubr.msk.f32.vlgmr.msra.gmra.mrb[226].mxu0 %vm2301_vm6, %v14550_v50 }
 0xf06   : > { %10749 = vmatprep.mubr.msk.f32.mxu0 %vm11381_vm4, %v14439_v12 }
 0xf09   : > { %10750 = vmatmul.mubr.msk.f32.gmra.mrb[228].mxu0 %vm2301_vm6, %v14551_v11 }
 0xf0a   : > { %10752 = vmatprep.mubr.msk.f32.mxu0 %vm11381_vm4, %v14439_v12 }
 0xf0d   : > { %10753 = vmatmul.mubr.msk.f32.gmra.mrb[230].mxu0 %vm2301_vm6, %v14552_v52 }
 0xf0e   : > { %10755 = vmatprep.mubr.msk.f32.mxu0 %vm11381_vm4, %v14439_v12 }
 0xf11   : > { %10756 = vmatmul.mubr.msk.f32.gmra.mrb[232].mxu0 %vm2301_vm6, %v14553_v33 }
 0xf12   : > { %10758 = vmatprep.mubr.msk.f32.mxu0 %vm11381_vm4, %v14439_v12 }
 0xf15   : > { %10759 = vmatmul.mubr.msk.f32.gmra.mrb[234].mxu0 %vm2301_vm6, %v14554_v38 }
 0xf16   : > { %10788 = vmatprep.mubr.msk.bf16.mxu0 %vm11381_vm4, %v14439_v12 }
 0xfc4   : > { %v4867_v21 = vpop.f32.mrb[216].mxu0 }
 0xfc5   : > { %v10709_v28 = vpop.f32.mrb[217].mxu0 }
 0xfc8   : > { %v4872_v43 = vpop.f32.mrb[218].mxu0 }
 0xfc9   : > { %v4891_v34 = vpack.c.bf16 %v4872_v43, %v4867_v21  ;;  %v10712_v32 = vpop.f32.mrb[219].mxu0 }
 0xfcb   : > { %10725 = vmatmul.mubr.msk.bf16.vlgmr.msra.gmra.mrb[228].mxu1 %vm2301_vm6, %v4891_v34 }
 0xfcc   : > { %10924 = vmatpush3.bf16.msra.mxu1 %v14556_v55  ;;  %v4877_v1 = vpop.f32.mrb[220].mxu0  ;;  %10728 = vmatprep.mubr.msk.bf16.mxu1 %vm11381_vm4, %v14439_v12 }
 0xfcd   : > { %v10715_v56 = vpop.f32.mrb[221].mxu0  ;;  %10925 = vmatprep.subr.bf16.mxu1 %v14441_v16 }
 0xfd0   : > { %10927 = vmatpush3.bf16.msra.mxu1 %v10926_v41  ;;  %v4882_v45 = vpop.f32.mrb[222].mxu0 }
 0xfd1   : > { %v4892_v22 = vpack.c.bf16 %v4882_v45, %v4877_v1  ;;  %v10718_v5 = vpop.f32.mrb[223].mxu0  ;;  %10769 = vmatprep.subr.mxu1 %v14439_v12  ;;  %v11317_v1 = vld [vmem:[#allocation2] sm:$0xff] }
 0xfd2   : > { %v3765_v56 = vadd.f32 %v11317_v1, %v12937_v29 }
 0xfd3   : > { %10729 = vmatmul.mubr.msk.bf16.gmra.mrb[232].mxu1 %vm2301_vm6, %v4892_v22  ;;  %v13193_v22 = vld [vmem:[%s14557_s11] ss:$0 sm:$0xff] }
 0xfd4   : > { %10770 = vmatpush3.msra.mxu1 %v12509_v0  ;;  %v4887_v49 = vpop.f32.mrb[224].mxu0  ;;  %10732 = vmatprep.mubr.msk.bf16.mxu1 %vm11381_vm4, %v14439_v12 }
 0xfd5   : > { %v10721_v27 = vpop.f32.mrb[225].mxu0  ;;  %v4893_v16 = vpack.c.bf16 %v4887_v49, %v4887_v49  ;;  %v11318_v49 = vld [vmem:[#allocation2 + $0x8] sm:$0xff] }
 0xfd6   : > { %v3766_v27 = vadd.f32 %v11318_v49, %v12942_v23 }
 0xfd8   : > { %v5064_v18 = vpop.f32.mrb[226].mxu0 }
 0xfd9   : > { %v5088_v6 = vmul.f32 0.35355338, %v5064_v18  ;;  %v10748_v20 = vpop.f32.mrb[227].mxu0  ;;  %v13199_v18 = vadd.f32 %v13193_v22, %v3765_v56 }
 0xfdb   : > { %10733 = vmatmul.mubr.msk.bf16.gmra.mrb[236].mxu1 %vm2301_vm6, %v4893_v16  ;;  %v5093_v53 = vadd.f32 %v5088_v6, %v12288_v26  ;;  %v11319_v16 = vld [vmem:[#allocation2 + $0x10] sm:$0xff] }
 0xfdc   : > { %v5069_v39 = vpop.f32.mrb[228].mxu0  ;;  %10771 = vmatprep.mubr.msk.f32.mxu1 %vm11381_vm4, %v14439_v12  ;;  %v3767_v29 = vadd.f32 %v11319_v16, %v12945_v63 }
 0xfdd   : > { %v5089_v41 = vmul.f32 0.35355338, %v5069_v39  ;;  %v10751_v15 = vpop.f32.mrb[229].mxu0  ;;  %v5098_v0 = vsel %vm2432_vm9, %v5093_v53, -inf  ;;  %v13209_v39 = vadd.f32 %v13193_v22, %v3766_v27 }
 0xfde   : > { %5099 = vmax.xlane.f32.xlu0 %v5098_v0  ;;  %v11321_v15 = vld [vmem:[#allocation2 + $0x20] sm:$0xff] }
 0xfdf   : > { %v5094_v47 = vadd.f32 %v5089_v41, %v12288_v26  ;;  %v11320_v41 = vld [vmem:[#allocation2 + $0x18] sm:$0xff]  ;;  %v3769_v0 = vadd.f32 %v11321_v15, %v12951_v46 }
 0xfe0   : > { %v5074_v51 = vpop.f32.mrb[230].mxu0  ;;  %v3768_v23 = vadd.f32 %v11320_v41, %v12948_v19 }
 0xfe1   : > { %v5090_v3 = vmul.f32 0.35355338, %v5074_v51  ;;  %v10754_v4 = vpop.f32.mrb[231].mxu0  ;;  %v5101_v59 = vsel %vm2432_vm9, %v5094_v47, -inf }
 0xfe2   : > { %5102 = vmax.xlane.f32.xlu1 %v5101_v59  ;;  %v13223_v4 = vadd.f32 %v13193_v22, %v3769_v0  ;;  %v13226_v19 = vadd.f32 %v13193_v22, %v3768_v23 }
 0xfe3   : > { %v5095_v48 = vadd.f32 %v5090_v3, %v12288_v26  ;;  %v3787_v3 = vsel %vm1138_vm5, %v13209_v39, 0.0 }
 0xfe4   : > { %v5079_v36 = vpop.f32.mrb[232].mxu0  ;;  %v3796_v46 = vsel %vm1138_vm5, %v13223_v4, 0.0  ;;  %v3793_v59 = vsel %vm1138_vm5, %v13226_v19, 0.0 }
 0xfe5   : > { %v5091_v14 = vmul.f32 0.35355338, %v5079_v36  ;;  %v10757_v60 = vpop.f32.mrb[233].mxu0  ;;  %v5104_v58 = vsel %vm2432_vm9, %v5095_v48, -inf }
 0xfe6   : > { %5105 = vmax.xlane.f32.xlu0 %v5104_v58 }
 0xfe7   : > { %v5096_v61 = vadd.f32 %v5091_v14, %v12288_v26 }
 0xfe8   : > { %v5084_v13 = vpop.f32.mrb[234].mxu0 }
 0xfe9   : > { %v5092_v7 = vmul.f32 0.35355338, %v5084_v13  ;;  %v10760_v42 = vpop.f32.mrb[235].mxu0  ;;  %v5107_v24 = vsel %vm2432_vm9, %v5096_v61, -inf }
 0xfea   : > { %5108 = vmax.xlane.f32.xlu1 %v5107_v24 }
 0xfeb   : > { %v5097_v54 = vadd.f32 %v5092_v7, %v12288_v26 }
 0xfed   : > { %v5110_v40 = vsel %vm2432_vm9, %v5097_v54, -inf }
 0xfee   : > { %5111 = vmax.xlane.f32.xlu0 %v5110_v40 }
0x106b   : > { %v5100_v9 = vpop.xlane.xlu0 %5099 }
0x106c   : > { %v5113_v31 = vsub.f32 %v5093_v53, %v5100_v9  ;;  %v3784_v53 = vsel %vm1138_vm5, %v13199_v18, 0.0 }
0x106e   : > { %v5118_v10 = vmul.f32 1.442695, %v5113_v31 }
0x106f   : > { %v5103_v25 = vpop.xlane.xlu1 %5102 }
0x1070   : > { %11253 = vpow2.f32 %v5118_v10  ;;  %v5114_v17 = vsub.f32 %v5094_v47, %v5103_v25  ;;  %v13216_v47 = vadd.f32 %v13193_v22, %v3767_v29 }
0x1072   : > { %v5120_v50 = vmul.f32 1.442695, %v5114_v17  ;;  %v3790_v51 = vsel %vm1138_vm5, %v13216_v47, 0.0 }
0x1073   : > { %v5106_v11 = vpop.xlane.xlu0 %5105 }
0x1074   : > { %11255 = vpow2.f32 %v5120_v50  ;;  %v5115_v52 = vsub.f32 %v5095_v48, %v5106_v11 }
0x1076   : > { %v5122_v33 = vmul.f32 1.442695, %v5115_v52 }
0x1077   : > { %v5109_v38 = vpop.xlane.xlu1 %5108 }
0x1078   : > { %11257 = vpow2.f32 %v5122_v33  ;;  %v5116_v62 = vsub.f32 %v5096_v61, %v5109_v38 }
0x107a   : > { %v13175_v44 = vpop.eup %11253  ;;  %v5124_v26 = vmul.f32 1.442695, %v5116_v62 }
0x107b   : > { %v5112_v21 = vpop.xlane.xlu0 %5111  ;;  %v5128_v28 = vsel %vm2432_vm9, %v13175_v44, 0.0 }
0x107c   : > { %11259 = vpow2.f32 %v5124_v26  ;;  %v5117_v43 = vsub.f32 %v5097_v54, %v5112_v21  ;;  %5129 = vadd.xlane.f32.xlu1 %v5128_v28 }
0x107e   : > { %v13179_v34 = vpop.eup %11255  ;;  %v5126_v32 = vmul.f32 1.442695, %v5117_v43  ;;  %v9108_v43 = vld [vmem:[%s11562_s22 + $0xc] sm:$0xf] }
0x107f   : > { %v5131_v2 = vsel %vm2432_vm9, %v13179_v34, 0.0 }
0x1080   : > { %11261 = vpow2.f32 %v5126_v32  ;;  %5132 = vadd.xlane.f32.xlu0 %v5131_v2 }
0x1082   : > { %v13183_v55 = vpop.eup %11257 }
0x1083   : > { %v5134_v45 = vsel %vm2432_vm9, %v13183_v55, 0.0 }
0x1084   : > { %5135 = vadd.xlane.f32.xlu1 %v5134_v45 }
0x1086   : > { %v13195_v5 = vpop.eup %11259 }
0x1087   : > { %v5137_v6 = vsel %vm2432_vm9, %v13195_v5, 0.0 }
0x1088   : > { %5138 = vadd.xlane.f32.xlu0 %v5137_v6 }
0x108a   : > { %v13204_v20 = vpop.eup %11261 }
0x108b   : > { %v5140_v63 = vsel %vm2432_vm9, %v13204_v20, 0.0 }
0x108c   : > { %3785 = vadd.xlane.f32.xlu0 %v3784_v53  ;;  %5141 = vadd.xlane.f32.xlu1 %v5140_v63  ;;  %v11322_v63 = vld [vmem:[#allocation2 + $0x28] sm:$0xff] }
0x1090   : > { %3791 = vadd.xlane.f32.xlu0 %v3790_v51  ;;  %3788 = vadd.xlane.f32.xlu1 %v3787_v3 }
0x1094   : > { %3797 = vadd.xlane.f32.xlu0 %v3796_v46  ;;  %3794 = vadd.xlane.f32.xlu1 %v3793_v59  ;;  %v11323_v59 = vld [vmem:[#allocation2 + $0x30] sm:$0xff] }
0x109e   : > { %v4941_v48 = vpop.f32.mrb[228].mxu1 }
0x109f   : > { %v13233_v36 = vadd.f32 %v4941_v48, %v13068_v57  ;;  %v10726_v14 = vpop.f32.mrb[229].mxu1 }
0x10a0   : > { %v4944_v60 = vpop.f32.mrb[230].mxu1 }
0x10a1   : > { %v13236_v58 = vadd.f32 %v4944_v60, %v13070_v8  ;;  %v10727_v61 = vpop.f32.mrb[231].mxu1 }
0x10a6   : > { %v4949_v13 = vpop.f32.mrb[232].mxu1 }
0x10a7   : > { %v13239_v7 = vadd.f32 %v4949_v13, %v13072_v37  ;;  %v10730_v42 = vpop.f32.mrb[233].mxu1 }
0x10a8   : > { %v4952_v24 = vpop.f32.mrb[234].mxu1 }
0x10a9   : > { %v13242_v54 = vadd.f32 %v4952_v24, %v13074_v35  ;;  %v10731_v40 = vpop.f32.mrb[235].mxu1 }
0x10ae   : > { %v4957_v9 = vpop.f32.mrb[236].mxu1 }
0x10af   : > { %v13245_v57 = vadd.f32 %v4957_v9, %v13076_v30  ;;  %v10734_v31 = vpop.f32.mrb[237].mxu1 }
0x10b0   : > { %v4960_v10 = vpop.f32.mrb[238].mxu1  ;;  %v11324_v31 = vld [vmem:[#allocation2 + $0x38] sm:$0xff] }
0x10b1   : > { %v10735_v25 = vpop.f32.mrb[239].mxu1 }
0x1109   : > { %v5130_v8 = vpop.xlane.xlu1 %5129 }
0x110a   : > { %11263 = vrcp.f32 %v5130_v8 }
0x110d   : > { %v5133_v17 = vpop.xlane.xlu0 %5132 }
0x110e   : > { %11265 = vrcp.f32 %v5133_v17 }
0x1111   : > { %v5136_v50 = vpop.xlane.xlu1 %5135 }
0x1112   : > { %11267 = vrcp.f32 %v5136_v50 }
0x1114   : > { %v11264_v37 = vpop.eup %11263 }
0x1115   : > { %v5148_v11 = vmul.f32 %v11264_v37, %v13175_v44  ;;  %v5139_v52 = vpop.xlane.xlu0 %5138  ;;  %v11325_v37 = vld [vmem:[#allocation2 + $0x40] sm:$0xff] }
0x1116   : > { %11269 = vrcp.f32 %v5139_v52 }
0x1117   : > { %10772 = vmatmul.mubr.msk.f32.vlgmr.msra.gmra.mrb[226].mxu1 %vm2432_vm9, %v5148_v11 }
0x1118   : > { %v11266_v35 = vpop.eup %11265  ;;  %10774 = vmatprep.mubr.msk.f32.mxu1 %vm11381_vm4, %v14439_v12 }
0x1119   : > { %v5142_v30 = vpop.xlane.xlu1 %5141  ;;  %v5149_v33 = vmul.f32 %v11266_v35, %v13179_v34  ;;  %v5272_v34 = vsel %vm2901_vm10, %v9108_v43, 0  ;;  %v3786_v15 = vpop.xlane.xlu0 %3785 }
0x111a   : > { %11271 = vrcp.f32 %v5142_v30  ;;  %10787 = vmatpush3.bf16.msra.mxu0 %v5272_v34 }
0x111b   : > { %10775 = vmatmul.mubr.msk.f32.gmra.mrb[240].mxu1 %vm2432_vm9, %v5149_v33 }
0x111c   : > { %v11268_v38 = vpop.eup %11267  ;;  %10777 = vmatprep.mubr.msk.f32.mxu1 %vm11381_vm4, %v14439_v12 }
0x111d   : > { %v5150_v62 = vmul.f32 %v11268_v38, %v13183_v55  ;;  %v3792_v61 = vpop.xlane.xlu0 %3791  ;;  %v3789_v40 = vpop.xlane.xlu1 %3788 }
0x111e   : > { %v3802_v50 = vmul.f32 0.03125, %v3792_v61  ;;  %v3801_v35 = vmul.f32 0.03125, %v3789_v40 }
0x111f   : > { %10778 = vmatmul.mubr.msk.f32.gmra.mrb[242].mxu1 %vm2432_vm9, %v5150_v62 }
0x1120   : > { %v11270_v44 = vpop.eup %11269  ;;  %10780 = vmatprep.mubr.msk.f32.mxu1 %vm11381_vm4, %v14439_v12  ;;  %v13302_v62 = vsub.f32 %v13216_v47, %v3802_v50  ;;  %v13308_v34 = vsub.f32 %v13209_v39, %v3801_v35 }
0x1121   : > { %v5151_v26 = vmul.f32 %v11270_v44, %v13195_v5  ;;  %v3798_v52 = vpop.xlane.xlu0 %3797  ;;  %v3795_v38 = vpop.xlane.xlu1 %3794 }
0x1122   : > { %v3804_v44 = vmul.f32 0.03125, %v3798_v52 }
0x1123   : > { %10781 = vmatmul.mubr.msk.f32.gmra.mrb[244].mxu1 %vm2432_vm9, %v5151_v26 }
0x1124   : > { %v11272_v21 = vpop.eup %11271  ;;  %10783 = vmatprep.mubr.msk.f32.mxu1 %vm11381_vm4, %v14439_v12 }
0x1125   : > { %v5152_v28 = vmul.f32 %v11272_v21, %v13204_v20 }
0x1127   : > { %10784 = vmatmul.mubr.msk.f32.gmra.mrb[246].mxu1 %vm2432_vm9, %v5152_v28 }
0x11ea   : > { %v5234_v32 = vpop.f32.mrb[226].mxu1 }
0x11eb   : > { %v10773_v2 = vpop.f32.mrb[227].mxu1 }
0x11ec   : > { %v11326_v2 = vld [vmem:[#allocation2 + $0x48] sm:$0xff] }
0x11ee   : > { %v5239_v55 = vpop.f32.mrb[240].mxu1 }
0x11ef   : > { %v5258_v1 = vpack.c.bf16 %v5239_v55, %v5234_v32  ;;  %v10776_v56 = vpop.f32.mrb[241].mxu1  ;;  %v3803_v32 = vmul.f32 0.03125, %v3795_v38 }
0x11f0   : > { %v13311_v56 = vsub.f32 %v13223_v4, %v3804_v44  ;;  %v3811_v4 = vmul.f32 %v13308_v34, %v13308_v34 }
0x11f1   : > { %10789 = vmatmul.mubr.msk.bf16.vlgmr.msra.gmra.mrb[236].mxu0 %vm2301_vm6, %v5258_v1  ;;  %v13320_v39 = vsub.f32 %v13226_v19, %v3803_v32 }
0x11f2   : > { %v5244_v45 = vpop.f32.mrb[242].mxu1  ;;  %10792 = vmatprep.mubr.msk.bf16.mxu0 %vm11381_vm4, %v14439_v12 }
0x11f3   : > { %v10779_v5 = vpop.f32.mrb[243].mxu1  ;;  %v3813_v19 = vmul.f32 %v13320_v39, %v13320_v39 }
0x11f6   : > { %v5249_v49 = vpop.f32.mrb[244].mxu1 }
0x11f7   : > { %v5259_v27 = vpack.c.bf16 %v5249_v49, %v5244_v45  ;;  %v10782_v16 = vpop.f32.mrb[245].mxu1  ;;  %v3812_v45 = vmul.f32 %v13302_v62, %v13302_v62  ;;  %v3814_v49 = vmul.f32 %v13311_v56, %v13311_v56 }
0x11f9   : > { %10793 = vmatmul.mubr.msk.bf16.gmra.mrb[240].mxu0 %vm2301_vm6, %v5259_v27  ;;  %v3818_v27 = vsel %vm1138_vm5, %v3811_v4, 0.0  ;;  %v3827_v16 = vsel %vm1138_vm5, %v3814_v49, 0.0 }
0x11fa   : > { %v5254_v29 = vpop.f32.mrb[246].mxu1  ;;  %10796 = vmatprep.mubr.msk.bf16.mxu0 %vm11381_vm4, %v14439_v12 }
0x11fb   : > { %v10785_v6 = vpop.f32.mrb[247].mxu1  ;;  %v5260_v20 = vpack.c.bf16 %v5254_v29, %v5254_v29  ;;  %v3824_v29 = vsel %vm1138_vm5, %v3813_v19, 0.0 }
0x11fc   : > { %v5461_v6 = vld [vmem:[%s11576_s10] sm:$0xff] }
0x1201   : > { %10797 = vmatmul.mubr.msk.bf16.gmra.mrb[244].mxu0 %vm2301_vm6, %v5260_v20  ;;  %v5469_v20 = vld [vmem:[%s11576_s10 + $0x40] sm:$0xff] }
0x12c4   : > { %v5308_v53 = vpop.f32.mrb[236].mxu0 }
0x12c5   : > { %v5330_v41 = vadd.f32 %v5308_v53, %v13233_v36  ;;  %v10790_v23 = vpop.f32.mrb[237].mxu0  ;;  %v3800_v36 = vmul.f32 0.03125, %v3786_v15  ;;  %v5462_v53 = vld [vmem:[%s11576_s10 + $0x8] sm:$0xff]  ;;  %v9115_v15 = vcombine.low %v5461_v6, %v5469_v20 }
0x12c6   : > { %v5311_v0 = vpop.f32.mrb[238].mxu0  ;;  %v5470_v23 = vld [vmem:[%s11576_s10 + $0x48] sm:$0xff] }
0x12c7   : > { %v5335_v51 = vadd.f32 %v11322_v63, %v5330_v41  ;;  %v5331_v3 = vadd.f32 %v5311_v0, %v13236_v58  ;;  %v10791_v46 = vpop.f32.mrb[239].mxu0  ;;  %v13289_v17 = vsub.f32 %v13199_v18, %v3800_v36  ;;  %v9116_v41 = vcombine.high %v5461_v6, %v5469_v20  ;;  %v13387_v20 = vld [vmem:[%s14559_s5] ss:$0 sm:$0xff] }
0x12c8   : > { %v9117_v0 = vcombine.low %v5462_v53, %v5470_v23  ;;  %v9118_v63 = vcombine.high %v5462_v53, %v5470_v23  ;;  %v5478_v46 = vld [vmem:[%s11576_s10 + $0x88] sm:$0xff]  ;;  %v11384_v36 = vmov 0  }
0x12c9   : > { %v5336_v48 = vadd.f32 %v11323_v59, %v5331_v3  ;;  %v13277_v14 = vadd.f32 %v13193_v22, %v5335_v51  ;;  %v3810_v18 = vmul.f32 %v13289_v17, %v13289_v17  ;;  %5752 = vmatprep.subr.bf16.mxu1 %v9116_v41  ;;  %v5477_v51 = vld [vmem:[%s11576_s10 + $0x80] sm:$0xff]  ;;  %5784 = vmatprep.mubr.bf16.mxu1 %v11384_v36 }
0x12ca   : > { %5835 = vmatprep.subr.bf16.mxu0 %v9118_v63  ;;  %5753 = vmatpush1.bf16.msra.mxu1 %v9115_v15  ;;  %v5485_v3 = vld [vmem:[%s11576_s10 + $0xc0] sm:$0xff] }
0x12cb   : > { %v5354_v12 = vsel %vm1138_vm5, %v13277_v14, 0.0  ;;  %v13282_v60 = vadd.f32 %v13193_v22, %v5336_v48  ;;  %v3815_v47 = vsel %vm1138_vm5, %v3810_v18, 0.0  ;;  %5836 = vmatpush1.bf16.msra.mxu0 %v9117_v0  ;;  %v9131_v59 = vcombine.low %v5477_v51, %v5485_v3  ;;  %5867 = vmatprep.mubr.bf16.mxu0 %v11384_v36 }
0x12cc   : > { %5355 = vadd.xlane.f32.xlu1 %v5354_v12  ;;  %v5316_v13 = vpop.f32.mrb[240].mxu0  ;;  %v9132_v48 = vcombine.high %v5477_v51, %v5485_v3  ;;  %v5486_v12 = vld [vmem:[%s11576_s10 + $0xc8] sm:$0xff] }
0x12cd   : > { %v5332_v42 = vadd.f32 %v5316_v13, %v13239_v7  ;;  %v10794_v24 = vpop.f32.mrb[241].mxu0  ;;  %v5357_v58 = vsel %vm1138_vm5, %v13282_v60, 0.0  ;;  %v9133_v61 = vcombine.low %v5478_v46, %v5486_v12  ;;  %v9134_v13 = vcombine.high %v5478_v46, %v5486_v12 }
0x12ce   : > { %5358 = vadd.xlane.f32.xlu0 %v5357_v58  ;;  %v5319_v9 = vpop.f32.mrb[242].mxu0  ;;  %5754 = vmatprep.subr.bf16.mxu1 %v9132_v48 }
0x12cf   : > { %v5337_v10 = vadd.f32 %v11324_v31, %v5332_v42  ;;  %v5333_v25 = vadd.f32 %v5319_v9, %v13242_v54  ;;  %v10795_v8 = vpop.f32.mrb[243].mxu0  ;;  %5837 = vmatprep.subr.bf16.mxu0 %v9134_v13  ;;  %5755 = vmatpush1.bf16.msra.mxu1 %v9131_v59 }
0x12d0   : > { %5838 = vmatpush1.bf16.msra.mxu0 %v9133_v61 }
0x12d1   : > { %v5338_v11 = vadd.f32 %v11325_v37, %v5333_v25  ;;  %v13292_v7 = vadd.f32 %v13193_v22, %v5337_v10 }
0x12d3   : > { %v5360_v30 = vsel %vm1138_vm5, %v13292_v7, 0.0  ;;  %v13297_v33 = vadd.f32 %v13193_v22, %v5338_v11 }
0x12d4   : > { %5361 = vadd.xlane.f32.xlu1 %v5360_v30  ;;  %v5324_v54 = vpop.f32.mrb[244].mxu0 }
0x12d5   : > { %v5334_v26 = vadd.f32 %v5324_v54, %v13245_v57  ;;  %v10798_v21 = vpop.f32.mrb[245].mxu0  ;;  %v5363_v28 = vsel %vm1138_vm5, %v13297_v33, 0.0 }
0x12d6   : > { %5364 = vadd.xlane.f32.xlu0 %v5363_v28  ;;  %v5327_v43 = vpop.f32.mrb[246].mxu0 }
0x12d7   : > { %v5339_v55 = vadd.f32 %v11326_v2, %v5334_v26  ;;  %v10799_v1 = vpop.f32.mrb[247].mxu0 }
0x12d9   : > { %v13315_v57 = vadd.f32 %v13193_v22, %v5339_v55  ;;  %v3821_v22 = vsel %vm1138_vm5, %v3812_v45, 0.0 }
0x12da   : > { %3816 = vadd.xlane.f32.xlu0 %v3815_v47 }
0x12db   : > { %v5366_v5 = vsel %vm1138_vm5, %v13315_v57, 0.0 }
0x12dc   : > { %5367 = vadd.xlane.f32.xlu1 %v5366_v5 }
0x12de   : > { %3822 = vadd.xlane.f32.xlu0 %v3821_v22 }
0x12e0   : > { %3819 = vadd.xlane.f32.xlu1 %v3818_v27 }
0x12e2   : > { %3828 = vadd.xlane.f32.xlu0 %v3827_v16 }
0x12e4   : > { %3825 = vadd.xlane.f32.xlu1 %v3824_v29  ;;  %v13379_v29 = vld [vmem:[%s14558_s30] ss:$0 sm:$0xff] }
0x1359   : > { %v5356_v42 = vpop.xlane.xlu1 %5355 }
0x135a   : > { %v5369_v24 = vmul.f32 0.03125, %v5356_v42 }
0x135b   : > { %v5359_v58 = vpop.xlane.xlu0 %5358 }
0x135c   : > { %v13345_v40 = vsub.f32 %v13277_v14, %v5369_v24  ;;  %v5370_v9 = vmul.f32 0.03125, %v5359_v58 }
0x135e   : > { %v13348_v31 = vsub.f32 %v13282_v60, %v5370_v9  ;;  %v5379_v10 = vmul.f32 %v13345_v40, %v13345_v40 }
0x1360   : > { %v5384_v25 = vsel %vm1138_vm5, %v5379_v10, 0.0  ;;  %v5380_v8 = vmul.f32 %v13348_v31, %v13348_v31 }
0x1361   : > { %v5362_v50 = vpop.xlane.xlu1 %5361  ;;  %5385 = vadd.xlane.f32.xlu1 %v5384_v25  ;;  %v5463_v25 = vld [vmem:[%s11576_s10 + $0x10] sm:$0xff] }
0x1362   : > { %v5371_v37 = vmul.f32 0.03125, %v5362_v50  ;;  %v5387_v11 = vsel %vm1138_vm5, %v5380_v8, 0.0  ;;  %v5471_v8 = vld [vmem:[%s11576_s10 + $0x50] sm:$0xff]  ;;  %v5464_v50 = vld [vmem:[%s11576_s10 + $0x18] sm:$0xff] }
0x1363   : > { %5388 = vadd.xlane.f32.xlu0 %v5387_v11  ;;  %v5365_v14 = vpop.xlane.xlu0 %5364  ;;  %v9120_v11 = vcombine.high %v5463_v25, %v5471_v8 }
0x1364   : > { %v13357_v52 = vsub.f32 %v13292_v7, %v5371_v37  ;;  %v5372_v60 = vmul.f32 0.03125, %v5365_v14  ;;  %v9119_v37 = vcombine.low %v5463_v25, %v5471_v8  ;;  %v5472_v14 = vld [vmem:[%s11576_s10 + $0x58] sm:$0xff] }
0x1365   : > { %5918 = vmatprep.subr.bf16.mxu1 %v9120_v11 }
0x1366   : > { %v13360_v35 = vsub.f32 %v13297_v33, %v5372_v60  ;;  %v5381_v30 = vmul.f32 %v13357_v52, %v13357_v52  ;;  %v9121_v60 = vcombine.low %v5464_v50, %v5472_v14 }
0x1367   : > { %v3817_v38 = vpop.xlane.xlu0 %3816 }
0x1368   : > { %v3830_v54 = vmul.f32 0.03125, %v3817_v38  ;;  %v5390_v18 = vsel %vm1138_vm5, %v5381_v30, 0.0  ;;  %v5382_v44 = vmul.f32 %v13360_v35, %v13360_v35  ;;  %v9122_v30 = vcombine.high %v5464_v50, %v5472_v14  ;;  %v5479_v38 = vld [vmem:[%s11576_s10 + $0x90] sm:$0xff] }
0x1369   : > { %5391 = vadd.xlane.f32.xlu1 %v5390_v18  ;;  %v5368_v26 = vpop.xlane.xlu1 %5367  ;;  %v5480_v18 = vld [vmem:[%s11576_s10 + $0x98] sm:$0xff] }
0x136a   : > { %v3835_v21 = vadd.f32 1e-05, %v3830_v54  ;;  %v5373_v28 = vmul.f32 0.03125, %v5368_v26  ;;  %v5393_v7 = vsel %vm1138_vm5, %v5382_v44, 0.0  ;;  %6001 = vmatprep.subr.bf16.mxu0 %v9122_v30  ;;  %v5487_v54 = vld [vmem:[%s11576_s10 + $0xd0] sm:$0xff]  ;;  %v5481_v30 = vld [vmem:[%s11576_s10 + $0xa0] sm:$0xff] }
0x136b   : > { %5394 = vadd.xlane.f32.xlu0 %v5393_v7  ;;  %v3823_v43 = vpop.xlane.xlu0 %3822  ;;  %v9135_v44 = vcombine.low %v5479_v38, %v5487_v54  ;;  %v9136_v26 = vcombine.high %v5479_v38, %v5487_v54  ;;  %v5489_v38 = vld [vmem:[%s11576_s10 + $0xe0] sm:$0xff]  ;;  %v5482_v54 = vld [vmem:[%s11576_s10 + $0xa8] sm:$0xff] }
0x136c   : > { %11273 = vrsqrt.f32 %v3835_v21  ;;  %v13369_v33 = vsub.f32 %v13315_v57, %v5373_v28  ;;  %v3832_v32 = vmul.f32 0.03125, %v3823_v43  ;;  %v5488_v21 = vld [vmem:[%s11576_s10 + $0xd8] sm:$0xff]  ;;  %v13433_v43 = vld [vmem:[%s11576_s10 + $0x20] sm:$0xff] }
0x136d   : > { %v3820_v2 = vpop.xlane.xlu1 %3819  ;;  %v9137_v28 = vcombine.low %v5480_v18, %v5488_v21  ;;  %v9138_v7 = vcombine.high %v5480_v18, %v5488_v21  ;;  %v5490_v18 = vld [vmem:[%s11576_s10 + $0xe8] sm:$0xff]  ;;  %v5467_v21 = vld [vmem:[%s11576_s10 + $0x30] sm:$0xff] }
0x136e   : > { %v3837_v55 = vadd.f32 1e-05, %v3832_v32  ;;  %v3831_v1 = vmul.f32 0.03125, %v3820_v2  ;;  %v5383_v47 = vmul.f32 %v13369_v33, %v13369_v33  ;;  %v13436_v32 = vld [vmem:[%s11576_s10 + $0x60] sm:$0xff]  ;;  %v13439_v2 = vld [vmem:[%s11576_s10 + $0x28] sm:$0xff] }
0x136f   : > { %v3829_v45 = vpop.xlane.xlu0 %3828 }
0x1370   : > { %11275 = vrsqrt.f32 %v3837_v55  ;;  %v3836_v5 = vadd.f32 1e-05, %v3831_v1  ;;  %v3834_v4 = vmul.f32 0.03125, %v3829_v45  ;;  %v5396_v22 = vsel %vm1138_vm5, %v5383_v47, 0.0  ;;  %v13446_v47 = vld [vmem:[%s11576_s10 + $0x68] sm:$0xff] }
0x1371   : > { %5397 = vadd.xlane.f32.xlu1 %v5396_v22  ;;  %v3826_v49 = vpop.xlane.xlu1 %3825  ;;  %v9123_v55 = vcombine.low %v13433_v43, %v13436_v32  ;;  %v9124_v1 = vcombine.high %v13433_v43, %v13436_v32  ;;  %v9125_v45 = vcombine.low %v13439_v2, %v13446_v47  ;;  %v5483_v43 = vld [vmem:[%s11576_s10 + $0xb0] sm:$0xff] }
0x1372   : > { %11277 = vrsqrt.f32 %v3836_v5  ;;  %v3839_v57 = vadd.f32 1e-05, %v3834_v4  ;;  %v3833_v27 = vmul.f32 0.03125, %v3826_v49  ;;  %v9126_v5 = vcombine.high %v13439_v2, %v13446_v47  ;;  %v5491_v32 = vld [vmem:[%s11576_s10 + $0xf0] sm:$0xff]  ;;  %v5484_v2 = vld [vmem:[%s11576_s10 + $0xb8] sm:$0xff] }
0x1374   : > { %11279 = vrsqrt.f32 %v3839_v57  ;;  %v3838_v19 = vadd.f32 1e-05, %v3833_v27 }
0x1376   : > { %v11274_v16 = vpop.eup %11273  ;;  %11281 = vrsqrt.f32 %v3838_v19 }
0x1377   : > { %v3845_v6 = vmul.f32 %v11274_v16, %v13289_v17 }
0x1379   : > { %v3856_v53 = vmul.f32 %v13379_v29, %v3845_v6 }
0x137a   : > { %v11276_v41 = vpop.eup %11275 }
0x137b   : > { %v3867_v23 = vadd.f32 %v13387_v20, %v3856_v53  ;;  %v3847_v15 = vmul.f32 %v11276_v41, %v13302_v62 }
0x137c   : > { %v11278_v0 = vpop.eup %11277 }
0x137d   : > { %3872 = vst.msk [vmem:[#allocation2] sm:$0xff] %vm1138_vm5, %v3867_v23  ;;  %v3858_v63 = vmul.f32 %v13379_v29, %v3847_v15  ;;  %v3846_v17 = vmul.f32 %v11278_v0, %v13308_v34 }
0x137e   : > { %v11280_v51 = vpop.eup %11279 }
0x137f   : > { %v3869_v3 = vadd.f32 %v13387_v20, %v3858_v63  ;;  %v3857_v46 = vmul.f32 %v13379_v29, %v3846_v17  ;;  %v3849_v59 = vmul.f32 %v11280_v51, %v13311_v56 }
0x1380   : > { %v11282_v48 = vpop.eup %11281 }
0x1381   : > { %3874 = vst.msk [vmem:[#allocation2 + $0x10] sm:$0xff] %vm1138_vm5, %v3869_v3  ;;  %v3868_v12 = vadd.f32 %v13387_v20, %v3857_v46  ;;  %v3860_v62 = vmul.f32 %v13379_v29, %v3849_v59  ;;  %v3848_v61 = vmul.f32 %v11282_v48, %v13320_v39 }
0x1383   : > { %3873 = vst.msk [vmem:[#allocation2 + $0x8] sm:$0xff] %vm1138_vm5, %v3868_v12  ;;  %v3871_v34 = vadd.f32 %v13387_v20, %v3860_v62  ;;  %v3859_v13 = vmul.f32 %v13379_v29, %v3848_v61 }
0x1384   : > { %v5446_v42 = vld [vmem:[#allocation2] sm:$0xff] }
0x1385   : > { %3876 = vst.msk [vmem:[#allocation2 + $0x20] sm:$0xff] %vm1138_vm5, %v3871_v34  ;;  %v3870_v56 = vadd.f32 %v13387_v20, %v3859_v13 }
0x1387   : > { %3875 = vst.msk [vmem:[#allocation2 + $0x18] sm:$0xff] %vm1138_vm5, %v3870_v56 }
0x1388   : > { %v5448_v9 = vld [vmem:[#allocation2 + $0x10] sm:$0xff] }
0x138a   : > { %v5447_v24 = vld [vmem:[#allocation2 + $0x8] sm:$0xff] }
0x138b   : > { %v13408_v58 = vpack.c.bf16 %v5447_v24, %v5446_v42 }
0x138d   : > { %9147 = vmatmul.mubr.msk.bf16.vlgmr.msra.gmra.mrb[248].mxu1 %vm1138_vm5, %v13408_v58  ;;  %9152 = vmatmul.mubr.msk.bf16.vlgmr.msra.gmra.mrb[248].mxu0 %vm1138_vm5, %v13408_v58 }
0x138e   : > { %5794 = vmatprep.mubr.bf16.mxu1 %v11384_v36  ;;  %5877 = vmatprep.mubr.bf16.mxu0 %v11384_v36  ;;  %v5449_v39 = vld [vmem:[#allocation2 + $0x18] sm:$0xff] }
0x138f   : > { %v13416_v10 = vpack.c.bf16 %v5449_v39, %v5448_v9  ;;  %5919 = vmatpush1.bf16.msra.mxu1 %v9119_v37  ;;  %6002 = vmatpush1.bf16.msra.mxu0 %v9121_v60  ;;  %v5450_v39 = vld [vmem:[#allocation2 + $0x20] sm:$0xff] }
0x1390   : > { %5920 = vmatprep.subr.bf16.mxu1 %v9136_v26  ;;  %6003 = vmatprep.subr.bf16.mxu0 %v9138_v7  ;;  %v9142_v26 = vcombine.high %v5482_v54, %v5490_v18  ;;  %v5468_v7 = vld [vmem:[%s11576_s10 + $0x38] sm:$0xff] }
0x1393   : > { %5921 = vmatpush1.bf16.msra.mxu1 %v9135_v44  ;;  %6004 = vmatpush1.bf16.msra.mxu0 %v9137_v28  ;;  %v9140_v44 = vcombine.high %v5481_v30, %v5489_v38  ;;  %v5475_v28 = vld [vmem:[%s11576_s10 + $0x70] sm:$0xff] }
0x1394   : > { %6084 = vmatprep.subr.bf16.mxu1 %v9124_v1  ;;  %6167 = vmatprep.subr.bf16.mxu0 %v9126_v5  ;;  %v5476_v1 = vld [vmem:[%s11576_s10 + $0x78] sm:$0xff]  ;;  %v9139_v5 = vcombine.low %v5481_v30, %v5489_v38  ;;  %v9127_v47 = vcombine.low %v5467_v21, %v5475_v28 }
0x1395   : > { %9148 = vmatmul.mubr.msk.bf16.gmra.mrb[252].mxu1 %vm1138_vm5, %v13416_v10  ;;  %9153 = vmatmul.mubr.msk.bf16.gmra.mrb[252].mxu0 %vm1138_vm5, %v13416_v10 }
0x1396   : > { %5804 = vmatprep.mubr.bf16.mxu1 %v11384_v36  ;;  %5887 = vmatprep.mubr.bf16.mxu0 %v11384_v36 }
0x13ee   : > { %v5386_v4 = vpop.xlane.xlu1 %5385 }
0x13ef   : > { %v5399_v22 = vmul.f32 0.03125, %v5386_v4  ;;  %v9141_v4 = vcombine.low %v5482_v54, %v5490_v18 }
0x13f0   : > { %v5389_v49 = vpop.xlane.xlu0 %5388 }
0x13f1   : > { %v5404_v57 = vadd.f32 1e-05, %v5399_v22  ;;  %v5400_v27 = vmul.f32 0.03125, %v5389_v49  ;;  %v9128_v22 = vcombine.high %v5467_v21, %v5475_v28  ;;  %v9130_v49 = vcombine.high %v5468_v7, %v5476_v1 }
0x13f3   : > { %11283 = vrsqrt.f32 %v5404_v57  ;;  %v5405_v19 = vadd.f32 1e-05, %v5400_v27  ;;  %v9144_v57 = vcombine.high %v5483_v43, %v5491_v32 }
0x13f5   : > { %11285 = vrsqrt.f32 %v5405_v19  ;;  %v9143_v19 = vcombine.low %v5483_v43, %v5491_v32 }
0x13f6   : > { %v5392_v16 = vpop.xlane.xlu1 %5391 }
0x13f7   : > { %v5401_v6 = vmul.f32 0.03125, %v5392_v16 }
0x13f8   : > { %v5395_v53 = vpop.xlane.xlu0 %5394 }
0x13f9   : > { %v5406_v41 = vadd.f32 1e-05, %v5401_v6  ;;  %v5402_v23 = vmul.f32 0.03125, %v5395_v53  ;;  %v10985_v6 = vld [vmem:[%s11591_s1 + $0x40] sm:$0xff]  }
0x13fa   : > { %v10986_v53 = vld [vmem:[%s11591_s1 + $0xc0] sm:$0xff]  }
0x13fb   : > { %11287 = vrsqrt.f32 %v5406_v41  ;;  %v5407_v15 = vadd.f32 1e-05, %v5402_v23  ;;  %v14560_v41 = vlaneseq }
0x13fd   : > { %v11284_v0 = vpop.eup %11283  ;;  %11289 = vrsqrt.f32 %v5407_v15  ;;  %v13553_v23 = vshrl.u32 %v14560_v41, 7 }
0x13fe   : > { %v5414_v63 = vmul.f32 %v11284_v0, %v13345_v40  ;;  %v5398_v17 = vpop.xlane.xlu1 %5397 }
0x13ff   : > { %v11286_v51 = vpop.eup %11285  ;;  %v5403_v3 = vmul.f32 0.03125, %v5398_v17  ;;  %v5499_v15 = vsub.s32 0, %v13553_v23  ;;  %v5507_v0 = vsub.s32 2, %v13553_v23  ;;  %v5503_v17 = vsub.s32 1, %v13553_v23 }
0x1400   : > { %v5425_v46 = vmul.f32 %v13379_v29, %v5414_v63  ;;  %v5415_v59 = vmul.f32 %v11286_v51, %v13348_v31  ;;  %v13564_v63 = vld [vmem:[%s11581_s23] sm:$0xff]  ;;  %v5511_v51 = vsub.s32 3, %v13553_v23 }
0x1401   : > { %v5408_v48 = vadd.f32 1e-05, %v5403_v3  ;;  %v13571_v3 = vrot.slane %v13564_v63, %v5499_v15 }
0x1402   : > { %v5436_v12 = vadd.f32 %v13387_v20, %v5425_v46  ;;  %v5426_v62 = vmul.f32 %v13379_v29, %v5415_v59  ;;  %v13576_v46 = vrot.slane %v13564_v63, %v5507_v0  ;;  %v13585_v59 = vrot.slane %v13564_v63, %v5503_v17 }
0x1403   : > { %11291 = vrsqrt.f32 %v5408_v48  ;;  %v13590_v48 = vrot.slane %v13564_v63, %v5511_v51 }
0x1404   : > { %5441 = vst.msk [vmem:[#allocation2 + $0x28] sm:$0xff] %vm1138_vm5, %v5436_v12  ;;  %v5437_v61 = vadd.f32 %v13387_v20, %v5426_v62 }
0x1405   : > { %v11288_v34 = vpop.eup %11287 }
0x1406   : > { %5442 = vst.msk [vmem:[#allocation2 + $0x30] sm:$0xff] %vm1138_vm5, %v5437_v61  ;;  %v5416_v40 = vmul.f32 %v11288_v34, %v13357_v52 }
0x1407   : > { %v11290_v13 = vpop.eup %11289 }
0x1408   : > { %v5427_v56 = vmul.f32 %v13379_v29, %v5416_v40  ;;  %v5417_v31 = vmul.f32 %v11290_v13, %v13360_v35 }
0x140a   : > { %v5438_v42 = vadd.f32 %v13387_v20, %v5427_v56  ;;  %v5428_v24 = vmul.f32 %v13379_v29, %v5417_v31 }
0x140b   : > { %v5451_v9 = vld [vmem:[#allocation2 + $0x28] sm:$0xff] }
0x140c   : > { %5443 = vst.msk [vmem:[#allocation2 + $0x38] sm:$0xff] %vm1138_vm5, %v5438_v42  ;;  %v5439_v25 = vadd.f32 %v13387_v20, %v5428_v24  ;;  %v13467_v8 = vpack.c.bf16 %v5451_v9, %v5450_v39 }
0x140d   : > { %v11292_v50 = vpop.eup %11291  ;;  %v5452_v11 = vld [vmem:[#allocation2 + $0x30] sm:$0xff] }
0x140e   : > { %5444 = vst.msk [vmem:[#allocation2 + $0x40] sm:$0xff] %vm1138_vm5, %v5439_v25  ;;  %v5418_v52 = vmul.f32 %v11292_v50, %v13369_v33  ;;  %9149 = vmatmul.mubr.msk.bf16.gmra.mrb[0].mxu1 %vm1138_vm5, %v13467_v8  ;;  %9154 = vmatmul.mubr.msk.bf16.gmra.mrb[0].mxu0 %vm1138_vm5, %v13467_v8 }
0x140f   : > { %5814 = vmatprep.mubr.bf16.mxu1 %v11384_v36  ;;  %5897 = vmatprep.mubr.bf16.mxu0 %v11384_v36 }
0x1410   : > { %v5429_v35 = vmul.f32 %v13379_v29, %v5418_v52 }
0x1412   : > { %v5440_v37 = vadd.f32 %v13387_v20, %v5429_v35 }
0x1413   : > { %v5453_v14 = vld [vmem:[#allocation2 + $0x38] sm:$0xff] }
0x1414   : > { %5445 = vst.msk [vmem:[#allocation2 + $0x48] sm:$0xff] %vm1138_vm5, %v5440_v37  ;;  %v13480_v33 = vpack.c.bf16 %v5453_v14, %v5452_v11 }
0x1415   : > { %v5454_v29 = vld [vmem:[#allocation2 + $0x40] sm:$0xff] }
0x1416   : > { %9150 = vmatmul.mubr.msk.bf16.gmra.mrb[4].mxu1 %vm1138_vm5, %v13480_v33  ;;  %9155 = vmatmul.mubr.msk.bf16.gmra.mrb[4].mxu0 %vm1138_vm5, %v13480_v33 }
0x1417   : > { %5824 = vmatprep.mubr.bf16.mxu1 %v11384_v36  ;;  %5907 = vmatprep.mubr.bf16.mxu0 %v11384_v36 }
0x141b   : > { %v5455_v20 = vld [vmem:[#allocation2 + $0x48] sm:$0xff] }
0x141c   : > { %v13488_v60 = vpack.c.bf16 %v5455_v20, %v5454_v29 }
0x141e   : > { %9151 = vmatmul.mubr.msk.bf16.gmra.mrb[8].mxu1 %vm1138_vm5, %v13488_v60  ;;  %9156 = vmatmul.mubr.msk.bf16.gmra.mrb[8].mxu0 %vm1138_vm5, %v13488_v60 }
0x141f   : > { %5950 = vmatprep.mubr.bf16.mxu1 %v11384_v36  ;;  %6033 = vmatprep.mubr.bf16.mxu0 %v11384_v36 }
0x1426   : > { %9157 = vmatmul.mubr.msk.bf16.vlgmr.msra.gmra.mrb[12].mxu1 %vm1138_vm5, %v13408_v58  ;;  %9162 = vmatmul.mubr.msk.bf16.vlgmr.msra.gmra.mrb[12].mxu0 %vm1138_vm5, %v13408_v58 }
0x1427   : > { %5960 = vmatprep.mubr.bf16.mxu1 %v11384_v36  ;;  %6043 = vmatprep.mubr.bf16.mxu0 %v11384_v36 }
0x1428   : > { %6085 = vmatpush1.bf16.msra.mxu1 %v9123_v55  ;;  %6168 = vmatpush1.bf16.msra.mxu0 %v9125_v45  ;;  %v5492_v55 = vld [vmem:[%s11576_s10 + $0xf8] sm:$0xff]  ;;  %v9129_v45 = vcombine.low %v5468_v7, %v5476_v1 }
0x1429   : > { %6086 = vmatprep.subr.bf16.mxu1 %v9140_v44  ;;  %6169 = vmatprep.subr.bf16.mxu0 %v9142_v26  ;;  %v9146_v27 = vcombine.high %v5484_v2, %v5492_v55  ;;  %v9145_v16 = vcombine.low %v5484_v2, %v5492_v55 }
0x142c   : > { %6087 = vmatpush1.bf16.msra.mxu1 %v9139_v5  ;;  %6170 = vmatpush1.bf16.msra.mxu0 %v9141_v4 }
0x142d   : > { %6250 = vmatprep.subr.bf16.mxu1 %v9128_v22  ;;  %6333 = vmatprep.subr.bf16.mxu0 %v9130_v49 }
0x142e   : > { %9158 = vmatmul.mubr.msk.bf16.gmra.mrb[16].mxu1 %vm1138_vm5, %v13416_v10  ;;  %9163 = vmatmul.mubr.msk.bf16.gmra.mrb[16].mxu0 %vm1138_vm5, %v13416_v10 }
0x142f   : > { %5970 = vmatprep.mubr.bf16.mxu1 %v11384_v36  ;;  %6053 = vmatprep.mubr.bf16.mxu0 %v11384_v36 }
0x1436   : > { %9159 = vmatmul.mubr.msk.bf16.gmra.mrb[20].mxu1 %vm1138_vm5, %v13467_v8  ;;  %9164 = vmatmul.mubr.msk.bf16.gmra.mrb[20].mxu0 %vm1138_vm5, %v13467_v8 }
0x1437   : > { %5980 = vmatprep.mubr.bf16.mxu1 %v11384_v36  ;;  %6063 = vmatprep.mubr.bf16.mxu0 %v11384_v36 }
0x143e   : > { %9160 = vmatmul.mubr.msk.bf16.gmra.mrb[24].mxu1 %vm1138_vm5, %v13480_v33  ;;  %9165 = vmatmul.mubr.msk.bf16.gmra.mrb[24].mxu0 %vm1138_vm5, %v13480_v33 }
0x143f   : > { %5990 = vmatprep.mubr.bf16.mxu1 %v11384_v36  ;;  %6073 = vmatprep.mubr.bf16.mxu0 %v11384_v36 }
0x1446   : > { %9161 = vmatmul.mubr.msk.bf16.gmra.mrb[28].mxu1 %vm1138_vm5, %v13488_v60  ;;  %9166 = vmatmul.mubr.msk.bf16.gmra.mrb[28].mxu0 %vm1138_vm5, %v13488_v60 }
0x1447   : > { %6116 = vmatprep.mubr.bf16.mxu1 %v11384_v36  ;;  %6199 = vmatprep.mubr.bf16.mxu0 %v11384_v36 }
0x144e   : > { %9167 = vmatmul.mubr.msk.bf16.vlgmr.msra.gmra.mrb[32].mxu1 %vm1138_vm5, %v13408_v58  ;;  %9172 = vmatmul.mubr.msk.bf16.vlgmr.msra.gmra.mrb[32].mxu0 %vm1138_vm5, %v13408_v58 }
0x144f   : > { %6126 = vmatprep.mubr.bf16.mxu1 %v11384_v36  ;;  %6209 = vmatprep.mubr.bf16.mxu0 %v11384_v36 }
0x1450   : > { %6251 = vmatpush1.bf16.msra.mxu1 %v9127_v47  ;;  %6334 = vmatpush1.bf16.msra.mxu0 %v9129_v45 }
0x1451   : > { %6252 = vmatprep.subr.bf16.mxu1 %v9144_v57  ;;  %6335 = vmatprep.subr.bf16.mxu0 %v9146_v27 }
0x1454   : > { %6253 = vmatpush1.bf16.msra.mxu1 %v9143_v19  ;;  %6336 = vmatpush1.bf16.msra.mxu0 %v9145_v16 }
0x1455   : > { %9616 = vmatprep.subr.bf16.mxu1 %v10985_v6  ;;  %9662 = vmatprep.subr.bf16.mxu0 %v10986_v53 }
0x1456   : > { %9168 = vmatmul.mubr.msk.bf16.gmra.mrb[36].mxu1 %vm1138_vm5, %v13416_v10  ;;  %9173 = vmatmul.mubr.msk.bf16.gmra.mrb[36].mxu0 %vm1138_vm5, %v13416_v10 }
0x1457   : > { %6136 = vmatprep.mubr.bf16.mxu1 %v11384_v36  ;;  %6219 = vmatprep.mubr.bf16.mxu0 %v11384_v36 }
0x145e   : > { %9169 = vmatmul.mubr.msk.bf16.gmra.mrb[40].mxu1 %vm1138_vm5, %v13467_v8  ;;  %9174 = vmatmul.mubr.msk.bf16.gmra.mrb[40].mxu0 %vm1138_vm5, %v13467_v8 }
0x145f   : > { %6146 = vmatprep.mubr.bf16.mxu1 %v11384_v36  ;;  %6229 = vmatprep.mubr.bf16.mxu0 %v11384_v36 }
0x1460   : > { %v5786_v12 = vpop.f32.mrb[248].mxu1  ;;  %v5869_v62 = vpop.f32.mrb[248].mxu0 }
0x1461   : > { %v5787_v61 = vadd.f32 %v5786_v12, %v13571_v3  ;;  %v5870_v34 = vadd.f32 %v5869_v62, %v13576_v46  ;;  %v5788_v40 = vpop.f32.mrb[249].mxu1  ;;  %v5871_v13 = vpop.f32.mrb[249].mxu0 }
0x1462   : > { %v5789_v56 = vadd.f32 %v5788_v40, %v13585_v59  ;;  %v5872_v31 = vadd.f32 %v5871_v13, %v13590_v48  ;;  %v5790_v42 = vpop.f32.mrb[250].mxu1  ;;  %v5873_v24 = vpop.f32.mrb[250].mxu0 }
0x1463   : > { %v5791_v39 = vadd.f32 %v5790_v42, %v13571_v3  ;;  %v5874_v9 = vadd.f32 %v5873_v24, %v13576_v46  ;;  %v5792_v25 = vpop.f32.mrb[251].mxu1  ;;  %v5875_v50 = vpop.f32.mrb[251].mxu0  ;;  %v6416_v37 = vmax.f32 %v5787_v61, 0.0  ;;  %v6418_v11 = vmax.f32 %v5870_v34, 0.0  ;;  %v10987_v42 = vld [vmem:[%s11591_s1] sm:$0xff]  }
0x1464   : > { %v5793_v52 = vadd.f32 %v5792_v25, %v13585_v59  ;;  %v5876_v35 = vadd.f32 %v5875_v50, %v13590_v48  ;;  %v6417_v20 = vmax.f32 %v5789_v56, 0.0  ;;  %v6419_v30 = vmax.f32 %v5872_v31, 0.0  ;;  %v10988_v24 = vld [vmem:[%s11591_s1 + $0x80] sm:$0xff]   ;;  %v10991_v25 = vld [vmem:[%s11591_s1 + $0x8] sm:$0xff]  }
0x1465   : > { %v6432_v14 = vmax.f32 %v5791_v39, 0.0  ;;  %v6434_v29 = vmax.f32 %v5874_v9, 0.0  ;;  %v10989_v39 = vld [vmem:[%s11591_s1 + $0x48] sm:$0xff]  }
0x1466   : > { %v6433_v38 = vmax.f32 %v5793_v52, 0.0  ;;  %v6435_v54 = vmax.f32 %v5876_v35, 0.0  ;;  %9170 = vmatmul.mubr.msk.bf16.gmra.mrb[44].mxu1 %vm1138_vm5, %v13480_v33  ;;  %9175 = vmatmul.mubr.msk.bf16.gmra.mrb[44].mxu0 %vm1138_vm5, %v13480_v33  ;;  %v10990_v9 = vld [vmem:[%s11591_s1 + $0xc8] sm:$0xff]   ;;  %v10993_v52 = vld [vmem:[%s11591_s1 + $0x50] sm:$0xff]  }
0x1467   : > { %v13606_v18 = vpack.c.bf16 %v6432_v14, %v6416_v37  ;;  %v13608_v44 = vpack.c.bf16 %v6434_v29, %v6418_v11  ;;  %6156 = vmatprep.mubr.bf16.mxu1 %v11384_v36  ;;  %6239 = vmatprep.mubr.bf16.mxu0 %v11384_v36  ;;  %v10992_v50 = vld [vmem:[%s11591_s1 + $0x88] sm:$0xff]   ;;  %v10994_v35 = vld [vmem:[%s11591_s1 + $0xd0] sm:$0xff]   ;;  %v10997_v11 = vld [vmem:[%s11591_s1 + $0x58] sm:$0xff]  }
0x1468   : > { %v13612_v26 = vpack.c.bf16 %v6433_v38, %v6417_v20  ;;  %v13614_v21 = vpack.c.bf16 %v6435_v54, %v6419_v30  ;;  %v5796_v28 = vpop.f32.mrb[252].mxu1  ;;  %v5879_v7 = vpop.f32.mrb[252].mxu0  ;;  %v10995_v37 = vld [vmem:[%s11591_s1 + $0x10] sm:$0xff]   ;;  %v10998_v14 = vld [vmem:[%s11591_s1 + $0xd8] sm:$0xff]   ;;  %v11001_v30 = vld [vmem:[%s11591_s1 + $0x60] sm:$0xff]  }
0x1469   : > { %v5797_v1 = vadd.f32 %v5796_v28, %v13571_v3  ;;  %v5880_v5 = vadd.f32 %v5879_v7, %v13576_v46  ;;  %v5798_v4 = vpop.f32.mrb[253].mxu1  ;;  %v5881_v22 = vpop.f32.mrb[253].mxu0  ;;  %v10999_v29 = vld [vmem:[%s11591_s1 + $0x18] sm:$0xff]   ;;  %v11002_v38 = vld [vmem:[%s11591_s1 + $0xe0] sm:$0xff]   ;;  %v11005_v28 = vld [vmem:[%s11591_s1 + $0x68] sm:$0xff]  }
0x146a   : > { %v5799_v49 = vadd.f32 %v5798_v4, %v13585_v59  ;;  %v5882_v43 = vadd.f32 %v5881_v22, %v13590_v48  ;;  %v5800_v32 = vpop.f32.mrb[254].mxu1  ;;  %v5883_v2 = vpop.f32.mrb[254].mxu0  ;;  %v11000_v20 = vld [vmem:[%s11591_s1 + $0x98] sm:$0xff]   ;;  %v11003_v54 = vld [vmem:[%s11591_s1 + $0x20] sm:$0xff]   ;;  %v11006_v7 = vld [vmem:[%s11591_s1 + $0xe8] sm:$0xff]  }
0x146b   : > { %v5801_v55 = vadd.f32 %v5800_v32, %v13571_v3  ;;  %v5884_v47 = vadd.f32 %v5883_v2, %v13576_v46  ;;  %v5802_v45 = vpop.f32.mrb[255].mxu1  ;;  %v5885_v57 = vpop.f32.mrb[255].mxu0  ;;  %v6448_v16 = vmax.f32 %v5797_v1, 0.0  ;;  %v6450_v6 = vmax.f32 %v5880_v5, 0.0  ;;  %v11007_v1 = vld [vmem:[%s11591_s1 + $0x28] sm:$0xff]   ;;  %v11009_v4 = vld [vmem:[%s11591_s1 + $0x70] sm:$0xff]  }
0x146c   : > { %v5803_v27 = vadd.f32 %v5802_v45, %v13585_v59  ;;  %v5886_v19 = vadd.f32 %v5885_v57, %v13590_v48  ;;  %v6449_v12 = vmax.f32 %v5799_v49, 0.0  ;;  %v6451_v62 = vmax.f32 %v5882_v43, 0.0  ;;  %v11008_v5 = vld [vmem:[%s11591_s1 + $0xa8] sm:$0xff]   ;;  %v11010_v22 = vld [vmem:[%s11591_s1 + $0xf0] sm:$0xff]   ;;  %v11013_v43 = vld [vmem:[%s11591_s1 + $0x78] sm:$0xff]  }
0x146d   : > { %v6464_v53 = vmax.f32 %v5801_v55, 0.0  ;;  %v6466_v41 = vmax.f32 %v5884_v47, 0.0  ;;  %v11011_v49 = vld [vmem:[%s11591_s1 + $0x30] sm:$0xff]   ;;  %v11014_v32 = vld [vmem:[%s11591_s1 + $0xf8] sm:$0xff]   ;;  %v11017_v47 = vld [vmem:[%s11591_s1 + $0x140] sm:$0xff]  }
0x146e   : > { %v6465_v61 = vmax.f32 %v5803_v27, 0.0  ;;  %v6467_v34 = vmax.f32 %v5886_v19, 0.0  ;;  %9171 = vmatmul.mubr.msk.bf16.gmra.mrb[48].mxu1 %vm1138_vm5, %v13488_v60  ;;  %9176 = vmatmul.mubr.msk.bf16.gmra.mrb[48].mxu0 %vm1138_vm5, %v13488_v60  ;;  %v11015_v2 = vld [vmem:[%s11591_s1 + $0x38] sm:$0xff]   ;;  %v11018_v45 = vld [vmem:[%s11591_s1 + $0x1c0] sm:$0xff]   ;;  %v11021_v57 = vld [vmem:[%s11591_s1 + $0x148] sm:$0xff]  }
0x146f   : > { %v13628_v40 = vpack.c.bf16 %v6464_v53, %v6448_v16  ;;  %v13630_v13 = vpack.c.bf16 %v6466_v41, %v6450_v6  ;;  %6282 = vmatprep.mubr.bf16.mxu1 %v11384_v36  ;;  %6365 = vmatprep.mubr.bf16.mxu0 %v11384_v36  ;;  %v11016_v55 = vld [vmem:[%s11591_s1 + $0xb8] sm:$0xff]   ;;  %v11022_v27 = vld [vmem:[%s11591_s1 + $0x1c8] sm:$0xff]   ;;  %v11026_v19 = vld [vmem:[%s11591_s1 + $0x1d0] sm:$0xff]  }
0x1470   : > { %v13634_v56 = vpack.c.bf16 %v6465_v61, %v6449_v12  ;;  %v13636_v31 = vpack.c.bf16 %v6467_v34, %v6451_v62  ;;  %v11029_v16 = vld [vmem:[%s11591_s1 + $0x158] sm:$0xff]   ;;  %v11033_v12 = vld [vmem:[%s11591_s1 + $0x160] sm:$0xff]  }
0x1471   : > { %v11030_v6 = vld [vmem:[%s11591_s1 + $0x1d8] sm:$0xff]   ;;  %v11034_v62 = vld [vmem:[%s11591_s1 + $0x1e0] sm:$0xff]  }
0x1472   : > { %v11031_v53 = vld [vmem:[%s11591_s1 + $0x118] sm:$0xff]   ;;  %v11035_v61 = vld [vmem:[%s11591_s1 + $0x120] sm:$0xff]  }
0x1473   : > { %v11032_v41 = vld [vmem:[%s11591_s1 + $0x198] sm:$0xff]   ;;  %v11036_v34 = vld [vmem:[%s11591_s1 + $0x1a0] sm:$0xff]  }
0x1476   : > { %9177 = vmatmul.mubr.msk.bf16.vlgmr.msra.gmra.mrb[52].mxu1 %vm1138_vm5, %v13408_v58  ;;  %9182 = vmatmul.mubr.msk.bf16.vlgmr.msra.gmra.mrb[52].mxu0 %vm1138_vm5, %v13408_v58  ;;  %v10996_v58 = vld [vmem:[%s11591_s1 + $0x90] sm:$0xff]  }
0x1477   : > { %6292 = vmatprep.mubr.bf16.mxu1 %v11384_v36  ;;  %6375 = vmatprep.mubr.bf16.mxu0 %v11384_v36 }
0x1478   : > { %9617 = vmatpush3.bf16.msra.mxu1 %v10987_v42  ;;  %9663 = vmatpush3.bf16.msra.mxu0 %v10988_v24  ;;  %v11041_v42 = vld [vmem:[%s11591_s1 + $0x170] sm:$0xff]  }
0x1479   : > { %9618 = vmatprep.subr.bf16.mxu1 %v10989_v39  ;;  %9664 = vmatprep.subr.bf16.mxu0 %v10990_v9  ;;  %v11042_v24 = vld [vmem:[%s11591_s1 + $0x1f0] sm:$0xff]  }
0x147a   : > { %v11043_v39 = vld [vmem:[%s11591_s1 + $0x130] sm:$0xff]  }
0x147b   : > { %v11044_v9 = vld [vmem:[%s11591_s1 + $0x1b0] sm:$0xff]  }
0x147c   : > { %9619 = vmatpush3.bf16.msra.mxu1 %v10991_v25  ;;  %9665 = vmatpush3.bf16.msra.mxu0 %v10992_v50  ;;  %v11045_v25 = vld [vmem:[%s11591_s1 + $0x178] sm:$0xff]  }
0x147d   : > { %9620 = vmatprep.subr.bf16.mxu1 %v10993_v52  ;;  %9666 = vmatprep.subr.bf16.mxu0 %v10994_v35  ;;  %v11046_v50 = vld [vmem:[%s11591_s1 + $0x1f8] sm:$0xff]  }
0x147e   : > { %9178 = vmatmul.mubr.msk.bf16.gmra.mrb[56].mxu1 %vm1138_vm5, %v13416_v10  ;;  %9183 = vmatmul.mubr.msk.bf16.gmra.mrb[56].mxu0 %vm1138_vm5, %v13416_v10  ;;  %v11004_v10 = vld [vmem:[%s11591_s1 + $0xa0] sm:$0xff]   ;;  %v11047_v52 = vld [vmem:[%s11591_s1 + $0x138] sm:$0xff]  }
0x147f   : > { %6302 = vmatprep.mubr.bf16.mxu1 %v11384_v36  ;;  %6385 = vmatprep.mubr.bf16.mxu0 %v11384_v36  ;;  %v11048_v35 = vld [vmem:[%s11591_s1 + $0x1b8] sm:$0xff]  }
0x1480   : > { %9621 = vmatpush3.bf16.msra.mxu1 %v10995_v37  ;;  %9667 = vmatpush3.bf16.msra.mxu0 %v10996_v58  ;;  %v11049_v37 = vld [vmem:[%s11591_s1 + $0x240] sm:$0xff]  }
0x1481   : > { %9622 = vmatprep.subr.bf16.mxu1 %v10997_v11  ;;  %9668 = vmatprep.subr.bf16.mxu0 %v10998_v14  ;;  %v11050_v58 = vld [vmem:[%s11591_s1 + $0x2c0] sm:$0xff]  }
0x1484   : > { %9623 = vmatpush3.bf16.msra.mxu1 %v10999_v29  ;;  %9669 = vmatpush3.bf16.msra.mxu0 %v11000_v20 }
0x1485   : > { %9624 = vmatprep.subr.bf16.mxu1 %v11001_v30  ;;  %9670 = vmatprep.subr.bf16.mxu0 %v11002_v38 }
0x1486   : > { %9179 = vmatmul.mubr.msk.bf16.gmra.mrb[60].mxu1 %vm1138_vm5, %v13467_v8  ;;  %9184 = vmatmul.mubr.msk.bf16.gmra.mrb[60].mxu0 %vm1138_vm5, %v13467_v8  ;;  %v11012_v8 = vld [vmem:[%s11591_s1 + $0xb0] sm:$0xff]  }
0x1487   : > { %6312 = vmatprep.mubr.bf16.mxu1 %v11384_v36  ;;  %6395 = vmatprep.mubr.bf16.mxu0 %v11384_v36 }
0x1488   : > { %9625 = vmatpush3.bf16.msra.mxu1 %v11003_v54  ;;  %9671 = vmatpush3.bf16.msra.mxu0 %v11004_v10 }
0x1489   : > { %9626 = vmatprep.subr.bf16.mxu1 %v11005_v28  ;;  %9672 = vmatprep.subr.bf16.mxu0 %v11006_v7 }
0x148c   : > { %9627 = vmatpush3.bf16.msra.mxu1 %v11007_v1  ;;  %9673 = vmatpush3.bf16.msra.mxu0 %v11008_v5 }
0x148d   : > { %9628 = vmatprep.subr.bf16.mxu1 %v11009_v4  ;;  %9674 = vmatprep.subr.bf16.mxu0 %v11010_v22 }
0x148e   : > { %9180 = vmatmul.mubr.msk.bf16.gmra.mrb[64].mxu1 %vm1138_vm5, %v13480_v33  ;;  %9185 = vmatmul.mubr.msk.bf16.gmra.mrb[64].mxu0 %vm1138_vm5, %v13480_v33  ;;  %v11020_v33 = vld [vmem:[%s11591_s1 + $0x180] sm:$0xff]  }
0x148f   : > { %6322 = vmatprep.mubr.bf16.mxu1 %v11384_v36  ;;  %6405 = vmatprep.mubr.bf16.mxu0 %v11384_v36  ;;  %v11019_v36 = vld [vmem:[%s11591_s1 + $0x100] sm:$0xff]  }
0x1490   : > { %9629 = vmatpush3.bf16.msra.mxu1 %v11011_v49  ;;  %9675 = vmatpush3.bf16.msra.mxu0 %v11012_v8 }
0x1491   : > { %9630 = vmatprep.subr.bf16.mxu1 %v11013_v43  ;;  %9676 = vmatprep.subr.bf16.mxu0 %v11014_v32 }
0x1494   : > { %9631 = vmatpush3.bf16.msra.mxu1 %v11015_v2  ;;  %9677 = vmatpush3.bf16.msra.mxu0 %v11016_v55 }
0x1495   : > { %9708 = vmatprep.subr.bf16.mxu1 %v11017_v47  ;;  %9754 = vmatprep.subr.bf16.mxu0 %v11018_v45 }
0x1496   : > { %9181 = vmatmul.mubr.msk.bf16.gmra.mrb[68].mxu1 %vm1138_vm5, %v13488_v60  ;;  %9186 = vmatmul.mubr.msk.bf16.gmra.mrb[68].mxu0 %vm1138_vm5, %v13488_v60  ;;  %v11023_v60 = vld [vmem:[%s11591_s1 + $0x108] sm:$0xff]  }
0x1497   : > { %7719 = vmatprep.mubr.bf16.mxu1 %v13612_v26  ;;  %7792 = vmatprep.mubr.bf16.mxu0 %v13614_v21  ;;  %v11024_v26 = vld [vmem:[%s11591_s1 + $0x188] sm:$0xff]   ;;  %v11025_v21 = vld [vmem:[%s11591_s1 + $0x150] sm:$0xff]  }
0x149e   : > { %7720 = vmatmul.mubr.bf16.vlgmr.msra.gmra.mrb[72].mxu1 %v13606_v18  ;;  %7793 = vmatmul.mubr.bf16.vlgmr.msra.gmra.mrb[72].mxu0 %v13608_v44  ;;  %v11027_v18 = vld [vmem:[%s11591_s1 + $0x110] sm:$0xff]  }
0x149f   : > { %7727 = vmatprep.mubr.bf16.mxu1 %v13634_v56  ;;  %7800 = vmatprep.mubr.bf16.mxu0 %v13636_v31  ;;  %v11028_v44 = vld [vmem:[%s11591_s1 + $0x190] sm:$0xff]   ;;  %v11039_v56 = vld [vmem:[%s11591_s1 + $0x128] sm:$0xff]  }
0x14a0   : > { %9709 = vmatpush3.bf16.msra.mxu1 %v11019_v36  ;;  %9755 = vmatpush3.bf16.msra.mxu0 %v11020_v33  ;;  %v11040_v31 = vld [vmem:[%s11591_s1 + $0x1a8] sm:$0xff]  }
0x14a1   : > { %9710 = vmatprep.subr.bf16.mxu1 %v11021_v57  ;;  %9756 = vmatprep.subr.bf16.mxu0 %v11022_v27 }
0x14a4   : > { %9711 = vmatpush3.bf16.msra.mxu1 %v11023_v60  ;;  %9757 = vmatpush3.bf16.msra.mxu0 %v11024_v26 }
0x14a5   : > { %9712 = vmatprep.subr.bf16.mxu1 %v11025_v21  ;;  %9758 = vmatprep.subr.bf16.mxu0 %v11026_v19 }
0x14a6   : > { %7728 = vmatmul.mubr.bf16.gmra.mrb[76].mxu1 %v13628_v40  ;;  %7801 = vmatmul.mubr.bf16.gmra.mrb[76].mxu0 %v13630_v13  ;;  %v11037_v40 = vld [vmem:[%s11591_s1 + $0x168] sm:$0xff]  }
0x14a7   : > { %v11038_v13 = vld [vmem:[%s11591_s1 + $0x1e8] sm:$0xff]  }
0x14a8   : > { %9713 = vmatpush3.bf16.msra.mxu1 %v11027_v18  ;;  %9759 = vmatpush3.bf16.msra.mxu0 %v11028_v44 }
0x14a9   : > { %9714 = vmatprep.subr.bf16.mxu1 %v11029_v16  ;;  %9760 = vmatprep.subr.bf16.mxu0 %v11030_v6 }
0x14ac   : > { %9715 = vmatpush3.bf16.msra.mxu1 %v11031_v53  ;;  %9761 = vmatpush3.bf16.msra.mxu0 %v11032_v41 }
0x14ad   : > { %9716 = vmatprep.subr.bf16.mxu1 %v11033_v12  ;;  %9762 = vmatprep.subr.bf16.mxu0 %v11034_v62 }
0x14b0   : > { %9717 = vmatpush3.bf16.msra.mxu1 %v11035_v61  ;;  %9763 = vmatpush3.bf16.msra.mxu0 %v11036_v34 }
0x14b1   : > { %9718 = vmatprep.subr.bf16.mxu1 %v11037_v40  ;;  %9764 = vmatprep.subr.bf16.mxu0 %v11038_v13 }
0x14b4   : > { %9719 = vmatpush3.bf16.msra.mxu1 %v11039_v56  ;;  %9765 = vmatpush3.bf16.msra.mxu0 %v11040_v31 }
0x14b5   : > { %9720 = vmatprep.subr.bf16.mxu1 %v11041_v42  ;;  %9766 = vmatprep.subr.bf16.mxu0 %v11042_v24  ;;  %v5515_v42 = vsub.s32 4, %v13553_v23 }
0x14b8   : > { %9721 = vmatpush3.bf16.msra.mxu1 %v11043_v39  ;;  %9767 = vmatpush3.bf16.msra.mxu0 %v11044_v9 }
0x14b9   : > { %9722 = vmatprep.subr.bf16.mxu1 %v11045_v25  ;;  %9768 = vmatprep.subr.bf16.mxu0 %v11046_v50 }
0x14bc   : > { %9723 = vmatpush3.bf16.msra.mxu1 %v11047_v52  ;;  %9769 = vmatpush3.bf16.msra.mxu0 %v11048_v35 }
0x14bd   : > { %9800 = vmatprep.subr.bf16.mxu1 %v11049_v37  ;;  %9846 = vmatprep.subr.bf16.mxu0 %v11050_v58 }
0x14e1   : > { %v5806_v11 = vpop.f32.mrb[0].mxu1  ;;  %v5889_v14 = vpop.f32.mrb[0].mxu0 }
0x14e2   : > { %v5807_v29 = vadd.f32 %v5806_v11, %v13571_v3  ;;  %v5890_v20 = vadd.f32 %v5889_v14, %v13576_v46  ;;  %v5808_v30 = vpop.f32.mrb[1].mxu1  ;;  %v5891_v38 = vpop.f32.mrb[1].mxu0  ;;  %v5523_v14 = vsub.s32 6, %v13553_v23 }
0x14e3   : > { %v5809_v54 = vadd.f32 %v5808_v30, %v13585_v59  ;;  %v5892_v10 = vadd.f32 %v5891_v38, %v13590_v48  ;;  %v5810_v28 = vpop.f32.mrb[2].mxu1  ;;  %v5893_v7 = vpop.f32.mrb[2].mxu0 }
0x14e4   : > { %v5811_v1 = vadd.f32 %v5810_v28, %v13571_v3  ;;  %v5894_v5 = vadd.f32 %v5893_v7, %v13576_v46  ;;  %v5812_v4 = vpop.f32.mrb[3].mxu1  ;;  %v5895_v22 = vpop.f32.mrb[3].mxu0  ;;  %v6480_v43 = vmax.f32 %v5807_v29, 0.0  ;;  %v6482_v32 = vmax.f32 %v5890_v20, 0.0 }
0x14e5   : > { %v5813_v49 = vadd.f32 %v5812_v4, %v13585_v59  ;;  %v5896_v8 = vadd.f32 %v5895_v22, %v13590_v48  ;;  %v6481_v47 = vmax.f32 %v5809_v54, 0.0  ;;  %v6483_v45 = vmax.f32 %v5892_v10, 0.0 }
0x14e6   : > { %v6496_v2 = vmax.f32 %v5811_v1, 0.0  ;;  %v6498_v55 = vmax.f32 %v5894_v5, 0.0  ;;  %v5519_v54 = vsub.s32 5, %v13553_v23  ;;  %v5527_v10 = vsub.s32 7, %v13553_v23 }
0x14e7   : > { %v6497_v36 = vmax.f32 %v5813_v49, 0.0  ;;  %v6499_v33 = vmax.f32 %v5896_v8, 0.0 }
0x14e8   : > { %v6608_v57 = vpack.c.bf16 %v6496_v2, %v6480_v43  ;;  %v6610_v27 = vpack.c.bf16 %v6498_v55, %v6482_v32  ;;  %v13765_v43 = vrot.slane %v13564_v63, %v5515_v42 }
0x14e9   : > { %v6609_v60 = vpack.c.bf16 %v6497_v36, %v6481_v47  ;;  %v6611_v26 = vpack.c.bf16 %v6499_v33, %v6483_v45  ;;  %v5816_v21 = vpop.f32.mrb[4].mxu1  ;;  %v5899_v19 = vpop.f32.mrb[4].mxu0  ;;  %v13772_v45 = vrot.slane %v13564_v63, %v5523_v14 }
0x14ea   : > { %v5817_v18 = vadd.f32 %v5816_v21, %v13571_v3  ;;  %v5900_v44 = vadd.f32 %v5899_v19, %v13576_v46  ;;  %v5818_v16 = vpop.f32.mrb[5].mxu1  ;;  %v5901_v6 = vpop.f32.mrb[5].mxu0 }
0x14eb   : > { %v5819_v53 = vadd.f32 %v5818_v16, %v13585_v59  ;;  %v5902_v41 = vadd.f32 %v5901_v6, %v13590_v48  ;;  %v5820_v12 = vpop.f32.mrb[6].mxu1  ;;  %v5903_v62 = vpop.f32.mrb[6].mxu0  ;;  %7735 = vmatprep.mubr.bf16.mxu1 %v6609_v60  ;;  %7808 = vmatprep.mubr.bf16.mxu0 %v6611_v26 }
0x14ec   : > { %v5821_v61 = vadd.f32 %v5820_v12, %v13571_v3  ;;  %v5904_v34 = vadd.f32 %v5903_v62, %v13576_v46  ;;  %v5822_v40 = vpop.f32.mrb[7].mxu1  ;;  %v5905_v13 = vpop.f32.mrb[7].mxu0  ;;  %7736 = vmatmul.mubr.bf16.gmra.mrb[80].mxu1 %v6608_v57  ;;  %7809 = vmatmul.mubr.bf16.gmra.mrb[80].mxu0 %v6610_v27  ;;  %v6512_v24 = vmax.f32 %v5817_v18, 0.0  ;;  %v6514_v39 = vmax.f32 %v5900_v44, 0.0 }
0x14ed   : > { %v5823_v56 = vadd.f32 %v5822_v40, %v13585_v59  ;;  %v5906_v31 = vadd.f32 %v5905_v13, %v13590_v48  ;;  %v6513_v50 = vmax.f32 %v5819_v53, 0.0  ;;  %v6515_v52 = vmax.f32 %v5902_v41, 0.0 }
0x14ee   : > { %v6528_v9 = vmax.f32 %v5821_v61, 0.0  ;;  %v6530_v25 = vmax.f32 %v5904_v34, 0.0  ;;  %v13779_v57 = vrot.slane %v13564_v63, %v5519_v54 }
0x14ef   : > { %v6529_v35 = vmax.f32 %v5823_v56, 0.0  ;;  %v6531_v37 = vmax.f32 %v5906_v31, 0.0 }
0x14f0   : > { %v6624_v58 = vpack.c.bf16 %v6528_v9, %v6512_v24  ;;  %v6626_v11 = vpack.c.bf16 %v6530_v25, %v6514_v39 }
0x14f1   : > { %v6625_v29 = vpack.c.bf16 %v6529_v35, %v6513_v50  ;;  %v6627_v20 = vpack.c.bf16 %v6531_v37, %v6515_v52  ;;  %v5826_v30 = vpop.f32.mrb[8].mxu1  ;;  %v5909_v38 = vpop.f32.mrb[8].mxu0 }
0x14f2   : > { %v5827_v28 = vadd.f32 %v5826_v30, %v13571_v3  ;;  %v5910_v7 = vadd.f32 %v5909_v38, %v13576_v46  ;;  %v5828_v1 = vpop.f32.mrb[9].mxu1  ;;  %v5911_v5 = vpop.f32.mrb[9].mxu0 }
0x14f3   : > { %v5829_v4 = vadd.f32 %v5828_v1, %v13585_v59  ;;  %v5912_v22 = vadd.f32 %v5911_v5, %v13590_v48  ;;  %v5830_v49 = vpop.f32.mrb[10].mxu1  ;;  %v5913_v8 = vpop.f32.mrb[10].mxu0  ;;  %7743 = vmatprep.mubr.bf16.mxu1 %v6625_v29  ;;  %7816 = vmatprep.mubr.bf16.mxu0 %v6627_v20 }
0x14f4   : > { %v5831_v32 = vadd.f32 %v5830_v49, %v13571_v3  ;;  %v5914_v2 = vadd.f32 %v5913_v8, %v13576_v46  ;;  %v5832_v55 = vpop.f32.mrb[11].mxu1  ;;  %v5915_v47 = vpop.f32.mrb[11].mxu0  ;;  %7744 = vmatmul.mubr.bf16.gmra.mrb[84].mxu1 %v6624_v58  ;;  %7817 = vmatmul.mubr.bf16.gmra.mrb[84].mxu0 %v6626_v11  ;;  %v13784_v3 = vrot.slane %v13564_v63, %v5527_v10  ;;  %v6544_v46 = vmax.f32 %v5827_v28, 0.0  ;;  %v11052_v49 = vld [vmem:[%s11591_s1 + $0x280] sm:$0xff]  }
0x14f5   : > { %v5833_v36 = vadd.f32 %v5832_v55, %v13585_v59  ;;  %v5916_v33 = vadd.f32 %v5915_v47, %v13590_v48  ;;  %v6546_v27 = vmax.f32 %v5910_v7, 0.0  ;;  %v6545_v21 = vmax.f32 %v5829_v4, 0.0  ;;  %v11053_v47 = vld [vmem:[%s11591_s1 + $0x248] sm:$0xff]  }
0x14f6   : > { %v6560_v60 = vmax.f32 %v5831_v32, 0.0  ;;  %v6562_v26 = vmax.f32 %v5914_v2, 0.0  ;;  %v6547_v19 = vmax.f32 %v5912_v22, 0.0  ;;  %v11051_v22 = vld [vmem:[%s11591_s1 + $0x200] sm:$0xff]  }
0x14f7   : > { %v6561_v18 = vmax.f32 %v5833_v36, 0.0  ;;  %v6563_v59 = vmax.f32 %v5916_v33, 0.0  ;;  %v11054_v36 = vld [vmem:[%s11591_s1 + $0x2c8] sm:$0xff]  }
0x14f8   : > { %v6640_v44 = vpack.c.bf16 %v6560_v60, %v6544_v46  ;;  %v6642_v48 = vpack.c.bf16 %v6562_v26, %v6546_v27 }
0x14f9   : > { %v6641_v16 = vpack.c.bf16 %v6561_v18, %v6545_v21  ;;  %v6643_v6 = vpack.c.bf16 %v6563_v59, %v6547_v19  ;;  %v5952_v53 = vpop.f32.mrb[12].mxu1  ;;  %v6035_v41 = vpop.f32.mrb[12].mxu0 }
0x14fa   : > { %v5953_v12 = vadd.f32 %v5952_v53, %v13765_v43  ;;  %v6036_v62 = vadd.f32 %v6035_v41, %v13772_v45  ;;  %v5954_v63 = vpop.f32.mrb[13].mxu1  ;;  %v6037_v61 = vpop.f32.mrb[13].mxu0 }
0x14fb   : > { %v5955_v34 = vadd.f32 %v5954_v63, %v13779_v57  ;;  %v6038_v40 = vadd.f32 %v6037_v61, %v13784_v3  ;;  %v5956_v13 = vpop.f32.mrb[14].mxu1  ;;  %v6039_v56 = vpop.f32.mrb[14].mxu0  ;;  %7751 = vmatprep.mubr.bf16.mxu1 %v6641_v16  ;;  %7824 = vmatprep.mubr.bf16.mxu0 %v6643_v6  ;;  %v11056_v16 = vld [vmem:[%s11591_s1 + $0x288] sm:$0xff]   ;;  %v11058_v63 = vld [vmem:[%s11591_s1 + $0x2d0] sm:$0xff]  }
0x14fc   : > { %v5957_v31 = vadd.f32 %v5956_v13, %v13765_v43  ;;  %v6040_v24 = vadd.f32 %v6039_v56, %v13772_v45  ;;  %v5958_v39 = vpop.f32.mrb[15].mxu1  ;;  %v6041_v9 = vpop.f32.mrb[15].mxu0  ;;  %7752 = vmatmul.mubr.bf16.gmra.mrb[88].mxu1 %v6640_v44  ;;  %7825 = vmatmul.mubr.bf16.gmra.mrb[88].mxu0 %v6642_v48  ;;  %v6420_v52 = vmax.f32 %v5953_v12, 0.0  ;;  %v6422_v35 = vmax.f32 %v6036_v62, 0.0  ;;  %v11055_v48 = vld [vmem:[%s11591_s1 + $0x208] sm:$0xff]   ;;  %v11057_v62 = vld [vmem:[%s11591_s1 + $0x250] sm:$0xff]  }
0x14fd   : > { %v5959_v25 = vadd.f32 %v5958_v39, %v13779_v57  ;;  %v6042_v50 = vadd.f32 %v6041_v9, %v13784_v3  ;;  %v6421_v11 = vmax.f32 %v5955_v34, 0.0  ;;  %v6423_v29 = vmax.f32 %v6038_v40, 0.0 }
0x14fe   : > { %v6436_v37 = vmax.f32 %v5957_v31, 0.0  ;;  %v6438_v58 = vmax.f32 %v6040_v24, 0.0 }
0x14ff   : > { %v6437_v20 = vmax.f32 %v5959_v25, 0.0  ;;  %v6439_v30 = vmax.f32 %v6042_v50, 0.0  ;;  %v11059_v50 = vld [vmem:[%s11591_s1 + $0x210] sm:$0xff]  }
0x1500   : > { %v6580_v38 = vpack.c.bf16 %v6436_v37, %v6420_v52  ;;  %v6582_v28 = vpack.c.bf16 %v6438_v58, %v6422_v35  ;;  %v11060_v52 = vld [vmem:[%s11591_s1 + $0x290] sm:$0xff]  }
0x1501   : > { %v6581_v7 = vpack.c.bf16 %v6437_v20, %v6421_v11  ;;  %v6583_v1 = vpack.c.bf16 %v6439_v30, %v6423_v29  ;;  %v5962_v5 = vpop.f32.mrb[16].mxu1  ;;  %v6045_v4 = vpop.f32.mrb[16].mxu0  ;;  %v11061_v29 = vld [vmem:[%s11591_s1 + $0x258] sm:$0xff]  }
0x1502   : > { %v5963_v8 = vadd.f32 %v5962_v5, %v13765_v43  ;;  %v6046_v32 = vadd.f32 %v6045_v4, %v13772_v45  ;;  %v5964_v2 = vpop.f32.mrb[17].mxu1  ;;  %v6047_v55 = vpop.f32.mrb[17].mxu0  ;;  %v11062_v20 = vld [vmem:[%s11591_s1 + $0x2d8] sm:$0xff]  }
0x1503   : > { %v5965_v33 = vadd.f32 %v5964_v2, %v13779_v57  ;;  %v6048_v46 = vadd.f32 %v6047_v55, %v13784_v3  ;;  %v5966_v27 = vpop.f32.mrb[18].mxu1  ;;  %v6049_v60 = vpop.f32.mrb[18].mxu0  ;;  %7865 = vmatprep.mubr.bf16.mxu1 %v6581_v7  ;;  %7938 = vmatprep.mubr.bf16.mxu0 %v6583_v1  ;;  %v11064_v2 = vld [vmem:[%s11591_s1 + $0x298] sm:$0xff]  }
0x1504   : > { %v5967_v26 = vadd.f32 %v5966_v27, %v13765_v43  ;;  %v6050_v21 = vadd.f32 %v6049_v60, %v13772_v45  ;;  %v5968_v19 = vpop.f32.mrb[19].mxu1  ;;  %v6051_v18 = vpop.f32.mrb[19].mxu0  ;;  %7866 = vmatmul.mubr.bf16.vlgmr.msra.gmra.mrb[92].mxu1 %v6580_v38  ;;  %7939 = vmatmul.mubr.bf16.vlgmr.msra.gmra.mrb[92].mxu0 %v6582_v28  ;;  %v6452_v6 = vmax.f32 %v5963_v8, 0.0  ;;  %v6454_v53 = vmax.f32 %v6046_v32, 0.0  ;;  %v11063_v32 = vld [vmem:[%s11591_s1 + $0x218] sm:$0xff]   ;;  %v11066_v27 = vld [vmem:[%s11591_s1 + $0x2e0] sm:$0xff]  }
0x1505   : > { %v5969_v59 = vadd.f32 %v5968_v19, %v13779_v57  ;;  %v6052_v44 = vadd.f32 %v6051_v18, %v13784_v3  ;;  %9801 = vmatpush3.bf16.msra.mxu1 %v11051_v22  ;;  %9847 = vmatpush3.bf16.msra.mxu0 %v11052_v49  ;;  %v6453_v61 = vmax.f32 %v5965_v33, 0.0  ;;  %v6455_v34 = vmax.f32 %v6048_v46, 0.0  ;;  %v11065_v46 = vld [vmem:[%s11591_s1 + $0x260] sm:$0xff]  }
0x1506   : > { %v6468_v41 = vmax.f32 %v5967_v26, 0.0  ;;  %v6470_v12 = vmax.f32 %v6050_v21, 0.0  ;;  %9802 = vmatprep.subr.bf16.mxu1 %v11053_v47  ;;  %9848 = vmatprep.subr.bf16.mxu0 %v11054_v36 }
0x1507   : > { %v6469_v40 = vmax.f32 %v5969_v59, 0.0  ;;  %v6471_v13 = vmax.f32 %v6052_v44, 0.0 }
0x1508   : > { %v6596_v56 = vpack.c.bf16 %v6468_v41, %v6452_v6  ;;  %v6598_v31 = vpack.c.bf16 %v6470_v12, %v6454_v53  ;;  %v11067_v53 = vld [vmem:[%s11591_s1 + $0x220] sm:$0xff]  }
0x1509   : > { %v6597_v24 = vpack.c.bf16 %v6469_v40, %v6453_v61  ;;  %v6599_v39 = vpack.c.bf16 %v6471_v13, %v6455_v34  ;;  %v5972_v9 = vpop.f32.mrb[20].mxu1  ;;  %v6055_v25 = vpop.f32.mrb[20].mxu0  ;;  %9803 = vmatpush3.bf16.msra.mxu1 %v11055_v48  ;;  %9849 = vmatpush3.bf16.msra.mxu0 %v11056_v16  ;;  %v11068_v41 = vld [vmem:[%s11591_s1 + $0x2a0] sm:$0xff]   ;;  %v11069_v34 = vld [vmem:[%s11591_s1 + $0x268] sm:$0xff]  }
0x150a   : > { %v5973_v35 = vadd.f32 %v5972_v9, %v13765_v43  ;;  %v6056_v37 = vadd.f32 %v6055_v25, %v13772_v45  ;;  %v5974_v58 = vpop.f32.mrb[21].mxu1  ;;  %v6057_v11 = vpop.f32.mrb[21].mxu0  ;;  %9804 = vmatprep.subr.bf16.mxu1 %v11057_v62  ;;  %9850 = vmatprep.subr.bf16.mxu0 %v11058_v63  ;;  %v11070_v40 = vld [vmem:[%s11591_s1 + $0x2e8] sm:$0xff]  }
0x150b   : > { %v5975_v30 = vadd.f32 %v5974_v58, %v13779_v57  ;;  %v6058_v38 = vadd.f32 %v6057_v11, %v13784_v3  ;;  %v5976_v28 = vpop.f32.mrb[22].mxu1  ;;  %v6059_v7 = vpop.f32.mrb[22].mxu0  ;;  %7873 = vmatprep.mubr.bf16.mxu1 %v6597_v24  ;;  %7946 = vmatprep.mubr.bf16.mxu0 %v6599_v39  ;;  %v11072_v58 = vld [vmem:[%s11591_s1 + $0x2a8] sm:$0xff]  }
0x150c   : > { %v5977_v1 = vadd.f32 %v5976_v28, %v13765_v43  ;;  %v6060_v5 = vadd.f32 %v6059_v7, %v13772_v45  ;;  %v5978_v4 = vpop.f32.mrb[23].mxu1  ;;  %v6061_v22 = vpop.f32.mrb[23].mxu0  ;;  %7874 = vmatmul.mubr.bf16.gmra.mrb[96].mxu1 %v6596_v56  ;;  %7947 = vmatmul.mubr.bf16.gmra.mrb[96].mxu0 %v6598_v31  ;;  %v6484_v55 = vmax.f32 %v5973_v35, 0.0  ;;  %v6486_v47 = vmax.f32 %v6056_v37, 0.0  ;;  %v11071_v37 = vld [vmem:[%s11591_s1 + $0x228] sm:$0xff]   ;;  %v11074_v28 = vld [vmem:[%s11591_s1 + $0x2f0] sm:$0xff]  }
0x150d   : > { %v5979_v49 = vadd.f32 %v5978_v4, %v13779_v57  ;;  %v6062_v8 = vadd.f32 %v6061_v22, %v13784_v3  ;;  %9805 = vmatpush3.bf16.msra.mxu1 %v11059_v50  ;;  %9851 = vmatpush3.bf16.msra.mxu0 %v11060_v52  ;;  %v6485_v60 = vmax.f32 %v5975_v30, 0.0  ;;  %v6487_v26 = vmax.f32 %v6058_v38, 0.0  ;;  %v11073_v38 = vld [vmem:[%s11591_s1 + $0x270] sm:$0xff]   ;;  %v13843_v22 = vld [vmem:[%s11581_s23 + $0x8] sm:$0xff] }
0x150e   : > { %v6500_v36 = vmax.f32 %v5977_v1, 0.0  ;;  %v6502_v33 = vmax.f32 %v6060_v5, 0.0  ;;  %9806 = vmatprep.subr.bf16.mxu1 %v11061_v29  ;;  %9852 = vmatprep.subr.bf16.mxu0 %v11062_v20 }
0x150f   : > { %v6501_v21 = vmax.f32 %v5979_v49, 0.0  ;;  %v6503_v19 = vmax.f32 %v6062_v8, 0.0 }
0x1510   : > { %v6612_v18 = vpack.c.bf16 %v6500_v36, %v6484_v55  ;;  %v6614_v59 = vpack.c.bf16 %v6502_v33, %v6486_v47  ;;  %v11075_v36 = vld [vmem:[%s11591_s1 + $0x230] sm:$0xff]  }
0x1511   : > { %v6613_v44 = vpack.c.bf16 %v6501_v21, %v6485_v60  ;;  %v6615_v48 = vpack.c.bf16 %v6503_v19, %v6487_v26  ;;  %v5982_v16 = vpop.f32.mrb[24].mxu1  ;;  %v6065_v6 = vpop.f32.mrb[24].mxu0  ;;  %9807 = vmatpush3.bf16.msra.mxu1 %v11063_v32  ;;  %9853 = vmatpush3.bf16.msra.mxu0 %v11064_v2  ;;  %v11076_v33 = vld [vmem:[%s11591_s1 + $0x2b0] sm:$0xff]   ;;  %v13852_v21 = vrot.slane %v13843_v22, %v5499_v15  ;;  %v11077_v19 = vld [vmem:[%s11591_s1 + $0x278] sm:$0xff]  }
0x1512   : > { %v5983_v12 = vadd.f32 %v5982_v16, %v13765_v43  ;;  %v6066_v62 = vadd.f32 %v6065_v6, %v13772_v45  ;;  %v5984_v63 = vpop.f32.mrb[25].mxu1  ;;  %v6067_v61 = vpop.f32.mrb[25].mxu0  ;;  %9808 = vmatprep.subr.bf16.mxu1 %v11065_v46  ;;  %9854 = vmatprep.subr.bf16.mxu0 %v11066_v27  ;;  %v13861_v6 = vrot.slane %v13843_v22, %v5507_v0 }
0x1513   : > { %v5985_v13 = vadd.f32 %v5984_v63, %v13779_v57  ;;  %v6068_v56 = vadd.f32 %v6067_v61, %v13784_v3  ;;  %v5986_v31 = vpop.f32.mrb[26].mxu1  ;;  %v6069_v24 = vpop.f32.mrb[26].mxu0  ;;  %7881 = vmatprep.mubr.bf16.mxu1 %v6613_v44  ;;  %7954 = vmatprep.mubr.bf16.mxu0 %v6615_v48  ;;  %v11080_v61 = vld [vmem:[%s11591_s1 + $0x2b8] sm:$0xff]  }
0x1514   : > { %v5987_v39 = vadd.f32 %v5986_v31, %v13765_v43  ;;  %v6070_v9 = vadd.f32 %v6069_v24, %v13772_v45  ;;  %v5988_v25 = vpop.f32.mrb[27].mxu1  ;;  %v6071_v50 = vpop.f32.mrb[27].mxu0  ;;  %7882 = vmatmul.mubr.bf16.gmra.mrb[100].mxu1 %v6612_v18  ;;  %7955 = vmatmul.mubr.bf16.gmra.mrb[100].mxu0 %v6614_v59  ;;  %v6516_v11 = vmax.f32 %v5983_v12, 0.0  ;;  %v6518_v29 = vmax.f32 %v6066_v62, 0.0  ;;  %v11078_v18 = vld [vmem:[%s11591_s1 + $0x2f8] sm:$0xff]   ;;  %v11082_v31 = vld [vmem:[%s11591_s1 + $0x3c0] sm:$0xff]  }
0x1515   : > { %v5989_v52 = vadd.f32 %v5988_v25, %v13779_v57  ;;  %v6072_v35 = vadd.f32 %v6071_v50, %v13784_v3  ;;  %9809 = vmatpush3.bf16.msra.mxu1 %v11067_v53  ;;  %9855 = vmatpush3.bf16.msra.mxu0 %v11068_v41  ;;  %v6517_v7 = vmax.f32 %v5985_v13, 0.0  ;;  %v6519_v1 = vmax.f32 %v6068_v56, 0.0 }
0x1516   : > { %v6532_v20 = vmax.f32 %v5987_v39, 0.0  ;;  %v6534_v30 = vmax.f32 %v6070_v9, 0.0  ;;  %9810 = vmatprep.subr.bf16.mxu1 %v11069_v34  ;;  %9856 = vmatprep.subr.bf16.mxu0 %v11070_v40  ;;  %v13868_v62 = vrot.slane %v13843_v22, %v5503_v17  ;;  %v11081_v17 = vld [vmem:[%s11591_s1 + $0x340] sm:$0xff]  }
0x1517   : > { %v6533_v5 = vmax.f32 %v5989_v52, 0.0  ;;  %v6535_v4 = vmax.f32 %v6072_v35, 0.0 }
0x1518   : > { %v6628_v49 = vpack.c.bf16 %v6532_v20, %v6516_v11  ;;  %v6630_v8 = vpack.c.bf16 %v6534_v30, %v6518_v29 }
0x1519   : > { %v6629_v32 = vpack.c.bf16 %v6533_v5, %v6517_v7  ;;  %v6631_v2 = vpack.c.bf16 %v6535_v4, %v6519_v1  ;;  %v5992_v55 = vpop.f32.mrb[28].mxu1  ;;  %v6075_v47 = vpop.f32.mrb[28].mxu0  ;;  %9811 = vmatpush3.bf16.msra.mxu1 %v11071_v37  ;;  %9857 = vmatpush3.bf16.msra.mxu0 %v11072_v58 }
0x151a   : > { %v5993_v46 = vadd.f32 %v5992_v55, %v13765_v43  ;;  %v6076_v27 = vadd.f32 %v6075_v47, %v13772_v45  ;;  %v5994_v60 = vpop.f32.mrb[29].mxu1  ;;  %v6077_v26 = vpop.f32.mrb[29].mxu0  ;;  %9812 = vmatprep.subr.bf16.mxu1 %v11073_v38  ;;  %9858 = vmatprep.subr.bf16.mxu0 %v11074_v28 }
0x151b   : > { %v5995_v59 = vadd.f32 %v5994_v60, %v13779_v57  ;;  %v6078_v44 = vadd.f32 %v6077_v26, %v13784_v3  ;;  %v5996_v48 = vpop.f32.mrb[30].mxu1  ;;  %v6079_v16 = vpop.f32.mrb[30].mxu0  ;;  %7889 = vmatprep.mubr.bf16.mxu1 %v6629_v32  ;;  %7962 = vmatprep.mubr.bf16.mxu0 %v6631_v2 }
0x151c   : > { %v5997_v15 = vadd.f32 %v5996_v48, %v13765_v43  ;;  %v6080_v53 = vadd.f32 %v6079_v16, %v13772_v45  ;;  %v5998_v41 = vpop.f32.mrb[31].mxu1  ;;  %v6081_v12 = vpop.f32.mrb[31].mxu0  ;;  %7890 = vmatmul.mubr.bf16.gmra.mrb[104].mxu1 %v6628_v49  ;;  %7963 = vmatmul.mubr.bf16.gmra.mrb[104].mxu0 %v6630_v8  ;;  %v13875_v43 = vrot.slane %v13843_v22, %v5511_v51  ;;  %v11079_v45 = vld [vmem:[%s11591_s1 + $0x238] sm:$0xff]   ;;  %v6548_v34 = vmax.f32 %v5993_v46, 0.0  ;;  %v11083_v48 = vld [vmem:[%s11591_s1 + $0x300] sm:$0xff]  }
0x151d   : > { %v5999_v63 = vadd.f32 %v5998_v41, %v13779_v57  ;;  %v6082_v0 = vadd.f32 %v6081_v12, %v13784_v3  ;;  %9813 = vmatpush3.bf16.msra.mxu1 %v11075_v36  ;;  %9859 = vmatpush3.bf16.msra.mxu0 %v11076_v33  ;;  %v6550_v40 = vmax.f32 %v6076_v27, 0.0  ;;  %v6549_v57 = vmax.f32 %v5995_v59, 0.0  ;;  %v11084_v16 = vld [vmem:[%s11591_s1 + $0x380] sm:$0xff]  }
0x151e   : > { %v6564_v13 = vmax.f32 %v5997_v15, 0.0  ;;  %v6566_v56 = vmax.f32 %v6080_v53, 0.0  ;;  %9814 = vmatprep.subr.bf16.mxu1 %v11077_v19  ;;  %9860 = vmatprep.subr.bf16.mxu0 %v11078_v18  ;;  %v6551_v24 = vmax.f32 %v6078_v44, 0.0 }
0x151f   : > { %v6565_v3 = vmax.f32 %v5999_v63, 0.0  ;;  %v6567_v39 = vmax.f32 %v6082_v0, 0.0  ;;  %v11085_v63 = vld [vmem:[%s11591_s1 + $0x348] sm:$0xff]  }
0x1520   : > { %v6644_v9 = vpack.c.bf16 %v6564_v13, %v6548_v34  ;;  %v6646_v25 = vpack.c.bf16 %v6566_v56, %v6550_v40  ;;  %v11086_v0 = vld [vmem:[%s11591_s1 + $0x3c8] sm:$0xff]  }
0x1521   : > { %v6645_v51 = vpack.c.bf16 %v6565_v3, %v6549_v57  ;;  %v6647_v50 = vpack.c.bf16 %v6567_v39, %v6551_v24  ;;  %v6118_v52 = vpop.f32.mrb[32].mxu1  ;;  %v6201_v35 = vpop.f32.mrb[32].mxu0  ;;  %9815 = vmatpush3.bf16.msra.mxu1 %v11079_v45  ;;  %9861 = vmatpush3.bf16.msra.mxu0 %v11080_v61  ;;  %v11087_v3 = vld [vmem:[%s11591_s1 + $0x308] sm:$0xff]  }
0x1522   : > { %v6119_v37 = vadd.f32 %v6118_v52, %v13852_v21  ;;  %v6202_v58 = vadd.f32 %v6201_v35, %v13861_v6  ;;  %v6120_v11 = vpop.f32.mrb[33].mxu1  ;;  %v6203_v29 = vpop.f32.mrb[33].mxu0  ;;  %9892 = vmatprep.subr.bf16.mxu1 %v11081_v17  ;;  %9938 = vmatprep.subr.bf16.mxu0 %v11082_v31  ;;  %v11088_v39 = vld [vmem:[%s11591_s1 + $0x388] sm:$0xff]   ;;  %v11089_v52 = vld [vmem:[%s11591_s1 + $0x350] sm:$0xff]  }
0x1523   : > { %v6121_v20 = vadd.f32 %v6120_v11, %v13868_v62  ;;  %v6204_v30 = vadd.f32 %v6203_v29, %v13875_v43  ;;  %v6122_v38 = vpop.f32.mrb[34].mxu1  ;;  %v6205_v28 = vpop.f32.mrb[34].mxu0  ;;  %7897 = vmatprep.mubr.bf16.mxu1 %v6645_v51  ;;  %7970 = vmatprep.mubr.bf16.mxu0 %v6647_v50  ;;  %v11090_v35 = vld [vmem:[%s11591_s1 + $0x3d0] sm:$0xff]  }
0x1524   : > { %v6123_v7 = vadd.f32 %v6122_v38, %v13852_v21  ;;  %v6206_v1 = vadd.f32 %v6205_v28, %v13861_v6  ;;  %v6124_v5 = vpop.f32.mrb[35].mxu1  ;;  %v6207_v4 = vpop.f32.mrb[35].mxu0  ;;  %7898 = vmatmul.mubr.bf16.gmra.mrb[108].mxu1 %v6644_v9  ;;  %7971 = vmatmul.mubr.bf16.gmra.mrb[108].mxu0 %v6646_v25  ;;  %v6424_v32 = vmax.f32 %v6119_v37, 0.0  ;;  %v6426_v2 = vmax.f32 %v6202_v58, 0.0 }
0x1525   : > { %v6125_v49 = vadd.f32 %v6124_v5, %v13868_v62  ;;  %v6208_v8 = vadd.f32 %v6207_v4, %v13875_v43  ;;  %v6425_v36 = vmax.f32 %v6121_v20, 0.0  ;;  %v6427_v33 = vmax.f32 %v6204_v30, 0.0  ;;  %v11091_v5 = vld [vmem:[%s11591_s1 + $0x310] sm:$0xff]  }
0x1526   : > { %v6440_v55 = vmax.f32 %v6123_v7, 0.0  ;;  %v6442_v47 = vmax.f32 %v6206_v1, 0.0  ;;  %v11092_v4 = vld [vmem:[%s11591_s1 + $0x390] sm:$0xff]  }
0x1527   : > { %v6441_v46 = vmax.f32 %v6125_v49, 0.0  ;;  %v6443_v27 = vmax.f32 %v6208_v8, 0.0 }
0x1528   : > { %v6584_v60 = vpack.c.bf16 %v6440_v55, %v6424_v32  ;;  %v6586_v26 = vpack.c.bf16 %v6442_v47, %v6426_v2  ;;  %v11093_v55 = vld [vmem:[%s11591_s1 + $0x358] sm:$0xff]  }
0x1529   : > { %v6585_v19 = vpack.c.bf16 %v6441_v46, %v6425_v36  ;;  %v6587_v18 = vpack.c.bf16 %v6443_v27, %v6427_v33  ;;  %v6128_v59 = vpop.f32.mrb[36].mxu1  ;;  %v6211_v44 = vpop.f32.mrb[36].mxu0  ;;  %v11094_v47 = vld [vmem:[%s11591_s1 + $0x3d8] sm:$0xff]  }
0x152a   : > { %v6129_v15 = vadd.f32 %v6128_v59, %v13852_v21  ;;  %v6212_v53 = vadd.f32 %v6211_v44, %v13861_v6  ;;  %v6130_v41 = vpop.f32.mrb[37].mxu1  ;;  %v6213_v12 = vpop.f32.mrb[37].mxu0 }
0x152b   : > { %v6131_v45 = vadd.f32 %v6130_v41, %v13868_v62  ;;  %v6214_v61 = vadd.f32 %v6213_v12, %v13875_v43  ;;  %v6132_v34 = vpop.f32.mrb[38].mxu1  ;;  %v6215_v40 = vpop.f32.mrb[38].mxu0  ;;  %8011 = vmatprep.mubr.bf16.mxu1 %v6585_v19  ;;  %8084 = vmatprep.mubr.bf16.mxu0 %v6587_v18 }
0x152c   : > { %v6133_v13 = vadd.f32 %v6132_v34, %v13852_v21  ;;  %v6216_v56 = vadd.f32 %v6215_v40, %v13861_v6  ;;  %v6134_v17 = vpop.f32.mrb[39].mxu1  ;;  %v6217_v31 = vpop.f32.mrb[39].mxu0  ;;  %8012 = vmatmul.mubr.bf16.vlgmr.msra.gmra.mrb[112].mxu1 %v6584_v60  ;;  %8085 = vmatmul.mubr.bf16.vlgmr.msra.gmra.mrb[112].mxu0 %v6586_v26  ;;  %v6456_v9 = vmax.f32 %v6129_v15, 0.0  ;;  %v6458_v25 = vmax.f32 %v6212_v53, 0.0 }
0x152d   : > { %v6135_v57 = vadd.f32 %v6134_v17, %v13868_v62  ;;  %v6218_v24 = vadd.f32 %v6217_v31, %v13875_v43  ;;  %9893 = vmatpush3.bf16.msra.mxu1 %v11083_v48  ;;  %9939 = vmatpush3.bf16.msra.mxu0 %v11084_v16  ;;  %v6457_v37 = vmax.f32 %v6131_v45, 0.0  ;;  %v6459_v58 = vmax.f32 %v6214_v61, 0.0  ;;  %v11095_v48 = vld [vmem:[%s11591_s1 + $0x318] sm:$0xff]  }
0x152e   : > { %v6472_v51 = vmax.f32 %v6133_v13, 0.0  ;;  %v6474_v50 = vmax.f32 %v6216_v56, 0.0  ;;  %9894 = vmatprep.subr.bf16.mxu1 %v11085_v63  ;;  %9940 = vmatprep.subr.bf16.mxu0 %v11086_v0  ;;  %v11096_v16 = vld [vmem:[%s11591_s1 + $0x398] sm:$0xff]   ;;  %v11097_v63 = vld [vmem:[%s11591_s1 + $0x360] sm:$0xff]  }
0x152f   : > { %v6473_v11 = vmax.f32 %v6135_v57, 0.0  ;;  %v6475_v29 = vmax.f32 %v6218_v24, 0.0  ;;  %v11098_v0 = vld [vmem:[%s11591_s1 + $0x3e0] sm:$0xff]  }
0x1530   : > { %v6600_v20 = vpack.c.bf16 %v6472_v51, %v6456_v9  ;;  %v6602_v30 = vpack.c.bf16 %v6474_v50, %v6458_v25 }
0x1531   : > { %v6601_v38 = vpack.c.bf16 %v6473_v11, %v6457_v37  ;;  %v6603_v28 = vpack.c.bf16 %v6475_v29, %v6459_v58  ;;  %v6138_v7 = vpop.f32.mrb[40].mxu1  ;;  %v6221_v1 = vpop.f32.mrb[40].mxu0  ;;  %9895 = vmatpush3.bf16.msra.mxu1 %v11087_v3  ;;  %9941 = vmatpush3.bf16.msra.mxu0 %v11088_v39  ;;  %v11099_v3 = vld [vmem:[%s11591_s1 + $0x320] sm:$0xff]  }
0x1532   : > { %v6139_v49 = vadd.f32 %v6138_v7, %v13852_v21  ;;  %v6222_v8 = vadd.f32 %v6221_v1, %v13861_v6  ;;  %v6140_v32 = vpop.f32.mrb[41].mxu1  ;;  %v6223_v2 = vpop.f32.mrb[41].mxu0  ;;  %9896 = vmatprep.subr.bf16.mxu1 %v11089_v52  ;;  %9942 = vmatprep.subr.bf16.mxu0 %v11090_v35  ;;  %v11100_v39 = vld [vmem:[%s11591_s1 + $0x3a0] sm:$0xff]   ;;  %v11101_v52 = vld [vmem:[%s11591_s1 + $0x368] sm:$0xff]  }
0x1533   : > { %v6141_v36 = vadd.f32 %v6140_v32, %v13868_v62  ;;  %v6224_v33 = vadd.f32 %v6223_v2, %v13875_v43  ;;  %v6142_v46 = vpop.f32.mrb[42].mxu1  ;;  %v6225_v27 = vpop.f32.mrb[42].mxu0  ;;  %8019 = vmatprep.mubr.bf16.mxu1 %v6601_v38  ;;  %8092 = vmatprep.mubr.bf16.mxu0 %v6603_v28  ;;  %v11102_v35 = vld [vmem:[%s11591_s1 + $0x3e8] sm:$0xff]  }
0x1534   : > { %v6143_v60 = vadd.f32 %v6142_v46, %v13852_v21  ;;  %v6226_v26 = vadd.f32 %v6225_v27, %v13861_v6  ;;  %v6144_v19 = vpop.f32.mrb[43].mxu1  ;;  %v6227_v18 = vpop.f32.mrb[43].mxu0  ;;  %8020 = vmatmul.mubr.bf16.gmra.mrb[116].mxu1 %v6600_v20  ;;  %8093 = vmatmul.mubr.bf16.gmra.mrb[116].mxu0 %v6602_v30  ;;  %v6488_v15 = vmax.f32 %v6139_v49, 0.0  ;;  %v6490_v53 = vmax.f32 %v6222_v8, 0.0 }
0x1535   : > { %v6145_v59 = vadd.f32 %v6144_v19, %v13868_v62  ;;  %v6228_v44 = vadd.f32 %v6227_v18, %v13875_v43  ;;  %9897 = vmatpush3.bf16.msra.mxu1 %v11091_v5  ;;  %9943 = vmatpush3.bf16.msra.mxu0 %v11092_v4  ;;  %v6489_v45 = vmax.f32 %v6141_v36, 0.0  ;;  %v6491_v61 = vmax.f32 %v6224_v33, 0.0  ;;  %v11103_v5 = vld [vmem:[%s11591_s1 + $0x328] sm:$0xff]  }
0x1536   : > { %v6504_v41 = vmax.f32 %v6143_v60, 0.0  ;;  %v6506_v12 = vmax.f32 %v6226_v26, 0.0  ;;  %9898 = vmatprep.subr.bf16.mxu1 %v11093_v55  ;;  %9944 = vmatprep.subr.bf16.mxu0 %v11094_v47  ;;  %v11104_v4 = vld [vmem:[%s11591_s1 + $0x3a8] sm:$0xff]   ;;  %v11105_v55 = vld [vmem:[%s11591_s1 + $0x370] sm:$0xff]  }
0x1537   : > { %v6505_v34 = vmax.f32 %v6145_v59, 0.0  ;;  %v6507_v40 = vmax.f32 %v6228_v44, 0.0  ;;  %v11106_v47 = vld [vmem:[%s11591_s1 + $0x3f0] sm:$0xff]  }
0x1538   : > { %v6616_v13 = vpack.c.bf16 %v6504_v41, %v6488_v15  ;;  %v6618_v56 = vpack.c.bf16 %v6506_v12, %v6490_v53 }
0x1539   : > { %v6617_v17 = vpack.c.bf16 %v6505_v34, %v6489_v45  ;;  %v6619_v31 = vpack.c.bf16 %v6507_v40, %v6491_v61  ;;  %v6148_v57 = vpop.f32.mrb[44].mxu1  ;;  %v6231_v24 = vpop.f32.mrb[44].mxu0  ;;  %9899 = vmatpush3.bf16.msra.mxu1 %v11095_v48  ;;  %9945 = vmatpush3.bf16.msra.mxu0 %v11096_v16  ;;  %v11107_v48 = vld [vmem:[%s11591_s1 + $0x330] sm:$0xff]   ;;  %v11110_v45 = vld [vmem:[%s11591_s1 + $0x3f8] sm:$0xff]  }
0x153a   : > { %v6149_v9 = vadd.f32 %v6148_v57, %v13852_v21  ;;  %v6232_v25 = vadd.f32 %v6231_v24, %v13861_v6  ;;  %v6150_v51 = vpop.f32.mrb[45].mxu1  ;;  %v6233_v50 = vpop.f32.mrb[45].mxu0  ;;  %9900 = vmatprep.subr.bf16.mxu1 %v11097_v63  ;;  %9946 = vmatprep.subr.bf16.mxu0 %v11098_v0  ;;  %v11108_v16 = vld [vmem:[%s11591_s1 + $0x3b0] sm:$0xff]   ;;  %v13944_v63 = vrot.slane %v13843_v22, %v5515_v42  ;;  %v11109_v0 = vld [vmem:[%s11591_s1 + $0x378] sm:$0xff]  }
0x153b   : > { %v6151_v37 = vadd.f32 %v6150_v51, %v13868_v62  ;;  %v6234_v58 = vadd.f32 %v6233_v50, %v13875_v43  ;;  %v6152_v11 = vpop.f32.mrb[46].mxu1  ;;  %v6235_v29 = vpop.f32.mrb[46].mxu0  ;;  %8027 = vmatprep.mubr.bf16.mxu1 %v6617_v17  ;;  %8100 = vmatprep.mubr.bf16.mxu0 %v6619_v31  ;;  %v13960_v24 = vrot.slane %v13843_v22, %v5519_v54 }
0x153c   : > { %v6153_v20 = vadd.f32 %v6152_v11, %v13852_v21  ;;  %v6236_v30 = vadd.f32 %v6235_v29, %v13861_v6  ;;  %v6154_v38 = vpop.f32.mrb[47].mxu1  ;;  %v6237_v28 = vpop.f32.mrb[47].mxu0  ;;  %8028 = vmatmul.mubr.bf16.gmra.mrb[120].mxu1 %v6616_v13  ;;  %8101 = vmatmul.mubr.bf16.gmra.mrb[120].mxu0 %v6618_v56  ;;  %v6520_v49 = vmax.f32 %v6149_v9, 0.0  ;;  %v6522_v8 = vmax.f32 %v6232_v25, 0.0 }
0x153d   : > { %v6155_v7 = vadd.f32 %v6154_v38, %v13868_v62  ;;  %v6238_v1 = vadd.f32 %v6237_v28, %v13875_v43  ;;  %9901 = vmatpush3.bf16.msra.mxu1 %v11099_v3  ;;  %9947 = vmatpush3.bf16.msra.mxu0 %v11100_v39  ;;  %v6521_v36 = vmax.f32 %v6151_v37, 0.0  ;;  %v6523_v33 = vmax.f32 %v6234_v58, 0.0 }
0x153e   : > { %v6536_v32 = vmax.f32 %v6153_v20, 0.0  ;;  %v6538_v2 = vmax.f32 %v6236_v30, 0.0  ;;  %9902 = vmatprep.subr.bf16.mxu1 %v11101_v52  ;;  %9948 = vmatprep.subr.bf16.mxu0 %v11102_v35  ;;  %v13953_v56 = vrot.slane %v13843_v22, %v5523_v14  ;;  %v13967_v14 = vrot.slane %v13843_v22, %v5527_v10 }
0x153f   : > { %v6537_v46 = vmax.f32 %v6155_v7, 0.0  ;;  %v6539_v27 = vmax.f32 %v6238_v1, 0.0 }
0x1540   : > { %v6632_v60 = vpack.c.bf16 %v6536_v32, %v6520_v49  ;;  %v6634_v26 = vpack.c.bf16 %v6538_v2, %v6522_v8 }
0x1541   : > { %v6633_v19 = vpack.c.bf16 %v6537_v46, %v6521_v36  ;;  %v6635_v18 = vpack.c.bf16 %v6539_v27, %v6523_v33  ;;  %v6158_v59 = vpop.f32.mrb[48].mxu1  ;;  %v6241_v44 = vpop.f32.mrb[48].mxu0  ;;  %9903 = vmatpush3.bf16.msra.mxu1 %v11103_v5  ;;  %9949 = vmatpush3.bf16.msra.mxu0 %v11104_v4 }
0x1542   : > { %v6159_v15 = vadd.f32 %v6158_v59, %v13852_v21  ;;  %v6242_v53 = vadd.f32 %v6241_v44, %v13861_v6  ;;  %v6160_v41 = vpop.f32.mrb[49].mxu1  ;;  %v6243_v12 = vpop.f32.mrb[49].mxu0  ;;  %9904 = vmatprep.subr.bf16.mxu1 %v11105_v55  ;;  %9950 = vmatprep.subr.bf16.mxu0 %v11106_v47 }
0x1543   : > { %v6161_v61 = vadd.f32 %v6160_v41, %v13868_v62  ;;  %v6244_v34 = vadd.f32 %v6243_v12, %v13875_v43  ;;  %v6162_v40 = vpop.f32.mrb[50].mxu1  ;;  %v6245_v13 = vpop.f32.mrb[50].mxu0  ;;  %8035 = vmatprep.mubr.bf16.mxu1 %v6633_v19  ;;  %8108 = vmatprep.mubr.bf16.mxu0 %v6635_v18 }
0x1544   : > { %v6163_v42 = vadd.f32 %v6162_v40, %v13852_v21  ;;  %v6246_v17 = vadd.f32 %v6245_v13, %v13861_v6  ;;  %v6164_v31 = vpop.f32.mrb[51].mxu1  ;;  %v6247_v57 = vpop.f32.mrb[51].mxu0  ;;  %8036 = vmatmul.mubr.bf16.gmra.mrb[124].mxu1 %v6632_v60  ;;  %8109 = vmatmul.mubr.bf16.gmra.mrb[124].mxu0 %v6634_v26  ;;  %v11111_v21 = vld [vmem:[%s11591_s1 + $0x338] sm:$0xff]   ;;  %v6552_v9 = vmax.f32 %v6159_v15, 0.0  ;;  %v6554_v25 = vmax.f32 %v6242_v53, 0.0 }
0x1545   : > { %v6165_v3 = vadd.f32 %v6164_v31, %v13868_v62  ;;  %v6248_v39 = vadd.f32 %v6247_v57, %v13875_v43  ;;  %9905 = vmatpush3.bf16.msra.mxu1 %v11107_v48  ;;  %9951 = vmatpush3.bf16.msra.mxu0 %v11108_v16  ;;  %v11112_v6 = vld [vmem:[%s11591_s1 + $0x3b8] sm:$0xff]   ;;  %v6553_v54 = vmax.f32 %v6161_v61, 0.0  ;;  %v6555_v52 = vmax.f32 %v6244_v34, 0.0  ;;  %s14561_s1 = scalar_lea.vmem %s14325_s18, %s11520_s24  ;;  %s14562_s24 = sld [smem:[#allocation7_spill]] }
0x1546   : > { %v6568_v51 = vmax.f32 %v6163_v42, 0.0  ;;  %v6570_v50 = vmax.f32 %v6246_v17, 0.0  ;;  %9906 = vmatprep.subr.bf16.mxu1 %v11109_v0  ;;  %9952 = vmatprep.subr.bf16.mxu0 %v11110_v45 }
0x1547   : > { %v6569_v62 = vmax.f32 %v6165_v3, 0.0  ;;  %v6571_v35 = vmax.f32 %v6248_v39, 0.0 }
0x1548   : > { %v6648_v43 = vpack.c.bf16 %v6568_v51, %v6552_v9  ;;  %v6650_v37 = vpack.c.bf16 %v6570_v50, %v6554_v25 }
0x1549   : > { %v6649_v23 = vpack.c.bf16 %v6569_v62, %v6553_v54  ;;  %v6651_v58 = vpack.c.bf16 %v6571_v35, %v6555_v52  ;;  %v6284_v10 = vpop.f32.mrb[52].mxu1  ;;  %v6367_v22 = vpop.f32.mrb[52].mxu0  ;;  %9907 = vmatpush3.bf16.msra.mxu1 %v11111_v21  ;;  %9953 = vmatpush3.bf16.msra.mxu0 %v11112_v6 }
0x154a   : > { %v6285_v11 = vadd.f32 %v6284_v10, %v13944_v63  ;;  %v6368_v29 = vadd.f32 %v6367_v22, %v13953_v56  ;;  %v6286_v20 = vpop.f32.mrb[53].mxu1  ;;  %v6369_v30 = vpop.f32.mrb[53].mxu0 }
0x154b   : > { %v6287_v38 = vadd.f32 %v6286_v20, %v13960_v24  ;;  %v6370_v28 = vadd.f32 %v6369_v30, %v13967_v14  ;;  %v6288_v7 = vpop.f32.mrb[54].mxu1  ;;  %v6371_v1 = vpop.f32.mrb[54].mxu0  ;;  %8043 = vmatprep.mubr.bf16.mxu1 %v6649_v23  ;;  %8116 = vmatprep.mubr.bf16.mxu0 %v6651_v58  ;;  %p9318_p5 = scmp.ne.s32.totalorder %s14562_s24, 1 }
0x154c   : > { %v6289_v5 = vadd.f32 %v6288_v7, %v13944_v63  ;;  %v6372_v4 = vadd.f32 %v6371_v1, %v13953_v56  ;;  %v6290_v49 = vpop.f32.mrb[55].mxu1  ;;  %v6373_v8 = vpop.f32.mrb[55].mxu0  ;;  %8044 = vmatmul.mubr.bf16.gmra.mrb[128].mxu1 %v6648_v43  ;;  %8117 = vmatmul.mubr.bf16.gmra.mrb[128].mxu0 %v6650_v37  ;;  %v6428_v55 = vmax.f32 %v6285_v11, 0.0  ;;  %v6430_v47 = vmax.f32 %v6368_v29, 0.0  ;;  %s14563_s2 = sld [smem:[#allocation82_spill]] (!%p9318_p5)  ;;  %s14564_s5 = sld [smem:[#allocation83_spill]] (!%p9318_p5) }
0x154d   : > { %v6291_v32 = vadd.f32 %v6290_v49, %v13960_v24  ;;  %v6374_v2 = vadd.f32 %v6373_v8, %v13967_v14  ;;  %v6429_v46 = vmax.f32 %v6287_v38, 0.0  ;;  %v6431_v27 = vmax.f32 %v6370_v28, 0.0 }
0x154e   : > { %v6444_v36 = vmax.f32 %v6289_v5, 0.0  ;;  %v6446_v33 = vmax.f32 %v6372_v4, 0.0  ;;  %vm11386_vm11 = vmmov (!%p9318_p5), 0   ;;  %vm8520_vm12 = vcmask (!%p9318_p5), 24576  }
0x154f   : > { %v6445_v60 = vmax.f32 %v6291_v32, 0.0  ;;  %v6447_v26 = vmax.f32 %v6374_v2, 0.0 }
0x1550   : > { %v6588_v19 = vpack.c.bf16 %v6444_v36, %v6428_v55  ;;  %v6590_v18 = vpack.c.bf16 %v6446_v33, %v6430_v47 }
0x1551   : > { %v6589_v59 = vpack.c.bf16 %v6445_v60, %v6429_v46  ;;  %v6591_v44 = vpack.c.bf16 %v6447_v26, %v6431_v27  ;;  %v6294_v48 = vpop.f32.mrb[56].mxu1  ;;  %v6377_v16 = vpop.f32.mrb[56].mxu0 }
0x1552   : > { %v6295_v15 = vadd.f32 %v6294_v48, %v13944_v63  ;;  %v6378_v53 = vadd.f32 %v6377_v16, %v13953_v56  ;;  %v6296_v41 = vpop.f32.mrb[57].mxu1  ;;  %v6379_v12 = vpop.f32.mrb[57].mxu0 }
0x1553   : > { %v6297_v0 = vadd.f32 %v6296_v41, %v13960_v24  ;;  %v6380_v45 = vadd.f32 %v6379_v12, %v13967_v14  ;;  %v6298_v61 = vpop.f32.mrb[58].mxu1  ;;  %v6381_v34 = vpop.f32.mrb[58].mxu0  ;;  %8157 = vmatprep.mubr.bf16.mxu1 %v6589_v59  ;;  %8230 = vmatprep.mubr.bf16.mxu0 %v6591_v44 }
0x1554   : > { %v6299_v40 = vadd.f32 %v6298_v61, %v13944_v63  ;;  %v6382_v13 = vadd.f32 %v6381_v34, %v13953_v56  ;;  %v6300_v42 = vpop.f32.mrb[59].mxu1  ;;  %v6383_v17 = vpop.f32.mrb[59].mxu0  ;;  %8158 = vmatmul.mubr.bf16.vlgmr.msra.gmra.mrb[132].mxu1 %v6588_v19  ;;  %8231 = vmatmul.mubr.bf16.vlgmr.msra.gmra.mrb[132].mxu0 %v6590_v18  ;;  %v6460_v3 = vmax.f32 %v6295_v15, 0.0  ;;  %v6462_v39 = vmax.f32 %v6378_v53, 0.0 }
0x1555   : > { %v6301_v31 = vadd.f32 %v6300_v42, %v13960_v24  ;;  %v6384_v57 = vadd.f32 %v6383_v17, %v13967_v14  ;;  %v6461_v9 = vmax.f32 %v6297_v0, 0.0  ;;  %v6463_v25 = vmax.f32 %v6380_v45, 0.0 }
0x1556   : > { %v6476_v21 = vmax.f32 %v6299_v40, 0.0  ;;  %v6478_v6 = vmax.f32 %v6382_v13, 0.0 }
0x1557   : > { %v6477_v51 = vmax.f32 %v6301_v31, 0.0  ;;  %v6479_v50 = vmax.f32 %v6384_v57, 0.0 }
0x1558   : > { %v6604_v54 = vpack.c.bf16 %v6476_v21, %v6460_v3  ;;  %v6606_v52 = vpack.c.bf16 %v6478_v6, %v6462_v39 }
0x1559   : > { %v6605_v62 = vpack.c.bf16 %v6477_v51, %v6461_v9  ;;  %v6607_v35 = vpack.c.bf16 %v6479_v50, %v6463_v25  ;;  %v6304_v43 = vpop.f32.mrb[60].mxu1  ;;  %v6387_v37 = vpop.f32.mrb[60].mxu0 }
0x155a   : > { %v6305_v23 = vadd.f32 %v6304_v43, %v13944_v63  ;;  %v6388_v58 = vadd.f32 %v6387_v37, %v13953_v56  ;;  %v6306_v10 = vpop.f32.mrb[61].mxu1  ;;  %v6389_v22 = vpop.f32.mrb[61].mxu0 }
0x155b   : > { %v6307_v11 = vadd.f32 %v6306_v10, %v13960_v24  ;;  %v6390_v29 = vadd.f32 %v6389_v22, %v13967_v14  ;;  %v6308_v20 = vpop.f32.mrb[62].mxu1  ;;  %v6391_v30 = vpop.f32.mrb[62].mxu0  ;;  %8165 = vmatprep.mubr.bf16.mxu1 %v6605_v62  ;;  %8238 = vmatprep.mubr.bf16.mxu0 %v6607_v35 }
0x155c   : > { %v6309_v38 = vadd.f32 %v6308_v20, %v13944_v63  ;;  %v6392_v28 = vadd.f32 %v6391_v30, %v13953_v56  ;;  %v6310_v7 = vpop.f32.mrb[63].mxu1  ;;  %v6393_v1 = vpop.f32.mrb[63].mxu0  ;;  %8166 = vmatmul.mubr.bf16.gmra.mrb[136].mxu1 %v6604_v54  ;;  %8239 = vmatmul.mubr.bf16.gmra.mrb[136].mxu0 %v6606_v52  ;;  %v6492_v49 = vmax.f32 %v6305_v23, 0.0  ;;  %v6494_v8 = vmax.f32 %v6388_v58, 0.0 }
0x155d   : > { %v6311_v5 = vadd.f32 %v6310_v7, %v13960_v24  ;;  %v6394_v4 = vadd.f32 %v6393_v1, %v13967_v14  ;;  %v6493_v55 = vmax.f32 %v6307_v11, 0.0  ;;  %v6495_v47 = vmax.f32 %v6390_v29, 0.0 }
0x155e   : > { %v6508_v32 = vmax.f32 %v6309_v38, 0.0  ;;  %v6510_v2 = vmax.f32 %v6392_v28, 0.0 }
0x155f   : > { %v6509_v36 = vmax.f32 %v6311_v5, 0.0  ;;  %v6511_v33 = vmax.f32 %v6394_v4, 0.0 }
0x1560   : > { %v6620_v46 = vpack.c.bf16 %v6508_v32, %v6492_v49  ;;  %v6622_v27 = vpack.c.bf16 %v6510_v2, %v6494_v8 }
0x1561   : > { %v6621_v60 = vpack.c.bf16 %v6509_v36, %v6493_v55  ;;  %v6623_v26 = vpack.c.bf16 %v6511_v33, %v6495_v47  ;;  %v6314_v19 = vpop.f32.mrb[64].mxu1  ;;  %v6397_v18 = vpop.f32.mrb[64].mxu0 }
0x1562   : > { %v6315_v59 = vadd.f32 %v6314_v19, %v13944_v63  ;;  %v6398_v44 = vadd.f32 %v6397_v18, %v13953_v56  ;;  %v6316_v48 = vpop.f32.mrb[65].mxu1  ;;  %v6399_v16 = vpop.f32.mrb[65].mxu0 }
0x1563   : > { %v6317_v15 = vadd.f32 %v6316_v48, %v13960_v24  ;;  %v6400_v53 = vadd.f32 %v6399_v16, %v13967_v14  ;;  %v6318_v41 = vpop.f32.mrb[66].mxu1  ;;  %v6401_v12 = vpop.f32.mrb[66].mxu0  ;;  %8173 = vmatprep.mubr.bf16.mxu1 %v6621_v60  ;;  %8246 = vmatprep.mubr.bf16.mxu0 %v6623_v26 }
0x1564   : > { %v6319_v0 = vadd.f32 %v6318_v41, %v13944_v63  ;;  %v6402_v45 = vadd.f32 %v6401_v12, %v13953_v56  ;;  %v6320_v61 = vpop.f32.mrb[67].mxu1  ;;  %v6403_v34 = vpop.f32.mrb[67].mxu0  ;;  %8174 = vmatmul.mubr.bf16.gmra.mrb[140].mxu1 %v6620_v46  ;;  %8247 = vmatmul.mubr.bf16.gmra.mrb[140].mxu0 %v6622_v27  ;;  %v6524_v42 = vmax.f32 %v6315_v59, 0.0  ;;  %v6526_v17 = vmax.f32 %v6398_v44, 0.0 }
0x1565   : > { %v6321_v40 = vadd.f32 %v6320_v61, %v13960_v24  ;;  %v6404_v13 = vadd.f32 %v6403_v34, %v13967_v14  ;;  %v6525_v3 = vmax.f32 %v6317_v15, 0.0  ;;  %v6527_v39 = vmax.f32 %v6400_v53, 0.0 }
0x1566   : > { %v6540_v31 = vmax.f32 %v6319_v0, 0.0  ;;  %v6542_v57 = vmax.f32 %v6402_v45, 0.0 }
0x1567   : > { %v6541_v21 = vmax.f32 %v6321_v40, 0.0  ;;  %v6543_v6 = vmax.f32 %v6404_v13, 0.0 }
0x1568   : > { %v6636_v9 = vpack.c.bf16 %v6540_v31, %v6524_v42  ;;  %v6638_v25 = vpack.c.bf16 %v6542_v57, %v6526_v17 }
0x1569   : > { %v6637_v51 = vpack.c.bf16 %v6541_v21, %v6525_v3  ;;  %v6639_v50 = vpack.c.bf16 %v6543_v6, %v6527_v39  ;;  %v6324_v54 = vpop.f32.mrb[68].mxu1  ;;  %v6407_v52 = vpop.f32.mrb[68].mxu0 }
0x156a   : > { %v6325_v62 = vadd.f32 %v6324_v54, %v13944_v63  ;;  %v6408_v35 = vadd.f32 %v6407_v52, %v13953_v56  ;;  %v6326_v43 = vpop.f32.mrb[69].mxu1  ;;  %v6409_v37 = vpop.f32.mrb[69].mxu0 }
0x156b   : > { %v6327_v23 = vadd.f32 %v6326_v43, %v13960_v24  ;;  %v6410_v58 = vadd.f32 %v6409_v37, %v13967_v14  ;;  %v6328_v10 = vpop.f32.mrb[70].mxu1  ;;  %v6411_v22 = vpop.f32.mrb[70].mxu0  ;;  %8181 = vmatprep.mubr.bf16.mxu1 %v6637_v51  ;;  %8254 = vmatprep.mubr.bf16.mxu0 %v6639_v50 }
0x156c   : > { %v6329_v11 = vadd.f32 %v6328_v10, %v13944_v63  ;;  %v6412_v29 = vadd.f32 %v6411_v22, %v13953_v56  ;;  %v6330_v20 = vpop.f32.mrb[71].mxu1  ;;  %v6413_v30 = vpop.f32.mrb[71].mxu0  ;;  %8182 = vmatmul.mubr.bf16.gmra.mrb[144].mxu1 %v6636_v9  ;;  %8255 = vmatmul.mubr.bf16.gmra.mrb[144].mxu0 %v6638_v25  ;;  %v6556_v7 = vmax.f32 %v6325_v62, 0.0  ;;  %v6558_v1 = vmax.f32 %v6408_v35, 0.0 }
0x156d   : > { %v6331_v38 = vadd.f32 %v6330_v20, %v13960_v24  ;;  %v6414_v28 = vadd.f32 %v6413_v30, %v13967_v14  ;;  %v6557_v49 = vmax.f32 %v6327_v23, 0.0  ;;  %v6559_v8 = vmax.f32 %v6410_v58, 0.0  ;;  %v14016_v24 = vld [vmem:[%s14561_s1] ss:$0 sm:$0xff] }
0x156e   : > { %v6572_v5 = vmax.f32 %v6329_v11, 0.0  ;;  %v6574_v4 = vmax.f32 %v6412_v29, 0.0 }
0x156f   : > { %v6573_v32 = vmax.f32 %v6331_v38, 0.0  ;;  %v6575_v2 = vmax.f32 %v6414_v28, 0.0 }
0x1570   : > { %v6652_v63 = vpack.c.bf16 %v6572_v5, %v6556_v7  ;;  %v6654_v55 = vpack.c.bf16 %v6574_v4, %v6558_v1 }
0x1571   : > { %v6653_v56 = vpack.c.bf16 %v6573_v32, %v6557_v49  ;;  %v6655_v47 = vpack.c.bf16 %v6575_v2, %v6559_v8  ;;  %v9632_v36 = vpop.f32.mrb[72].mxu1  ;;  %v9678_v33 = vpop.f32.mrb[72].mxu0 }
0x1572   : > { %v9633_v14 = vpop.f32.mrb[73].mxu1  ;;  %v9679_v46 = vpop.f32.mrb[73].mxu0 }
0x1573   : > { %v9634_v27 = vadd.f32 %v9633_v14, %v9632_v36  ;;  %v9680_v60 = vadd.f32 %v9679_v46, %v9678_v33  ;;  %v9635_v26 = vpop.f32.mrb[74].mxu1  ;;  %v9681_v19 = vpop.f32.mrb[74].mxu0  ;;  %8189 = vmatprep.mubr.bf16.mxu1 %v6653_v56  ;;  %8262 = vmatprep.mubr.bf16.mxu0 %v6655_v47 }
0x1574   : > { %v9636_v18 = vpop.f32.mrb[75].mxu1  ;;  %v9682_v59 = vpop.f32.mrb[75].mxu0  ;;  %8190 = vmatmul.mubr.bf16.gmra.mrb[148].mxu1 %v6652_v63  ;;  %8263 = vmatmul.mubr.bf16.gmra.mrb[148].mxu0 %v6654_v55 }
0x1575   : > { %v7722_v44 = vadd.f32 %v9634_v27, %v14016_v24  ;;  %v9637_v48 = vadd.f32 %v9636_v18, %v9635_v26  ;;  %v9683_v16 = vadd.f32 %v9682_v59, %v9681_v19 }
0x1577   : > { %v14019_v15 = vadd.f32 %v9680_v60, %v7722_v44  ;;  %v7725_v53 = vadd.f32 %v9637_v48, %v14016_v24 }
0x1579   : > { %v14022_v41 = vadd.f32 %v9683_v16, %v7725_v53  ;;  %v9638_v12 = vpop.f32.mrb[76].mxu1  ;;  %v9684_v0 = vpop.f32.mrb[76].mxu0 }
0x157a   : > { %v9639_v45 = vpop.f32.mrb[77].mxu1  ;;  %v9685_v61 = vpop.f32.mrb[77].mxu0 }
0x157b   : > { %v9640_v34 = vadd.f32 %v9639_v45, %v9638_v12  ;;  %v9686_v40 = vadd.f32 %v9685_v61, %v9684_v0  ;;  %v9641_v13 = vpop.f32.mrb[78].mxu1  ;;  %v9687_v42 = vpop.f32.mrb[78].mxu0 }
0x157c   : > { %v9642_v17 = vpop.f32.mrb[79].mxu1  ;;  %v9688_v31 = vpop.f32.mrb[79].mxu0 }
0x157d   : > { %v7730_v57 = vadd.f32 %v9640_v34, %v14016_v24  ;;  %v9643_v3 = vadd.f32 %v9642_v17, %v9641_v13  ;;  %v9689_v39 = vadd.f32 %v9688_v31, %v9687_v42 }
0x157f   : > { %v14025_v21 = vadd.f32 %v9686_v40, %v7730_v57  ;;  %v7733_v6 = vadd.f32 %v9643_v3, %v14016_v24 }
0x1581   : > { %v14028_v9 = vadd.f32 %v9689_v39, %v7733_v6 }
0x15bf   : > { %v9644_v25 = vpop.f32.mrb[80].mxu1  ;;  %v9690_v51 = vpop.f32.mrb[80].mxu0 }
0x15c0   : > { %v9645_v50 = vpop.f32.mrb[81].mxu1  ;;  %v9691_v54 = vpop.f32.mrb[81].mxu0 }
0x15c1   : > { %v9646_v52 = vadd.f32 %v9645_v50, %v9644_v25  ;;  %v9692_v62 = vadd.f32 %v9691_v54, %v9690_v51  ;;  %v9647_v35 = vpop.f32.mrb[82].mxu1  ;;  %v9693_v43 = vpop.f32.mrb[82].mxu0 }
0x15c2   : > { %v9648_v37 = vpop.f32.mrb[83].mxu1  ;;  %v9694_v23 = vpop.f32.mrb[83].mxu0 }
0x15c3   : > { %v7738_v58 = vadd.f32 %v9646_v52, %v14016_v24  ;;  %v9649_v10 = vadd.f32 %v9648_v37, %v9647_v35  ;;  %v9695_v22 = vadd.f32 %v9694_v23, %v9693_v43 }
0x15c5   : > { %v14031_v11 = vadd.f32 %v9692_v62, %v7738_v58  ;;  %v7741_v29 = vadd.f32 %v9649_v10, %v14016_v24 }
0x15c7   : > { %v14034_v20 = vadd.f32 %v9695_v22, %v7741_v29  ;;  %v9650_v30 = vpop.f32.mrb[84].mxu1  ;;  %v9696_v38 = vpop.f32.mrb[84].mxu0 }
0x15c8   : > { %v9651_v28 = vpop.f32.mrb[85].mxu1  ;;  %v9697_v7 = vpop.f32.mrb[85].mxu0 }
0x15c9   : > { %v9652_v1 = vadd.f32 %v9651_v28, %v9650_v30  ;;  %v9698_v5 = vadd.f32 %v9697_v7, %v9696_v38  ;;  %v9653_v4 = vpop.f32.mrb[86].mxu1  ;;  %v9699_v49 = vpop.f32.mrb[86].mxu0 }
0x15ca   : > { %v9654_v8 = vpop.f32.mrb[87].mxu1  ;;  %v9700_v32 = vpop.f32.mrb[87].mxu0 }
0x15cb   : > { %v7746_v2 = vadd.f32 %v9652_v1, %v14016_v24  ;;  %v9655_v63 = vadd.f32 %v9654_v8, %v9653_v4  ;;  %v9701_v55 = vadd.f32 %v9700_v32, %v9699_v49 }
0x15cd   : > { %v14037_v56 = vadd.f32 %v9698_v5, %v7746_v2  ;;  %v7749_v47 = vadd.f32 %v9655_v63, %v14016_v24 }
0x15cf   : > { %v14040_v36 = vadd.f32 %v9701_v55, %v7749_v47  ;;  %v9656_v33 = vpop.f32.mrb[88].mxu1  ;;  %v9702_v14 = vpop.f32.mrb[88].mxu0 }
0x15d0   : > { %v9657_v46 = vpop.f32.mrb[89].mxu1  ;;  %v9703_v27 = vpop.f32.mrb[89].mxu0 }
0x15d1   : > { %v9658_v60 = vadd.f32 %v9657_v46, %v9656_v33  ;;  %v9704_v26 = vadd.f32 %v9703_v27, %v9702_v14  ;;  %v9659_v19 = vpop.f32.mrb[90].mxu1  ;;  %v9705_v18 = vpop.f32.mrb[90].mxu0 }
0x15d2   : > { %v9660_v59 = vpop.f32.mrb[91].mxu1  ;;  %v9706_v44 = vpop.f32.mrb[91].mxu0 }
0x15d3   : > { %v7754_v48 = vadd.f32 %v9658_v60, %v14016_v24  ;;  %v9661_v16 = vadd.f32 %v9660_v59, %v9659_v19  ;;  %v9707_v53 = vadd.f32 %v9706_v44, %v9705_v18 }
0x15d5   : > { %v14043_v12 = vadd.f32 %v9704_v26, %v7754_v48  ;;  %v7757_v0 = vadd.f32 %v9661_v16, %v14016_v24 }
0x15d7   : > { %v14046_v45 = vadd.f32 %v9707_v53, %v7757_v0  ;;  %v9724_v61 = vpop.f32.mrb[92].mxu1  ;;  %v9770_v34 = vpop.f32.mrb[92].mxu0 }
0x15d8   : > { %v9725_v40 = vpop.f32.mrb[93].mxu1  ;;  %v9771_v13 = vpop.f32.mrb[93].mxu0 }
0x15d9   : > { %v9726_v42 = vadd.f32 %v9725_v40, %v9724_v61  ;;  %v9772_v17 = vadd.f32 %v9771_v13, %v9770_v34  ;;  %v9727_v31 = vpop.f32.mrb[94].mxu1  ;;  %v9773_v57 = vpop.f32.mrb[94].mxu0 }
0x15da   : > { %v9728_v3 = vpop.f32.mrb[95].mxu1  ;;  %v9774_v39 = vpop.f32.mrb[95].mxu0 }
0x15db   : > { %v7868_v6 = vadd.f32 %v9726_v42, %v14019_v15  ;;  %v9729_v25 = vadd.f32 %v9728_v3, %v9727_v31  ;;  %v9775_v51 = vadd.f32 %v9774_v39, %v9773_v57 }
0x15dd   : > { %v14049_v50 = vadd.f32 %v9772_v17, %v7868_v6  ;;  %v7871_v24 = vadd.f32 %v9729_v25, %v14022_v41 }
0x15df   : > { %v14052_v54 = vadd.f32 %v9775_v51, %v7871_v24  ;;  %v9730_v52 = vpop.f32.mrb[96].mxu1  ;;  %v9776_v62 = vpop.f32.mrb[96].mxu0 }
0x15e0   : > { %v9731_v35 = vpop.f32.mrb[97].mxu1  ;;  %v9777_v43 = vpop.f32.mrb[97].mxu0 }
0x15e1   : > { %v9732_v37 = vadd.f32 %v9731_v35, %v9730_v52  ;;  %v9778_v23 = vadd.f32 %v9777_v43, %v9776_v62  ;;  %v9733_v58 = vpop.f32.mrb[98].mxu1  ;;  %v9779_v10 = vpop.f32.mrb[98].mxu0 }
0x15e2   : > { %v9734_v22 = vpop.f32.mrb[99].mxu1  ;;  %v9780_v29 = vpop.f32.mrb[99].mxu0 }
0x15e3   : > { %v7876_v15 = vadd.f32 %v9732_v37, %v14025_v21  ;;  %v9735_v30 = vadd.f32 %v9734_v22, %v9733_v58  ;;  %v9781_v38 = vadd.f32 %v9780_v29, %v9779_v10 }
0x15e5   : > { %v14055_v28 = vadd.f32 %v9778_v23, %v7876_v15  ;;  %v7879_v41 = vadd.f32 %v9735_v30, %v14028_v9 }
0x15e7   : > { %v14058_v7 = vadd.f32 %v9781_v38, %v7879_v41  ;;  %v9736_v1 = vpop.f32.mrb[100].mxu1  ;;  %v9782_v5 = vpop.f32.mrb[100].mxu0 }
0x15e8   : > { %v9737_v4 = vpop.f32.mrb[101].mxu1  ;;  %v9783_v49 = vpop.f32.mrb[101].mxu0 }
0x15e9   : > { %v9738_v8 = vadd.f32 %v9737_v4, %v9736_v1  ;;  %v9784_v32 = vadd.f32 %v9783_v49, %v9782_v5  ;;  %v9739_v2 = vpop.f32.mrb[102].mxu1  ;;  %v9785_v63 = vpop.f32.mrb[102].mxu0 }
0x15ea   : > { %v9740_v55 = vpop.f32.mrb[103].mxu1  ;;  %v9786_v47 = vpop.f32.mrb[103].mxu0 }
0x15eb   : > { %v7884_v21 = vadd.f32 %v9738_v8, %v14031_v11  ;;  %v9741_v33 = vadd.f32 %v9740_v55, %v9739_v2  ;;  %v9787_v14 = vadd.f32 %v9786_v47, %v9785_v63 }
0x15ed   : > { %v14061_v46 = vadd.f32 %v9784_v32, %v7884_v21  ;;  %v7887_v9 = vadd.f32 %v9741_v33, %v14034_v20 }
0x15ef   : > { %v14064_v27 = vadd.f32 %v9787_v14, %v7887_v9  ;;  %v9742_v60 = vpop.f32.mrb[104].mxu1  ;;  %v9788_v26 = vpop.f32.mrb[104].mxu0 }
0x15f0   : > { %v9743_v19 = vpop.f32.mrb[105].mxu1  ;;  %v9789_v18 = vpop.f32.mrb[105].mxu0 }
0x15f1   : > { %v9744_v59 = vadd.f32 %v9743_v19, %v9742_v60  ;;  %v9790_v44 = vadd.f32 %v9789_v18, %v9788_v26  ;;  %v9745_v48 = vpop.f32.mrb[106].mxu1  ;;  %v9791_v16 = vpop.f32.mrb[106].mxu0 }
0x15f2   : > { %v9746_v53 = vpop.f32.mrb[107].mxu1  ;;  %v9792_v0 = vpop.f32.mrb[107].mxu0 }
0x15f3   : > { %v7892_v11 = vadd.f32 %v9744_v59, %v14037_v56  ;;  %v9747_v61 = vadd.f32 %v9746_v53, %v9745_v48  ;;  %v9793_v34 = vadd.f32 %v9792_v0, %v9791_v16 }
0x15f5   : > { %v14067_v40 = vadd.f32 %v9790_v44, %v7892_v11  ;;  %v7895_v20 = vadd.f32 %v9747_v61, %v14040_v36 }
0x15f7   : > { %v14070_v13 = vadd.f32 %v9793_v34, %v7895_v20  ;;  %v9748_v42 = vpop.f32.mrb[108].mxu1  ;;  %v9794_v17 = vpop.f32.mrb[108].mxu0 }
0x15f8   : > { %v9749_v31 = vpop.f32.mrb[109].mxu1  ;;  %v9795_v57 = vpop.f32.mrb[109].mxu0 }
0x15f9   : > { %v9750_v3 = vadd.f32 %v9749_v31, %v9748_v42  ;;  %v9796_v39 = vadd.f32 %v9795_v57, %v9794_v17  ;;  %v9751_v6 = vpop.f32.mrb[110].mxu1  ;;  %v9797_v25 = vpop.f32.mrb[110].mxu0 }
0x15fa   : > { %v9752_v51 = vpop.f32.mrb[111].mxu1  ;;  %v9798_v24 = vpop.f32.mrb[111].mxu0 }
0x15fb   : > { %v7900_v56 = vadd.f32 %v9750_v3, %v14043_v12  ;;  %v9753_v52 = vadd.f32 %v9752_v51, %v9751_v6  ;;  %v9799_v62 = vadd.f32 %v9798_v24, %v9797_v25 }
0x15fd   : > { %v14073_v35 = vadd.f32 %v9796_v39, %v7900_v56  ;;  %v7903_v36 = vadd.f32 %v9753_v52, %v14046_v45 }
0x15ff   : > { %v14076_v43 = vadd.f32 %v9799_v62, %v7903_v36  ;;  %v9816_v37 = vpop.f32.mrb[112].mxu1  ;;  %v9862_v23 = vpop.f32.mrb[112].mxu0 }
0x1600   : > { %v9817_v58 = vpop.f32.mrb[113].mxu1  ;;  %v9863_v10 = vpop.f32.mrb[113].mxu0 }
0x1601   : > { %v9818_v22 = vadd.f32 %v9817_v58, %v9816_v37  ;;  %v9864_v29 = vadd.f32 %v9863_v10, %v9862_v23  ;;  %v9819_v15 = vpop.f32.mrb[114].mxu1  ;;  %v9865_v30 = vpop.f32.mrb[114].mxu0 }
0x1602   : > { %v9820_v38 = vpop.f32.mrb[115].mxu1  ;;  %v9866_v41 = vpop.f32.mrb[115].mxu0 }
0x1603   : > { %v8014_v12 = vadd.f32 %v9818_v22, %v14049_v50  ;;  %v9821_v1 = vadd.f32 %v9820_v38, %v9819_v15  ;;  %v9867_v5 = vadd.f32 %v9866_v41, %v9865_v30 }
0x1605   : > { %v14079_v4 = vadd.f32 %v9864_v29, %v8014_v12  ;;  %v8017_v45 = vadd.f32 %v9821_v1, %v14052_v54 }
0x1607   : > { %v14082_v49 = vadd.f32 %v9867_v5, %v8017_v45  ;;  %v9822_v8 = vpop.f32.mrb[116].mxu1  ;;  %v9868_v32 = vpop.f32.mrb[116].mxu0 }
0x1608   : > { %v9823_v2 = vpop.f32.mrb[117].mxu1  ;;  %v9869_v63 = vpop.f32.mrb[117].mxu0 }
0x1609   : > { %v9824_v55 = vadd.f32 %v9823_v2, %v9822_v8  ;;  %v9870_v47 = vadd.f32 %v9869_v63, %v9868_v32  ;;  %v9825_v21 = vpop.f32.mrb[118].mxu1  ;;  %v9871_v33 = vpop.f32.mrb[118].mxu0 }
0x160a   : > { %v9826_v14 = vpop.f32.mrb[119].mxu1  ;;  %v9872_v9 = vpop.f32.mrb[119].mxu0 }
0x160b   : > { %v8022_v50 = vadd.f32 %v9824_v55, %v14055_v28  ;;  %v9827_v60 = vadd.f32 %v9826_v14, %v9825_v21  ;;  %v9873_v26 = vadd.f32 %v9872_v9, %v9871_v33 }
0x160d   : > { %v14085_v19 = vadd.f32 %v9870_v47, %v8022_v50  ;;  %v8025_v54 = vadd.f32 %v9827_v60, %v14058_v7 }
0x160f   : > { %v14088_v18 = vadd.f32 %v9873_v26, %v8025_v54  ;;  %v9828_v59 = vpop.f32.mrb[120].mxu1  ;;  %v9874_v44 = vpop.f32.mrb[120].mxu0 }
0x1610   : > { %v9829_v48 = vpop.f32.mrb[121].mxu1  ;;  %v9875_v16 = vpop.f32.mrb[121].mxu0 }
0x1611   : > { %v9830_v53 = vadd.f32 %v9829_v48, %v9828_v59  ;;  %v9876_v0 = vadd.f32 %v9875_v16, %v9874_v44  ;;  %v9831_v11 = vpop.f32.mrb[122].mxu1  ;;  %v9877_v61 = vpop.f32.mrb[122].mxu0 }
0x1612   : > { %v9832_v34 = vpop.f32.mrb[123].mxu1  ;;  %v9878_v20 = vpop.f32.mrb[123].mxu0 }
0x1613   : > { %v8030_v28 = vadd.f32 %v9830_v53, %v14061_v46  ;;  %v9833_v42 = vadd.f32 %v9832_v34, %v9831_v11  ;;  %v9879_v17 = vadd.f32 %v9878_v20, %v9877_v61  ;;  %v11327_v11 = vld [vmem:[#allocation2] sm:$0xff] }
0x1615   : > { %v14091_v31 = vadd.f32 %v9876_v0, %v8030_v28  ;;  %v8033_v7 = vadd.f32 %v9833_v42, %v14064_v27 }
0x1617   : > { %v14094_v57 = vadd.f32 %v9879_v17, %v8033_v7  ;;  %v9834_v3 = vpop.f32.mrb[124].mxu1  ;;  %v9880_v39 = vpop.f32.mrb[124].mxu0 }
0x1618   : > { %v9835_v6 = vpop.f32.mrb[125].mxu1  ;;  %v9881_v25 = vpop.f32.mrb[125].mxu0 }
0x1619   : > { %v9836_v51 = vadd.f32 %v9835_v6, %v9834_v3  ;;  %v9882_v24 = vadd.f32 %v9881_v25, %v9880_v39  ;;  %v9837_v56 = vpop.f32.mrb[126].mxu1  ;;  %v9883_v52 = vpop.f32.mrb[126].mxu0  ;;  %v11328_v3 = vld [vmem:[#allocation2 + $0x8] sm:$0xff] }
0x161a   : > { %v9838_v62 = vpop.f32.mrb[127].mxu1  ;;  %v9884_v36 = vpop.f32.mrb[127].mxu0 }
0x161b   : > { %v8038_v46 = vadd.f32 %v9836_v51, %v14067_v40  ;;  %v9839_v37 = vadd.f32 %v9838_v62, %v9837_v56  ;;  %v9885_v23 = vadd.f32 %v9884_v36, %v9883_v52 }
0x161d   : > { %v14097_v58 = vadd.f32 %v9882_v24, %v8038_v46  ;;  %v8041_v27 = vadd.f32 %v9839_v37, %v14070_v13 }
0x161f   : > { %v14100_v10 = vadd.f32 %v9885_v23, %v8041_v27  ;;  %v9840_v22 = vpop.f32.mrb[128].mxu1  ;;  %v9886_v29 = vpop.f32.mrb[128].mxu0  ;;  %v11329_v23 = vld [vmem:[#allocation2 + $0x10] sm:$0xff] }
0x1620   : > { %v9841_v15 = vpop.f32.mrb[129].mxu1  ;;  %v9887_v30 = vpop.f32.mrb[129].mxu0 }
0x1621   : > { %v9842_v38 = vadd.f32 %v9841_v15, %v9840_v22  ;;  %v9888_v41 = vadd.f32 %v9887_v30, %v9886_v29  ;;  %v9843_v12 = vpop.f32.mrb[130].mxu1  ;;  %v9889_v1 = vpop.f32.mrb[130].mxu0 }
0x1622   : > { %v9844_v5 = vpop.f32.mrb[131].mxu1  ;;  %v9890_v45 = vpop.f32.mrb[131].mxu0 }
0x1623   : > { %v8046_v40 = vadd.f32 %v9842_v38, %v14073_v35  ;;  %v9845_v8 = vadd.f32 %v9844_v5, %v9843_v12  ;;  %v9891_v32 = vadd.f32 %v9890_v45, %v9889_v1  ;;  %v11330_v12 = vld [vmem:[#allocation2 + $0x18] sm:$0xff] }
0x1625   : > { %v14103_v2 = vadd.f32 %v9888_v41, %v8046_v40  ;;  %v8049_v13 = vadd.f32 %v9845_v8, %v14076_v43 }
0x1627   : > { %v14106_v63 = vadd.f32 %v9891_v32, %v8049_v13  ;;  %v9908_v55 = vpop.f32.mrb[132].mxu1  ;;  %v9954_v47 = vpop.f32.mrb[132].mxu0 }
0x1628   : > { %v9909_v21 = vpop.f32.mrb[133].mxu1  ;;  %v9955_v33 = vpop.f32.mrb[133].mxu0 }
0x1629   : > { %v9910_v14 = vadd.f32 %v9909_v21, %v9908_v55  ;;  %v9956_v9 = vadd.f32 %v9955_v33, %v9954_v47  ;;  %v9911_v50 = vpop.f32.mrb[134].mxu1  ;;  %v9957_v60 = vpop.f32.mrb[134].mxu0 }
0x162a   : > { %v9912_v26 = vpop.f32.mrb[135].mxu1  ;;  %v9958_v54 = vpop.f32.mrb[135].mxu0 }
0x162b   : > { %v8160_v35 = vadd.f32 %v9910_v14, %v14079_v4  ;;  %v9913_v59 = vadd.f32 %v9912_v26, %v9911_v50  ;;  %v9959_v44 = vadd.f32 %v9958_v54, %v9957_v60  ;;  %v11331_v14 = vld [vmem:[#allocation2 + $0x20] sm:$0xff] }
0x162d   : > { %v8233_v48 = vadd.f32 %v9956_v9, %v8160_v35  ;;  %v8163_v16 = vadd.f32 %v9913_v59, %v14082_v49 }
0x162f   : > { %v8236_v43 = vadd.f32 %v9959_v44, %v8163_v16  ;;  %v9914_v53 = vpop.f32.mrb[136].mxu1  ;;  %v9960_v0 = vpop.f32.mrb[136].mxu0  ;;  %v14110_v61 = vadd.f32 %v11327_v11, %v8233_v48  ;;  %v11332_v44 = vld [vmem:[#allocation2 + $0x28] sm:$0xff] }
0x1630   : > { %v9915_v34 = vpop.f32.mrb[137].mxu1  ;;  %v9961_v20 = vpop.f32.mrb[137].mxu0 }
0x1631   : > { %v9916_v28 = vadd.f32 %v9915_v34, %v9914_v53  ;;  %v9962_v42 = vadd.f32 %v9961_v20, %v9960_v0  ;;  %v9917_v17 = vpop.f32.mrb[138].mxu1  ;;  %v9963_v7 = vpop.f32.mrb[138].mxu0  ;;  %v8283_v4 = vsel %vm1138_vm5, %v14110_v61, 0.0  ;;  %v14114_v39 = vadd.f32 %v11328_v3, %v8236_v43 }
0x1632   : > { %v9918_v6 = vpop.f32.mrb[139].mxu1  ;;  %v9964_v49 = vpop.f32.mrb[139].mxu0  ;;  %8284 = vadd.xlane.f32.xlu0 %v8283_v4 }
0x1633   : > { %v8168_v25 = vadd.f32 %v9916_v28, %v14085_v19  ;;  %v9919_v51 = vadd.f32 %v9918_v6, %v9917_v17  ;;  %v9965_v24 = vadd.f32 %v9964_v49, %v9963_v7  ;;  %v8286_v56 = vsel %vm1138_vm5, %v14114_v39, 0.0  ;;  %v11333_v7 = vld [vmem:[#allocation2 + $0x30] sm:$0xff] }
0x1634   : > { %8287 = vadd.xlane.f32.xlu1 %v8286_v56  ;;  %v11334_v56 = vld [vmem:[#allocation2 + $0x38] sm:$0xff] }
0x1635   : > { %v8241_v52 = vadd.f32 %v9962_v42, %v8168_v25  ;;  %v8171_v62 = vadd.f32 %v9919_v51, %v14088_v18 }
0x1637   : > { %v8244_v36 = vadd.f32 %v9965_v24, %v8171_v62  ;;  %v9920_v46 = vpop.f32.mrb[140].mxu1  ;;  %v9966_v37 = vpop.f32.mrb[140].mxu0  ;;  %v14120_v27 = vadd.f32 %v11329_v23, %v8241_v52 }
0x1638   : > { %v9921_v22 = vpop.f32.mrb[141].mxu1  ;;  %v9967_v29 = vpop.f32.mrb[141].mxu0 }
0x1639   : > { %v9922_v15 = vadd.f32 %v9921_v22, %v9920_v46  ;;  %v9968_v30 = vadd.f32 %v9967_v29, %v9966_v37  ;;  %v9923_v19 = vpop.f32.mrb[142].mxu1  ;;  %v9969_v38 = vpop.f32.mrb[142].mxu0  ;;  %v8289_v41 = vsel %vm1138_vm5, %v14120_v27, 0.0  ;;  %v14124_v1 = vadd.f32 %v11330_v12, %v8244_v36 }
0x163a   : > { %v9924_v5 = vpop.f32.mrb[143].mxu1  ;;  %v9970_v18 = vpop.f32.mrb[143].mxu0  ;;  %8290 = vadd.xlane.f32.xlu0 %v8289_v41  ;;  %v11336_v41 = vld [vmem:[#allocation2 + $0x48] sm:$0xff] }
0x163b   : > { %v8176_v45 = vadd.f32 %v9922_v15, %v14091_v31  ;;  %v9925_v40 = vadd.f32 %v9924_v5, %v9923_v19  ;;  %v9971_v8 = vadd.f32 %v9970_v18, %v9969_v38  ;;  %v8292_v32 = vsel %vm1138_vm5, %v14124_v1, 0.0 }
0x163c   : > { %8293 = vadd.xlane.f32.xlu1 %v8292_v32 }
0x163d   : > { %v8249_v13 = vadd.f32 %v9968_v30, %v8176_v45  ;;  %v8179_v55 = vadd.f32 %v9925_v40, %v14094_v57  ;;  %v11335_v30 = vld [vmem:[#allocation2 + $0x40] sm:$0xff] }
0x163f   : > { %v8252_v47 = vadd.f32 %v9971_v8, %v8179_v55  ;;  %v9926_v21 = vpop.f32.mrb[144].mxu1  ;;  %v9972_v33 = vpop.f32.mrb[144].mxu0  ;;  %v14130_v9 = vadd.f32 %v11331_v14, %v8249_v13 }
0x1640   : > { %v9927_v50 = vpop.f32.mrb[145].mxu1  ;;  %v9973_v60 = vpop.f32.mrb[145].mxu0 }
0x1641   : > { %v9928_v26 = vadd.f32 %v9927_v50, %v9926_v21  ;;  %v9974_v54 = vadd.f32 %v9973_v60, %v9972_v33  ;;  %v9929_v31 = vpop.f32.mrb[146].mxu1  ;;  %v9975_v35 = vpop.f32.mrb[146].mxu0  ;;  %v8295_v59 = vsel %vm1138_vm5, %v14130_v9, 0.0  ;;  %v14134_v48 = vadd.f32 %v11332_v44, %v8252_v47 }
0x1642   : > { %v9930_v16 = vpop.f32.mrb[147].mxu1  ;;  %v9976_v57 = vpop.f32.mrb[147].mxu0  ;;  %8296 = vadd.xlane.f32.xlu0 %v8295_v59 }
0x1643   : > { %v8184_v43 = vadd.f32 %v9928_v26, %v14097_v58  ;;  %v9931_v53 = vadd.f32 %v9930_v16, %v9929_v31  ;;  %v9977_v0 = vadd.f32 %v9976_v57, %v9975_v35  ;;  %v8298_v11 = vsel %vm1138_vm5, %v14134_v48, 0.0 }
0x1644   : > { %8299 = vadd.xlane.f32.xlu1 %v8298_v11 }
0x1645   : > { %v8257_v34 = vadd.f32 %v9974_v54, %v8184_v43  ;;  %v8187_v20 = vadd.f32 %v9931_v53, %v14100_v10 }
0x1647   : > { %v8260_v28 = vadd.f32 %v9977_v0, %v8187_v20  ;;  %v9932_v42 = vpop.f32.mrb[148].mxu1  ;;  %v9978_v17 = vpop.f32.mrb[148].mxu0  ;;  %v14140_v4 = vadd.f32 %v11333_v7, %v8257_v34 }
0x1648   : > { %v9933_v3 = vpop.f32.mrb[149].mxu1  ;;  %v9979_v6 = vpop.f32.mrb[149].mxu0 }
0x1649   : > { %v9934_v49 = vadd.f32 %v9933_v3, %v9932_v42  ;;  %v9980_v25 = vadd.f32 %v9979_v6, %v9978_v17  ;;  %v9935_v58 = vpop.f32.mrb[150].mxu1  ;;  %v9981_v51 = vpop.f32.mrb[150].mxu0  ;;  %v8301_v24 = vsel %vm1138_vm5, %v14140_v4, 0.0  ;;  %v8278_v52 = vadd.f32 %v11334_v56, %v8260_v28 }
0x164a   : > { %v9936_v62 = vpop.f32.mrb[151].mxu1  ;;  %v9982_v36 = vpop.f32.mrb[151].mxu0  ;;  %8302 = vadd.xlane.f32.xlu0 %v8301_v24 }
0x164b   : > { %v8192_v10 = vadd.f32 %v9934_v49, %v14103_v2  ;;  %v9937_v46 = vadd.f32 %v9936_v62, %v9935_v58  ;;  %v9983_v37 = vadd.f32 %v9982_v36, %v9981_v51  ;;  %v8304_v23 = vsel %vm1138_vm5, %v8278_v52, 0.0 }
0x164c   : > { %8305 = vadd.xlane.f32.xlu1 %v8304_v23 }
0x164d   : > { %v8265_v22 = vadd.f32 %v9980_v25, %v8192_v10  ;;  %v8195_v29 = vadd.f32 %v9937_v46, %v14106_v63 }
0x164f   : > { %v8268_v15 = vadd.f32 %v9983_v37, %v8195_v29  ;;  %v8279_v19 = vadd.f32 %v11335_v30, %v8265_v22 }
0x1651   : > { %v8307_v38 = vsel %vm1138_vm5, %v8279_v19, 0.0  ;;  %v8280_v12 = vadd.f32 %v11336_v41, %v8268_v15 }
0x1652   : > { %8308 = vadd.xlane.f32.xlu0 %v8307_v38 }
0x1653   : > { %v8310_v5 = vsel %vm1138_vm5, %v8280_v12, 0.0 }
0x1654   : > { %8311 = vadd.xlane.f32.xlu1 %v8310_v5  ;;  %v14211_v5 = vld [vmem:[%s945_s9] ss:$0 sm:$0xff] }
0x16bf   : > { %v8285_v2 = vpop.xlane.xlu0 %8284 }
0x16c0   : > { %v8313_v18 = vmul.f32 0.03125, %v8285_v2 }
0x16c1   : > { %v8288_v45 = vpop.xlane.xlu1 %8287 }
0x16c2   : > { %v14150_v40 = vsub.f32 %v14110_v61, %v8313_v18  ;;  %v8314_v8 = vmul.f32 0.03125, %v8288_v45 }
0x16c4   : > { %v14153_v63 = vsub.f32 %v14114_v39, %v8314_v8  ;;  %v8333_v32 = vmul.f32 %v14150_v40, %v14150_v40  ;;  %v14219_v8 = vld [vmem:[%s948_s0] ss:$0 sm:$0xff] }
0x16c6   : > { %v8343_v13 = vsel %vm1138_vm5, %v8333_v32, 0.0  ;;  %v8334_v55 = vmul.f32 %v14153_v63, %v14153_v63 }
0x16c7   : > { %8344 = vadd.xlane.f32.xlu0 %v8343_v13  ;;  %v8291_v47 = vpop.xlane.xlu0 %8290 }
0x16c8   : > { %v8315_v21 = vmul.f32 0.03125, %v8291_v47  ;;  %v8346_v33 = vsel %vm1138_vm5, %v8334_v55, 0.0 }
0x16c9   : > { %8347 = vadd.xlane.f32.xlu1 %v8346_v33  ;;  %v8294_v61 = vpop.xlane.xlu1 %8293 }
0x16ca   : > { %v14162_v14 = vsub.f32 %v14120_v27, %v8315_v21  ;;  %v8316_v39 = vmul.f32 0.03125, %v8294_v61 }
0x16cc   : > { %v14165_v50 = vsub.f32 %v14124_v1, %v8316_v39  ;;  %v8335_v60 = vmul.f32 %v14162_v14, %v14162_v14 }
0x16ce   : > { %v8349_v26 = vsel %vm1138_vm5, %v8335_v60, 0.0  ;;  %v8336_v54 = vmul.f32 %v14165_v50, %v14165_v50 }
0x16cf   : > { %8350 = vadd.xlane.f32.xlu0 %v8349_v26  ;;  %v8297_v31 = vpop.xlane.xlu0 %8296 }
0x16d0   : > { %v8317_v35 = vmul.f32 0.03125, %v8297_v31  ;;  %v8352_v59 = vsel %vm1138_vm5, %v8336_v54, 0.0 }
0x16d1   : > { %8353 = vadd.xlane.f32.xlu1 %v8352_v59  ;;  %v8300_v27 = vpop.xlane.xlu1 %8299 }
0x16d2   : > { %v14174_v44 = vsub.f32 %v14130_v9, %v8317_v35  ;;  %v8318_v1 = vmul.f32 0.03125, %v8300_v27 }
0x16d4   : > { %v14177_v16 = vsub.f32 %v14134_v48, %v8318_v1  ;;  %v8337_v57 = vmul.f32 %v14174_v44, %v14174_v44 }
0x16d6   : > { %v8355_v43 = vsel %vm1138_vm5, %v8337_v57, 0.0  ;;  %v8338_v53 = vmul.f32 %v14177_v16, %v14177_v16 }
0x16d7   : > { %8356 = vadd.xlane.f32.xlu0 %v8355_v43  ;;  %v8303_v0 = vpop.xlane.xlu0 %8302 }
0x16d8   : > { %v8319_v11 = vmul.f32 0.03125, %v8303_v0  ;;  %v8358_v34 = vsel %vm1138_vm5, %v8338_v53, 0.0 }
0x16d9   : > { %8359 = vadd.xlane.f32.xlu1 %v8358_v34  ;;  %v8306_v9 = vpop.xlane.xlu1 %8305 }
0x16da   : > { %v14186_v20 = vsub.f32 %v14140_v4, %v8319_v11  ;;  %v8320_v48 = vmul.f32 0.03125, %v8306_v9 }
0x16dc   : > { %v14188_v28 = vsub.f32 %v8278_v52, %v8320_v48  ;;  %v8339_v42 = vmul.f32 %v14186_v20, %v14186_v20 }
0x16de   : > { %v8361_v17 = vsel %vm1138_vm5, %v8339_v42, 0.0  ;;  %v8340_v7 = vmul.f32 %v14188_v28, %v14188_v28 }
0x16df   : > { %8362 = vadd.xlane.f32.xlu0 %v8361_v17  ;;  %v8309_v3 = vpop.xlane.xlu0 %8308 }
0x16e0   : > { %v8321_v6 = vmul.f32 0.03125, %v8309_v3  ;;  %v8364_v49 = vsel %vm1138_vm5, %v8340_v7, 0.0 }
0x16e1   : > { %8365 = vadd.xlane.f32.xlu1 %v8364_v49  ;;  %v8312_v25 = vpop.xlane.xlu1 %8311 }
0x16e2   : > { %v14196_v4 = vsub.f32 %v8279_v19, %v8321_v6  ;;  %v8322_v58 = vmul.f32 0.03125, %v8312_v25 }
0x16e4   : > { %v14198_v51 = vsub.f32 %v8280_v12, %v8322_v58  ;;  %v8341_v24 = vmul.f32 %v14196_v4, %v14196_v4 }
0x16e6   : > { %v8367_v56 = vsel %vm1138_vm5, %v8341_v24, 0.0  ;;  %v8342_v52 = vmul.f32 %v14198_v51, %v14198_v51 }
0x16e7   : > { %8368 = vadd.xlane.f32.xlu0 %v8367_v56 }
0x16e8   : > { %v8370_v62 = vsel %vm1138_vm5, %v8342_v52, 0.0 }
0x16e9   : > { %8371 = vadd.xlane.f32.xlu1 %v8370_v62 }
0x1754   : > { %v8345_v36 = vpop.xlane.xlu0 %8344 }
0x1755   : > { %v8373_v10 = vmul.f32 0.03125, %v8345_v36 }
0x1756   : > { %v8348_v46 = vpop.xlane.xlu1 %8347 }
0x1757   : > { %v8383_v37 = vadd.f32 1e-05, %v8373_v10  ;;  %v8374_v23 = vmul.f32 0.03125, %v8348_v46 }
0x1759   : > { %11293 = vrsqrt.f32 %v8383_v37  ;;  %v8384_v22 = vadd.f32 1e-05, %v8374_v23 }
0x175b   : > { %11295 = vrsqrt.f32 %v8384_v22 }
0x175c   : > { %v8351_v29 = vpop.xlane.xlu0 %8350 }
0x175d   : > { %v8375_v15 = vmul.f32 0.03125, %v8351_v29 }
0x175e   : > { %v8354_v30 = vpop.xlane.xlu1 %8353 }
0x175f   : > { %v8385_v19 = vadd.f32 1e-05, %v8375_v15  ;;  %v8376_v38 = vmul.f32 0.03125, %v8354_v30 }
0x1761   : > { %11297 = vrsqrt.f32 %v8385_v19  ;;  %v8386_v41 = vadd.f32 1e-05, %v8376_v38  ;;  %v11385_v38 = vmov (!%p9318_p5), 0.0  }
0x1762   : > { %10800 = vmatprep.subr.bf16.mxu0 (!%p9318_p5), %v11385_v38  ;;  %10808 = vmatprep.subr.bf16.mxu1 (!%p9318_p5), %v11385_v38 }
0x1763   : > { %v11294_v12 = vpop.eup %11293  ;;  %11299 = vrsqrt.f32 %v8386_v41  ;;  %v11339_v41 = vld [vmem:[%s14563_s2 + $0x8] sm:$0xff] (!%p9318_p5)   ;;  %10804 = vmatprep.mubr.msk.bf16.mxu0 (!%p9318_p5), %vm11386_vm11, %v11385_v38  ;;  %10812 = vmatprep.mubr.msk.bf16.mxu1 (!%p9318_p5), %vm11386_vm11, %v11385_v38 }
0x1764   : > { %v8403_v2 = vmul.f32 %v11294_v12, %v14150_v40  ;;  %v8357_v18 = vpop.xlane.xlu0 %8356  ;;  %v11340_v12 = vld [vmem:[%s14563_s2 + $0x8] sm:$0xff] (!%p9318_p5)  }
0x1765   : > { %v11296_v45 = vpop.eup %11295  ;;  %v8377_v32 = vmul.f32 0.03125, %v8357_v18  ;;  %v8464_v18 = vld [vmem:[%s14564_s5] sm:$0x1] (!%p9318_p5) }
0x1766   : > { %v8419_v13 = vmul.f32 %v14211_v5, %v8403_v2  ;;  %v8404_v55 = vmul.f32 %v11296_v45, %v14153_v63  ;;  %v8360_v47 = vpop.xlane.xlu1 %8359  ;;  %v8527_v45 = vld [vmem:[%s14564_s5] sm:$0x1] (!%p9318_p5) }
0x1767   : > { %v8387_v21 = vadd.f32 1e-05, %v8377_v32  ;;  %v8378_v33 = vmul.f32 0.03125, %v8360_v47 }
0x1768   : > { %v8435_v61 = vadd.f32 %v14219_v8, %v8419_v13  ;;  %v8420_v40 = vmul.f32 %v14211_v5, %v8404_v55 }
0x1769   : > { %11301 = vrsqrt.f32 %v8387_v21  ;;  %v8388_v39 = vadd.f32 1e-05, %v8378_v33 }
0x176a   : > { %8445 = vst.msk [vmem:[#allocation2] sm:$0xff] %vm1138_vm5, %v8435_v61  ;;  %v8436_v60 = vadd.f32 %v14219_v8, %v8420_v40 }
0x176b   : > { %v11298_v26 = vpop.eup %11297  ;;  %11303 = vrsqrt.f32 %v8388_v39 }
0x176c   : > { %8446 = vst.msk [vmem:[#allocation2 + $0x8] sm:$0xff] %vm1138_vm5, %v8436_v60  ;;  %v8405_v54 = vmul.f32 %v11298_v26, %v14162_v14  ;;  %v8363_v63 = vpop.xlane.xlu0 %8362 }
0x176d   : > { %v11300_v31 = vpop.eup %11299  ;;  %v8379_v35 = vmul.f32 0.03125, %v8363_v63 }
0x176e   : > { %v8421_v59 = vmul.f32 %v14211_v5, %v8405_v54  ;;  %v8406_v27 = vmul.f32 %v11300_v31, %v14165_v50  ;;  %v8366_v1 = vpop.xlane.xlu1 %8365 }
0x176f   : > { %v8389_v57 = vadd.f32 1e-05, %v8379_v35  ;;  %v8380_v43 = vmul.f32 0.03125, %v8366_v1 }
0x1770   : > { %v8437_v53 = vadd.f32 %v14219_v8, %v8421_v59  ;;  %v8422_v0 = vmul.f32 %v14211_v5, %v8406_v27 }
0x1771   : > { %11305 = vrsqrt.f32 %v8389_v57  ;;  %v8390_v11 = vadd.f32 1e-05, %v8380_v43 }
0x1772   : > { %8447 = vst.msk [vmem:[#allocation2 + $0x10] sm:$0xff] %vm1138_vm5, %v8437_v53  ;;  %v8438_v14 = vadd.f32 %v14219_v8, %v8422_v0 }
0x1773   : > { %v11302_v34 = vpop.eup %11301  ;;  %11307 = vrsqrt.f32 %v8390_v11 }
0x1774   : > { %8448 = vst.msk [vmem:[#allocation2 + $0x18] sm:$0xff] %vm1138_vm5, %v8438_v14  ;;  %v8407_v9 = vmul.f32 %v11302_v34, %v14174_v44  ;;  %v8369_v50 = vpop.xlane.xlu0 %8368 }
0x1775   : > { %v11304_v48 = vpop.eup %11303  ;;  %v8381_v42 = vmul.f32 0.03125, %v8369_v50 }
0x1776   : > { %v8423_v17 = vmul.f32 %v14211_v5, %v8407_v9  ;;  %v8408_v7 = vmul.f32 %v11304_v48, %v14177_v16  ;;  %v8372_v3 = vpop.xlane.xlu1 %8371 }
0x1777   : > { %v8391_v6 = vadd.f32 1e-05, %v8381_v42  ;;  %v8382_v49 = vmul.f32 0.03125, %v8372_v3 }
0x1778   : > { %v8439_v25 = vadd.f32 %v14219_v8, %v8423_v17  ;;  %v8424_v58 = vmul.f32 %v14211_v5, %v8408_v7 }
0x1779   : > { %11309 = vrsqrt.f32 %v8391_v6  ;;  %v8392_v24 = vadd.f32 1e-05, %v8382_v49 }
0x177a   : > { %8449 = vst.msk [vmem:[#allocation2 + $0x20] sm:$0xff] %vm1138_vm5, %v8439_v25  ;;  %v8440_v44 = vadd.f32 %v14219_v8, %v8424_v58 }
0x177b   : > { %v11306_v56 = vpop.eup %11305  ;;  %11311 = vrsqrt.f32 %v8392_v24 }
0x177c   : > { %8450 = vst.msk [vmem:[#allocation2 + $0x28] sm:$0xff] %vm1138_vm5, %v8440_v44  ;;  %v8409_v52 = vmul.f32 %v11306_v56, %v14186_v20 }
0x177d   : > { %v11308_v16 = vpop.eup %11307 }
0x177e   : > { %v8425_v62 = vmul.f32 %v14211_v5, %v8409_v52  ;;  %v8410_v36 = vmul.f32 %v11308_v16, %v14188_v28 }
0x1780   : > { %v8441_v10 = vadd.f32 %v14219_v8, %v8425_v62  ;;  %v8426_v46 = vmul.f32 %v14211_v5, %v8410_v36 }
0x1782   : > { %8451 = vst.msk [vmem:[#allocation2 + $0x30] sm:$0xff] %vm1138_vm5, %v8441_v10  ;;  %v8442_v37 = vadd.f32 %v14219_v8, %v8426_v46 }
0x1783   : > { %v11310_v23 = vpop.eup %11309 }
0x1784   : > { %8452 = vst.msk [vmem:[#allocation2 + $0x38] sm:$0xff] %vm1138_vm5, %v8442_v37  ;;  %v8411_v22 = vmul.f32 %v11310_v23, %v14196_v4  ;;  %v11337_v4 = vld [vmem:[%s14563_s2] sm:$0xff] (!%p9318_p5)  }
0x1785   : > { %v11312_v29 = vpop.eup %11311  ;;  %10801 = vmatpush3.bf16.msra.mxu0 (!%p9318_p5), %v11337_v4 }
0x1786   : > { %v8427_v20 = vmul.f32 %v14211_v5, %v8411_v22  ;;  %v8412_v15 = vmul.f32 %v11312_v29, %v14198_v51  ;;  %8458 = sbr.rel (%p9318_p5) target bundleno = 6245 (0x1865), region = 120  ;;  %v11338_v51 = vld [vmem:[%s14563_s2] sm:$0xff] (!%p9318_p5)   ;;  %10802 = vmatprep.subr.bf16.mxu0 (!%p9318_p5), %v11385_v38 }
0x1787   : > { %10809 = vmatpush3.bf16.msra.mxu1 (!%p9318_p5), %v11338_v51 }
0x1788   : > { %v8443_v28 = vadd.f32 %v14219_v8, %v8427_v20  ;;  %v8428_v30 = vmul.f32 %v14211_v5, %v8412_v15  ;;  %10810 = vmatprep.subr.bf16.mxu1 (!%p9318_p5), %v11385_v38  ;;  %v8459_v5 = vpack.c.bf16 (!%p9318_p5), %v8439_v25, %v8439_v25 }
0x1789   : > { %10803 = vmatpush3.bf16.msra.mxu0 (!%p9318_p5), %v11339_v41 }
0x178a   : > { %8453 = vst.msk [vmem:[#allocation2 + $0x40] sm:$0xff] %vm1138_vm5, %v8443_v28  ;;  %v8444_v19 = vadd.f32 %v14219_v8, %v8428_v30 }
0x178b   : > { %10811 = vmatpush3.bf16.msra.mxu1 (!%p9318_p5), %v11340_v12 }
0x178c   : > { %8454 = vst.msk [vmem:[#allocation2 + $0x48] sm:$0xff] %vm1138_vm5, %v8444_v19  ;;  %v8522_v2 = vpack.c.bf16 (!%p9318_p5), %v8444_v19, %v8444_v19  ;;  %10805 = vmatmul.mubr.msk.bf16.vlgmr.msra.gmra.mrb[0].mxu0 (!%p9318_p5), %vm1138_vm5, %v8459_v5 }
0x178e   : > { %10813 = vmatmul.mubr.msk.bf16.vlgmr.msra.gmra.mrb[0].mxu1 %vm1138_vm5, %v8522_v2 }
0x185f   : > { %v8514_v8 = vpop.f32.mrb[0].mxu0 }
0x1860   : > { %v8515_v32 = vadd.f32 %v8514_v8, %v8464_v18  ;;  %v10806_v55 = vpop.f32.mrb[1].mxu0 }
0x1861   : > { %v8577_v13 = vpop.f32.mrb[0].mxu1  ;;  %v8517_v33 = vpop.f32.mrb[2].mxu0 }
0x1862   : > { %v8578_v47 = vadd.f32 %v8577_v13, %v8527_v45  ;;  %v10814_v21 = vpop.f32.mrb[1].mxu1  ;;  %8521 = vst.msk [vmem:[#allocation3] sm:$0x1] %vm8520_vm12, %v8515_v32  ;;  %v10807_v40 = vpop.f32.mrb[3].mxu0 }
0x1863   : > { %v8580_v61 = vpop.f32.mrb[2].mxu1 }
0x1864   : > { %8583 = vst.msk [vmem:[#allocation3 + $0x1] sm:$0x1] %vm8520_vm12, %v8578_v47  ;;  %v10815_v39 = vpop.f32.mrb[3].mxu1 }
0x1865 PF: > { %s14565_s1 = sld [smem:[#allocation7_spill]]  ;;  %s11387_s7 = smov [#allocation3]  }
0x1866   : > { %s8591_s3 = sshll.u32 %s11387_s7, 4  ;;  %s8592_s3 = int_to_ptr.vmem [resolvable:$true] %s8591_s3 }
0x1867   : > { %s11341_s6 = scalar_lea.vmem %s8592_s3, 32  ;;  %p11348_p10 = scmp.lt.s32.totalorder %s8592_s3, %s8592_s3 }
0x1868   : > { %p11342_p7 = scmp.ne.s32.totalorder %s8592_s3, %s11341_s6  ;;  %p11349_p11 = scmp.lt.s32.totalorder %s11341_s6, %s11341_s6 }
0x186a   : > { %p11350_p12 = por %p11349_p11, %p11348_p10 }
0x186b   : > { %p10942_p6 = scmp.eq.s32.totalorder %s14565_s1, 1 }
0x186d   : > { %p11343_p8 = pnand %p11342_p7, %p10942_p6 }
0x186f   : > { %p11344_p9 = pneg %p11343_p8 }
0x1871   : > { %p11351_p13 = pnand %p11350_p12, %p11344_p9 }
0x1873   : > { %11354 = shalt.err (!%p11351_p13)
}
0x1874   : > { %s14566_s9 = sld [smem:[#allocation84_spill]] }
0x187a   : > { %s11355_s0 = scalar_lea.hbm %s14566_s9, 32 }
0x187b   : > { %p11356_p0 = scmp.ne.s32.totalorder %s14566_s9, %s11355_s0  ;;  %p11361_p3 = scmp.lt.u32.totalorder %s11355_s0, %s14566_s9 }
0x187d   : > { %p11357_p1 = pnand %p11356_p0, %p10942_p6 }
0x187f   : > { %p11358_p2 = pneg %p11357_p1 }
0x1881   : > { %p11363_p4 = pnand %p11361_p3, %p11358_p2 }
0x1883   : > { %11366 = shalt.err (!%p11363_p4)
}
0x1884   : > { %10939 = dma.vmem_to_hbm [thread:$0]  (%p10942_p6), %s8592_s3, 32, %s14566_s9, [#allocation4]  }
0x1885   : > { %11372 = dma.done.wait (%p10942_p6), [#allocation4], 32  }
0x1886   : > { %11374 = vsyncadd (%p10942_p6), [#allocation4], 4294967264 }
0x1887 PF: > { %s14567_s27 = sld [smem:[#allocation6_spill]] }
0x188d   : > { %s34_s4 = sadd.s32 1, %s14567_s27  }
0x188e   : > { %p31_p5 = scmp.ge.s32.totalorder %s34_s4, 4  }
0x1890   :  { %33 = sbr.rel (!%p31_p5) target bundleno = 18 (0x12), region = 213 }
0x1897   :  { %8604 = vsyncpa [#allocation4], 1 }
0x1898   :  { %8606 = vsyncpa [#allocation4 + $0x1], 1 }

</bundles_post_ra>
